<compile_context>
chip_gen: v6e
topology: v6e:2x2x1
jax: 0.10.0
libtpu: 0.0.40
codegen_flags: <defaults>
</compile_context>

<pallas_src>
import functools

import jax
import jax.numpy as jnp
from jax.experimental import pallas as pl
from jax.experimental.pallas import tpu as pltpu


# ----------------------------------------------------------------------------
# helpers
# ----------------------------------------------------------------------------
def _round_up(x, m):
    return (x + m - 1) // m * m


def _vmem_limit_bytes():
    """<=48 MiB on v7x (64 MiB physical/TC), up to 96 MiB on v5e/v6e (128 MiB)."""
    try:
        cap = int(pltpu.get_tpu_info().vmem_capacity_bytes)
        return min(cap * 3 // 4, 96 * 1024 * 1024)
    except Exception:                      # conservative cross-generation fallback
        return 48 * 1024 * 1024


_VMEM_LIMIT = _vmem_limit_bytes()


# ----------------------------------------------------------------------------
# Pallas kernels
# ----------------------------------------------------------------------------
def _matmul_bias_relu_kernel(a_ref, w_ref, b_ref, o_ref):
    """One (tm, K) x (K, tn) MXU pass with bias + ReLU fused into the write.

    A is cast to bf16 in VMEM (no HBM cast pass); accumulation is f32.
    No K grid axis / no scratch accumulator: K = full C_in fits one block.
    """
    a = a_ref[...].astype(jnp.bfloat16)
    y = jnp.dot(a, w_ref[...], preferred_element_type=jnp.float32)
    y = jnp.maximum(y + b_ref[...], 0.0)
    o_ref[...] = y.astype(o_ref.dtype)


def _direct_conv_kernel(x_ref, w_ref, b_ref, o_ref):
    """Direct k x k conv on one zero-padded image block.

    The kh*kw taps are streamed through the MXU from VMEM (no HBM im2col);
    f32 accumulation, bias + ReLU fused into the single output write.
    """
    k = w_ref.shape[0]
    _, Hp, Wp, C = x_ref.shape
    H, W = Hp - k + 1, Wp - k + 1          # 'same' conv, stride 1, odd k
    Op = o_ref.shape[-1]

    xp = x_ref[0]                          # (Hp, Wp, C) bf16, resident in VMEM
    acc = jnp.zeros((H * W, Op), jnp.float32)
    for di in range(k):
        for dj in range(k):
            # NOTE: W should be a multiple of 8 for a free (H,W,C)->(H*W,C) merge.
            a = xp[di:di + H, dj:dj + W, :].reshape(H * W, C)
            acc = acc + jnp.dot(a, w_ref[di, dj],
                                preferred_element_type=jnp.float32)
    y = jnp.maximum(acc + b_ref[...], 0.0)
    o_ref[0] = y.astype(o_ref.dtype)


def _maxpool3x3_kernel(x_ref, o_ref):
    """3x3 / stride-1 / pad-1 max pool on one un-padded image block.

    Borders are handled in VMEM with clamped (edge-replicated) shifts, which is
    exactly equivalent to -inf padding for a max; no padded HBM copy is made.
    """
    x = x_ref[0]                           # (H, W, C) f32
    H, W = x.shape[0], x.shape[1]
    up = jnp.concatenate([x[1:], x[H - 1:H]], axis=0)
    down = jnp.concatenate([x[0:1], x[:H - 1]], axis=0)
    v = jnp.maximum(jnp.maximum(x, up), down)
    left = jnp.concatenate([v[:, 1:], v[:, W - 1:W]], axis=1)
    right = jnp.concatenate([v[:, 0:1], v[:, :W - 1]], axis=1)
    m = jnp.maximum(jnp.maximum(v, left), right)
    o_ref[0] = m.astype(o_ref.dtype)


# ----------------------------------------------------------------------------
# wrappers
# ----------------------------------------------------------------------------
def _matmul_bias_relu(a, wmat, bias, out_dtype):
    """a: (M, K) f32/bf16, wmat: (K, Np) bf16 (pre-padded N), bias: (1, Np) f32."""
    M, K = a.shape
    Kw, Np = wmat.shape
    assert Kw == K, "weight packing / input K mismatch"

    tn = 256 if Np % 256 == 0 else 128
    n_blocks = Np // tn
    Mp = _round_up(M, 8)
    tm = min(512, Mp)
    if n_blocks == 1 and Mp >= 16:
        # keep >= 2 parallel grid blocks so both v7x TensorCores get work
        tm = min(tm, _round_up((Mp + 1) // 2, 8))
    Mp = _round_up(Mp, tm)
    if Mp != M:
        a = jnp.pad(a, ((0, Mp - M), (0, 0)))   # rows only; K is never padded

    grid = (Mp // tm, n_blocks)
    out = pl.pallas_call(
        _matmul_bias_relu_kernel,
        out_shape=jax.ShapeDtypeStruct((Mp, Np), out_dtype),
        grid_spec=pltpu.PrefetchScalarGridSpec(
            num_scalar_prefetch=0,
            grid=grid,
            in_specs=[pl.BlockSpec((tm, K), lambda i, j: (i, 0)),
                      pl.BlockSpec((K, tn), lambda i, j: (0, j)),
                      pl.BlockSpec((1, tn), lambda i, j: (0, j))],
            out_specs=pl.BlockSpec((tm, tn), lambda i, j: (i, j))),
        compiler_params=pltpu.CompilerParams(
            dimension_semantics=("parallel", "parallel"),
            vmem_limit_bytes=_VMEM_LIMIT),
    )(a, wmat, bias)
    return out                                  # (Mp, Np); caller slices


def conv_kxk_relu(x, w, bias, out_ch):
    """'same' k x k conv + bias + ReLU.  x: (N,H,W,C) bf16, w: (k,k,C,Op) bf16."""
    N, H, W, C = x.shape
    k = w.shape[0]
    pad = (k - 1) // 2
    Op = w.shape[-1]
    xp = jnp.pad(x, ((0, 0), (pad, pad), (pad, pad), (0, 0)))   # small bf16 halo pad
    Hp, Wp = H + 2 * pad, W + 2 * pad

    out = pl.pallas_call(
        _direct_conv_kernel,
        out_shape=jax.ShapeDtypeStruct((N, H * W, Op), jnp.float32),
        grid_spec=pltpu.PrefetchScalarGridSpec(
            num_scalar_prefetch=0,
            grid=(N,),
            in_specs=[pl.BlockSpec((1, Hp, Wp, C), lambda n: (n, 0, 0, 0)),
                      pl.BlockSpec((k, k, C, Op), lambda n: (0, 0, 0, 0)),
                      pl.BlockSpec((1, Op), lambda n: (0, 0))],
            out_specs=pl.BlockSpec((1, H * W, Op), lambda n: (n, 0, 0))),
        compiler_params=pltpu.CompilerParams(
            dimension_semantics=("parallel",),
            vmem_limit_bytes=_VMEM_LIMIT),
    )(xp, w, bias)
    return out[:, :, :out_ch].reshape(N, H, W, out_ch)


def maxpool3x3_s1(x):
    """MaxPool2d(kernel_size=3, stride=1, padding=1) on NHWC f32 -> bf16."""
    N, H, W, C = x.shape
    return pl.pallas_call(
        _maxpool3x3_kernel,
        out_shape=jax.ShapeDtypeStruct((N, H, W, C), jnp.bfloat16),
        grid_spec=pltpu.PrefetchScalarGridSpec(
            num_scalar_prefetch=0,
            grid=(N,),
            in_specs=[pl.BlockSpec((1, H, W, C), lambda n: (n, 0, 0, 0))],
            out_specs=pl.BlockSpec((1, H, W, C), lambda n: (n, 0, 0, 0))),
        compiler_params=pltpu.CompilerParams(
            dimension_semantics=("parallel",),
            vmem_limit_bytes=_VMEM_LIMIT),
    )(x)


# ----------------------------------------------------------------------------
# Inception forward (mirrors the PyTorch module graph)
# ----------------------------------------------------------------------------
def inception_forward(params, x_nchw, *, cfg):
    x = jnp.transpose(x_nchw, (0, 2, 3, 1)).astype(jnp.float32)   # NCHW -> NHWC
    N, H, W, C = x.shape
    M = N * H * W
    o1, o2, o3 = cfg["ch1x1"], cfg["ch3x3red"], cfg["ch5x5red"]

    # --- fused 1x1 stem: branch1 | branch2-reduce | branch3-reduce in one pass ---
    y = _matmul_bias_relu(x.reshape(M, C), params["stem1x1"]["wmat"],
                          params["stem1x1"]["bias"], out_dtype=jnp.bfloat16)
    b1 = y[:M, :o1].reshape(N, H, W, o1)
    b2_1 = y[:M, o1:o1 + o2].reshape(N, H, W, o2)
    b3_1 = y[:M, o1 + o2:o1 + o2 + o3].reshape(N, H, W, o3)

    # --- branch 2 / branch 3 tails: direct k x k convs (taps streamed in-kernel) ---
    b2 = conv_kxk_relu(b2_1, params["b2_2"]["w"], params["b2_2"]["bias"],
                       out_ch=cfg["ch3x3"])
    b3 = conv_kxk_relu(b3_1, params["b3_2"]["w"], params["b3_2"]["bias"],
                       out_ch=cfg["ch5x5"])

    # --- branch 4: 3x3/s1 max pool (bf16 out) + 1x1 conv ---
    p = maxpool3x3_s1(x)
    yp = _matmul_bias_relu(p.reshape(M, C), params["b4"]["wmat"],
                           params["b4"]["bias"], out_dtype=jnp.float32)
    b4 = yp[:M, :cfg["pool_proj"]].reshape(N, H, W, cfg["pool_proj"])

    out = jnp.concatenate([b1.astype(jnp.float32), b2, b3, b4], axis=-1)
    return jnp.transpose(out, (0, 3, 1, 2))                       # back to NCHW


# ----------------------------------------------------------------------------
# parameter packing (weights pre-reshaped / pre-padded to bf16 once)
# ----------------------------------------------------------------------------
def _pack_1x1_group(convs):
    """[(w:(O,C,1,1), b:(O,))...] -> one (C, Np) bf16 matrix + (1, Np) f32 bias."""
    ws = [jnp.transpose(w[:, :, 0, 0], (1, 0)) for w, _ in convs]   # (C, O_i)
    bs = [b for _, b in convs]
    wcat = jnp.concatenate(ws, axis=1)
    bcat = jnp.concatenate(bs)
    C, O = wcat.shape
    Np = _round_up(O, 256)        # full MXU width on v6e/v7x
    wmat = jnp.pad(wcat, ((0, 0), (0, Np - O))).astype(jnp.bfloat16)
    bias = jnp.pad(bcat, (0, Np - O)).astype(jnp.float32).reshape(1, Np)
    return {"wmat": wmat, "bias": bias}


def _pack_conv_kxk(w, b):
    """PyTorch (O, C, kh, kw) weight -> (kh, kw, C, Op) bf16 + (1, Op) f32 bias."""
    O, C, kh, kw = w.shape
    Op = _round_up(O, 128)
    wt = jnp.transpose(w, (2, 3, 1, 0))                              # (kh,kw,C,O)
    wt = jnp.pad(wt, ((0, 0), (0, 0), (0, 0), (0, Op - O))).astype(jnp.bfloat16)
    bias = jnp.pad(b, (0, Op - O)).astype(jnp.float32).reshape(1, Op)
    return {"w": wt, "bias": bias}


def pack_params(raw):
    return {"stem1x1": _pack_1x1_group([raw["b1"], raw["b2_1"], raw["b3_1"]]),
            "b2_2": _pack_conv_kxk(*raw["b2_2"]),
            "b3_2": _pack_conv_kxk(*raw["b3_2"]),
            "b4": _pack_1x1_group([raw["b4"]])}


def _key_iter(seed):
    key = jax.random.PRNGKey(seed)
    while True:
        key, sub = jax.random.split(key)
        yield sub


def init_inception(in_channels, ch1x1, ch3x3red, ch3x3, ch5x5red, ch5x5,
                   pool_proj, seed=0):
    ks = _key_iter(seed)

    def rand_conv(i, o, k):
        bound = 1.0 / ((i * k * k) ** 0.5)
        w = jax.random.uniform(next(ks), (o, i, k, k), jnp.float32, -bound, bound)
        b = jax.random.uniform(next(ks), (o,), jnp.float32, -bound, bound)
        return w, b

    raw = {"b1": rand_conv(in_channels, ch1x1, 1),
           "b2_1": rand_conv(in_channels, ch3x3red, 1),
           "b2_2": rand_conv(ch3x3red, ch3x3, 3),
           "b3_1": rand_conv(in_channels, ch5x5red, 1),
           "b3_2": rand_conv(ch5x5red, ch5x5, 5),
           "b4": rand_conv(in_channels, pool_proj, 1)}
    cfg = dict(ch1x1=ch1x1, ch3x3red=ch3x3red, ch3x3=ch3x3,
               ch5x5red=ch5x5red, ch5x5=ch5x5, pool_proj=pool_proj)
    return pack_params(raw), raw, cfg


# ----------------------------------------------------------------------------
# pure-JAX reference (for a loose in-script sanity check)
# ----------------------------------------------------------------------------
def _ref_conv(x, w, b, pad):
    wt = jnp.transpose(w, (2, 3, 1, 0))                              # HWIO
    y = jax.lax.conv_general_dilated(
        x, wt, window_strides=(1, 1), padding=((pad, pad), (pad, pad)),
        dimension_numbers=("NHWC", "HWIO", "NHWC"))
    return jnp.maximum(y + b, 0.0)


def reference_forward(raw, x_nchw):
    x = jnp.transpose(x_nchw, (0, 2, 3, 1)).astype(jnp.float32)
    b1 = _ref_conv(x, *raw["b1"], 0)
    b2 = _ref_conv(_ref_conv(x, *raw["b2_1"], 0), *raw["b2_2"], 1)
    b3 = _ref_conv(_ref_conv(x, *raw["b3_1"], 0), *raw["b3_2"], 2)
    p = jax.lax.reduce_window(x, -jnp.inf, jax.lax.max, (1, 3, 3, 1),
                              (1, 1, 1, 1),
                              padding=((0, 0), (1, 1), (1, 1), (0, 0)))
    b4 = _ref_conv(p, *raw["b4"], 0)
    y = jnp.concatenate([b1, b2, b3, b4], axis=-1)
    return jnp.transpose(y, (0, 3, 1, 2))


# ----------------------------------------------------------------------------
if __name__ == "__main__":
    in_ch, ch1x1, ch3x3red, ch3x3, ch5x5red, ch5x5, pool_proj = 8, 16, 16, 32, 8, 16, 16
    params, raw, cfg = init_inception(in_ch, ch1x1, ch3x3red, ch3x3,
                                      ch5x5red, ch5x5, pool_proj, seed=0)
    x = jax.random.normal(jax.random.PRNGKey(0), (2, in_ch, 16, 16), jnp.float32)

    fwd = jax.jit(functools.partial(inception_forward, cfg=cfg))
    out = jax.block_until_ready(fwd(params, x))

    out_ch = ch1x1 + ch3x3 + ch5x5 + pool_proj
    assert out.shape == (2, out_ch, 16, 16) and out.dtype == jnp.float32
    assert bool(jnp.all(jnp.isfinite(out)))

    # loose check vs pure-JAX f32 reference (bf16 operands/intermediates -> tolerance)
    ref = jax.block_until_ready(reference_forward(raw, x))
    err = float(jnp.max(jnp.abs(out - ref)))
    scale = float(jnp.max(jnp.abs(ref))) + 1e-6
    assert err <= 0.05 * scale + 0.02, f"kernel/reference mismatch: {err} vs scale {scale}"

    print("KERNEL_OK")
</pallas_src>

<mosaic_0001>
module attributes {stable_mosaic.version = 11 : i64} {
  func.func @_matmul_bias_relu_kernel(%arg0: i32, %arg1: i32, %arg2: memref<256x8xf32, #tpu.memory_space<vmem>>, %arg3: memref<8x256xbf16, #tpu.memory_space<vmem>>, %arg4: memref<1x256xf32, #tpu.memory_space<vmem>>, %arg5: memref<256x256xbf16, #tpu.memory_space<vmem>>) attributes {dimension_semantics = [#tpu.dimension_semantics<parallel>, #tpu.dimension_semantics<parallel>], iteration_bounds = array<i64: 2, 1>, scalar_prefetch = 0 : i64, scratch_operands = 0 : i64, tpu.core_type = #tpu.core_type<tc>, window_params = [{transform_indices = @transform_0, window_bounds = array<i64: 256, 8>}, {transform_indices = @transform_1, window_bounds = array<i64: 8, 256>}, {transform_indices = @transform_2, window_bounds = array<i64: 1, 256>}, {transform_indices = @transform_3, window_bounds = array<i64: 256, 256>}]} {
    %c0 = arith.constant 0 : index
    %c0_0 = arith.constant 0 : index
    %0 = vector.load %arg2[%c0, %c0_0] : memref<256x8xf32, #tpu.memory_space<vmem>>, vector<256x8xf32>
    %1 = arith.truncf %0 : vector<256x8xf32> to vector<256x8xbf16>
    %c0_1 = arith.constant 0 : index
    %c0_2 = arith.constant 0 : index
    %2 = vector.load %arg3[%c0_1, %c0_2] : memref<8x256xbf16, #tpu.memory_space<vmem>>, vector<8x256xbf16>
    %cst = arith.constant dense<0.000000e+00> : vector<256x256xf32>
    %3 = tpu.matmul %1, %2, %cst {dimension_numbers = #tpu.dot_dimension_numbers<[1], [0], [0], [1], [0, 0, 1, 1], [], []>} : vector<256x8xbf16>, vector<8x256xbf16>, vector<256x256xf32> -> vector<256x256xf32>
    %c0_3 = arith.constant 0 : index
    %c0_4 = arith.constant 0 : index
    %4 = vector.load %arg4[%c0_3, %c0_4] : memref<1x256xf32, #tpu.memory_space<vmem>>, vector<1x256xf32>
    %5 = vector.broadcast %4 : vector<1x256xf32> to vector<256x256xf32>
    %6 = arith.addf %3, %5 : vector<256x256xf32>
    %cst_5 = arith.constant 0.000000e+00 : f32
    %7 = vector.broadcast %cst_5 : f32 to vector<256x256xf32>
    %8 = arith.maximumf %6, %7 : vector<256x256xf32>
    %9 = arith.truncf %8 : vector<256x256xf32> to vector<256x256xbf16>
    %c0_6 = arith.constant 0 : index
    %c0_7 = arith.constant 0 : index
    %10 = vector.load %arg5[%c0_6, %c0_7] : memref<256x256xbf16, #tpu.memory_space<vmem>>, vector<256x256xbf16>
    tpu.vector_store %arg5[%c0_6, %c0_7], %9 {strides = array<i32>} : memref<256x256xbf16, #tpu.memory_space<vmem>>, vector<256x256xbf16>,
    return
  }
  func.func @transform_0(%arg0: i32, %arg1: i32) -> (i32, i32) {
    %c0_i32 = arith.constant 0 : i32
    %c0_i32_0 = arith.constant 0 : i32
    return %arg0, %c0_i32 : i32, i32
  }
  func.func @transform_1(%arg0: i32, %arg1: i32) -> (i32, i32) {
    %c0_i32 = arith.constant 0 : i32
    %c0_i32_0 = arith.constant 0 : i32
    return %c0_i32, %arg1 : i32, i32
  }
  func.func @transform_2(%arg0: i32, %arg1: i32) -> (i32, i32) {
    %c0_i32 = arith.constant 0 : i32
    %c0_i32_0 = arith.constant 0 : i32
    return %c0_i32, %arg1 : i32, i32
  }
  func.func @transform_3(%arg0: i32, %arg1: i32) -> (i32, i32) {
    %c0_i32 = arith.constant 0 : i32
    return %arg0, %arg1 : i32, i32
  }
}

module attributes {stable_mosaic.version = 11 : i64} {
  func.func @_maxpool3x3_kernel(%arg0: i32, %arg1: memref<1x16x16x8xf32, #tpu.memory_space<vmem>>, %arg2: memref<1x16x16x8xbf16, #tpu.memory_space<vmem>>) attributes {dimension_semantics = [#tpu.dimension_semantics<parallel>], iteration_bounds = array<i64: 2>, scalar_prefetch = 0 : i64, scratch_operands = 0 : i64, tpu.core_type = #tpu.core_type<tc>, window_params = [{transform_indices = @transform_0, window_bounds = array<i64: 1, 16, 16, 8>}, {transform_indices = @transform_1, window_bounds = array<i64: 1, 16, 16, 8>}]} {
    %c0 = arith.constant 0 : index
    %c0_0 = arith.constant 0 : index
    %c0_1 = arith.constant 0 : index
    %c0_2 = arith.constant 0 : index
    %0 = vector.load %arg1[%c0, %c0_0, %c0_1, %c0_2] : memref<1x16x16x8xf32, #tpu.memory_space<vmem>>, vector<1x16x16x8xf32>
    %1 = vector.shape_cast %0 : vector<1x16x16x8xf32> to vector<16x16x8xf32>
    %2 = vector.extract_strided_slice %1 {offsets = [1, 0, 0], sizes = [15, 16, 8], strides = [1, 1, 1]} : vector<16x16x8xf32> to vector<15x16x8xf32>
    %3 = vector.extract_strided_slice %1 {offsets = [15, 0, 0], sizes = [1, 16, 8], strides = [1, 1, 1]} : vector<16x16x8xf32> to vector<1x16x8xf32>
    %4 = tpu.concatenate %2, %3 in 0 : vector<15x16x8xf32>, vector<1x16x8xf32> -> vector<16x16x8xf32>
    %5 = vector.extract_strided_slice %1 {offsets = [0, 0, 0], sizes = [1, 16, 8], strides = [1, 1, 1]} : vector<16x16x8xf32> to vector<1x16x8xf32>
    %6 = vector.extract_strided_slice %1 {offsets = [0, 0, 0], sizes = [15, 16, 8], strides = [1, 1, 1]} : vector<16x16x8xf32> to vector<15x16x8xf32>
    %7 = tpu.concatenate %5, %6 in 0 : vector<1x16x8xf32>, vector<15x16x8xf32> -> vector<16x16x8xf32>
    %8 = arith.maximumf %1, %4 : vector<16x16x8xf32>
    %9 = arith.maximumf %8, %7 : vector<16x16x8xf32>
    %10 = vector.extract_strided_slice %9 {offsets = [0, 1, 0], sizes = [16, 15, 8], strides = [1, 1, 1]} : vector<16x16x8xf32> to vector<16x15x8xf32>
    %11 = vector.extract_strided_slice %9 {offsets = [0, 15, 0], sizes = [16, 1, 8], strides = [1, 1, 1]} : vector<16x16x8xf32> to vector<16x1x8xf32>
    %12 = tpu.concatenate %10, %11 in 1 : vector<16x15x8xf32>, vector<16x1x8xf32> -> vector<16x16x8xf32>
    %13 = vector.extract_strided_slice %9 {offsets = [0, 0, 0], sizes = [16, 1, 8], strides = [1, 1, 1]} : vector<16x16x8xf32> to vector<16x1x8xf32>
    %14 = vector.extract_strided_slice %9 {offsets = [0, 0, 0], sizes = [16, 15, 8], strides = [1, 1, 1]} : vector<16x16x8xf32> to vector<16x15x8xf32>
    %15 = tpu.concatenate %13, %14 in 1 : vector<16x1x8xf32>, vector<16x15x8xf32> -> vector<16x16x8xf32>
    %16 = arith.maximumf %9, %12 : vector<16x16x8xf32>
    %17 = arith.maximumf %16, %15 : vector<16x16x8xf32>
    %18 = arith.truncf %17 : vector<16x16x8xf32> to vector<16x16x8xbf16>
    %c0_3 = arith.constant 0 : index
    %c0_4 = arith.constant 0 : index
    %c0_5 = arith.constant 0 : index
    %c0_6 = arith.constant 0 : index
    %19 = vector.load %arg2[%c0_3, %c0_4, %c0_5, %c0_6] : memref<1x16x16x8xbf16, #tpu.memory_space<vmem>>, vector<1x16x16x8xbf16>
    %20 = vector.shape_cast %19 : vector<1x16x16x8xbf16> to vector<16x16x8xbf16>
    %21 = vector.shape_cast %18 : vector<16x16x8xbf16> to vector<1x16x16x8xbf16>
    tpu.vector_store %arg2[%c0_3, %c0_4, %c0_5, %c0_6], %21 {strides = array<i32>} : memref<1x16x16x8xbf16, #tpu.memory_space<vmem>>, vector<1x16x16x8xbf16>,
    return
  }
  func.func @transform_0(%arg0: i32) -> (i32, i32, i32, i32) {
    %c0_i32 = arith.constant 0 : i32
    %c0_i32_0 = arith.constant 0 : i32
    %c0_i32_1 = arith.constant 0 : i32
    %c0_i32_2 = arith.constant 0 : i32
    return %arg0, %c0_i32, %c0_i32_0, %c0_i32_1 : i32, i32, i32, i32
  }
  func.func @transform_1(%arg0: i32) -> (i32, i32, i32, i32) {
    %c0_i32 = arith.constant 0 : i32
    %c0_i32_0 = arith.constant 0 : i32
    %c0_i32_1 = arith.constant 0 : i32
    %c0_i32_2 = arith.constant 0 : i32
    return %arg0, %c0_i32, %c0_i32_0, %c0_i32_1 : i32, i32, i32, i32
  }
}

module attributes {stable_mosaic.version = 11 : i64} {
  func.func @_matmul_bias_relu_kernel(%arg0: i32, %arg1: i32, %arg2: memref<256x8xbf16, #tpu.memory_space<vmem>>, %arg3: memref<8x256xbf16, #tpu.memory_space<vmem>>, %arg4: memref<1x256xf32, #tpu.memory_space<vmem>>, %arg5: memref<256x256xf32, #tpu.memory_space<vmem>>) attributes {dimension_semantics = [#tpu.dimension_semantics<parallel>, #tpu.dimension_semantics<parallel>], iteration_bounds = array<i64: 2, 1>, scalar_prefetch = 0 : i64, scratch_operands = 0 : i64, tpu.core_type = #tpu.core_type<tc>, window_params = [{transform_indices = @transform_0, window_bounds = array<i64: 256, 8>}, {transform_indices = @transform_1, window_bounds = array<i64: 8, 256>}, {transform_indices = @transform_2, window_bounds = array<i64: 1, 256>}, {transform_indices = @transform_3, window_bounds = array<i64: 256, 256>}]} {
    %c0 = arith.constant 0 : index
    %c0_0 = arith.constant 0 : index
    %0 = vector.load %arg2[%c0, %c0_0] : memref<256x8xbf16, #tpu.memory_space<vmem>>, vector<256x8xbf16>
    %c0_1 = arith.constant 0 : index
    %c0_2 = arith.constant 0 : index
    %1 = vector.load %arg3[%c0_1, %c0_2] : memref<8x256xbf16, #tpu.memory_space<vmem>>, vector<8x256xbf16>
    %cst = arith.constant dense<0.000000e+00> : vector<256x256xf32>
    %2 = tpu.matmul %0, %1, %cst {dimension_numbers = #tpu.dot_dimension_numbers<[1], [0], [0], [1], [0, 0, 1, 1], [], []>} : vector<256x8xbf16>, vector<8x256xbf16>, vector<256x256xf32> -> vector<256x256xf32>
    %c0_3 = arith.constant 0 : index
    %c0_4 = arith.constant 0 : index
    %3 = vector.load %arg4[%c0_3, %c0_4] : memref<1x256xf32, #tpu.memory_space<vmem>>, vector<1x256xf32>
    %4 = vector.broadcast %3 : vector<1x256xf32> to vector<256x256xf32>
    %5 = arith.addf %2, %4 : vector<256x256xf32>
    %cst_5 = arith.constant 0.000000e+00 : f32
    %6 = vector.broadcast %cst_5 : f32 to vector<256x256xf32>
    %7 = arith.maximumf %5, %6 : vector<256x256xf32>
    %c0_6 = arith.constant 0 : index
    %c0_7 = arith.constant 0 : index
    %8 = vector.load %arg5[%c0_6, %c0_7] : memref<256x256xf32, #tpu.memory_space<vmem>>, vector<256x256xf32>
    tpu.vector_store %arg5[%c0_6, %c0_7], %7 {strides = array<i32>} : memref<256x256xf32, #tpu.memory_space<vmem>>, vector<256x256xf32>,
    return
  }
  func.func @transform_0(%arg0: i32, %arg1: i32) -> (i32, i32) {
    %c0_i32 = arith.constant 0 : i32
    %c0_i32_0 = arith.constant 0 : i32
    return %arg0, %c0_i32 : i32, i32
  }
  func.func @transform_1(%arg0: i32, %arg1: i32) -> (i32, i32) {
    %c0_i32 = arith.constant 0 : i32
    %c0_i32_0 = arith.constant 0 : i32
    return %c0_i32, %arg1 : i32, i32
  }
  func.func @transform_2(%arg0: i32, %arg1: i32) -> (i32, i32) {
    %c0_i32 = arith.constant 0 : i32
    %c0_i32_0 = arith.constant 0 : i32
    return %c0_i32, %arg1 : i32, i32
  }
  func.func @transform_3(%arg0: i32, %arg1: i32) -> (i32, i32) {
    %c0_i32 = arith.constant 0 : i32
    return %arg0, %arg1 : i32, i32
  }
}

module attributes {stable_mosaic.version = 11 : i64} {
  func.func @_direct_conv_kernel(%arg0: i32, %arg1: memref<1x20x20x8xbf16, #tpu.memory_space<vmem>>, %arg2: memref<5x5x8x128xbf16, #tpu.memory_space<vmem>>, %arg3: memref<1x128xf32, #tpu.memory_space<vmem>>, %arg4: memref<1x256x128xf32, #tpu.memory_space<vmem>>) attributes {dimension_semantics = [#tpu.dimension_semantics<parallel>], iteration_bounds = array<i64: 2>, scalar_prefetch = 0 : i64, scratch_operands = 0 : i64, tpu.core_type = #tpu.core_type<tc>, window_params = [{transform_indices = @transform_0, window_bounds = array<i64: 1, 20, 20, 8>}, {pipeline_mode = #tpu.pipeline_mode<synchronous>, transform_indices = @transform_1, window_bounds = array<i64: 5, 5, 8, 128>}, {pipeline_mode = #tpu.pipeline_mode<synchronous>, transform_indices = @transform_2, window_bounds = array<i64: 1, 128>}, {transform_indices = @transform_3, window_bounds = array<i64: 1, 256, 128>}]} {
    %c0 = arith.constant 0 : index
    %c0_0 = arith.constant 0 : index
    %c0_1 = arith.constant 0 : index
    %c0_2 = arith.constant 0 : index
    %0 = vector.load %arg1[%c0, %c0_0, %c0_1, %c0_2] : memref<1x20x20x8xbf16, #tpu.memory_space<vmem>>, vector<1x20x20x8xbf16>
    %1 = vector.shape_cast %0 : vector<1x20x20x8xbf16> to vector<20x20x8xbf16>
    %cst = arith.constant 0.000000e+00 : f32
    %2 = vector.broadcast %cst : f32 to vector<256x128xf32>
    %3 = vector.extract_strided_slice %1 {offsets = [0, 0, 0], sizes = [16, 16, 8], strides = [1, 1, 1]} : vector<20x20x8xbf16> to vector<16x16x8xbf16>
    %4 = vector.shape_cast %3 : vector<16x16x8xbf16> to vector<256x8xbf16>
    %c0_3 = arith.constant 0 : index
    %c0_4 = arith.constant 0 : index
    %c0_5 = arith.constant 0 : index
    %c0_6 = arith.constant 0 : index
    %5 = vector.load %arg2[%c0_3, %c0_4, %c0_5, %c0_6] : memref<5x5x8x128xbf16, #tpu.memory_space<vmem>>, vector<1x1x8x128xbf16>
    %6 = vector.shape_cast %5 : vector<1x1x8x128xbf16> to vector<8x128xbf16>
    %cst_7 = arith.constant dense<0.000000e+00> : vector<256x128xf32>
    %7 = tpu.matmul %4, %6, %cst_7 {dimension_numbers = #tpu.dot_dimension_numbers<[1], [0], [0], [1], [0, 0, 1, 1], [], []>} : vector<256x8xbf16>, vector<8x128xbf16>, vector<256x128xf32> -> vector<256x128xf32>
    %8 = arith.addf %2, %7 : vector<256x128xf32>
    %9 = vector.extract_strided_slice %1 {offsets = [0, 1, 0], sizes = [16, 16, 8], strides = [1, 1, 1]} : vector<20x20x8xbf16> to vector<16x16x8xbf16>
    %10 = vector.shape_cast %9 : vector<16x16x8xbf16> to vector<256x8xbf16>
    %c0_8 = arith.constant 0 : index
    %c1 = arith.constant 1 : index
    %c0_9 = arith.constant 0 : index
    %c0_10 = arith.constant 0 : index
    %11 = vector.load %arg2[%c0_8, %c1, %c0_9, %c0_10] : memref<5x5x8x128xbf16, #tpu.memory_space<vmem>>, vector<1x1x8x128xbf16>
    %12 = vector.shape_cast %11 : vector<1x1x8x128xbf16> to vector<8x128xbf16>
    %cst_11 = arith.constant dense<0.000000e+00> : vector<256x128xf32>
    %13 = tpu.matmul %10, %12, %cst_11 {dimension_numbers = #tpu.dot_dimension_numbers<[1], [0], [0], [1], [0, 0, 1, 1], [], []>} : vector<256x8xbf16>, vector<8x128xbf16>, vector<256x128xf32> -> vector<256x128xf32>
    %14 = arith.addf %8, %13 : vector<256x128xf32>
    %15 = vector.extract_strided_slice %1 {offsets = [0, 2, 0], sizes = [16, 16, 8], strides = [1, 1, 1]} : vector<20x20x8xbf16> to vector<16x16x8xbf16>
    %16 = vector.shape_cast %15 : vector<16x16x8xbf16> to vector<256x8xbf16>
    %c0_12 = arith.constant 0 : index
    %c2 = arith.constant 2 : index
    %c0_13 = arith.constant 0 : index
    %c0_14 = arith.constant 0 : index
    %17 = vector.load %arg2[%c0_12, %c2, %c0_13, %c0_14] : memref<5x5x8x128xbf16, #tpu.memory_space<vmem>>, vector<1x1x8x128xbf16>
    %18 = vector.shape_cast %17 : vector<1x1x8x128xbf16> to vector<8x128xbf16>
    %cst_15 = arith.constant dense<0.000000e+00> : vector<256x128xf32>
    %19 = tpu.matmul %16, %18, %cst_15 {dimension_numbers = #tpu.dot_dimension_numbers<[1], [0], [0], [1], [0, 0, 1, 1], [], []>} : vector<256x8xbf16>, vector<8x128xbf16>, vector<256x128xf32> -> vector<256x128xf32>
    %20 = arith.addf %14, %19 : vector<256x128xf32>
    %21 = vector.extract_strided_slice %1 {offsets = [0, 3, 0], sizes = [16, 16, 8], strides = [1, 1, 1]} : vector<20x20x8xbf16> to vector<16x16x8xbf16>
    %22 = vector.shape_cast %21 : vector<16x16x8xbf16> to vector<256x8xbf16>
    %c0_16 = arith.constant 0 : index
    %c3 = arith.constant 3 : index
    %c0_17 = arith.constant 0 : index
    %c0_18 = arith.constant 0 : index
    %23 = vector.load %arg2[%c0_16, %c3, %c0_17, %c0_18] : memref<5x5x8x128xbf16, #tpu.memory_space<vmem>>, vector<1x1x8x128xbf16>
    %24 = vector.shape_cast %23 : vector<1x1x8x128xbf16> to vector<8x128xbf16>
    %cst_19 = arith.constant dense<0.000000e+00> : vector<256x128xf32>
    %25 = tpu.matmul %22, %24, %cst_19 {dimension_numbers = #tpu.dot_dimension_numbers<[1], [0], [0], [1], [0, 0, 1, 1], [], []>} : vector<256x8xbf16>, vector<8x128xbf16>, vector<256x128xf32> -> vector<256x128xf32>
    %26 = arith.addf %20, %25 : vector<256x128xf32>
    %27 = vector.extract_strided_slice %1 {offsets = [0, 4, 0], sizes = [16, 16, 8], strides = [1, 1, 1]} : vector<20x20x8xbf16> to vector<16x16x8xbf16>
    %28 = vector.shape_cast %27 : vector<16x16x8xbf16> to vector<256x8xbf16>
    %c0_20 = arith.constant 0 : index
    %c4 = arith.constant 4 : index
    %c0_21 = arith.constant 0 : index
    %c0_22 = arith.constant 0 : index
    %29 = vector.load %arg2[%c0_20, %c4, %c0_21, %c0_22] : memref<5x5x8x128xbf16, #tpu.memory_space<vmem>>, vector<1x1x8x128xbf16>
    %30 = vector.shape_cast %29 : vector<1x1x8x128xbf16> to vector<8x128xbf16>
    %cst_23 = arith.constant dense<0.000000e+00> : vector<256x128xf32>
    %31 = tpu.matmul %28, %30, %cst_23 {dimension_numbers = #tpu.dot_dimension_numbers<[1], [0], [0], [1], [0, 0, 1, 1], [], []>} : vector<256x8xbf16>, vector<8x128xbf16>, vector<256x128xf32> -> vector<256x128xf32>
    %32 = arith.addf %26, %31 : vector<256x128xf32>
    %33 = vector.extract_strided_slice %1 {offsets = [1, 0, 0], sizes = [16, 16, 8], strides = [1, 1, 1]} : vector<20x20x8xbf16> to vector<16x16x8xbf16>
    %34 = vector.shape_cast %33 : vector<16x16x8xbf16> to vector<256x8xbf16>
    %c1_24 = arith.constant 1 : index
    %c0_25 = arith.constant 0 : index
    %c0_26 = arith.constant 0 : index
    %c0_27 = arith.constant 0 : index
    %35 = vector.load %arg2[%c1_24, %c0_25, %c0_26, %c0_27] : memref<5x5x8x128xbf16, #tpu.memory_space<vmem>>, vector<1x1x8x128xbf16>
    %36 = vector.shape_cast %35 : vector<1x1x8x128xbf16> to vector<8x128xbf16>
    %cst_28 = arith.constant dense<0.000000e+00> : vector<256x128xf32>
    %37 = tpu.matmul %34, %36, %cst_28 {dimension_numbers = #tpu.dot_dimension_numbers<[1], [0], [0], [1], [0, 0, 1, 1], [], []>} : vector<256x8xbf16>, vector<8x128xbf16>, vector<256x128xf32> -> vector<256x128xf32>
    %38 = arith.addf %32, %37 : vector<256x128xf32>
    %39 = vector.extract_strided_slice %1 {offsets = [1, 1, 0], sizes = [16, 16, 8], strides = [1, 1, 1]} : vector<20x20x8xbf16> to vector<16x16x8xbf16>
    %40 = vector.shape_cast %39 : vector<16x16x8xbf16> to vector<256x8xbf16>
    %c1_29 = arith.constant 1 : index
    %c1_30 = arith.constant 1 : index
    %c0_31 = arith.constant 0 : index
    %c0_32 = arith.constant 0 : index
    %41 = vector.load %arg2[%c1_29, %c1_30, %c0_31, %c0_32] : memref<5x5x8x128xbf16, #tpu.memory_space<vmem>>, vector<1x1x8x128xbf16>
    %42 = vector.shape_cast %41 : vector<1x1x8x128xbf16> to vector<8x128xbf16>
    %cst_33 = arith.constant dense<0.000000e+00> : vector<256x128xf32>
    %43 = tpu.matmul %40, %42, %cst_33 {dimension_numbers = #tpu.dot_dimension_numbers<[1], [0], [0], [1], [0, 0, 1, 1], [], []>} : vector<256x8xbf16>, vector<8x128xbf16>, vector<256x128xf32> -> vector<256x128xf32>
    %44 = arith.addf %38, %43 : vector<256x128xf32>
    %45 = vector.extract_strided_slice %1 {offsets = [1, 2, 0], sizes = [16, 16, 8], strides = [1, 1, 1]} : vector<20x20x8xbf16> to vector<16x16x8xbf16>
    %46 = vector.shape_cast %45 : vector<16x16x8xbf16> to vector<256x8xbf16>
    %c1_34 = arith.constant 1 : index
    %c2_35 = arith.constant 2 : index
    %c0_36 = arith.constant 0 : index
    %c0_37 = arith.constant 0 : index
    %47 = vector.load %arg2[%c1_34, %c2_35, %c0_36, %c0_37] : memref<5x5x8x128xbf16, #tpu.memory_space<vmem>>, vector<1x1x8x128xbf16>
    %48 = vector.shape_cast %47 : vector<1x1x8x128xbf16> to vector<8x128xbf16>
    %cst_38 = arith.constant dense<0.000000e+00> : vector<256x128xf32>
    %49 = tpu.matmul %46, %48, %cst_38 {dimension_numbers = #tpu.dot_dimension_numbers<[1], [0], [0], [1], [0, 0, 1, 1], [], []>} : vector<256x8xbf16>, vector<8x128xbf16>, vector<256x128xf32> -> vector<256x128xf32>
    %50 = arith.addf %44, %49 : vector<256x128xf32>
    %51 = vector.extract_strided_slice %1 {offsets = [1, 3, 0], sizes = [16, 16, 8], strides = [1, 1, 1]} : vector<20x20x8xbf16> to vector<16x16x8xbf16>
    %52 = vector.shape_cast %51 : vector<16x16x8xbf16> to vector<256x8xbf16>
    %c1_39 = arith.constant 1 : index
    %c3_40 = arith.constant 3 : index
    %c0_41 = arith.constant 0 : index
    %c0_42 = arith.constant 0 : index
    %53 = vector.load %arg2[%c1_39, %c3_40, %c0_41, %c0_42] : memref<5x5x8x128xbf16, #tpu.memory_space<vmem>>, vector<1x1x8x128xbf16>
    %54 = vector.shape_cast %53 : vector<1x1x8x128xbf16> to vector<8x128xbf16>
    %cst_43 = arith.constant dense<0.000000e+00> : vector<256x128xf32>
    %55 = tpu.matmul %52, %54, %cst_43 {dimension_numbers = #tpu.dot_dimension_numbers<[1], [0], [0], [1], [0, 0, 1, 1], [], []>} : vector<256x8xbf16>, vector<8x128xbf16>, vector<256x128xf32> -> vector<256x128xf32>
    %56 = arith.addf %50, %55 : vector<256x128xf32>
    %57 = vector.extract_strided_slice %1 {offsets = [1, 4, 0], sizes = [16, 16, 8], strides = [1, 1, 1]} : vector<20x20x8xbf16> to vector<16x16x8xbf16>
    %58 = vector.shape_cast %57 : vector<16x16x8xbf16> to vector<256x8xbf16>
    %c1_44 = arith.constant 1 : index
    %c4_45 = arith.constant 4 : index
    %c0_46 = arith.constant 0 : index
    %c0_47 = arith.constant 0 : index
    %59 = vector.load %arg2[%c1_44, %c4_45, %c0_46, %c0_47] : memref<5x5x8x128xbf16, #tpu.memory_space<vmem>>, vector<1x1x8x128xbf16>
    %60 = vector.shape_cast %59 : vector<1x1x8x128xbf16> to vector<8x128xbf16>
    %cst_48 = arith.constant dense<0.000000e+00> : vector<256x128xf32>
    %61 = tpu.matmul %58, %60, %cst_48 {dimension_numbers = #tpu.dot_dimension_numbers<[1], [0], [0], [1], [0, 0, 1, 1], [], []>} : vector<256x8xbf16>, vector<8x128xbf16>, vector<256x128xf32> -> vector<256x128xf32>
    %62 = arith.addf %56, %61 : vector<256x128xf32>
    %63 = vector.extract_strided_slice %1 {offsets = [2, 0, 0], sizes = [16, 16, 8], strides = [1, 1, 1]} : vector<20x20x8xbf16> to vector<16x16x8xbf16>
    %64 = vector.shape_cast %63 : vector<16x16x8xbf16> to vector<256x8xbf16>
    %c2_49 = arith.constant 2 : index
    %c0_50 = arith.constant 0 : index
    %c0_51 = arith.constant 0 : index
    %c0_52 = arith.constant 0 : index
    %65 = vector.load %arg2[%c2_49, %c0_50, %c0_51, %c0_52] : memref<5x5x8x128xbf16, #tpu.memory_space<vmem>>, vector<1x1x8x128xbf16>
    %66 = vector.shape_cast %65 : vector<1x1x8x128xbf16> to vector<8x128xbf16>
    %cst_53 = arith.constant dense<0.000000e+00> : vector<256x128xf32>
    %67 = tpu.matmul %64, %66, %cst_53 {dimension_numbers = #tpu.dot_dimension_numbers<[1], [0], [0], [1], [0, 0, 1, 1], [], []>} : vector<256x8xbf16>, vector<8x128xbf16>, vector<256x128xf32> -> vector<256x128xf32>
    %68 = arith.addf %62, %67 : vector<256x128xf32>
    %69 = vector.extract_strided_slice %1 {offsets = [2, 1, 0], sizes = [16, 16, 8], strides = [1, 1, 1]} : vector<20x20x8xbf16> to vector<16x16x8xbf16>
    %70 = vector.shape_cast %69 : vector<16x16x8xbf16> to vector<256x8xbf16>
    %c2_54 = arith.constant 2 : index
    %c1_55 = arith.constant 1 : index
    %c0_56 = arith.constant 0 : index
    %c0_57 = arith.constant 0 : index
    %71 = vector.load %arg2[%c2_54, %c1_55, %c0_56, %c0_57] : memref<5x5x8x128xbf16, #tpu.memory_space<vmem>>, vector<1x1x8x128xbf16>
    %72 = vector.shape_cast %71 : vector<1x1x8x128xbf16> to vector<8x128xbf16>
    %cst_58 = arith.constant dense<0.000000e+00> : vector<256x128xf32>
    %73 = tpu.matmul %70, %72, %cst_58 {dimension_numbers = #tpu.dot_dimension_numbers<[1], [0], [0], [1], [0, 0, 1, 1], [], []>} : vector<256x8xbf16>, vector<8x128xbf16>, vector<256x128xf32> -> vector<256x128xf32>
    %74 = arith.addf %68, %73 : vector<256x128xf32>
    %75 = vector.extract_strided_slice %1 {offsets = [2, 2, 0], sizes = [16, 16, 8], strides = [1, 1, 1]} : vector<20x20x8xbf16> to vector<16x16x8xbf16>
    %76 = vector.shape_cast %75 : vector<16x16x8xbf16> to vector<256x8xbf16>
    %c2_59 = arith.constant 2 : index
    %c2_60 = arith.constant 2 : index
    %c0_61 = arith.constant 0 : index
    %c0_62 = arith.constant 0 : index
    %77 = vector.load %arg2[%c2_59, %c2_60, %c0_61, %c0_62] : memref<5x5x8x128xbf16, #tpu.memory_space<vmem>>, vector<1x1x8x128xbf16>
    %78 = vector.shape_cast %77 : vector<1x1x8x128xbf16> to vector<8x128xbf16>
    %cst_63 = arith.constant dense<0.000000e+00> : vector<256x128xf32>
    %79 = tpu.matmul %76, %78, %cst_63 {dimension_numbers = #tpu.dot_dimension_numbers<[1], [0], [0], [1], [0, 0, 1, 1], [], []>} : vector<256x8xbf16>, vector<8x128xbf16>, vector<256x128xf32> -> vector<256x128xf32>
    %80 = arith.addf %74, %79 : vector<256x128xf32>
    %81 = vector.extract_strided_slice %1 {offsets = [2, 3, 0], sizes = [16, 16, 8], strides = [1, 1, 1]} : vector<20x20x8xbf16> to vector<16x16x8xbf16>
    %82 = vector.shape_cast %81 : vector<16x16x8xbf16> to vector<256x8xbf16>
    %c2_64 = arith.constant 2 : index
    %c3_65 = arith.constant 3 : index
    %c0_66 = arith.constant 0 : index
    %c0_67 = arith.constant 0 : index
    %83 = vector.load %arg2[%c2_64, %c3_65, %c0_66, %c0_67] : memref<5x5x8x128xbf16, #tpu.memory_space<vmem>>, vector<1x1x8x128xbf16>
    %84 = vector.shape_cast %83 : vector<1x1x8x128xbf16> to vector<8x128xbf16>
    %cst_68 = arith.constant dense<0.000000e+00> : vector<256x128xf32>
    %85 = tpu.matmul %82, %84, %cst_68 {dimension_numbers = #tpu.dot_dimension_numbers<[1], [0], [0], [1], [0, 0, 1, 1], [], []>} : vector<256x8xbf16>, vector<8x128xbf16>, vector<256x128xf32> -> vector<256x128xf32>
    %86 = arith.addf %80, %85 : vector<256x128xf32>
    %87 = vector.extract_strided_slice %1 {offsets = [2, 4, 0], sizes = [16, 16, 8], strides = [1, 1, 1]} : vector<20x20x8xbf16> to vector<16x16x8xbf16>
    %88 = vector.shape_cast %87 : vector<16x16x8xbf16> to vector<256x8xbf16>
    %c2_69 = arith.constant 2 : index
    %c4_70 = arith.constant 4 : index
    %c0_71 = arith.constant 0 : index
    %c0_72 = arith.constant 0 : index
    %89 = vector.load %arg2[%c2_69, %c4_70, %c0_71, %c0_72] : memref<5x5x8x128xbf16, #tpu.memory_space<vmem>>, vector<1x1x8x128xbf16>
    %90 = vector.shape_cast %89 : vector<1x1x8x128xbf16> to vector<8x128xbf16>
    %cst_73 = arith.constant dense<0.000000e+00> : vector<256x128xf32>
    %91 = tpu.matmul %88, %90, %cst_73 {dimension_numbers = #tpu.dot_dimension_numbers<[1], [0], [0], [1], [0, 0, 1, 1], [], []>} : vector<256x8xbf16>, vector<8x128xbf16>, vector<256x128xf32> -> vector<256x128xf32>
    %92 = arith.addf %86, %91 : vector<256x128xf32>
    %93 = vector.extract_strided_slice %1 {offsets = [3, 0, 0], sizes = [16, 16, 8], strides = [1, 1, 1]} : vector<20x20x8xbf16> to vector<16x16x8xbf16>
    %94 = vector.shape_cast %93 : vector<16x16x8xbf16> to vector<256x8xbf16>
    %c3_74 = arith.constant 3 : index
    %c0_75 = arith.constant 0 : index
    %c0_76 = arith.constant 0 : index
    %c0_77 = arith.constant 0 : index
    %95 = vector.load %arg2[%c3_74, %c0_75, %c0_76, %c0_77] : memref<5x5x8x128xbf16, #tpu.memory_space<vmem>>, vector<1x1x8x128xbf16>
    %96 = vector.shape_cast %95 : vector<1x1x8x128xbf16> to vector<8x128xbf16>
    %cst_78 = arith.constant dense<0.000000e+00> : vector<256x128xf32>
    %97 = tpu.matmul %94, %96, %cst_78 {dimension_numbers = #tpu.dot_dimension_numbers<[1], [0], [0], [1], [0, 0, 1, 1], [], []>} : vector<256x8xbf16>, vector<8x128xbf16>, vector<256x128xf32> -> vector<256x128xf32>
    %98 = arith.addf %92, %97 : vector<256x128xf32>
    %99 = vector.extract_strided_slice %1 {offsets = [3, 1, 0], sizes = [16, 16, 8], strides = [1, 1, 1]} : vector<20x20x8xbf16> to vector<16x16x8xbf16>
    %100 = vector.shape_cast %99 : vector<16x16x8xbf16> to vector<256x8xbf16>
    %c3_79 = arith.constant 3 : index
    %c1_80 = arith.constant 1 : index
    %c0_81 = arith.constant 0 : index
    %c0_82 = arith.constant 0 : index
    %101 = vector.load %arg2[%c3_79, %c1_80, %c0_81, %c0_82] : memref<5x5x8x128xbf16, #tpu.memory_space<vmem>>, vector<1x1x8x128xbf16>
    %102 = vector.shape_cast %101 : vector<1x1x8x128xbf16> to vector<8x128xbf16>
    %cst_83 = arith.constant dense<0.000000e+00> : vector<256x128xf32>
    %103 = tpu.matmul %100, %102, %cst_83 {dimension_numbers = #tpu.dot_dimension_numbers<[1], [0], [0], [1], [0, 0, 1, 1], [], []>} : vector<256x8xbf16>, vector<8x128xbf16>, vector<256x128xf32> -> vector<256x128xf32>
    %104 = arith.addf %98, %103 : vector<256x128xf32>
    %105 = vector.extract_strided_slice %1 {offsets = [3, 2, 0], sizes = [16, 16, 8], strides = [1, 1, 1]} : vector<20x20x8xbf16> to vector<16x16x8xbf16>
    %106 = vector.shape_cast %105 : vector<16x16x8xbf16> to vector<256x8xbf16>
    %c3_84 = arith.constant 3 : index
    %c2_85 = arith.constant 2 : index
    %c0_86 = arith.constant 0 : index
    %c0_87 = arith.constant 0 : index
    %107 = vector.load %arg2[%c3_84, %c2_85, %c0_86, %c0_87] : memref<5x5x8x128xbf16, #tpu.memory_space<vmem>>, vector<1x1x8x128xbf16>
    %108 = vector.shape_cast %107 : vector<1x1x8x128xbf16> to vector<8x128xbf16>
    %cst_88 = arith.constant dense<0.000000e+00> : vector<256x128xf32>
    %109 = tpu.matmul %106, %108, %cst_88 {dimension_numbers = #tpu.dot_dimension_numbers<[1], [0], [0], [1], [0, 0, 1, 1], [], []>} : vector<256x8xbf16>, vector<8x128xbf16>, vector<256x128xf32> -> vector<256x128xf32>
    %110 = arith.addf %104, %109 : vector<256x128xf32>
    %111 = vector.extract_strided_slice %1 {offsets = [3, 3, 0], sizes = [16, 16, 8], strides = [1, 1, 1]} : vector<20x20x8xbf16> to vector<16x16x8xbf16>
    %112 = vector.shape_cast %111 : vector<16x16x8xbf16> to vector<256x8xbf16>
    %c3_89 = arith.constant 3 : index
    %c3_90 = arith.constant 3 : index
    %c0_91 = arith.constant 0 : index
    %c0_92 = arith.constant 0 : index
    %113 = vector.load %arg2[%c3_89, %c3_90, %c0_91, %c0_92] : memref<5x5x8x128xbf16, #tpu.memory_space<vmem>>, vector<1x1x8x128xbf16>
    %114 = vector.shape_cast %113 : vector<1x1x8x128xbf16> to vector<8x128xbf16>
    %cst_93 = arith.constant dense<0.000000e+00> : vector<256x128xf32>
    %115 = tpu.matmul %112, %114, %cst_93 {dimension_numbers = #tpu.dot_dimension_numbers<[1], [0], [0], [1], [0, 0, 1, 1], [], []>} : vector<256x8xbf16>, vector<8x128xbf16>, vector<256x128xf32> -> vector<256x128xf32>
    %116 = arith.addf %110, %115 : vector<256x128xf32>
    %117 = vector.extract_strided_slice %1 {offsets = [3, 4, 0], sizes = [16, 16, 8], strides = [1, 1, 1]} : vector<20x20x8xbf16> to vector<16x16x8xbf16>
    %118 = vector.shape_cast %117 : vector<16x16x8xbf16> to vector<256x8xbf16>
    %c3_94 = arith.constant 3 : index
    %c4_95 = arith.constant 4 : index
    %c0_96 = arith.constant 0 : index
    %c0_97 = arith.constant 0 : index
    %119 = vector.load %arg2[%c3_94, %c4_95, %c0_96, %c0_97] : memref<5x5x8x128xbf16, #tpu.memory_space<vmem>>, vector<1x1x8x128xbf16>
    %120 = vector.shape_cast %119 : vector<1x1x8x128xbf16> to vector<8x128xbf16>
    %cst_98 = arith.constant dense<0.000000e+00> : vector<256x128xf32>
    %121 = tpu.matmul %118, %120, %cst_98 {dimension_numbers = #tpu.dot_dimension_numbers<[1], [0], [0], [1], [0, 0, 1, 1], [], []>} : vector<256x8xbf16>, vector<8x128xbf16>, vector<256x128xf32> -> vector<256x128xf32>
    %122 = arith.addf %116, %121 : vector<256x128xf32>
    %123 = vector.extract_strided_slice %1 {offsets = [4, 0, 0], sizes = [16, 16, 8], strides = [1, 1, 1]} : vector<20x20x8xbf16> to vector<16x16x8xbf16>
    %124 = vector.shape_cast %123 : vector<16x16x8xbf16> to vector<256x8xbf16>
    %c4_99 = arith.constant 4 : index
    %c0_100 = arith.constant 0 : index
    %c0_101 = arith.constant 0 : index
    %c0_102 = arith.constant 0 : index
    %125 = vector.load %arg2[%c4_99, %c0_100, %c0_101, %c0_102] : memref<5x5x8x128xbf16, #tpu.memory_space<vmem>>, vector<1x1x8x128xbf16>
    %126 = vector.shape_cast %125 : vector<1x1x8x128xbf16> to vector<8x128xbf16>
    %cst_103 = arith.constant dense<0.000000e+00> : vector<256x128xf32>
    %127 = tpu.matmul %124, %126, %cst_103 {dimension_numbers = #tpu.dot_dimension_numbers<[1], [0], [0], [1], [0, 0, 1, 1], [], []>} : vector<256x8xbf16>, vector<8x128xbf16>, vector<256x128xf32> -> vector<256x128xf32>
    %128 = arith.addf %122, %127 : vector<256x128xf32>
    %129 = vector.extract_strided_slice %1 {offsets = [4, 1, 0], sizes = [16, 16, 8], strides = [1, 1, 1]} : vector<20x20x8xbf16> to vector<16x16x8xbf16>
    %130 = vector.shape_cast %129 : vector<16x16x8xbf16> to vector<256x8xbf16>
    %c4_104 = arith.constant 4 : index
    %c1_105 = arith.constant 1 : index
    %c0_106 = arith.constant 0 : index
    %c0_107 = arith.constant 0 : index
    %131 = vector.load %arg2[%c4_104, %c1_105, %c0_106, %c0_107] : memref<5x5x8x128xbf16, #tpu.memory_space<vmem>>, vector<1x1x8x128xbf16>
    %132 = vector.shape_cast %131 : vector<1x1x8x128xbf16> to vector<8x128xbf16>
    %cst_108 = arith.constant dense<0.000000e+00> : vector<256x128xf32>
    %133 = tpu.matmul %130, %132, %cst_108 {dimension_numbers = #tpu.dot_dimension_numbers<[1], [0], [0], [1], [0, 0, 1, 1], [], []>} : vector<256x8xbf16>, vector<8x128xbf16>, vector<256x128xf32> -> vector<256x128xf32>
    %134 = arith.addf %128, %133 : vector<256x128xf32>
    %135 = vector.extract_strided_slice %1 {offsets = [4, 2, 0], sizes = [16, 16, 8], strides = [1, 1, 1]} : vector<20x20x8xbf16> to vector<16x16x8xbf16>
    %136 = vector.shape_cast %135 : vector<16x16x8xbf16> to vector<256x8xbf16>
    %c4_109 = arith.constant 4 : index
    %c2_110 = arith.constant 2 : index
    %c0_111 = arith.constant 0 : index
    %c0_112 = arith.constant 0 : index
    %137 = vector.load %arg2[%c4_109, %c2_110, %c0_111, %c0_112] : memref<5x5x8x128xbf16, #tpu.memory_space<vmem>>, vector<1x1x8x128xbf16>
    %138 = vector.shape_cast %137 : vector<1x1x8x128xbf16> to vector<8x128xbf16>
    %cst_113 = arith.constant dense<0.000000e+00> : vector<256x128xf32>
    %139 = tpu.matmul %136, %138, %cst_113 {dimension_numbers = #tpu.dot_dimension_numbers<[1], [0], [0], [1], [0, 0, 1, 1], [], []>} : vector<256x8xbf16>, vector<8x128xbf16>, vector<256x128xf32> -> vector<256x128xf32>
    %140 = arith.addf %134, %139 : vector<256x128xf32>
    %141 = vector.extract_strided_slice %1 {offsets = [4, 3, 0], sizes = [16, 16, 8], strides = [1, 1, 1]} : vector<20x20x8xbf16> to vector<16x16x8xbf16>
    %142 = vector.shape_cast %141 : vector<16x16x8xbf16> to vector<256x8xbf16>
    %c4_114 = arith.constant 4 : index
    %c3_115 = arith.constant 3 : index
    %c0_116 = arith.constant 0 : index
    %c0_117 = arith.constant 0 : index
    %143 = vector.load %arg2[%c4_114, %c3_115, %c0_116, %c0_117] : memref<5x5x8x128xbf16, #tpu.memory_space<vmem>>, vector<1x1x8x128xbf16>
    %144 = vector.shape_cast %143 : vector<1x1x8x128xbf16> to vector<8x128xbf16>
    %cst_118 = arith.constant dense<0.000000e+00> : vector<256x128xf32>
    %145 = tpu.matmul %142, %144, %cst_118 {dimension_numbers = #tpu.dot_dimension_numbers<[1], [0], [0], [1], [0, 0, 1, 1], [], []>} : vector<256x8xbf16>, vector<8x128xbf16>, vector<256x128xf32> -> vector<256x128xf32>
    %146 = arith.addf %140, %145 : vector<256x128xf32>
    %147 = vector.extract_strided_slice %1 {offsets = [4, 4, 0], sizes = [16, 16, 8], strides = [1, 1, 1]} : vector<20x20x8xbf16> to vector<16x16x8xbf16>
    %148 = vector.shape_cast %147 : vector<16x16x8xbf16> to vector<256x8xbf16>
    %c4_119 = arith.constant 4 : index
    %c4_120 = arith.constant 4 : index
    %c0_121 = arith.constant 0 : index
    %c0_122 = arith.constant 0 : index
    %149 = vector.load %arg2[%c4_119, %c4_120, %c0_121, %c0_122] : memref<5x5x8x128xbf16, #tpu.memory_space<vmem>>, vector<1x1x8x128xbf16>
    %150 = vector.shape_cast %149 : vector<1x1x8x128xbf16> to vector<8x128xbf16>
    %cst_123 = arith.constant dense<0.000000e+00> : vector<256x128xf32>
    %151 = tpu.matmul %148, %150, %cst_123 {dimension_numbers = #tpu.dot_dimension_numbers<[1], [0], [0], [1], [0, 0, 1, 1], [], []>} : vector<256x8xbf16>, vector<8x128xbf16>, vector<256x128xf32> -> vector<256x128xf32>
    %152 = arith.addf %146, %151 : vector<256x128xf32>
    %c0_124 = arith.constant 0 : index
    %c0_125 = arith.constant 0 : index
    %153 = vector.load %arg3[%c0_124, %c0_125] : memref<1x128xf32, #tpu.memory_space<vmem>>, vector<1x128xf32>
    %154 = vector.broadcast %153 : vector<1x128xf32> to vector<256x128xf32>
    %155 = arith.addf %152, %154 : vector<256x128xf32>
    %cst_126 = arith.constant 0.000000e+00 : f32
    %156 = vector.broadcast %cst_126 : f32 to vector<256x128xf32>
    %157 = arith.maximumf %155, %156 : vector<256x128xf32>
    %c0_127 = arith.constant 0 : index
    %c0_128 = arith.constant 0 : index
    %c0_129 = arith.constant 0 : index
    %158 = vector.load %arg4[%c0_127, %c0_128, %c0_129] : memref<1x256x128xf32, #tpu.memory_space<vmem>>, vector<1x256x128xf32>
    %159 = vector.shape_cast %158 : vector<1x256x128xf32> to vector<256x128xf32>
    %160 = vector.shape_cast %157 : vector<256x128xf32> to vector<1x256x128xf32>
    tpu.vector_store %arg4[%c0_127, %c0_128, %c0_129], %160 {strides = array<i32>} : memref<1x256x128xf32, #tpu.memory_space<vmem>>, vector<1x256x128xf32>,
    return
  }
  func.func @transform_0(%arg0: i32) -> (i32, i32, i32, i32) {
    %c0_i32 = arith.constant 0 : i32
    %c0_i32_0 = arith.constant 0 : i32
    %c0_i32_1 = arith.constant 0 : i32
    %c0_i32_2 = arith.constant 0 : i32
    return %arg0, %c0_i32, %c0_i32_0, %c0_i32_1 : i32, i32, i32, i32
  }
  func.func @transform_1(%arg0: i32) -> (i32, i32, i32, i32) {
    %c0_i32 = arith.constant 0 : i32
    %c0_i32_0 = arith.constant 0 : i32
    %c0_i32_1 = arith.constant 0 : i32
    %c0_i32_2 = arith.constant 0 : i32
    %c0_i32_3 = arith.constant 0 : i32
    return %c0_i32, %c0_i32_0, %c0_i32_1, %c0_i32_2 : i32, i32, i32, i32
  }
  func.func @transform_2(%arg0: i32) -> (i32, i32) {
    %c0_i32 = arith.constant 0 : i32
    %c0_i32_0 = arith.constant 0 : i32
    %c0_i32_1 = arith.constant 0 : i32
    return %c0_i32, %c0_i32_0 : i32, i32
  }
  func.func @transform_3(%arg0: i32) -> (i32, i32, i32) {
    %c0_i32 = arith.constant 0 : i32
    %c0_i32_0 = arith.constant 0 : i32
    %c0_i32_1 = arith.constant 0 : i32
    return %arg0, %c0_i32, %c0_i32_0 : i32, i32, i32
  }
}

module attributes {stable_mosaic.version = 11 : i64} {
  func.func @_direct_conv_kernel(%arg0: i32, %arg1: memref<1x18x18x16xbf16, #tpu.memory_space<vmem>>, %arg2: memref<3x3x16x128xbf16, #tpu.memory_space<vmem>>, %arg3: memref<1x128xf32, #tpu.memory_space<vmem>>, %arg4: memref<1x256x128xf32, #tpu.memory_space<vmem>>) attributes {dimension_semantics = [#tpu.dimension_semantics<parallel>], iteration_bounds = array<i64: 2>, scalar_prefetch = 0 : i64, scratch_operands = 0 : i64, tpu.core_type = #tpu.core_type<tc>, window_params = [{transform_indices = @transform_0, window_bounds = array<i64: 1, 18, 18, 16>}, {pipeline_mode = #tpu.pipeline_mode<synchronous>, transform_indices = @transform_1, window_bounds = array<i64: 3, 3, 16, 128>}, {pipeline_mode = #tpu.pipeline_mode<synchronous>, transform_indices = @transform_2, window_bounds = array<i64: 1, 128>}, {transform_indices = @transform_3, window_bounds = array<i64: 1, 256, 128>}]} {
    %c0 = arith.constant 0 : index
    %c0_0 = arith.constant 0 : index
    %c0_1 = arith.constant 0 : index
    %c0_2 = arith.constant 0 : index
    %0 = vector.load %arg1[%c0, %c0_0, %c0_1, %c0_2] : memref<1x18x18x16xbf16, #tpu.memory_space<vmem>>, vector<1x18x18x16xbf16>
    %1 = vector.shape_cast %0 : vector<1x18x18x16xbf16> to vector<18x18x16xbf16>
    %cst = arith.constant 0.000000e+00 : f32
    %2 = vector.broadcast %cst : f32 to vector<256x128xf32>
    %3 = vector.extract_strided_slice %1 {offsets = [0, 0, 0], sizes = [16, 16, 16], strides = [1, 1, 1]} : vector<18x18x16xbf16> to vector<16x16x16xbf16>
    %4 = vector.shape_cast %3 : vector<16x16x16xbf16> to vector<256x16xbf16>
    %c0_3 = arith.constant 0 : index
    %c0_4 = arith.constant 0 : index
    %c0_5 = arith.constant 0 : index
    %c0_6 = arith.constant 0 : index
    %5 = vector.load %arg2[%c0_3, %c0_4, %c0_5, %c0_6] : memref<3x3x16x128xbf16, #tpu.memory_space<vmem>>, vector<1x1x16x128xbf16>
    %6 = vector.shape_cast %5 : vector<1x1x16x128xbf16> to vector<16x128xbf16>
    %cst_7 = arith.constant dense<0.000000e+00> : vector<256x128xf32>
    %7 = tpu.matmul %4, %6, %cst_7 {dimension_numbers = #tpu.dot_dimension_numbers<[1], [0], [0], [1], [0, 0, 1, 1], [], []>} : vector<256x16xbf16>, vector<16x128xbf16>, vector<256x128xf32> -> vector<256x128xf32>
    %8 = arith.addf %2, %7 : vector<256x128xf32>
    %9 = vector.extract_strided_slice %1 {offsets = [0, 1, 0], sizes = [16, 16, 16], strides = [1, 1, 1]} : vector<18x18x16xbf16> to vector<16x16x16xbf16>
    %10 = vector.shape_cast %9 : vector<16x16x16xbf16> to vector<256x16xbf16>
    %c0_8 = arith.constant 0 : index
    %c1 = arith.constant 1 : index
    %c0_9 = arith.constant 0 : index
    %c0_10 = arith.constant 0 : index
    %11 = vector.load %arg2[%c0_8, %c1, %c0_9, %c0_10] : memref<3x3x16x128xbf16, #tpu.memory_space<vmem>>, vector<1x1x16x128xbf16>
    %12 = vector.shape_cast %11 : vector<1x1x16x128xbf16> to vector<16x128xbf16>
    %cst_11 = arith.constant dense<0.000000e+00> : vector<256x128xf32>
    %13 = tpu.matmul %10, %12, %cst_11 {dimension_numbers = #tpu.dot_dimension_numbers<[1], [0], [0], [1], [0, 0, 1, 1], [], []>} : vector<256x16xbf16>, vector<16x128xbf16>, vector<256x128xf32> -> vector<256x128xf32>
    %14 = arith.addf %8, %13 : vector<256x128xf32>
    %15 = vector.extract_strided_slice %1 {offsets = [0, 2, 0], sizes = [16, 16, 16], strides = [1, 1, 1]} : vector<18x18x16xbf16> to vector<16x16x16xbf16>
    %16 = vector.shape_cast %15 : vector<16x16x16xbf16> to vector<256x16xbf16>
    %c0_12 = arith.constant 0 : index
    %c2 = arith.constant 2 : index
    %c0_13 = arith.constant 0 : index
    %c0_14 = arith.constant 0 : index
    %17 = vector.load %arg2[%c0_12, %c2, %c0_13, %c0_14] : memref<3x3x16x128xbf16, #tpu.memory_space<vmem>>, vector<1x1x16x128xbf16>
    %18 = vector.shape_cast %17 : vector<1x1x16x128xbf16> to vector<16x128xbf16>
    %cst_15 = arith.constant dense<0.000000e+00> : vector<256x128xf32>
    %19 = tpu.matmul %16, %18, %cst_15 {dimension_numbers = #tpu.dot_dimension_numbers<[1], [0], [0], [1], [0, 0, 1, 1], [], []>} : vector<256x16xbf16>, vector<16x128xbf16>, vector<256x128xf32> -> vector<256x128xf32>
    %20 = arith.addf %14, %19 : vector<256x128xf32>
    %21 = vector.extract_strided_slice %1 {offsets = [1, 0, 0], sizes = [16, 16, 16], strides = [1, 1, 1]} : vector<18x18x16xbf16> to vector<16x16x16xbf16>
    %22 = vector.shape_cast %21 : vector<16x16x16xbf16> to vector<256x16xbf16>
    %c1_16 = arith.constant 1 : index
    %c0_17 = arith.constant 0 : index
    %c0_18 = arith.constant 0 : index
    %c0_19 = arith.constant 0 : index
    %23 = vector.load %arg2[%c1_16, %c0_17, %c0_18, %c0_19] : memref<3x3x16x128xbf16, #tpu.memory_space<vmem>>, vector<1x1x16x128xbf16>
    %24 = vector.shape_cast %23 : vector<1x1x16x128xbf16> to vector<16x128xbf16>
    %cst_20 = arith.constant dense<0.000000e+00> : vector<256x128xf32>
    %25 = tpu.matmul %22, %24, %cst_20 {dimension_numbers = #tpu.dot_dimension_numbers<[1], [0], [0], [1], [0, 0, 1, 1], [], []>} : vector<256x16xbf16>, vector<16x128xbf16>, vector<256x128xf32> -> vector<256x128xf32>
    %26 = arith.addf %20, %25 : vector<256x128xf32>
    %27 = vector.extract_strided_slice %1 {offsets = [1, 1, 0], sizes = [16, 16, 16], strides = [1, 1, 1]} : vector<18x18x16xbf16> to vector<16x16x16xbf16>
    %28 = vector.shape_cast %27 : vector<16x16x16xbf16> to vector<256x16xbf16>
    %c1_21 = arith.constant 1 : index
    %c1_22 = arith.constant 1 : index
    %c0_23 = arith.constant 0 : index
    %c0_24 = arith.constant 0 : index
    %29 = vector.load %arg2[%c1_21, %c1_22, %c0_23, %c0_24] : memref<3x3x16x128xbf16, #tpu.memory_space<vmem>>, vector<1x1x16x128xbf16>
    %30 = vector.shape_cast %29 : vector<1x1x16x128xbf16> to vector<16x128xbf16>
    %cst_25 = arith.constant dense<0.000000e+00> : vector<256x128xf32>
    %31 = tpu.matmul %28, %30, %cst_25 {dimension_numbers = #tpu.dot_dimension_numbers<[1], [0], [0], [1], [0, 0, 1, 1], [], []>} : vector<256x16xbf16>, vector<16x128xbf16>, vector<256x128xf32> -> vector<256x128xf32>
    %32 = arith.addf %26, %31 : vector<256x128xf32>
    %33 = vector.extract_strided_slice %1 {offsets = [1, 2, 0], sizes = [16, 16, 16], strides = [1, 1, 1]} : vector<18x18x16xbf16> to vector<16x16x16xbf16>
    %34 = vector.shape_cast %33 : vector<16x16x16xbf16> to vector<256x16xbf16>
    %c1_26 = arith.constant 1 : index
    %c2_27 = arith.constant 2 : index
    %c0_28 = arith.constant 0 : index
    %c0_29 = arith.constant 0 : index
    %35 = vector.load %arg2[%c1_26, %c2_27, %c0_28, %c0_29] : memref<3x3x16x128xbf16, #tpu.memory_space<vmem>>, vector<1x1x16x128xbf16>
    %36 = vector.shape_cast %35 : vector<1x1x16x128xbf16> to vector<16x128xbf16>
    %cst_30 = arith.constant dense<0.000000e+00> : vector<256x128xf32>
    %37 = tpu.matmul %34, %36, %cst_30 {dimension_numbers = #tpu.dot_dimension_numbers<[1], [0], [0], [1], [0, 0, 1, 1], [], []>} : vector<256x16xbf16>, vector<16x128xbf16>, vector<256x128xf32> -> vector<256x128xf32>
    %38 = arith.addf %32, %37 : vector<256x128xf32>
    %39 = vector.extract_strided_slice %1 {offsets = [2, 0, 0], sizes = [16, 16, 16], strides = [1, 1, 1]} : vector<18x18x16xbf16> to vector<16x16x16xbf16>
    %40 = vector.shape_cast %39 : vector<16x16x16xbf16> to vector<256x16xbf16>
    %c2_31 = arith.constant 2 : index
    %c0_32 = arith.constant 0 : index
    %c0_33 = arith.constant 0 : index
    %c0_34 = arith.constant 0 : index
    %41 = vector.load %arg2[%c2_31, %c0_32, %c0_33, %c0_34] : memref<3x3x16x128xbf16, #tpu.memory_space<vmem>>, vector<1x1x16x128xbf16>
    %42 = vector.shape_cast %41 : vector<1x1x16x128xbf16> to vector<16x128xbf16>
    %cst_35 = arith.constant dense<0.000000e+00> : vector<256x128xf32>
    %43 = tpu.matmul %40, %42, %cst_35 {dimension_numbers = #tpu.dot_dimension_numbers<[1], [0], [0], [1], [0, 0, 1, 1], [], []>} : vector<256x16xbf16>, vector<16x128xbf16>, vector<256x128xf32> -> vector<256x128xf32>
    %44 = arith.addf %38, %43 : vector<256x128xf32>
    %45 = vector.extract_strided_slice %1 {offsets = [2, 1, 0], sizes = [16, 16, 16], strides = [1, 1, 1]} : vector<18x18x16xbf16> to vector<16x16x16xbf16>
    %46 = vector.shape_cast %45 : vector<16x16x16xbf16> to vector<256x16xbf16>
    %c2_36 = arith.constant 2 : index
    %c1_37 = arith.constant 1 : index
    %c0_38 = arith.constant 0 : index
    %c0_39 = arith.constant 0 : index
    %47 = vector.load %arg2[%c2_36, %c1_37, %c0_38, %c0_39] : memref<3x3x16x128xbf16, #tpu.memory_space<vmem>>, vector<1x1x16x128xbf16>
    %48 = vector.shape_cast %47 : vector<1x1x16x128xbf16> to vector<16x128xbf16>
    %cst_40 = arith.constant dense<0.000000e+00> : vector<256x128xf32>
    %49 = tpu.matmul %46, %48, %cst_40 {dimension_numbers = #tpu.dot_dimension_numbers<[1], [0], [0], [1], [0, 0, 1, 1], [], []>} : vector<256x16xbf16>, vector<16x128xbf16>, vector<256x128xf32> -> vector<256x128xf32>
    %50 = arith.addf %44, %49 : vector<256x128xf32>
    %51 = vector.extract_strided_slice %1 {offsets = [2, 2, 0], sizes = [16, 16, 16], strides = [1, 1, 1]} : vector<18x18x16xbf16> to vector<16x16x16xbf16>
    %52 = vector.shape_cast %51 : vector<16x16x16xbf16> to vector<256x16xbf16>
    %c2_41 = arith.constant 2 : index
    %c2_42 = arith.constant 2 : index
    %c0_43 = arith.constant 0 : index
    %c0_44 = arith.constant 0 : index
    %53 = vector.load %arg2[%c2_41, %c2_42, %c0_43, %c0_44] : memref<3x3x16x128xbf16, #tpu.memory_space<vmem>>, vector<1x1x16x128xbf16>
    %54 = vector.shape_cast %53 : vector<1x1x16x128xbf16> to vector<16x128xbf16>
    %cst_45 = arith.constant dense<0.000000e+00> : vector<256x128xf32>
    %55 = tpu.matmul %52, %54, %cst_45 {dimension_numbers = #tpu.dot_dimension_numbers<[1], [0], [0], [1], [0, 0, 1, 1], [], []>} : vector<256x16xbf16>, vector<16x128xbf16>, vector<256x128xf32> -> vector<256x128xf32>
    %56 = arith.addf %50, %55 : vector<256x128xf32>
    %c0_46 = arith.constant 0 : index
    %c0_47 = arith.constant 0 : index
    %57 = vector.load %arg3[%c0_46, %c0_47] : memref<1x128xf32, #tpu.memory_space<vmem>>, vector<1x128xf32>
    %58 = vector.broadcast %57 : vector<1x128xf32> to vector<256x128xf32>
    %59 = arith.addf %56, %58 : vector<256x128xf32>
    %cst_48 = arith.constant 0.000000e+00 : f32
    %60 = vector.broadcast %cst_48 : f32 to vector<256x128xf32>
    %61 = arith.maximumf %59, %60 : vector<256x128xf32>
    %c0_49 = arith.constant 0 : index
    %c0_50 = arith.constant 0 : index
    %c0_51 = arith.constant 0 : index
    %62 = vector.load %arg4[%c0_49, %c0_50, %c0_51] : memref<1x256x128xf32, #tpu.memory_space<vmem>>, vector<1x256x128xf32>
    %63 = vector.shape_cast %62 : vector<1x256x128xf32> to vector<256x128xf32>
    %64 = vector.shape_cast %61 : vector<256x128xf32> to vector<1x256x128xf32>
    tpu.vector_store %arg4[%c0_49, %c0_50, %c0_51], %64 {strides = array<i32>} : memref<1x256x128xf32, #tpu.memory_space<vmem>>, vector<1x256x128xf32>,
    return
  }
  func.func @transform_0(%arg0: i32) -> (i32, i32, i32, i32) {
    %c0_i32 = arith.constant 0 : i32
    %c0_i32_0 = arith.constant 0 : i32
    %c0_i32_1 = arith.constant 0 : i32
    %c0_i32_2 = arith.constant 0 : i32
    return %arg0, %c0_i32, %c0_i32_0, %c0_i32_1 : i32, i32, i32, i32
  }
  func.func @transform_1(%arg0: i32) -> (i32, i32, i32, i32) {
    %c0_i32 = arith.constant 0 : i32
    %c0_i32_0 = arith.constant 0 : i32
    %c0_i32_1 = arith.constant 0 : i32
    %c0_i32_2 = arith.constant 0 : i32
    %c0_i32_3 = arith.constant 0 : i32
    return %c0_i32, %c0_i32_0, %c0_i32_1, %c0_i32_2 : i32, i32, i32, i32
  }
  func.func @transform_2(%arg0: i32) -> (i32, i32) {
    %c0_i32 = arith.constant 0 : i32
    %c0_i32_0 = arith.constant 0 : i32
    %c0_i32_1 = arith.constant 0 : i32
    return %c0_i32, %c0_i32_0 : i32, i32
  }
  func.func @transform_3(%arg0: i32) -> (i32, i32, i32) {
    %c0_i32 = arith.constant 0 : i32
    %c0_i32_0 = arith.constant 0 : i32
    %c0_i32_1 = arith.constant 0 : i32
    return %arg0, %c0_i32, %c0_i32_0 : i32, i32, i32
  }
}

</mosaic_0001>

<bundles_post_ra>
// kernel: inception_forward.5
= control target key start
LH: loop header
LB: loop body
LE: loop exit
PB: predicated region body
PF: predicated region fallthrough
CT: control target
= control target key end

     0   :  { %s1127_s12 = smov 0   ;;  %s1129_s13 = smov 0   ;;  %s1341_s0 = inlined_call_operand.vmem [shape: f32[512,8], index: 0, kind: input, shape index: {}]   ;;  %s1342_s1 = inlined_call_operand.vmem [shape: bf16[8,256], index: 1, kind: input, shape index: {}]   ;;  %s1343_s2 = inlined_call_operand.vmem [shape: f32[1,256], index: 2, kind: input, shape index: {}]   ;;  %s1344_s3 = inlined_call_operand.vmem [shape: bf16[512,256], index: 3, kind: output, shape index: {}]  }
   0x1   :  { %s1131_s14 = smov 0  }
   0x2 LB: > { %s25_s15 = sadd.s32 1, %s1100_s13  ;;  %p961_p0 = scmp.ge.s32.totalorder %s1104_s14, 1  ;;  %s1104_s14 = sphi %s1131_s14, %s13_s14   ;;  %s1100_s13 = sphi %s1129_s13, %s1346_s13   ;;  %s1096_s12 = sphi %s1127_s12, %s1345_s12  }
   0x3   : > { %p27_p1 = scmp.ge.s32.totalorder %s25_s15, 2  ;;  %p173_p2 = scmp.lt.s32.totalorder %s1104_s14, 3 }
   0x5   : > { %s1348_s15 = smov (%p27_p1, %s25_s15), 0  ;;  %p174_p3 = pnand %p961_p0, %p173_p2 }
   0x6   : > { %s962_s18 = sshll.u32 (!%p174_p3), %s1096_s12, 5 }
   0x7   : > { %177 = sbr.rel (%p174_p3) target bundleno = 281 (0x119), region = 32  ;;  %p212_p4 = scmp.lt.s32.totalorder (!%p174_p3), %s962_s18, 63 }
   0xc   : > { %v289_v0 = vld [vmem:[%s1342_s1] sm:$0xff]  ;;  %vm356_vm0 = vcmask 1043456   ;;  %v1106_v3 = vmov 0   ;;  %s1350_s18 = smov (!%p212_p4, %s962_s18), 63  ;;  %vm307_vm1 = vcmask 64512   ;;  %v292_v53 = vlaneseq }
   0xd   : > { %v968_v1 = vcombine.high %v289_v0, %v289_v0  ;;  %v967_v2 = vcombine.low %v289_v0, %v289_v0  ;;  %395 = vmatprep.mubr.bf16.mxu0 %v1106_v3  ;;  %475 = vmatprep.mubr.bf16.mxu1 %v1106_v3  ;;  %s963_s19 = sshll.u32 %s1350_s18, 3  ;;  %v290_v56 = vld [vmem:[%s1343_s2] sm:$0x3] }
   0xe   : > { %s1158_s22 = scalar_lea.vmem %s1341_s0, %s963_s19  ;;  %v293_v54 = vshrl.u32 %v292_v53, 7  ;;  %s1239_s27 = scalar_lea.vmem %s1344_s3, %s963_s19 }
   0xf   : > { %969 = vmatprep.subr.msk.bf16.mxu0 %vm356_vm0, %v968_v1  ;;  %1053 = vmatprep.subr.msk.bf16.mxu1 %vm356_vm0, %v968_v1  ;;  %v358_v4 = vsel %vm356_vm0, %v967_v2, 0  ;;  %v241_v5 = vld [vmem:[%s1158_s22] sm:$0xff]  ;;  %v242_v6 = vld [vmem:[%s1158_s22 + $0x8] sm:$0xff]  ;;  %v243_v11 = vld [vmem:[%s1158_s22 + $0x10] sm:$0xff] }
  0x10   : > { %378 = vmatpush1.bf16.msra.mxu0 %v358_v4  ;;  %1054 = vmatpush1.bf16.msra.mxu1 %v358_v4  ;;  %v257_v7 = vld [vmem:[%s1158_s22 + $0x80] sm:$0xff]  ;;  %v273_v8 = vpack.c.bf16 %v242_v6, %v241_v5  ;;  %v258_v9 = vld [vmem:[%s1158_s22 + $0x88] sm:$0xff]  ;;  %v244_v12 = vld [vmem:[%s1158_s22 + $0x18] sm:$0xff]  ;;  %v294_v55 = vsub.s32 0, %v293_v54  ;;  %v298_v57 = vsub.s32 1, %v293_v54 }
  0x11   : > { %v281_v10 = vpack.c.bf16 %v258_v9, %v257_v7  ;;  %v259_v13 = vld [vmem:[%s1158_s22 + $0x90] sm:$0xff]  ;;  %v260_v14 = vld [vmem:[%s1158_s22 + $0x98] sm:$0xff]  ;;  %v274_v15 = vpack.c.bf16 %v244_v12, %v243_v11  ;;  %v245_v17 = vld [vmem:[%s1158_s22 + $0x20] sm:$0xff] }
  0x12   : > { %v282_v16 = vpack.c.bf16 %v260_v14, %v259_v13  ;;  %v246_v18 = vld [vmem:[%s1158_s22 + $0x28] sm:$0xff]  ;;  %v261_v19 = vld [vmem:[%s1158_s22 + $0xa0] sm:$0xff]  ;;  %v247_v23 = vld [vmem:[%s1158_s22 + $0x30] sm:$0xff]  ;;  %v1225_v58 = vrot.slane %v290_v56, %v294_v55  ;;  %v1227_v59 = vrot.slane %v290_v56, %v298_v57 }
  0x13   : > { %970 = vmatmul.mubr.msk.bf16.vlgmr.msra.gmra.mxu0 %vm307_vm1, %v273_v8  ;;  %978 = vmatmul.mubr.msk.bf16.vlgmr.msra.gmra.mxu1 %vm307_vm1, %v281_v10  ;;  %v262_v20 = vld [vmem:[%s1158_s22 + $0xa8] sm:$0xff]  ;;  %v275_v21 = vpack.c.bf16 %v246_v18, %v245_v17  ;;  %v248_v24 = vld [vmem:[%s1158_s22 + $0x38] sm:$0xff]  ;;  %v263_v25 = vld [vmem:[%s1158_s22 + $0xb0] sm:$0xff] }
  0x14   : > { %405 = vmatprep.mubr.bf16.mxu0 %v1106_v3  ;;  %485 = vmatprep.mubr.bf16.mxu1 %v1106_v3  ;;  %v283_v22 = vpack.c.bf16 %v262_v20, %v261_v19  ;;  %v264_v26 = vld [vmem:[%s1158_s22 + $0xb8] sm:$0xff]  ;;  %v276_v27 = vpack.c.bf16 %v248_v24, %v247_v23  ;;  %v249_v29 = vld [vmem:[%s1158_s22 + $0x40] sm:$0xff]  ;;  %v250_v30 = vld [vmem:[%s1158_s22 + $0x48] sm:$0xff] }
  0x15   : > { %v284_v28 = vpack.c.bf16 %v264_v26, %v263_v25  ;;  %v265_v31 = vld [vmem:[%s1158_s22 + $0xc0] sm:$0xff]  ;;  %v266_v32 = vld [vmem:[%s1158_s22 + $0xc8] sm:$0xff]  ;;  %v277_v33 = vpack.c.bf16 %v250_v30, %v249_v29  ;;  %v251_v35 = vld [vmem:[%s1158_s22 + $0x50] sm:$0xff] }
  0x16   : > { %v285_v34 = vpack.c.bf16 %v266_v32, %v265_v31  ;;  %v252_v36 = vld [vmem:[%s1158_s22 + $0x58] sm:$0xff]  ;;  %v267_v37 = vld [vmem:[%s1158_s22 + $0xd0] sm:$0xff]  ;;  %v253_v41 = vld [vmem:[%s1158_s22 + $0x60] sm:$0xff] }
  0x17   : > { %v268_v38 = vld [vmem:[%s1158_s22 + $0xd8] sm:$0xff]  ;;  %v278_v39 = vpack.c.bf16 %v252_v36, %v251_v35  ;;  %v254_v42 = vld [vmem:[%s1158_s22 + $0x68] sm:$0xff]  ;;  %v269_v43 = vld [vmem:[%s1158_s22 + $0xe0] sm:$0xff] }
  0x18   : > { %v286_v40 = vpack.c.bf16 %v268_v38, %v267_v37  ;;  %v270_v44 = vld [vmem:[%s1158_s22 + $0xe8] sm:$0xff]  ;;  %v279_v45 = vpack.c.bf16 %v254_v42, %v253_v41  ;;  %v255_v47 = vld [vmem:[%s1158_s22 + $0x70] sm:$0xff]  ;;  %v256_v48 = vld [vmem:[%s1158_s22 + $0x78] sm:$0xff] }
  0x19   : > { %v287_v46 = vpack.c.bf16 %v270_v44, %v269_v43  ;;  %v271_v49 = vld [vmem:[%s1158_s22 + $0xf0] sm:$0xff]  ;;  %v272_v50 = vld [vmem:[%s1158_s22 + $0xf8] sm:$0xff]  ;;  %v280_v51 = vpack.c.bf16 %v256_v48, %v255_v47 }
  0x1a   : > { %v288_v52 = vpack.c.bf16 %v272_v50, %v271_v49 }
  0x1b   : > { %971 = vmatmul.mubr.msk.bf16.gmra.mxu0 %vm307_vm1, %v274_v15  ;;  %979 = vmatmul.mubr.msk.bf16.gmra.mxu1 %vm307_vm1, %v282_v16 }
  0x1c   : > { %415 = vmatprep.mubr.bf16.mxu0 %v1106_v3  ;;  %495 = vmatprep.mubr.bf16.mxu1 %v1106_v3 }
  0x23   : > { %972 = vmatmul.mubr.msk.bf16.gmra.mxu0 %vm307_vm1, %v275_v21  ;;  %980 = vmatmul.mubr.msk.bf16.gmra.mxu1 %vm307_vm1, %v283_v22 }
  0x24   : > { %425 = vmatprep.mubr.bf16.mxu0 %v1106_v3  ;;  %505 = vmatprep.mubr.bf16.mxu1 %v1106_v3 }
  0x2b   : > { %973 = vmatmul.mubr.msk.bf16.gmra.mxu0 %vm307_vm1, %v276_v27  ;;  %981 = vmatmul.mubr.msk.bf16.gmra.mxu1 %vm307_vm1, %v284_v28 }
  0x2c   : > { %435 = vmatprep.mubr.bf16.mxu0 %v1106_v3  ;;  %515 = vmatprep.mubr.bf16.mxu1 %v1106_v3 }
  0x33   : > { %974 = vmatmul.mubr.msk.bf16.gmra.mxu0 %vm307_vm1, %v277_v33  ;;  %982 = vmatmul.mubr.msk.bf16.gmra.mxu1 %vm307_vm1, %v285_v34 }
  0x34   : > { %445 = vmatprep.mubr.bf16.mxu0 %v1106_v3  ;;  %525 = vmatprep.mubr.bf16.mxu1 %v1106_v3 }
  0x3b   : > { %975 = vmatmul.mubr.msk.bf16.gmra.mxu0 %vm307_vm1, %v278_v39  ;;  %983 = vmatmul.mubr.msk.bf16.gmra.mxu1 %vm307_vm1, %v286_v40 }
  0x3c   : > { %455 = vmatprep.mubr.bf16.mxu0 %v1106_v3  ;;  %535 = vmatprep.mubr.bf16.mxu1 %v1106_v3 }
  0x43   : > { %976 = vmatmul.mubr.msk.bf16.gmra.mxu0 %vm307_vm1, %v279_v45  ;;  %984 = vmatmul.mubr.msk.bf16.gmra.mxu1 %vm307_vm1, %v287_v46 }
  0x44   : > { %465 = vmatprep.mubr.bf16.mxu0 %v1106_v3  ;;  %545 = vmatprep.mubr.bf16.mxu1 %v1106_v3 }
  0x4b   : > { %977 = vmatmul.mubr.msk.bf16.gmra.mxu0 %vm307_vm1, %v280_v51  ;;  %985 = vmatmul.mubr.msk.bf16.gmra.mxu1 %vm307_vm1, %v288_v52 }
  0xd3   : > { %v397_v60 = vpop.f32.mrf.mxu0  ;;  %v477_v62 = vpop.f32.mrf.mxu1 }
  0xd4   : > { %v398_v61 = vadd.f32 %v397_v60, %v1225_v58  ;;  %v478_v63 = vadd.f32 %v477_v62, %v1225_v58 }
  0xd5   : > { %v399_v0 = vpop.f32.mrf.mxu0  ;;  %v479_v2 = vpop.f32.mrf.mxu1 }
  0xd6   : > { %v400_v1 = vadd.f32 %v399_v0, %v1227_v59  ;;  %v480_v3 = vadd.f32 %v479_v2, %v1227_v59  ;;  %v556_v5 = vmax.f32 %v398_v61, 0.0  ;;  %v588_v9 = vmax.f32 %v478_v63, 0.0 }
  0xd7   : > { %v401_v4 = vpop.f32.mrf.mxu0  ;;  %v481_v8 = vpop.f32.mrf.mxu1 }
  0xd8   : > { %v557_v6 = vmax.f32 %v400_v1, 0.0  ;;  %v402_v7 = vadd.f32 %v401_v4, %v1225_v58  ;;  %v589_v10 = vmax.f32 %v480_v3, 0.0  ;;  %v482_v11 = vadd.f32 %v481_v8, %v1225_v58 }
  0xd9   : > { %v403_v12 = vpop.f32.mrf.mxu0  ;;  %v483_v15 = vpop.f32.mrf.mxu1 }
  0xda   : > { %v1021_v13 = vpack.c.bf16 %v557_v6, %v556_v5  ;;  %v404_v14 = vadd.f32 %v403_v12, %v1227_v59  ;;  %v1037_v16 = vpack.c.bf16 %v589_v10, %v588_v9  ;;  %v484_v17 = vadd.f32 %v483_v15, %v1227_v59 }
  0xdb   : > { %v407_v18 = vpop.f32.mrf.mxu0  ;;  %v558_v19 = vmax.f32 %v402_v7, 0.0  ;;  %v487_v22 = vpop.f32.mrf.mxu1  ;;  %v590_v23 = vmax.f32 %v482_v11, 0.0 }
  0xdc   : > { %812 = vst [vmem:[%s1239_s27] sm:$0xff] %v1021_v13  ;;  %v559_v20 = vmax.f32 %v404_v14, 0.0  ;;  %v408_v21 = vadd.f32 %v407_v18, %v1225_v58  ;;  %828 = vst [vmem:[%s1239_s27 + $0x80] sm:$0xff] %v1037_v16  ;;  %v591_v24 = vmax.f32 %v484_v17, 0.0  ;;  %v488_v25 = vadd.f32 %v487_v22, %v1225_v58 }
  0xdd   : > { %v409_v26 = vpop.f32.mrf.mxu0  ;;  %v489_v29 = vpop.f32.mrf.mxu1 }
  0xde   : > { %v1022_v27 = vpack.c.bf16 %v559_v20, %v558_v19  ;;  %v410_v28 = vadd.f32 %v409_v26, %v1227_v59  ;;  %v1038_v30 = vpack.c.bf16 %v591_v24, %v590_v23  ;;  %v490_v31 = vadd.f32 %v489_v29, %v1227_v59 }
  0xdf   : > { %v411_v32 = vpop.f32.mrf.mxu0  ;;  %v560_v33 = vmax.f32 %v408_v21, 0.0  ;;  %v491_v36 = vpop.f32.mrf.mxu1  ;;  %v592_v37 = vmax.f32 %v488_v25, 0.0 }
  0xe0   : > { %813 = vst [vmem:[%s1239_s27 + $0x8] sm:$0xff] %v1022_v27  ;;  %v561_v34 = vmax.f32 %v410_v28, 0.0  ;;  %v412_v35 = vadd.f32 %v411_v32, %v1225_v58  ;;  %829 = vst [vmem:[%s1239_s27 + $0x88] sm:$0xff] %v1038_v30  ;;  %v593_v38 = vmax.f32 %v490_v31, 0.0  ;;  %v492_v39 = vadd.f32 %v491_v36, %v1225_v58 }
  0xe1   : > { %v413_v40 = vpop.f32.mrf.mxu0  ;;  %v493_v43 = vpop.f32.mrf.mxu1 }
  0xe2   : > { %v1023_v41 = vpack.c.bf16 %v561_v34, %v560_v33  ;;  %v414_v42 = vadd.f32 %v413_v40, %v1227_v59  ;;  %v1039_v44 = vpack.c.bf16 %v593_v38, %v592_v37  ;;  %v494_v45 = vadd.f32 %v493_v43, %v1227_v59 }
  0xe3   : > { %v417_v46 = vpop.f32.mrf.mxu0  ;;  %v562_v47 = vmax.f32 %v412_v35, 0.0  ;;  %v497_v50 = vpop.f32.mrf.mxu1  ;;  %v594_v51 = vmax.f32 %v492_v39, 0.0 }
  0xe4   : > { %814 = vst [vmem:[%s1239_s27 + $0x10] sm:$0xff] %v1023_v41  ;;  %v563_v48 = vmax.f32 %v414_v42, 0.0  ;;  %v418_v49 = vadd.f32 %v417_v46, %v1225_v58  ;;  %830 = vst [vmem:[%s1239_s27 + $0x90] sm:$0xff] %v1039_v44  ;;  %v595_v52 = vmax.f32 %v494_v45, 0.0  ;;  %v498_v53 = vadd.f32 %v497_v50, %v1225_v58 }
  0xe5   : > { %v419_v54 = vpop.f32.mrf.mxu0  ;;  %v499_v57 = vpop.f32.mrf.mxu1 }
  0xe6   : > { %v1024_v55 = vpack.c.bf16 %v563_v48, %v562_v47  ;;  %v420_v56 = vadd.f32 %v419_v54, %v1227_v59  ;;  %v1040_v60 = vpack.c.bf16 %v595_v52, %v594_v51  ;;  %v500_v61 = vadd.f32 %v499_v57, %v1227_v59 }
  0xe7   : > { %v421_v62 = vpop.f32.mrf.mxu0  ;;  %v564_v63 = vmax.f32 %v418_v49, 0.0  ;;  %v501_v2 = vpop.f32.mrf.mxu1  ;;  %v596_v3 = vmax.f32 %v498_v53, 0.0 }
  0xe8   : > { %815 = vst [vmem:[%s1239_s27 + $0x18] sm:$0xff] %v1024_v55  ;;  %v565_v0 = vmax.f32 %v420_v56, 0.0  ;;  %v422_v1 = vadd.f32 %v421_v62, %v1225_v58  ;;  %831 = vst [vmem:[%s1239_s27 + $0x98] sm:$0xff] %v1040_v60  ;;  %v597_v4 = vmax.f32 %v500_v61, 0.0  ;;  %v502_v5 = vadd.f32 %v501_v2, %v1225_v58 }
  0xe9   : > { %v423_v6 = vpop.f32.mrf.mxu0  ;;  %v503_v9 = vpop.f32.mrf.mxu1 }
  0xea   : > { %v1025_v7 = vpack.c.bf16 %v565_v0, %v564_v63  ;;  %v424_v8 = vadd.f32 %v423_v6, %v1227_v59  ;;  %v1041_v10 = vpack.c.bf16 %v597_v4, %v596_v3  ;;  %v504_v11 = vadd.f32 %v503_v9, %v1227_v59 }
  0xeb   : > { %v427_v12 = vpop.f32.mrf.mxu0  ;;  %v566_v13 = vmax.f32 %v422_v1, 0.0  ;;  %v507_v16 = vpop.f32.mrf.mxu1  ;;  %v598_v17 = vmax.f32 %v502_v5, 0.0 }
  0xec   : > { %816 = vst [vmem:[%s1239_s27 + $0x20] sm:$0xff] %v1025_v7  ;;  %v567_v14 = vmax.f32 %v424_v8, 0.0  ;;  %v428_v15 = vadd.f32 %v427_v12, %v1225_v58  ;;  %832 = vst [vmem:[%s1239_s27 + $0xa0] sm:$0xff] %v1041_v10  ;;  %v599_v18 = vmax.f32 %v504_v11, 0.0  ;;  %v508_v19 = vadd.f32 %v507_v16, %v1225_v58 }
  0xed   : > { %v429_v20 = vpop.f32.mrf.mxu0  ;;  %v509_v23 = vpop.f32.mrf.mxu1 }
  0xee   : > { %v1026_v21 = vpack.c.bf16 %v567_v14, %v566_v13  ;;  %v430_v22 = vadd.f32 %v429_v20, %v1227_v59  ;;  %v1042_v24 = vpack.c.bf16 %v599_v18, %v598_v17  ;;  %v510_v25 = vadd.f32 %v509_v23, %v1227_v59 }
  0xef   : > { %v431_v26 = vpop.f32.mrf.mxu0  ;;  %v568_v27 = vmax.f32 %v428_v15, 0.0  ;;  %v511_v30 = vpop.f32.mrf.mxu1  ;;  %v600_v31 = vmax.f32 %v508_v19, 0.0 }
  0xf0   : > { %817 = vst [vmem:[%s1239_s27 + $0x28] sm:$0xff] %v1026_v21  ;;  %v569_v28 = vmax.f32 %v430_v22, 0.0  ;;  %v432_v29 = vadd.f32 %v431_v26, %v1225_v58  ;;  %833 = vst [vmem:[%s1239_s27 + $0xa8] sm:$0xff] %v1042_v24  ;;  %v601_v32 = vmax.f32 %v510_v25, 0.0  ;;  %v512_v33 = vadd.f32 %v511_v30, %v1225_v58 }
  0xf1   : > { %v433_v34 = vpop.f32.mrf.mxu0  ;;  %v513_v37 = vpop.f32.mrf.mxu1 }
  0xf2   : > { %v1027_v35 = vpack.c.bf16 %v569_v28, %v568_v27  ;;  %v434_v36 = vadd.f32 %v433_v34, %v1227_v59  ;;  %v1043_v38 = vpack.c.bf16 %v601_v32, %v600_v31  ;;  %v514_v39 = vadd.f32 %v513_v37, %v1227_v59 }
  0xf3   : > { %v437_v40 = vpop.f32.mrf.mxu0  ;;  %v570_v41 = vmax.f32 %v432_v29, 0.0  ;;  %v517_v44 = vpop.f32.mrf.mxu1  ;;  %v602_v45 = vmax.f32 %v512_v33, 0.0 }
  0xf4   : > { %818 = vst [vmem:[%s1239_s27 + $0x30] sm:$0xff] %v1027_v35  ;;  %v571_v42 = vmax.f32 %v434_v36, 0.0  ;;  %v438_v43 = vadd.f32 %v437_v40, %v1225_v58  ;;  %834 = vst [vmem:[%s1239_s27 + $0xb0] sm:$0xff] %v1043_v38  ;;  %v603_v46 = vmax.f32 %v514_v39, 0.0  ;;  %v518_v47 = vadd.f32 %v517_v44, %v1225_v58 }
  0xf5   : > { %v439_v48 = vpop.f32.mrf.mxu0  ;;  %v519_v51 = vpop.f32.mrf.mxu1 }
  0xf6   : > { %v1028_v49 = vpack.c.bf16 %v571_v42, %v570_v41  ;;  %v440_v50 = vadd.f32 %v439_v48, %v1227_v59  ;;  %v1044_v52 = vpack.c.bf16 %v603_v46, %v602_v45  ;;  %v520_v53 = vadd.f32 %v519_v51, %v1227_v59 }
  0xf7   : > { %v441_v54 = vpop.f32.mrf.mxu0  ;;  %v572_v55 = vmax.f32 %v438_v43, 0.0  ;;  %v521_v60 = vpop.f32.mrf.mxu1  ;;  %v604_v61 = vmax.f32 %v518_v47, 0.0 }
  0xf8   : > { %819 = vst [vmem:[%s1239_s27 + $0x38] sm:$0xff] %v1028_v49  ;;  %v573_v56 = vmax.f32 %v440_v50, 0.0  ;;  %v442_v57 = vadd.f32 %v441_v54, %v1225_v58  ;;  %835 = vst [vmem:[%s1239_s27 + $0xb8] sm:$0xff] %v1044_v52  ;;  %v605_v62 = vmax.f32 %v520_v53, 0.0  ;;  %v522_v63 = vadd.f32 %v521_v60, %v1225_v58 }
  0xf9   : > { %v443_v0 = vpop.f32.mrf.mxu0  ;;  %v523_v3 = vpop.f32.mrf.mxu1 }
  0xfa   : > { %v1029_v1 = vpack.c.bf16 %v573_v56, %v572_v55  ;;  %v444_v2 = vadd.f32 %v443_v0, %v1227_v59  ;;  %v1045_v4 = vpack.c.bf16 %v605_v62, %v604_v61  ;;  %v524_v5 = vadd.f32 %v523_v3, %v1227_v59 }
  0xfb   : > { %v447_v6 = vpop.f32.mrf.mxu0  ;;  %v574_v7 = vmax.f32 %v442_v57, 0.0  ;;  %v527_v10 = vpop.f32.mrf.mxu1  ;;  %v606_v11 = vmax.f32 %v522_v63, 0.0 }
  0xfc   : > { %820 = vst [vmem:[%s1239_s27 + $0x40] sm:$0xff] %v1029_v1  ;;  %v575_v8 = vmax.f32 %v444_v2, 0.0  ;;  %v448_v9 = vadd.f32 %v447_v6, %v1225_v58  ;;  %836 = vst [vmem:[%s1239_s27 + $0xc0] sm:$0xff] %v1045_v4  ;;  %v607_v12 = vmax.f32 %v524_v5, 0.0  ;;  %v528_v13 = vadd.f32 %v527_v10, %v1225_v58 }
  0xfd   : > { %v449_v14 = vpop.f32.mrf.mxu0  ;;  %v529_v17 = vpop.f32.mrf.mxu1 }
  0xfe   : > { %v1030_v15 = vpack.c.bf16 %v575_v8, %v574_v7  ;;  %v450_v16 = vadd.f32 %v449_v14, %v1227_v59  ;;  %v1046_v18 = vpack.c.bf16 %v607_v12, %v606_v11  ;;  %v530_v19 = vadd.f32 %v529_v17, %v1227_v59 }
  0xff   : > { %v451_v20 = vpop.f32.mrf.mxu0  ;;  %v576_v21 = vmax.f32 %v448_v9, 0.0  ;;  %v531_v24 = vpop.f32.mrf.mxu1  ;;  %v608_v25 = vmax.f32 %v528_v13, 0.0 }
 0x100   : > { %821 = vst [vmem:[%s1239_s27 + $0x48] sm:$0xff] %v1030_v15  ;;  %v577_v22 = vmax.f32 %v450_v16, 0.0  ;;  %v452_v23 = vadd.f32 %v451_v20, %v1225_v58  ;;  %837 = vst [vmem:[%s1239_s27 + $0xc8] sm:$0xff] %v1046_v18  ;;  %v609_v26 = vmax.f32 %v530_v19, 0.0  ;;  %v532_v27 = vadd.f32 %v531_v24, %v1225_v58 }
 0x101   : > { %v453_v28 = vpop.f32.mrf.mxu0  ;;  %v533_v31 = vpop.f32.mrf.mxu1 }
 0x102   : > { %v1031_v29 = vpack.c.bf16 %v577_v22, %v576_v21  ;;  %v454_v30 = vadd.f32 %v453_v28, %v1227_v59  ;;  %v1047_v32 = vpack.c.bf16 %v609_v26, %v608_v25  ;;  %v534_v33 = vadd.f32 %v533_v31, %v1227_v59 }
 0x103   : > { %v457_v34 = vpop.f32.mrf.mxu0  ;;  %v578_v35 = vmax.f32 %v452_v23, 0.0  ;;  %v537_v38 = vpop.f32.mrf.mxu1  ;;  %v610_v39 = vmax.f32 %v532_v27, 0.0 }
 0x104   : > { %822 = vst [vmem:[%s1239_s27 + $0x50] sm:$0xff] %v1031_v29  ;;  %v579_v36 = vmax.f32 %v454_v30, 0.0  ;;  %v458_v37 = vadd.f32 %v457_v34, %v1225_v58  ;;  %838 = vst [vmem:[%s1239_s27 + $0xd0] sm:$0xff] %v1047_v32  ;;  %v611_v40 = vmax.f32 %v534_v33, 0.0  ;;  %v538_v41 = vadd.f32 %v537_v38, %v1225_v58 }
 0x105   : > { %v459_v42 = vpop.f32.mrf.mxu0  ;;  %v539_v45 = vpop.f32.mrf.mxu1 }
 0x106   : > { %v1032_v43 = vpack.c.bf16 %v579_v36, %v578_v35  ;;  %v460_v44 = vadd.f32 %v459_v42, %v1227_v59  ;;  %v1048_v46 = vpack.c.bf16 %v611_v40, %v610_v39  ;;  %v540_v47 = vadd.f32 %v539_v45, %v1227_v59 }
 0x107   : > { %v461_v48 = vpop.f32.mrf.mxu0  ;;  %v580_v49 = vmax.f32 %v458_v37, 0.0  ;;  %v541_v52 = vpop.f32.mrf.mxu1  ;;  %v612_v53 = vmax.f32 %v538_v41, 0.0 }
 0x108   : > { %823 = vst [vmem:[%s1239_s27 + $0x58] sm:$0xff] %v1032_v43  ;;  %v581_v50 = vmax.f32 %v460_v44, 0.0  ;;  %v462_v51 = vadd.f32 %v461_v48, %v1225_v58  ;;  %839 = vst [vmem:[%s1239_s27 + $0xd8] sm:$0xff] %v1048_v46  ;;  %v613_v54 = vmax.f32 %v540_v47, 0.0  ;;  %v542_v55 = vadd.f32 %v541_v52, %v1225_v58 }
 0x109   : > { %v463_v56 = vpop.f32.mrf.mxu0  ;;  %v543_v61 = vpop.f32.mrf.mxu1 }
 0x10a   : > { %v1033_v57 = vpack.c.bf16 %v581_v50, %v580_v49  ;;  %v464_v60 = vadd.f32 %v463_v56, %v1227_v59  ;;  %v1049_v62 = vpack.c.bf16 %v613_v54, %v612_v53  ;;  %v544_v63 = vadd.f32 %v543_v61, %v1227_v59 }
 0x10b   : > { %v467_v0 = vpop.f32.mrf.mxu0  ;;  %v582_v1 = vmax.f32 %v462_v51, 0.0  ;;  %v547_v4 = vpop.f32.mrf.mxu1  ;;  %v614_v5 = vmax.f32 %v542_v55, 0.0 }
 0x10c   : > { %824 = vst [vmem:[%s1239_s27 + $0x60] sm:$0xff] %v1033_v57  ;;  %v583_v2 = vmax.f32 %v464_v60, 0.0  ;;  %v468_v3 = vadd.f32 %v467_v0, %v1225_v58  ;;  %840 = vst [vmem:[%s1239_s27 + $0xe0] sm:$0xff] %v1049_v62  ;;  %v615_v6 = vmax.f32 %v544_v63, 0.0  ;;  %v548_v7 = vadd.f32 %v547_v4, %v1225_v58 }
 0x10d   : > { %v469_v8 = vpop.f32.mrf.mxu0  ;;  %v549_v11 = vpop.f32.mrf.mxu1 }
 0x10e   : > { %v1034_v9 = vpack.c.bf16 %v583_v2, %v582_v1  ;;  %v470_v10 = vadd.f32 %v469_v8, %v1227_v59  ;;  %v1050_v12 = vpack.c.bf16 %v615_v6, %v614_v5  ;;  %v550_v13 = vadd.f32 %v549_v11, %v1227_v59 }
 0x10f   : > { %v471_v14 = vpop.f32.mrf.mxu0  ;;  %v584_v15 = vmax.f32 %v468_v3, 0.0  ;;  %v551_v18 = vpop.f32.mrf.mxu1  ;;  %v616_v19 = vmax.f32 %v548_v7, 0.0 }
 0x110   : > { %825 = vst [vmem:[%s1239_s27 + $0x68] sm:$0xff] %v1034_v9  ;;  %v585_v16 = vmax.f32 %v470_v10, 0.0  ;;  %v472_v17 = vadd.f32 %v471_v14, %v1225_v58  ;;  %841 = vst [vmem:[%s1239_s27 + $0xe8] sm:$0xff] %v1050_v12  ;;  %v617_v20 = vmax.f32 %v550_v13, 0.0  ;;  %v552_v21 = vadd.f32 %v551_v18, %v1225_v58 }
 0x111   : > { %v473_v22 = vpop.f32.mrf.mxu0  ;;  %v553_v25 = vpop.f32.mrf.mxu1 }
 0x112   : > { %v1035_v23 = vpack.c.bf16 %v585_v16, %v584_v15  ;;  %v474_v24 = vadd.f32 %v473_v22, %v1227_v59  ;;  %v1051_v26 = vpack.c.bf16 %v617_v20, %v616_v19  ;;  %v554_v27 = vadd.f32 %v553_v25, %v1227_v59 }
 0x113   : > { %v586_v28 = vmax.f32 %v472_v17, 0.0  ;;  %v618_v30 = vmax.f32 %v552_v21, 0.0 }
 0x114   : > { %826 = vst [vmem:[%s1239_s27 + $0x70] sm:$0xff] %v1035_v23  ;;  %v587_v29 = vmax.f32 %v474_v24, 0.0  ;;  %842 = vst [vmem:[%s1239_s27 + $0xf0] sm:$0xff] %v1051_v26  ;;  %v619_v31 = vmax.f32 %v554_v27, 0.0 }
 0x116   : > { %v1036_v32 = vpack.c.bf16 %v587_v29, %v586_v28  ;;  %v1052_v33 = vpack.c.bf16 %v619_v31, %v618_v30 }
 0x118   : > { %827 = vst [vmem:[%s1239_s27 + $0x78] sm:$0xff] %v1036_v32  ;;  %843 = vst [vmem:[%s1239_s27 + $0xf8] sm:$0xff] %v1052_v33 }
 0x119 PF: > { %s13_s14 = sadd.s32 1, %s1104_s14   ;;  %s1345_s12 = smov %s1100_s13 }
 0x11a   : > { %p10_p5 = scmp.ge.s32.totalorder %s13_s14, 4   ;;  %s1346_s13 = smov %s1348_s15 }
 0x11c   :  { %12 = sbr.rel (!%p10_p5) target bundleno = 2 (0x2), region = 68 }

// kernel: inception_forward.8
= control target key start
LH: loop header
LB: loop body
LE: loop exit
PB: predicated region body
PF: predicated region fallthrough
CT: control target
= control target key end

     0   :  { %s818_s6 = smov 0   ;;  %s1112_s0 = inlined_call_operand.vmem [shape: f32[2,16,16,8], index: 0, kind: input, shape index: {}]   ;;  %s1113_s1 = inlined_call_operand.vmem [shape: bf16[2,16,16,8], index: 1, kind: output, shape index: {}]  }
   0x1 LB: > { %s715_s7 = sadd.s32 4294967295, %s806_s6   ;;  %p719_p0 = scmp.ge.s32.totalorder %s806_s6, 1  ;;  %s806_s6 = sphi %s818_s6, %s11_s6  }
   0x2   : > { %p87_p1 = scmp.lt.s32.totalorder %s806_s6, 3 }
   0x4   : > { %p88_p2 = pnand %p719_p0, %p87_p1 }
   0x5   : > { %p107_p3 = scmp.lt.s32.totalorder (!%p88_p2), %s715_s7, 1 }
   0x6   : > { %91 = sbr.rel (%p88_p2) target bundleno = 93 (0x5d), region = 24 }
   0xb   : > { %s1115_s7 = smov (!%p107_p3, %s715_s7), 1  ;;  %vm241_vm0 = vcmask 1046528   ;;  %vm338_vm1 = vcmask 1040384   ;;  %vm627_vm2 = vcmask 60416  }
   0xc   : > { %s758_s8 = sshll.u32 %s1115_s7, 8  ;;  %s759_s12 = sshll.u32 %s1115_s7, 7 }
   0xd   : > { %s832_s11 = scalar_lea.vmem %s1112_s0, %s758_s8  ;;  %s874_s15 = scalar_lea.vmem %s1113_s1, %s759_s12 }
   0xe   : > { %v117_v0 = vld [vmem:[%s832_s11] sm:$0xff]  ;;  %v118_v1 = vld [vmem:[%s832_s11 + $0x8] sm:$0xff]  ;;  %v119_v2 = vld [vmem:[%s832_s11 + $0x10] sm:$0xff] }
   0xf   : > { %v120_v3 = vld [vmem:[%s832_s11 + $0x18] sm:$0xff]  ;;  %v149_v4 = vmax.f32 %v117_v0, %v119_v2  ;;  %v121_v5 = vld [vmem:[%s832_s11 + $0x20] sm:$0xff]  ;;  %v840_v6 = vld [vmem:[%s832_s11 + $0x28] sm:$0xff] }
  0x10   : > { %v150_v7 = vmax.f32 %v118_v1, %v120_v3  ;;  %v151_v8 = vmax.f32 %v119_v2, %v121_v5  ;;  %v152_v9 = vmax.f32 %v120_v3, %v840_v6  ;;  %v844_v10 = vld [vmem:[%s832_s11 + $0x30] sm:$0xff]  ;;  %v847_v11 = vld [vmem:[%s832_s11 + $0x38] sm:$0xff]  ;;  %v850_v12 = vld [vmem:[%s832_s11 + $0x40] sm:$0xff] }
  0x11   : > { %v179_v13 = vmax.f32 %v149_v4, %v117_v0  ;;  %v153_v14 = vmax.f32 %v121_v5, %v844_v10  ;;  %v154_v15 = vmax.f32 %v840_v6, %v847_v11  ;;  %v856_v16 = vld [vmem:[%s832_s11 + $0x48] sm:$0xff]  ;;  %v155_v17 = vmax.f32 %v844_v10, %v850_v12  ;;  %v880_v54 = vld [vmem:[%s832_s11 + $0x50] sm:$0xff]  ;;  %v883_v55 = vld [vmem:[%s832_s11 + $0x58] sm:$0xff] }
  0x12   : > { %v180_v18 = vmax.f32 %v150_v7, %v118_v1  ;;  %v181_v19 = vmax.f32 %v151_v8, %v117_v0  ;;  %v182_v20 = vmax.f32 %v152_v9, %v118_v1  ;;  %v156_v21 = vmax.f32 %v847_v11, %v856_v16  ;;  %v898_v4 = vld [vmem:[%s832_s11 + $0x60] sm:$0xff] }
  0x13   : > { %v242_v22 = vrot.slane %v179_v13, 1  ;;  %v339_v23 = vrot.slane %v179_v13, 7  ;;  %v183_v24 = vmax.f32 %v153_v14, %v119_v2  ;;  %v184_v25 = vmax.f32 %v154_v15, %v120_v3 }
  0x14   : > { %v243_v26 = vrot.slane %v180_v18, 1  ;;  %v340_v27 = vrot.slane %v180_v18, 7  ;;  %v245_v28 = vrot.slane %v181_v19, 1  ;;  %v246_v29 = vrot.slane %v182_v20, 1 }
  0x15   : > { %v419_v30 = vsel %vm338_vm1, %v179_v13, %v339_v23  ;;  %v342_v31 = vrot.slane %v181_v19, 7  ;;  %v343_v32 = vrot.slane %v182_v20, 7  ;;  %v248_v33 = vrot.slane %v183_v24, 1 }
  0x16   : > { %v244_v34 = vsel %vm241_vm0, %v242_v22, %v243_v26  ;;  %v322_v35 = vsel %vm241_vm0, %v243_v26, %v180_v18  ;;  %v341_v36 = vsel %vm338_vm1, %v339_v23, %v340_v27  ;;  %v247_v37 = vsel %vm241_vm0, %v245_v28, %v246_v29  ;;  %v911_v22 = vld [vmem:[%s832_s11 + $0x70] sm:$0xff] }
  0x17   : > { %v435_v38 = vmax.f32 %v179_v13, %v244_v34  ;;  %v436_v39 = vmax.f32 %v180_v18, %v322_v35  ;;  %v420_v40 = vsel %vm338_vm1, %v181_v19, %v342_v31  ;;  %v437_v41 = vmax.f32 %v181_v19, %v247_v37 }
  0x18   : > { %v323_v42 = vsel %vm241_vm0, %v246_v29, %v182_v20  ;;  %v344_v43 = vsel %vm338_vm1, %v342_v31, %v343_v32  ;;  %v249_v44 = vrot.slane %v184_v25, 1  ;;  %v345_v45 = vrot.slane %v183_v24, 7 }
  0x19   : > { %v467_v46 = vmax.f32 %v435_v38, %v419_v30  ;;  %v468_v47 = vmax.f32 %v436_v39, %v341_v36  ;;  %v469_v48 = vmax.f32 %v437_v41, %v420_v40  ;;  %v438_v49 = vmax.f32 %v182_v20, %v323_v42  ;;  %v906_v20 = vld [vmem:[%s832_s11 + $0x68] sm:$0xff]  ;;  %v934_v41 = vld [vmem:[%s832_s11 + $0x80] sm:$0xff] }
  0x1a   : > { %v250_v50 = vsel %vm241_vm0, %v248_v33, %v249_v44  ;;  %v421_v51 = vsel %vm338_vm1, %v183_v24, %v345_v45  ;;  %v324_v52 = vsel %vm241_vm0, %v249_v44, %v184_v25  ;;  %v346_v53 = vrot.slane %v184_v25, 7 }
  0x1b   : > { %v760_v56 = vpack.c.bf16 %v467_v46, %v467_v46  ;;  %v761_v57 = vpack.c.bf16 %v468_v47, %v468_v47  ;;  %v762_v58 = vpack.c.bf16 %v469_v48, %v469_v48  ;;  %v470_v59 = vmax.f32 %v438_v49, %v344_v43 }
  0x1c   : > { %v439_v60 = vmax.f32 %v183_v24, %v250_v50  ;;  %v347_v61 = vsel %vm338_vm1, %v345_v45, %v346_v53  ;;  %v440_v62 = vmax.f32 %v184_v25, %v324_v52  ;;  %v185_v63 = vmax.f32 %v155_v17, %v121_v5  ;;  %v944_v52 = vld [vmem:[%s832_s11 + $0x88] sm:$0xff] }
  0x1d   : > { %628 = vst.msk [vmem:[%s874_s15] sm:$0xf] %vm627_vm2, %v760_v56  ;;  %629 = vst.msk [vmem:[%s874_s15 + $0x4] sm:$0xf] %vm627_vm2, %v761_v57  ;;  %v763_v0 = vpack.c.bf16 %v470_v59, %v470_v59  ;;  %v186_v1 = vmax.f32 %v156_v21, %v840_v6  ;;  %v157_v2 = vmax.f32 %v850_v12, %v880_v54 }
  0x1e   : > { %630 = vst.msk [vmem:[%s874_s15 + $0x8] sm:$0xf] %vm627_vm2, %v762_v58  ;;  %v158_v3 = vmax.f32 %v856_v16, %v883_v55  ;;  %v471_v5 = vmax.f32 %v439_v60, %v421_v51  ;;  %v472_v7 = vmax.f32 %v440_v62, %v347_v61  ;;  %v251_v8 = vrot.slane %v185_v63, 1  ;;  %v952_v60 = vld [vmem:[%s832_s11 + $0x90] sm:$0xff] }
  0x1f   : > { %v348_v9 = vrot.slane %v185_v63, 7  ;;  %631 = vst.msk [vmem:[%s874_s15 + $0xc] sm:$0xf] %vm627_vm2, %v763_v0  ;;  %v252_v13 = vrot.slane %v186_v1, 1  ;;  %v349_v6 = vrot.slane %v186_v1, 7  ;;  %v187_v14 = vmax.f32 %v157_v2, %v844_v10 }
  0x20   : > { %v188_v15 = vmax.f32 %v158_v3, %v847_v11  ;;  %v764_v17 = vpack.c.bf16 %v471_v5, %v471_v5  ;;  %v765_v18 = vpack.c.bf16 %v472_v7, %v472_v7  ;;  %v159_v21 = vmax.f32 %v880_v54, %v898_v4 }
  0x21   : > { %v422_v19 = vsel %vm338_vm1, %v185_v63, %v348_v9  ;;  %v253_v23 = vsel %vm241_vm0, %v251_v8, %v252_v13  ;;  %v325_v24 = vsel %vm241_vm0, %v252_v13, %v186_v1  ;;  %v350_v25 = vsel %vm338_vm1, %v348_v9, %v349_v6 }
  0x22   : > { %v254_v10 = vrot.slane %v187_v14, 1  ;;  %632 = vst.msk [vmem:[%s874_s15 + $0x10] sm:$0xf] %vm627_vm2, %v764_v17  ;;  %633 = vst.msk [vmem:[%s874_s15 + $0x14] sm:$0xf] %vm627_vm2, %v765_v18  ;;  %v441_v11 = vmax.f32 %v185_v63, %v253_v23  ;;  %v442_v26 = vmax.f32 %v186_v1, %v325_v24  ;;  %v255_v27 = vrot.slane %v188_v15, 1 }
  0x23   : > { %v351_v28 = vrot.slane %v187_v14, 7  ;;  %v352_v29 = vrot.slane %v188_v15, 7  ;;  %v160_v30 = vmax.f32 %v883_v55, %v906_v20  ;;  %v189_v31 = vmax.f32 %v159_v21, %v850_v12  ;;  %v931_v12 = vld [vmem:[%s832_s11 + $0x78] sm:$0xff] }
  0x24   : > { %v161_v32 = vmax.f32 %v898_v4, %v911_v22  ;;  %v473_v33 = vmax.f32 %v441_v11, %v422_v19  ;;  %v474_v34 = vmax.f32 %v442_v26, %v350_v25  ;;  %v256_v35 = vsel %vm241_vm0, %v254_v10, %v255_v27  ;;  %v136_v21 = vld [vmem:[%s832_s11 + $0x98] sm:$0xff] }
  0x25   : > { %v423_v36 = vsel %vm338_vm1, %v187_v14, %v351_v28  ;;  %v443_v37 = vmax.f32 %v187_v14, %v256_v35  ;;  %v326_v38 = vsel %vm241_vm0, %v255_v27, %v188_v15  ;;  %v353_v39 = vsel %vm338_vm1, %v351_v28, %v352_v29 }
  0x26   : > { %v190_v40 = vmax.f32 %v160_v30, %v856_v16  ;;  %v766_v42 = vpack.c.bf16 %v473_v33, %v473_v33  ;;  %v767_v43 = vpack.c.bf16 %v474_v34, %v474_v34  ;;  %v444_v44 = vmax.f32 %v188_v15, %v326_v38 }
  0x27   : > { %v257_v45 = vrot.slane %v189_v31, 1  ;;  %v475_v46 = vmax.f32 %v443_v37, %v423_v36  ;;  %v354_v48 = vrot.slane %v189_v31, 7  ;;  %v162_v50 = vmax.f32 %v906_v20, %v931_v12 }
  0x28   : > { %v258_v47 = vrot.slane %v190_v40, 1  ;;  %v355_v49 = vrot.slane %v190_v40, 7  ;;  %634 = vst.msk [vmem:[%s874_s15 + $0x18] sm:$0xf] %vm627_vm2, %v766_v42  ;;  %635 = vst.msk [vmem:[%s874_s15 + $0x1c] sm:$0xf] %vm627_vm2, %v767_v43  ;;  %v476_v16 = vmax.f32 %v444_v44, %v353_v39  ;;  %v191_v51 = vmax.f32 %v161_v32, %v880_v54 }
  0x29   : > { %v163_v53 = vmax.f32 %v911_v22, %v934_v41  ;;  %v768_v56 = vpack.c.bf16 %v475_v46, %v475_v46  ;;  %v424_v58 = vsel %vm338_vm1, %v189_v31, %v354_v48  ;;  %v192_v0 = vmax.f32 %v162_v50, %v883_v55  ;;  %v987_v42 = vld [vmem:[%s832_s11 + $0xb0] sm:$0xff] }
  0x2a   : > { %v259_v57 = vsel %vm241_vm0, %v257_v45, %v258_v47  ;;  %v327_v59 = vsel %vm241_vm0, %v258_v47, %v190_v40  ;;  %v769_v61 = vpack.c.bf16 %v476_v16, %v476_v16  ;;  %v356_v63 = vsel %vm338_vm1, %v354_v48, %v355_v49 }
  0x2b   : > { %v445_v62 = vmax.f32 %v189_v31, %v259_v57  ;;  %v446_v54 = vmax.f32 %v190_v40, %v327_v59  ;;  %636 = vst.msk [vmem:[%s874_s15 + $0x20] sm:$0xf] %vm627_vm2, %v768_v56  ;;  %v260_v1 = vrot.slane %v191_v51, 1  ;;  %v357_v2 = vrot.slane %v191_v51, 7  ;;  %v981_v31 = vld [vmem:[%s832_s11 + $0xa0] sm:$0xff]  ;;  %v138_v40 = vld [vmem:[%s832_s11 + $0xa8] sm:$0xff] }
  0x2c   : > { %v164_v3 = vmax.f32 %v931_v12, %v944_v52  ;;  %637 = vst.msk [vmem:[%s874_s15 + $0x24] sm:$0xf] %vm627_vm2, %v769_v61  ;;  %v193_v8 = vmax.f32 %v163_v53, %v898_v4  ;;  %v165_v9 = vmax.f32 %v934_v41, %v952_v60  ;;  %v261_v13 = vrot.slane %v192_v0, 1  ;;  %v1003_v56 = vld [vmem:[%s832_s11 + $0xc0] sm:$0xff] }
  0x2d   : > { %v477_v5 = vmax.f32 %v445_v62, %v424_v58  ;;  %v478_v7 = vmax.f32 %v446_v54, %v356_v63  ;;  %v425_v55 = vsel %vm338_vm1, %v191_v51, %v357_v2  ;;  %v358_v6 = vrot.slane %v192_v0, 7 }
  0x2e   : > { %v194_v14 = vmax.f32 %v164_v3, %v906_v20  ;;  %v263_v18 = vrot.slane %v193_v8, 1  ;;  %v360_v19 = vrot.slane %v193_v8, 7  ;;  %v262_v23 = vsel %vm241_vm0, %v260_v1, %v261_v13 }
  0x2f   : > { %v770_v15 = vpack.c.bf16 %v477_v5, %v477_v5  ;;  %v771_v17 = vpack.c.bf16 %v478_v7, %v478_v7  ;;  %v328_v4 = vsel %vm241_vm0, %v261_v13, %v192_v0  ;;  %v359_v24 = vsel %vm338_vm1, %v357_v2, %v358_v6 }
  0x30   : > { %v264_v25 = vrot.slane %v194_v14, 1  ;;  %v447_v10 = vmax.f32 %v191_v51, %v262_v23  ;;  %v448_v11 = vmax.f32 %v192_v0, %v328_v4  ;;  %v426_v20 = vsel %vm338_vm1, %v193_v8, %v360_v19  ;;  %v998_v51 = vld [vmem:[%s832_s11 + $0xb8] sm:$0xff] }
  0x31   : > { %638 = vst.msk [vmem:[%s874_s15 + $0x28] sm:$0xf] %vm627_vm2, %v770_v15  ;;  %639 = vst.msk [vmem:[%s874_s15 + $0x2c] sm:$0xf] %vm627_vm2, %v771_v17  ;;  %v361_v26 = vrot.slane %v194_v14, 7  ;;  %v166_v29 = vmax.f32 %v944_v52, %v136_v21  ;;  %v195_v30 = vmax.f32 %v165_v9, %v911_v22  ;;  %v167_v45 = vmax.f32 %v952_v60, %v981_v31 }
  0x32   : > { %v265_v27 = vsel %vm241_vm0, %v263_v18, %v264_v25  ;;  %v329_v28 = vsel %vm241_vm0, %v264_v25, %v194_v14  ;;  %v479_v32 = vmax.f32 %v447_v10, %v425_v55  ;;  %v480_v33 = vmax.f32 %v448_v11, %v359_v24 }
  0x33   : > { %v449_v34 = vmax.f32 %v193_v8, %v265_v27  ;;  %v362_v35 = vsel %vm338_vm1, %v360_v19, %v361_v26  ;;  %v450_v36 = vmax.f32 %v194_v14, %v329_v28  ;;  %v196_v37 = vmax.f32 %v166_v29, %v931_v12  ;;  %v1019_v14 = vld [vmem:[%s832_s11 + $0xc8] sm:$0xff] }
  0x34   : > { %v266_v38 = vrot.slane %v195_v30, 1  ;;  %v363_v39 = vrot.slane %v195_v30, 7  ;;  %v772_v22 = vpack.c.bf16 %v479_v32, %v479_v32  ;;  %v773_v43 = vpack.c.bf16 %v480_v33, %v480_v33 }
  0x35   : > { %v481_v44 = vmax.f32 %v449_v34, %v426_v20  ;;  %v482_v46 = vmax.f32 %v450_v36, %v362_v35  ;;  %v267_v47 = vrot.slane %v196_v37, 1  ;;  %v364_v49 = vrot.slane %v196_v37, 7  ;;  %v143_v34 = vld [vmem:[%s832_s11 + $0xd0] sm:$0xff]  ;;  %v144_v35 = vld [vmem:[%s832_s11 + $0xd8] sm:$0xff]  ;;  %v145_v36 = vld [vmem:[%s832_s11 + $0xe0] sm:$0xff] }
  0x36   : > { %v427_v48 = vsel %vm338_vm1, %v195_v30, %v363_v39  ;;  %640 = vst.msk [vmem:[%s874_s15 + $0x30] sm:$0xf] %vm627_vm2, %v772_v22  ;;  %641 = vst.msk [vmem:[%s874_s15 + $0x34] sm:$0xf] %vm627_vm2, %v773_v43  ;;  %v168_v16 = vmax.f32 %v136_v21, %v138_v40  ;;  %v197_v50 = vmax.f32 %v167_v45, %v934_v41 }
  0x37   : > { %v774_v12 = vpack.c.bf16 %v481_v44, %v481_v44  ;;  %v169_v53 = vmax.f32 %v981_v31, %v987_v42  ;;  %v775_v57 = vpack.c.bf16 %v482_v46, %v482_v46  ;;  %v268_v58 = vsel %vm241_vm0, %v266_v38, %v267_v47 }
  0x38   : > { %v330_v59 = vsel %vm241_vm0, %v267_v47, %v196_v37  ;;  %v365_v61 = vsel %vm338_vm1, %v363_v39, %v364_v49  ;;  %v451_v62 = vmax.f32 %v195_v30, %v268_v58  ;;  %v198_v41 = vmax.f32 %v168_v16, %v944_v52  ;;  %v147_v49 = vld [vmem:[%s832_s11 + $0xf0] sm:$0xff] }
  0x39   : > { %642 = vst.msk [vmem:[%s874_s15 + $0x38] sm:$0xf] %vm627_vm2, %v774_v12  ;;  %v452_v63 = vmax.f32 %v196_v37, %v330_v59  ;;  %v269_v54 = vrot.slane %v197_v50, 1  ;;  %643 = vst.msk [vmem:[%s874_s15 + $0x3c] sm:$0xf] %vm627_vm2, %v775_v57  ;;  %v366_v0 = vrot.slane %v197_v50, 7  ;;  %v170_v1 = vmax.f32 %v138_v40, %v998_v51 }
  0x3a   : > { %v199_v2 = vmax.f32 %v169_v53, %v952_v60  ;;  %v171_v3 = vmax.f32 %v987_v42, %v1003_v56  ;;  %v483_v5 = vmax.f32 %v451_v62, %v427_v48  ;;  %v270_v8 = vrot.slane %v198_v41, 1  ;;  %v146_v48 = vld [vmem:[%s832_s11 + $0xe8] sm:$0xff]  ;;  %v148_v12 = vld [vmem:[%s832_s11 + $0xf8] sm:$0xff] }
  0x3b   : > { %v484_v7 = vmax.f32 %v452_v63, %v365_v61  ;;  %v367_v9 = vrot.slane %v198_v41, 7  ;;  %v428_v13 = vsel %vm338_vm1, %v197_v50, %v366_v0  ;;  %v200_v52 = vmax.f32 %v170_v1, %v136_v21 }
  0x3c   : > { %v272_v55 = vrot.slane %v199_v2, 1  ;;  %v369_v6 = vrot.slane %v199_v2, 7  ;;  %v776_v15 = vpack.c.bf16 %v483_v5, %v483_v5  ;;  %v271_v60 = vsel %vm241_vm0, %v269_v54, %v270_v8 }
  0x3d   : > { %v777_v17 = vpack.c.bf16 %v484_v7, %v484_v7  ;;  %v331_v18 = vsel %vm241_vm0, %v270_v8, %v198_v41  ;;  %v453_v19 = vmax.f32 %v197_v50, %v271_v60  ;;  %v368_v23 = vsel %vm338_vm1, %v366_v0, %v367_v9 }
  0x3e   : > { %v454_v4 = vmax.f32 %v198_v41, %v331_v18  ;;  %v273_v24 = vrot.slane %v200_v52, 1  ;;  %644 = vst.msk [vmem:[%s874_s15 + $0x40] sm:$0xf] %vm627_vm2, %v776_v15  ;;  %v429_v21 = vsel %vm338_vm1, %v199_v2, %v369_v6  ;;  %v370_v25 = vrot.slane %v200_v52, 7 }
  0x3f   : > { %645 = vst.msk [vmem:[%s874_s15 + $0x44] sm:$0xf] %vm627_vm2, %v777_v17  ;;  %v172_v10 = vmax.f32 %v998_v51, %v1019_v14  ;;  %v201_v11 = vmax.f32 %v171_v3, %v981_v31  ;;  %v485_v20 = vmax.f32 %v453_v19, %v428_v13  ;;  %v173_v46 = vmax.f32 %v1003_v56, %v143_v34 }
  0x40   : > { %v486_v26 = vmax.f32 %v454_v4, %v368_v23  ;;  %v274_v27 = vsel %vm241_vm0, %v272_v55, %v273_v24  ;;  %v332_v28 = vsel %vm241_vm0, %v273_v24, %v200_v52  ;;  %v371_v30 = vsel %vm338_vm1, %v369_v6, %v370_v25 }
  0x41   : > { %v455_v29 = vmax.f32 %v199_v2, %v274_v27  ;;  %v456_v32 = vmax.f32 %v200_v52, %v332_v28  ;;  %v202_v33 = vmax.f32 %v172_v10, %v138_v40  ;;  %v778_v31 = vpack.c.bf16 %v485_v20, %v485_v20 }
  0x42   : > { %v779_v37 = vpack.c.bf16 %v486_v26, %v486_v26  ;;  %v275_v38 = vrot.slane %v201_v11, 1  ;;  %v372_v39 = vrot.slane %v201_v11, 7  ;;  %v174_v47 = vmax.f32 %v1019_v14, %v144_v35 }
  0x43   : > { %v487_v22 = vmax.f32 %v455_v29, %v429_v21  ;;  %v488_v43 = vmax.f32 %v456_v32, %v371_v30  ;;  %v276_v44 = vrot.slane %v202_v33, 1  ;;  %v373_v45 = vrot.slane %v202_v33, 7  ;;  %646 = vst.msk [vmem:[%s874_s15 + $0x48] sm:$0xf] %vm627_vm2, %v778_v31 }
  0x44   : > { %647 = vst.msk [vmem:[%s874_s15 + $0x4c] sm:$0xf] %vm627_vm2, %v779_v37  ;;  %v430_v40 = vsel %vm338_vm1, %v201_v11, %v372_v39  ;;  %v175_v16 = vmax.f32 %v143_v34, %v145_v36  ;;  %v203_v63 = vmax.f32 %v173_v46, %v987_v42  ;;  %v204_v41 = vmax.f32 %v174_v47, %v998_v51 }
  0x45   : > { %v780_v50 = vpack.c.bf16 %v487_v22, %v487_v22  ;;  %v781_v53 = vpack.c.bf16 %v488_v43, %v488_v43  ;;  %v277_v57 = vsel %vm241_vm0, %v275_v38, %v276_v44  ;;  %v333_v58 = vsel %vm241_vm0, %v276_v44, %v202_v33 }
  0x46   : > { %v457_v59 = vmax.f32 %v201_v11, %v277_v57  ;;  %v374_v61 = vsel %vm338_vm1, %v372_v39, %v373_v45  ;;  %v458_v62 = vmax.f32 %v202_v33, %v333_v58  ;;  %v176_v54 = vmax.f32 %v144_v35, %v146_v48 }
  0x47   : > { %648 = vst.msk [vmem:[%s874_s15 + $0x50] sm:$0xf] %vm627_vm2, %v780_v50  ;;  %649 = vst.msk [vmem:[%s874_s15 + $0x54] sm:$0xf] %vm627_vm2, %v781_v53  ;;  %v1057_v0 = vmax.f32 %v145_v36, %v147_v49  ;;  %v1059_v1 = vmax.f32 %v146_v48, %v148_v12  ;;  %v278_v5 = vrot.slane %v203_v63, 1  ;;  %v375_v7 = vrot.slane %v203_v63, 7 }
  0x48   : > { %v489_v2 = vmax.f32 %v457_v59, %v430_v40  ;;  %v490_v3 = vmax.f32 %v458_v62, %v374_v61  ;;  %v279_v8 = vrot.slane %v204_v41, 1  ;;  %v376_v9 = vrot.slane %v204_v41, 7 }
  0x49   : > { %v205_v42 = vmax.f32 %v175_v16, %v1003_v56  ;;  %v206_v13 = vmax.f32 %v176_v54, %v1019_v14  ;;  %v431_v51 = vsel %vm338_vm1, %v203_v63, %v375_v7  ;;  %v207_v6 = vmax.f32 %v1057_v0, %v143_v34 }
  0x4a   : > { %v782_v52 = vpack.c.bf16 %v489_v2, %v489_v2  ;;  %v783_v55 = vpack.c.bf16 %v490_v3, %v490_v3  ;;  %v280_v15 = vsel %vm241_vm0, %v278_v5, %v279_v8  ;;  %v334_v17 = vsel %vm241_vm0, %v279_v8, %v204_v41 }
  0x4b   : > { %v377_v60 = vsel %vm338_vm1, %v375_v7, %v376_v9  ;;  %v281_v18 = vrot.slane %v205_v42, 1  ;;  %v459_v56 = vmax.f32 %v203_v63, %v280_v15  ;;  %v460_v19 = vmax.f32 %v204_v41, %v334_v17 }
  0x4c   : > { %650 = vst.msk [vmem:[%s874_s15 + $0x58] sm:$0xf] %vm627_vm2, %v782_v52  ;;  %651 = vst.msk [vmem:[%s874_s15 + $0x5c] sm:$0xf] %vm627_vm2, %v783_v55  ;;  %v282_v14 = vrot.slane %v206_v13, 1  ;;  %v378_v23 = vrot.slane %v205_v42, 7  ;;  %v208_v24 = vmax.f32 %v1059_v1, %v144_v35 }
  0x4d   : > { %v379_v4 = vrot.slane %v206_v13, 7  ;;  %v284_v21 = vrot.slane %v207_v6, 1  ;;  %v381_v25 = vrot.slane %v207_v6, 7  ;;  %v491_v10 = vmax.f32 %v459_v56, %v431_v51 }
  0x4e   : > { %v492_v11 = vmax.f32 %v460_v19, %v377_v60  ;;  %v283_v20 = vsel %vm241_vm0, %v281_v18, %v282_v14  ;;  %v432_v26 = vsel %vm338_vm1, %v205_v42, %v378_v23  ;;  %v335_v28 = vsel %vm241_vm0, %v282_v14, %v206_v13 }
  0x4f   : > { %v461_v27 = vmax.f32 %v205_v42, %v283_v20  ;;  %v380_v29 = vsel %vm338_vm1, %v378_v23, %v379_v4  ;;  %v285_v30 = vrot.slane %v208_v24, 1  ;;  %v784_v32 = vpack.c.bf16 %v491_v10, %v491_v10 }
  0x50   : > { %v785_v33 = vpack.c.bf16 %v492_v11, %v492_v11  ;;  %v462_v34 = vmax.f32 %v206_v13, %v335_v28  ;;  %v433_v35 = vsel %vm338_vm1, %v207_v6, %v381_v25  ;;  %v382_v38 = vrot.slane %v208_v24, 7 }
  0x51   : > { %v493_v36 = vmax.f32 %v461_v27, %v432_v26  ;;  %v286_v31 = vsel %vm241_vm0, %v284_v21, %v285_v30  ;;  %v336_v37 = vsel %vm241_vm0, %v285_v30, %v208_v24  ;;  %652 = vst.msk [vmem:[%s874_s15 + $0x60] sm:$0xf] %vm627_vm2, %v784_v32  ;;  %v287_v44 = vrot.slane %v1057_v0, 1 }
  0x52   : > { %653 = vst.msk [vmem:[%s874_s15 + $0x64] sm:$0xf] %vm627_vm2, %v785_v33  ;;  %v494_v39 = vmax.f32 %v462_v34, %v380_v29  ;;  %v463_v22 = vmax.f32 %v207_v6, %v286_v31  ;;  %v464_v43 = vmax.f32 %v208_v24, %v336_v37  ;;  %v383_v40 = vsel %vm338_vm1, %v381_v25, %v382_v38 }
  0x53   : > { %v786_v45 = vpack.c.bf16 %v493_v36, %v493_v36  ;;  %v288_v46 = vrot.slane %v1059_v1, 1  ;;  %v384_v47 = vrot.slane %v1057_v0, 7  ;;  %v385_v16 = vrot.slane %v1059_v1, 7 }
  0x54   : > { %v787_v48 = vpack.c.bf16 %v494_v39, %v494_v39  ;;  %v495_v49 = vmax.f32 %v463_v22, %v433_v35  ;;  %v496_v12 = vmax.f32 %v464_v43, %v383_v40 }
  0x55   : > { %654 = vst.msk [vmem:[%s874_s15 + $0x68] sm:$0xf] %vm627_vm2, %v786_v45  ;;  %v289_v50 = vsel %vm241_vm0, %v287_v44, %v288_v46  ;;  %v434_v53 = vsel %vm338_vm1, %v1057_v0, %v384_v47  ;;  %v337_v57 = vsel %vm241_vm0, %v288_v46, %v1059_v1  ;;  %v386_v62 = vsel %vm338_vm1, %v384_v47, %v385_v16 }
  0x56   : > { %655 = vst.msk [vmem:[%s874_s15 + $0x6c] sm:$0xf] %vm627_vm2, %v787_v48  ;;  %v788_v58 = vpack.c.bf16 %v495_v49, %v495_v49  ;;  %v789_v59 = vpack.c.bf16 %v496_v12, %v496_v12  ;;  %v465_v61 = vmax.f32 %v1057_v0, %v289_v50  ;;  %v466_v63 = vmax.f32 %v1059_v1, %v337_v57 }
  0x58   : > { %656 = vst.msk [vmem:[%s874_s15 + $0x70] sm:$0xf] %vm627_vm2, %v788_v58  ;;  %657 = vst.msk [vmem:[%s874_s15 + $0x74] sm:$0xf] %vm627_vm2, %v789_v59  ;;  %v497_v41 = vmax.f32 %v465_v61, %v434_v53  ;;  %v498_v54 = vmax.f32 %v466_v63, %v386_v62 }
  0x5a   : > { %v790_v2 = vpack.c.bf16 %v497_v41, %v497_v41  ;;  %v791_v3 = vpack.c.bf16 %v498_v54, %v498_v54 }
  0x5c   : > { %658 = vst.msk [vmem:[%s874_s15 + $0x78] sm:$0xf] %vm627_vm2, %v790_v2  ;;  %659 = vst.msk [vmem:[%s874_s15 + $0x7c] sm:$0xf] %vm627_vm2, %v791_v3 }
  0x5d PF: > { %s11_s6 = sadd.s32 1, %s806_s6  }
  0x5e   : > { %p8_p4 = scmp.ge.s32.totalorder %s11_s6, 4  }
  0x60   :  { %10 = sbr.rel (!%p8_p4) target bundleno = 1 (0x1), region = 54 }

// kernel: inception_forward.9
= control target key start
LH: loop header
LB: loop body
LE: loop exit
PB: predicated region body
PF: predicated region fallthrough
CT: control target
= control target key end

     0   :  { %s999_s12 = smov 0   ;;  %s1001_s13 = smov 0   ;;  %s1210_s0 = inlined_call_operand.vmem [shape: bf16[512,8], index: 0, kind: input, shape index: {}]   ;;  %s1211_s1 = inlined_call_operand.vmem [shape: bf16[8,256], index: 1, kind: input, shape index: {}]   ;;  %s1212_s2 = inlined_call_operand.vmem [shape: f32[1,256], index: 2, kind: input, shape index: {}]   ;;  %s1213_s3 = inlined_call_operand.vmem [shape: f32[512,256], index: 3, kind: output, shape index: {}]  }
   0x1   :  { %s1003_s14 = smov 0  }
   0x2 LB: > { %s25_s15 = sadd.s32 1, %s972_s13  ;;  %p865_p0 = scmp.ge.s32.totalorder %s976_s14, 1  ;;  %s976_s14 = sphi %s1003_s14, %s13_s14   ;;  %s972_s13 = sphi %s1001_s13, %s1215_s13   ;;  %s968_s12 = sphi %s999_s12, %s1214_s12  }
   0x3   : > { %p27_p1 = scmp.ge.s32.totalorder %s25_s15, 2  ;;  %p173_p2 = scmp.lt.s32.totalorder %s976_s14, 3 }
   0x5   : > { %s1217_s15 = smov (%p27_p1, %s25_s15), 0  ;;  %p174_p3 = pnand %p865_p0, %p173_p2 }
   0x6   : > { %s866_s18 = sshll.u32 (!%p174_p3), %s968_s12, 5 }
   0x7   : > { %177 = sbr.rel (%p174_p3) target bundleno = 279 (0x117), region = 32  ;;  %p212_p4 = scmp.lt.s32.totalorder (!%p174_p3), %s866_s18, 63 }
   0xc   : > { %v273_v0 = vld [vmem:[%s1211_s1] sm:$0xff]  ;;  %vm420_vm0 = vcmask 1043456   ;;  %v978_v3 = vmov 0   ;;  %s1219_s18 = smov (!%p212_p4, %s866_s18), 63  ;;  %vm371_vm1 = vcmask 64512   ;;  %v276_v21 = vlaneseq }
   0xd   : > { %v888_v1 = vcombine.high %v273_v0, %v273_v0  ;;  %v887_v2 = vcombine.low %v273_v0, %v273_v0  ;;  %459 = vmatprep.mubr.bf16.mxu0 %v978_v3  ;;  %539 = vmatprep.mubr.bf16.mxu1 %v978_v3  ;;  %s867_s19 = sshll.u32 %s1219_s18, 2  ;;  %v274_v24 = vld [vmem:[%s1212_s2] sm:$0x3]  ;;  %s908_s25 = sshll.u32 %s1219_s18, 4 }
   0xe   : > { %s1026_s22 = scalar_lea.vmem %s1210_s0, %s867_s19  ;;  %v277_v22 = vshrl.u32 %v276_v21, 7  ;;  %s1072_s28 = scalar_lea.vmem %s1213_s3, %s908_s25 }
   0xf   : > { %889 = vmatprep.subr.msk.bf16.mxu0 %vm420_vm0, %v888_v1  ;;  %909 = vmatprep.subr.msk.bf16.mxu1 %vm420_vm0, %v888_v1  ;;  %v422_v4 = vsel %vm420_vm0, %v887_v2, 0  ;;  %v938_v5 = vld [vmem:[%s1026_s22] sm:$0xff]   ;;  %v940_v7 = vld [vmem:[%s1026_s22 + $0x8] sm:$0xff]   ;;  %v942_v9 = vld [vmem:[%s1026_s22 + $0x10] sm:$0xff]  }
  0x10   : > { %442 = vmatpush1.bf16.msra.mxu0 %v422_v4  ;;  %910 = vmatpush1.bf16.msra.mxu1 %v422_v4  ;;  %v939_v6 = vld [vmem:[%s1026_s22 + $0x40] sm:$0xff]   ;;  %v941_v8 = vld [vmem:[%s1026_s22 + $0x48] sm:$0xff]   ;;  %v943_v10 = vld [vmem:[%s1026_s22 + $0x50] sm:$0xff]   ;;  %v278_v23 = vsub.s32 0, %v277_v22  ;;  %v282_v25 = vsub.s32 1, %v277_v22 }
  0x11   : > { %v944_v11 = vld [vmem:[%s1026_s22 + $0x18] sm:$0xff]   ;;  %v946_v13 = vld [vmem:[%s1026_s22 + $0x20] sm:$0xff]   ;;  %v948_v15 = vld [vmem:[%s1026_s22 + $0x28] sm:$0xff]  }
  0x12   : > { %v945_v12 = vld [vmem:[%s1026_s22 + $0x58] sm:$0xff]   ;;  %v947_v14 = vld [vmem:[%s1026_s22 + $0x60] sm:$0xff]   ;;  %v949_v16 = vld [vmem:[%s1026_s22 + $0x68] sm:$0xff]   ;;  %v1063_v26 = vrot.slane %v274_v24, %v278_v23  ;;  %v1066_v27 = vrot.slane %v274_v24, %v282_v25 }
  0x13   : > { %890 = vmatmul.mubr.msk.bf16.vlgmr.msra.gmra.mxu0 %vm371_vm1, %v938_v5  ;;  %898 = vmatmul.mubr.msk.bf16.vlgmr.msra.gmra.mxu1 %vm371_vm1, %v939_v6  ;;  %v950_v17 = vld [vmem:[%s1026_s22 + $0x30] sm:$0xff]   ;;  %v952_v19 = vld [vmem:[%s1026_s22 + $0x38] sm:$0xff]  }
  0x14   : > { %469 = vmatprep.mubr.bf16.mxu0 %v978_v3  ;;  %549 = vmatprep.mubr.bf16.mxu1 %v978_v3  ;;  %v951_v18 = vld [vmem:[%s1026_s22 + $0x70] sm:$0xff]   ;;  %v953_v20 = vld [vmem:[%s1026_s22 + $0x78] sm:$0xff]  }
  0x1b   : > { %891 = vmatmul.mubr.msk.bf16.gmra.mxu0 %vm371_vm1, %v940_v7  ;;  %899 = vmatmul.mubr.msk.bf16.gmra.mxu1 %vm371_vm1, %v941_v8 }
  0x1c   : > { %479 = vmatprep.mubr.bf16.mxu0 %v978_v3  ;;  %559 = vmatprep.mubr.bf16.mxu1 %v978_v3 }
  0x23   : > { %892 = vmatmul.mubr.msk.bf16.gmra.mxu0 %vm371_vm1, %v942_v9  ;;  %900 = vmatmul.mubr.msk.bf16.gmra.mxu1 %vm371_vm1, %v943_v10 }
  0x24   : > { %489 = vmatprep.mubr.bf16.mxu0 %v978_v3  ;;  %569 = vmatprep.mubr.bf16.mxu1 %v978_v3 }
  0x2b   : > { %893 = vmatmul.mubr.msk.bf16.gmra.mxu0 %vm371_vm1, %v944_v11  ;;  %901 = vmatmul.mubr.msk.bf16.gmra.mxu1 %vm371_vm1, %v945_v12 }
  0x2c   : > { %499 = vmatprep.mubr.bf16.mxu0 %v978_v3  ;;  %579 = vmatprep.mubr.bf16.mxu1 %v978_v3 }
  0x33   : > { %894 = vmatmul.mubr.msk.bf16.gmra.mxu0 %vm371_vm1, %v946_v13  ;;  %902 = vmatmul.mubr.msk.bf16.gmra.mxu1 %vm371_vm1, %v947_v14 }
  0x34   : > { %509 = vmatprep.mubr.bf16.mxu0 %v978_v3  ;;  %589 = vmatprep.mubr.bf16.mxu1 %v978_v3 }
  0x3b   : > { %895 = vmatmul.mubr.msk.bf16.gmra.mxu0 %vm371_vm1, %v948_v15  ;;  %903 = vmatmul.mubr.msk.bf16.gmra.mxu1 %vm371_vm1, %v949_v16 }
  0x3c   : > { %519 = vmatprep.mubr.bf16.mxu0 %v978_v3  ;;  %599 = vmatprep.mubr.bf16.mxu1 %v978_v3 }
  0x43   : > { %896 = vmatmul.mubr.msk.bf16.gmra.mxu0 %vm371_vm1, %v950_v17  ;;  %904 = vmatmul.mubr.msk.bf16.gmra.mxu1 %vm371_vm1, %v951_v18 }
  0x44   : > { %529 = vmatprep.mubr.bf16.mxu0 %v978_v3  ;;  %609 = vmatprep.mubr.bf16.mxu1 %v978_v3 }
  0x4b   : > { %897 = vmatmul.mubr.msk.bf16.gmra.mxu0 %vm371_vm1, %v952_v19  ;;  %905 = vmatmul.mubr.msk.bf16.gmra.mxu1 %vm371_vm1, %v953_v20 }
  0xd3   : > { %v461_v28 = vpop.f32.mrf.mxu0  ;;  %v541_v30 = vpop.f32.mrf.mxu1 }
  0xd4   : > { %v462_v29 = vadd.f32 %v461_v28, %v1063_v26  ;;  %v542_v31 = vadd.f32 %v541_v30, %v1063_v26 }
  0xd5   : > { %v463_v32 = vpop.f32.mrf.mxu0  ;;  %v543_v35 = vpop.f32.mrf.mxu1 }
  0xd6   : > { %v620_v33 = vmax.f32 %v462_v29, 0.0  ;;  %v464_v34 = vadd.f32 %v463_v32, %v1066_v27  ;;  %v652_v36 = vmax.f32 %v542_v31, 0.0  ;;  %v544_v37 = vadd.f32 %v543_v35, %v1066_v27 }
  0xd7   : > { %v465_v38 = vpop.f32.mrf.mxu0  ;;  %v545_v41 = vpop.f32.mrf.mxu1 }
  0xd8   : > { %684 = vst [vmem:[%s1072_s28] sm:$0xff] %v620_v33  ;;  %v621_v39 = vmax.f32 %v464_v34, 0.0  ;;  %v466_v40 = vadd.f32 %v465_v38, %v1063_v26  ;;  %716 = vst [vmem:[%s1072_s28 + $0x100] sm:$0xff] %v652_v36  ;;  %v653_v42 = vmax.f32 %v544_v37, 0.0  ;;  %v546_v43 = vadd.f32 %v545_v41, %v1063_v26 }
  0xd9   : > { %v467_v44 = vpop.f32.mrf.mxu0  ;;  %v547_v47 = vpop.f32.mrf.mxu1 }
  0xda   : > { %685 = vst [vmem:[%s1072_s28 + $0x8] sm:$0xff] %v621_v39  ;;  %v622_v45 = vmax.f32 %v466_v40, 0.0  ;;  %v468_v46 = vadd.f32 %v467_v44, %v1066_v27  ;;  %717 = vst [vmem:[%s1072_s28 + $0x108] sm:$0xff] %v653_v42  ;;  %v654_v48 = vmax.f32 %v546_v43, 0.0  ;;  %v548_v49 = vadd.f32 %v547_v47, %v1066_v27 }
  0xdb   : > { %v471_v50 = vpop.f32.mrf.mxu0  ;;  %v551_v53 = vpop.f32.mrf.mxu1 }
  0xdc   : > { %686 = vst [vmem:[%s1072_s28 + $0x10] sm:$0xff] %v622_v45  ;;  %v623_v51 = vmax.f32 %v468_v46, 0.0  ;;  %v472_v52 = vadd.f32 %v471_v50, %v1063_v26  ;;  %718 = vst [vmem:[%s1072_s28 + $0x110] sm:$0xff] %v654_v48  ;;  %v655_v54 = vmax.f32 %v548_v49, 0.0  ;;  %v552_v55 = vadd.f32 %v551_v53, %v1063_v26 }
  0xdd   : > { %v473_v56 = vpop.f32.mrf.mxu0  ;;  %v553_v59 = vpop.f32.mrf.mxu1 }
  0xde   : > { %687 = vst [vmem:[%s1072_s28 + $0x18] sm:$0xff] %v623_v51  ;;  %v624_v57 = vmax.f32 %v472_v52, 0.0  ;;  %v474_v58 = vadd.f32 %v473_v56, %v1066_v27  ;;  %719 = vst [vmem:[%s1072_s28 + $0x118] sm:$0xff] %v655_v54  ;;  %v656_v60 = vmax.f32 %v552_v55, 0.0  ;;  %v554_v61 = vadd.f32 %v553_v59, %v1066_v27 }
  0xdf   : > { %v475_v62 = vpop.f32.mrf.mxu0  ;;  %v555_v1 = vpop.f32.mrf.mxu1 }
  0xe0   : > { %688 = vst [vmem:[%s1072_s28 + $0x20] sm:$0xff] %v624_v57  ;;  %v625_v63 = vmax.f32 %v474_v58, 0.0  ;;  %v476_v0 = vadd.f32 %v475_v62, %v1063_v26  ;;  %720 = vst [vmem:[%s1072_s28 + $0x120] sm:$0xff] %v656_v60  ;;  %v657_v2 = vmax.f32 %v554_v61, 0.0  ;;  %v556_v3 = vadd.f32 %v555_v1, %v1063_v26 }
  0xe1   : > { %v477_v4 = vpop.f32.mrf.mxu0  ;;  %v557_v7 = vpop.f32.mrf.mxu1 }
  0xe2   : > { %689 = vst [vmem:[%s1072_s28 + $0x28] sm:$0xff] %v625_v63  ;;  %v626_v5 = vmax.f32 %v476_v0, 0.0  ;;  %v478_v6 = vadd.f32 %v477_v4, %v1066_v27  ;;  %721 = vst [vmem:[%s1072_s28 + $0x128] sm:$0xff] %v657_v2  ;;  %v658_v8 = vmax.f32 %v556_v3, 0.0  ;;  %v558_v9 = vadd.f32 %v557_v7, %v1066_v27 }
  0xe3   : > { %v481_v10 = vpop.f32.mrf.mxu0  ;;  %v561_v13 = vpop.f32.mrf.mxu1 }
  0xe4   : > { %690 = vst [vmem:[%s1072_s28 + $0x30] sm:$0xff] %v626_v5  ;;  %v627_v11 = vmax.f32 %v478_v6, 0.0  ;;  %v482_v12 = vadd.f32 %v481_v10, %v1063_v26  ;;  %722 = vst [vmem:[%s1072_s28 + $0x130] sm:$0xff] %v658_v8  ;;  %v659_v14 = vmax.f32 %v558_v9, 0.0  ;;  %v562_v15 = vadd.f32 %v561_v13, %v1063_v26 }
  0xe5   : > { %v483_v16 = vpop.f32.mrf.mxu0  ;;  %v563_v19 = vpop.f32.mrf.mxu1 }
  0xe6   : > { %691 = vst [vmem:[%s1072_s28 + $0x38] sm:$0xff] %v627_v11  ;;  %v628_v17 = vmax.f32 %v482_v12, 0.0  ;;  %v484_v18 = vadd.f32 %v483_v16, %v1066_v27  ;;  %723 = vst [vmem:[%s1072_s28 + $0x138] sm:$0xff] %v659_v14  ;;  %v660_v20 = vmax.f32 %v562_v15, 0.0  ;;  %v564_v21 = vadd.f32 %v563_v19, %v1066_v27 }
  0xe7   : > { %v485_v22 = vpop.f32.mrf.mxu0  ;;  %v565_v25 = vpop.f32.mrf.mxu1 }
  0xe8   : > { %692 = vst [vmem:[%s1072_s28 + $0x40] sm:$0xff] %v628_v17  ;;  %v629_v23 = vmax.f32 %v484_v18, 0.0  ;;  %v486_v24 = vadd.f32 %v485_v22, %v1063_v26  ;;  %724 = vst [vmem:[%s1072_s28 + $0x140] sm:$0xff] %v660_v20  ;;  %v661_v28 = vmax.f32 %v564_v21, 0.0  ;;  %v566_v29 = vadd.f32 %v565_v25, %v1063_v26 }
  0xe9   : > { %v487_v30 = vpop.f32.mrf.mxu0  ;;  %v567_v33 = vpop.f32.mrf.mxu1 }
  0xea   : > { %693 = vst [vmem:[%s1072_s28 + $0x48] sm:$0xff] %v629_v23  ;;  %v630_v31 = vmax.f32 %v486_v24, 0.0  ;;  %v488_v32 = vadd.f32 %v487_v30, %v1066_v27  ;;  %725 = vst [vmem:[%s1072_s28 + $0x148] sm:$0xff] %v661_v28  ;;  %v662_v34 = vmax.f32 %v566_v29, 0.0  ;;  %v568_v35 = vadd.f32 %v567_v33, %v1066_v27 }
  0xeb   : > { %v491_v36 = vpop.f32.mrf.mxu0  ;;  %v571_v39 = vpop.f32.mrf.mxu1 }
  0xec   : > { %694 = vst [vmem:[%s1072_s28 + $0x50] sm:$0xff] %v630_v31  ;;  %v631_v37 = vmax.f32 %v488_v32, 0.0  ;;  %v492_v38 = vadd.f32 %v491_v36, %v1063_v26  ;;  %726 = vst [vmem:[%s1072_s28 + $0x150] sm:$0xff] %v662_v34  ;;  %v663_v40 = vmax.f32 %v568_v35, 0.0  ;;  %v572_v41 = vadd.f32 %v571_v39, %v1063_v26 }
  0xed   : > { %v493_v42 = vpop.f32.mrf.mxu0  ;;  %v573_v45 = vpop.f32.mrf.mxu1 }
  0xee   : > { %695 = vst [vmem:[%s1072_s28 + $0x58] sm:$0xff] %v631_v37  ;;  %v632_v43 = vmax.f32 %v492_v38, 0.0  ;;  %v494_v44 = vadd.f32 %v493_v42, %v1066_v27  ;;  %727 = vst [vmem:[%s1072_s28 + $0x158] sm:$0xff] %v663_v40  ;;  %v664_v46 = vmax.f32 %v572_v41, 0.0  ;;  %v574_v47 = vadd.f32 %v573_v45, %v1066_v27 }
  0xef   : > { %v495_v48 = vpop.f32.mrf.mxu0  ;;  %v575_v51 = vpop.f32.mrf.mxu1 }
  0xf0   : > { %696 = vst [vmem:[%s1072_s28 + $0x60] sm:$0xff] %v632_v43  ;;  %v633_v49 = vmax.f32 %v494_v44, 0.0  ;;  %v496_v50 = vadd.f32 %v495_v48, %v1063_v26  ;;  %728 = vst [vmem:[%s1072_s28 + $0x160] sm:$0xff] %v664_v46  ;;  %v665_v52 = vmax.f32 %v574_v47, 0.0  ;;  %v576_v53 = vadd.f32 %v575_v51, %v1063_v26 }
  0xf1   : > { %v497_v54 = vpop.f32.mrf.mxu0  ;;  %v577_v57 = vpop.f32.mrf.mxu1 }
  0xf2   : > { %697 = vst [vmem:[%s1072_s28 + $0x68] sm:$0xff] %v633_v49  ;;  %v634_v55 = vmax.f32 %v496_v50, 0.0  ;;  %v498_v56 = vadd.f32 %v497_v54, %v1066_v27  ;;  %729 = vst [vmem:[%s1072_s28 + $0x168] sm:$0xff] %v665_v52  ;;  %v666_v58 = vmax.f32 %v576_v53, 0.0  ;;  %v578_v59 = vadd.f32 %v577_v57, %v1066_v27 }
  0xf3   : > { %v501_v60 = vpop.f32.mrf.mxu0  ;;  %v581_v63 = vpop.f32.mrf.mxu1 }
  0xf4   : > { %698 = vst [vmem:[%s1072_s28 + $0x70] sm:$0xff] %v634_v55  ;;  %v635_v61 = vmax.f32 %v498_v56, 0.0  ;;  %v502_v62 = vadd.f32 %v501_v60, %v1063_v26  ;;  %730 = vst [vmem:[%s1072_s28 + $0x170] sm:$0xff] %v666_v58  ;;  %v667_v0 = vmax.f32 %v578_v59, 0.0  ;;  %v582_v1 = vadd.f32 %v581_v63, %v1063_v26 }
  0xf5   : > { %v503_v2 = vpop.f32.mrf.mxu0  ;;  %v583_v5 = vpop.f32.mrf.mxu1 }
  0xf6   : > { %699 = vst [vmem:[%s1072_s28 + $0x78] sm:$0xff] %v635_v61  ;;  %v636_v3 = vmax.f32 %v502_v62, 0.0  ;;  %v504_v4 = vadd.f32 %v503_v2, %v1066_v27  ;;  %731 = vst [vmem:[%s1072_s28 + $0x178] sm:$0xff] %v667_v0  ;;  %v668_v6 = vmax.f32 %v582_v1, 0.0  ;;  %v584_v7 = vadd.f32 %v583_v5, %v1066_v27 }
  0xf7   : > { %v505_v8 = vpop.f32.mrf.mxu0  ;;  %v585_v11 = vpop.f32.mrf.mxu1 }
  0xf8   : > { %700 = vst [vmem:[%s1072_s28 + $0x80] sm:$0xff] %v636_v3  ;;  %v637_v9 = vmax.f32 %v504_v4, 0.0  ;;  %v506_v10 = vadd.f32 %v505_v8, %v1063_v26  ;;  %732 = vst [vmem:[%s1072_s28 + $0x180] sm:$0xff] %v668_v6  ;;  %v669_v12 = vmax.f32 %v584_v7, 0.0  ;;  %v586_v13 = vadd.f32 %v585_v11, %v1063_v26 }
  0xf9   : > { %v507_v14 = vpop.f32.mrf.mxu0  ;;  %v587_v17 = vpop.f32.mrf.mxu1 }
  0xfa   : > { %701 = vst [vmem:[%s1072_s28 + $0x88] sm:$0xff] %v637_v9  ;;  %v638_v15 = vmax.f32 %v506_v10, 0.0  ;;  %v508_v16 = vadd.f32 %v507_v14, %v1066_v27  ;;  %733 = vst [vmem:[%s1072_s28 + $0x188] sm:$0xff] %v669_v12  ;;  %v670_v18 = vmax.f32 %v586_v13, 0.0  ;;  %v588_v19 = vadd.f32 %v587_v17, %v1066_v27 }
  0xfb   : > { %v511_v20 = vpop.f32.mrf.mxu0  ;;  %v591_v23 = vpop.f32.mrf.mxu1 }
  0xfc   : > { %702 = vst [vmem:[%s1072_s28 + $0x90] sm:$0xff] %v638_v15  ;;  %v639_v21 = vmax.f32 %v508_v16, 0.0  ;;  %v512_v22 = vadd.f32 %v511_v20, %v1063_v26  ;;  %734 = vst [vmem:[%s1072_s28 + $0x190] sm:$0xff] %v670_v18  ;;  %v671_v24 = vmax.f32 %v588_v19, 0.0  ;;  %v592_v25 = vadd.f32 %v591_v23, %v1063_v26 }
  0xfd   : > { %v513_v28 = vpop.f32.mrf.mxu0  ;;  %v593_v31 = vpop.f32.mrf.mxu1 }
  0xfe   : > { %703 = vst [vmem:[%s1072_s28 + $0x98] sm:$0xff] %v639_v21  ;;  %v640_v29 = vmax.f32 %v512_v22, 0.0  ;;  %v514_v30 = vadd.f32 %v513_v28, %v1066_v27  ;;  %735 = vst [vmem:[%s1072_s28 + $0x198] sm:$0xff] %v671_v24  ;;  %v672_v32 = vmax.f32 %v592_v25, 0.0  ;;  %v594_v33 = vadd.f32 %v593_v31, %v1066_v27 }
  0xff   : > { %v515_v34 = vpop.f32.mrf.mxu0  ;;  %v595_v37 = vpop.f32.mrf.mxu1 }
 0x100   : > { %704 = vst [vmem:[%s1072_s28 + $0xa0] sm:$0xff] %v640_v29  ;;  %v641_v35 = vmax.f32 %v514_v30, 0.0  ;;  %v516_v36 = vadd.f32 %v515_v34, %v1063_v26  ;;  %736 = vst [vmem:[%s1072_s28 + $0x1a0] sm:$0xff] %v672_v32  ;;  %v673_v38 = vmax.f32 %v594_v33, 0.0  ;;  %v596_v39 = vadd.f32 %v595_v37, %v1063_v26 }
 0x101   : > { %v517_v40 = vpop.f32.mrf.mxu0  ;;  %v597_v43 = vpop.f32.mrf.mxu1 }
 0x102   : > { %705 = vst [vmem:[%s1072_s28 + $0xa8] sm:$0xff] %v641_v35  ;;  %v642_v41 = vmax.f32 %v516_v36, 0.0  ;;  %v518_v42 = vadd.f32 %v517_v40, %v1066_v27  ;;  %737 = vst [vmem:[%s1072_s28 + $0x1a8] sm:$0xff] %v673_v38  ;;  %v674_v44 = vmax.f32 %v596_v39, 0.0  ;;  %v598_v45 = vadd.f32 %v597_v43, %v1066_v27 }
 0x103   : > { %v521_v46 = vpop.f32.mrf.mxu0  ;;  %v601_v49 = vpop.f32.mrf.mxu1 }
 0x104   : > { %706 = vst [vmem:[%s1072_s28 + $0xb0] sm:$0xff] %v642_v41  ;;  %v643_v47 = vmax.f32 %v518_v42, 0.0  ;;  %v522_v48 = vadd.f32 %v521_v46, %v1063_v26  ;;  %738 = vst [vmem:[%s1072_s28 + $0x1b0] sm:$0xff] %v674_v44  ;;  %v675_v50 = vmax.f32 %v598_v45, 0.0  ;;  %v602_v51 = vadd.f32 %v601_v49, %v1063_v26 }
 0x105   : > { %v523_v52 = vpop.f32.mrf.mxu0  ;;  %v603_v55 = vpop.f32.mrf.mxu1 }
 0x106   : > { %707 = vst [vmem:[%s1072_s28 + $0xb8] sm:$0xff] %v643_v47  ;;  %v644_v53 = vmax.f32 %v522_v48, 0.0  ;;  %v524_v54 = vadd.f32 %v523_v52, %v1066_v27  ;;  %739 = vst [vmem:[%s1072_s28 + $0x1b8] sm:$0xff] %v675_v50  ;;  %v676_v56 = vmax.f32 %v602_v51, 0.0  ;;  %v604_v57 = vadd.f32 %v603_v55, %v1066_v27 }
 0x107   : > { %v525_v58 = vpop.f32.mrf.mxu0  ;;  %v605_v61 = vpop.f32.mrf.mxu1 }
 0x108   : > { %708 = vst [vmem:[%s1072_s28 + $0xc0] sm:$0xff] %v644_v53  ;;  %v645_v59 = vmax.f32 %v524_v54, 0.0  ;;  %v526_v60 = vadd.f32 %v525_v58, %v1063_v26  ;;  %740 = vst [vmem:[%s1072_s28 + $0x1c0] sm:$0xff] %v676_v56  ;;  %v677_v62 = vmax.f32 %v604_v57, 0.0  ;;  %v606_v63 = vadd.f32 %v605_v61, %v1063_v26 }
 0x109   : > { %v527_v0 = vpop.f32.mrf.mxu0  ;;  %v607_v3 = vpop.f32.mrf.mxu1 }
 0x10a   : > { %709 = vst [vmem:[%s1072_s28 + $0xc8] sm:$0xff] %v645_v59  ;;  %v646_v1 = vmax.f32 %v526_v60, 0.0  ;;  %v528_v2 = vadd.f32 %v527_v0, %v1066_v27  ;;  %741 = vst [vmem:[%s1072_s28 + $0x1c8] sm:$0xff] %v677_v62  ;;  %v678_v4 = vmax.f32 %v606_v63, 0.0  ;;  %v608_v5 = vadd.f32 %v607_v3, %v1066_v27 }
 0x10b   : > { %v531_v6 = vpop.f32.mrf.mxu0  ;;  %v611_v9 = vpop.f32.mrf.mxu1 }
 0x10c   : > { %710 = vst [vmem:[%s1072_s28 + $0xd0] sm:$0xff] %v646_v1  ;;  %v647_v7 = vmax.f32 %v528_v2, 0.0  ;;  %v532_v8 = vadd.f32 %v531_v6, %v1063_v26  ;;  %742 = vst [vmem:[%s1072_s28 + $0x1d0] sm:$0xff] %v678_v4  ;;  %v679_v10 = vmax.f32 %v608_v5, 0.0  ;;  %v612_v11 = vadd.f32 %v611_v9, %v1063_v26 }
 0x10d   : > { %v533_v12 = vpop.f32.mrf.mxu0  ;;  %v613_v15 = vpop.f32.mrf.mxu1 }
 0x10e   : > { %711 = vst [vmem:[%s1072_s28 + $0xd8] sm:$0xff] %v647_v7  ;;  %v648_v13 = vmax.f32 %v532_v8, 0.0  ;;  %v534_v14 = vadd.f32 %v533_v12, %v1066_v27  ;;  %743 = vst [vmem:[%s1072_s28 + $0x1d8] sm:$0xff] %v679_v10  ;;  %v680_v16 = vmax.f32 %v612_v11, 0.0  ;;  %v614_v17 = vadd.f32 %v613_v15, %v1066_v27 }
 0x10f   : > { %v535_v18 = vpop.f32.mrf.mxu0  ;;  %v615_v21 = vpop.f32.mrf.mxu1 }
 0x110   : > { %712 = vst [vmem:[%s1072_s28 + $0xe0] sm:$0xff] %v648_v13  ;;  %v649_v19 = vmax.f32 %v534_v14, 0.0  ;;  %v536_v20 = vadd.f32 %v535_v18, %v1063_v26  ;;  %744 = vst [vmem:[%s1072_s28 + $0x1e0] sm:$0xff] %v680_v16  ;;  %v681_v22 = vmax.f32 %v614_v17, 0.0  ;;  %v616_v23 = vadd.f32 %v615_v21, %v1063_v26 }
 0x111   : > { %v537_v24 = vpop.f32.mrf.mxu0  ;;  %v617_v29 = vpop.f32.mrf.mxu1 }
 0x112   : > { %713 = vst [vmem:[%s1072_s28 + $0xe8] sm:$0xff] %v649_v19  ;;  %v650_v25 = vmax.f32 %v536_v20, 0.0  ;;  %v538_v28 = vadd.f32 %v537_v24, %v1066_v27  ;;  %745 = vst [vmem:[%s1072_s28 + $0x1e8] sm:$0xff] %v681_v22  ;;  %v682_v30 = vmax.f32 %v616_v23, 0.0  ;;  %v618_v31 = vadd.f32 %v617_v29, %v1066_v27 }
 0x114   : > { %714 = vst [vmem:[%s1072_s28 + $0xf0] sm:$0xff] %v650_v25  ;;  %v651_v32 = vmax.f32 %v538_v28, 0.0  ;;  %746 = vst [vmem:[%s1072_s28 + $0x1f0] sm:$0xff] %v682_v30  ;;  %v683_v33 = vmax.f32 %v618_v31, 0.0 }
 0x116   : > { %715 = vst [vmem:[%s1072_s28 + $0xf8] sm:$0xff] %v651_v32  ;;  %747 = vst [vmem:[%s1072_s28 + $0x1f8] sm:$0xff] %v683_v33 }
 0x117 PF: > { %s13_s14 = sadd.s32 1, %s976_s14   ;;  %s1214_s12 = smov %s972_s13 }
 0x118   : > { %p10_p5 = scmp.ge.s32.totalorder %s13_s14, 4   ;;  %s1215_s13 = smov %s1217_s15 }
 0x11a   :  { %12 = sbr.rel (!%p10_p5) target bundleno = 2 (0x2), region = 68 }

// kernel: inception_forward.6
= control target key start
LH: loop header
LB: loop body
LE: loop exit
PB: predicated region body
PF: predicated region fallthrough
CT: control target
= control target key end

     0   :  { %s3858_s12 = smov 0   ;;  %s5349_s0 = inlined_call_operand.vmem [shape: bf16[2,18,18,16], index: 0, kind: input, shape index: {}]   ;;  %s5350_s1 = inlined_call_operand.vmem [shape: bf16[3,3,16,128], index: 1, kind: input, shape index: {}]   ;;  %s5351_s2 = inlined_call_operand.vmem [shape: f32[1,128], index: 2, kind: input, shape index: {}]   ;;  %s5352_s3 = inlined_call_operand.vmem [shape: f32[2,256,128], index: 3, kind: output, shape index: {}]  }
   0x1 LB: > { %s3080_s13 = sadd.s32 4294967295, %s3836_s12   ;;  %p3084_p0 = scmp.ge.s32.totalorder %s3836_s12, 1  ;;  %s3836_s12 = sphi %s3858_s12, %s13_s12  }
   0x2   : > { %p137_p1 = scmp.lt.s32.totalorder %s3836_s12, 3 }
   0x4   : > { %p138_p2 = pnand %p3084_p0, %p137_p1 }
   0x6   : > { %141 = sbr.rel (%p138_p2) target bundleno = 556 (0x22c), region = 32 }
   0xb   : > { %v3803_v0 = vld [vmem:[%s5350_s1 + $0x8] sm:$0xff]   ;;  %p161_p3 = scmp.lt.s32.totalorder %s3080_s13, 1  ;;  %v3872_v1 = vld [vmem:[%s5350_s1] sm:$0xff]   ;;  %v3879_v2 = vld [vmem:[%s5350_s1 + $0x10] sm:$0xff]   ;;  %vm228_vm0 = vsmask.f32 3328 }
   0xc   : > { %3792 = vmatprep.subr.bf16.mxu1 %v3803_v0  ;;  %3486 = vmatprep.subr.bf16.mxu0 %v3803_v0  ;;  %vm229_vm1 = vsmask.f32 7440  ;;  %vm672_vm2 = vcmask 130048   ;;  %v5396_v29 = vmov 0  ;;  %vm1193_vm4 = vcmask 1042432  }
   0xd   : > { %s5556_s13 = smov (!%p161_p3, %s3080_s13), 1  ;;  %3793 = vmatpush3.bf16.msra.mxu1 %v3803_v0  ;;  %3487 = vmatpush3.bf16.msra.mxu0 %v3803_v0  ;;  %vm3926_vm3 = vmor %vm228_vm0, %vm229_vm1  ;;  %vm1194_vm5 = vcmask 1046532  }
   0xe   : > { %s3794_s20 = smul.u32 216, %s5556_s13  ;;  %3520 = vmatprep.subr.bf16.mxu1 %v3872_v1  ;;  %3554 = vmatprep.subr.bf16.mxu0 %v3879_v2  ;;  %v5397_v29 = vsel %vm3926_vm3, 4294967295, %v5396_v29  ;;  %vm4247_vm6 = vmor %vm1193_vm4, %vm1194_vm5  ;;  %s3332_s11 = sshll.u32 %s5556_s13, 8 }
   0xf   : > { %5398 = vst [vmem:[#allocation2_spill] sm:$0xff] %v5397_v29  ;;  %s5204_s15 = scalar_lea.vmem %s5352_s3, %s3332_s11 }
  0x10   : > { %s3887_s23 = scalar_lea.vmem %s5349_s0, %s3794_s20 }
  0x11   : > { %v3890_v3 = vld [vmem:[%s3887_s23] sm:$0xf]  ;;  %v3893_v4 = vld [vmem:[%s3887_s23 + $0x4] sm:$0xf]  ;;  %v3896_v5 = vld [vmem:[%s3887_s23 + $0x8] sm:$0x1] }
  0x12   : > { %v232_v6 = vshrl.u32 %v3890_v3, 16  ;;  %v235_v7 = vshll.u32 %v3890_v3, 16  ;;  %v241_v8 = vshll.u32 %v3893_v4, 16  ;;  %v245_v9 = vshrl.u32 %v3893_v4, 16  ;;  %v3903_v10 = vld [vmem:[%s3887_s23 + $0x60] sm:$0xf] }
  0x13   : > { %v251_v11 = vshll.u32 %v3896_v5, 16  ;;  %v3908_v13 = vld [vmem:[%s3887_s23 + $0x64] sm:$0xf]  ;;  %v3911_v14 = vld [vmem:[%s3887_s23 + $0x68] sm:$0x1]  ;;  %v424_v20 = vshrl.u32 %v3903_v10, 16 }
  0x14   : > { %v234_v15 = vrot.slane %v232_v6, 4  ;;  %v237_v16 = vrot.slane %v235_v7, 5  ;;  %v243_v17 = vrot.slane %v241_v8, 5  ;;  %v247_v18 = vrot.slane %v245_v9, 4  ;;  %v3919_v27 = vld [vmem:[%s3887_s23 + $0xc] sm:$0xf] }
  0x15   : > { %v253_v19 = vrot.slane %v251_v11, 5  ;;  %v427_v21 = vshll.u32 %v3903_v10, 16  ;;  %v433_v22 = vshll.u32 %v3908_v13, 16  ;;  %v437_v25 = vshrl.u32 %v3908_v13, 16  ;;  %v3922_v28 = vld [vmem:[%s3887_s23 + $0x10] sm:$0xf] }
  0x16   : > { %v238_v23 = vor.u32 %v237_v16, %v234_v15  ;;  %v248_v24 = vor.u32 %v247_v18, %v243_v17  ;;  %v443_v26 = vshll.u32 %v3911_v14, 16  ;;  %v426_v30 = vrot.slane %v424_v20, 4  ;;  %v3933_v39 = vld [vmem:[%s3887_s23 + $0x14] sm:$0x1]  ;;  %v3944_v51 = vld [vmem:[%s3887_s23 + $0x6c] sm:$0xf] }
  0x17   : > { %v429_v31 = vrot.slane %v427_v21, 5  ;;  %v435_v32 = vrot.slane %v433_v22, 5  ;;  %v439_v36 = vrot.slane %v437_v25, 4  ;;  %v256_v40 = vshrl.u32 %v3919_v27, 16  ;;  %5399 = vst [vmem:[#allocation3_spill] sm:$0xff] %v3944_v51 }
  0x18   : > { %v239_v34 = vrot.slane %v238_v23, 4  ;;  %v249_v35 = vrot.slane %v248_v24, 4  ;;  %v445_v37 = vrot.slane %v443_v26, 5  ;;  %v259_v41 = vshll.u32 %v3919_v27, 16  ;;  %v3948_v56 = vld [vmem:[%s3887_s23 + $0x70] sm:$0xf] }
  0x19   : > { %v430_v38 = vor.u32 %v429_v31, %v426_v30  ;;  %v265_v42 = vshll.u32 %v3922_v28, 16  ;;  %v440_v45 = vor.u32 %v439_v36, %v435_v32  ;;  %v269_v46 = vshrl.u32 %v3922_v28, 16  ;;  %v3956_v61 = vld [vmem:[%s3887_s23 + $0x74] sm:$0x1]  ;;  %v3962_v7 = vld [vmem:[%s3887_s23 + $0x18] sm:$0xf] }
  0x1a   : > { %v244_v43 = vsel %vm3926_vm3, %v239_v34, %v243_v17  ;;  %v254_v44 = vsel %vm3926_vm3, %v249_v35, %v253_v19  ;;  %v258_v49 = vrot.slane %v256_v40, 4  ;;  %v261_v50 = vrot.slane %v259_v41, 5  ;;  %5400 = vst [vmem:[#allocation4_spill] sm:$0xff] %v3956_v61  ;;  %v3971_v20 = vld [vmem:[%s3887_s23 + $0x1c] sm:$0xf]  ;;  %v3993_v40 = vld [vmem:[%s5350_s1 + $0x20] sm:$0xff]  }
  0x1b   : > { %v3090_v47 = vcombine.low %v244_v43, %v254_v44  ;;  %v431_v48 = vrot.slane %v430_v38, 4  ;;  %v441_v52 = vrot.slane %v440_v45, 4  ;;  %v267_v53 = vrot.slane %v265_v42, 5  ;;  %v3978_v24 = vld [vmem:[%s3887_s23 + $0x20] sm:$0x1] }
  0x1c   : > { %v271_v54 = vrot.slane %v269_v46, 4  ;;  %v275_v55 = vshll.u32 %v3933_v39, 16  ;;  %v262_v58 = vor.u32 %v261_v50, %v258_v49  ;;  %v448_v6 = vshrl.u32 %v3944_v51, 16  ;;  %v3985_v34 = vld [vmem:[%s3887_s23 + $0x78] sm:$0xf] }
  0x1d   : > { %3488 = vmatprep.mubr.msk.bf16.mxu0 %vm672_vm2, %v3090_v47  ;;  %v436_v57 = vsel %vm3926_vm3, %v431_v48, %v435_v32  ;;  %v446_v62 = vsel %vm3926_vm3, %v441_v52, %v445_v37  ;;  %v451_v11 = vshll.u32 %v3944_v51, 16  ;;  %v457_v15 = vshll.u32 %v3948_v56, 16  ;;  %5402 = vst [vmem:[#allocation6_spill] sm:$0xff] %v3985_v34  ;;  %v3998_v45 = vld [vmem:[%s3887_s23 + $0x7c] sm:$0xf] }
  0x1e   : > { %v272_v63 = vor.u32 %v271_v54, %v267_v53  ;;  %v277_v0 = vrot.slane %v275_v55, 5  ;;  %v3964_v8 = vcombine.low %v436_v57, %v446_v62  ;;  %v263_v9 = vrot.slane %v262_v58, 4  ;;  %5404 = vst [vmem:[#allocation8_spill] sm:$0xff] %v3998_v45  ;;  %v4006_v55 = vld [vmem:[%s3887_s23 + $0x80] sm:$0x1] }
  0x1f   : > { %v450_v17 = vrot.slane %v448_v6, 4  ;;  %v461_v18 = vshrl.u32 %v3948_v56, 16  ;;  %v467_v19 = vshll.u32 %v3956_v61, 16  ;;  %v453_v22 = vrot.slane %v451_v11, 5  ;;  %5405 = vst [vmem:[#allocation9_spill] sm:$0xff] %v4006_v55 }
  0x20   : > { %5401 = vst [vmem:[#allocation5_spill] sm:$0xff] %v3964_v8  ;;  %v273_v16 = vrot.slane %v272_v63, 4  ;;  %3504 = vmatprep.mubr.msk.bf16.mxu1 %vm672_vm2, %v3964_v8  ;;  %v268_v21 = vsel %vm3926_vm3, %v263_v9, %v267_v53  ;;  %v459_v23 = vrot.slane %v457_v15, 5  ;;  %v280_v25 = vshrl.u32 %v3962_v7, 16  ;;  %v4019_v15 = vld [vmem:[%s3887_s23 + $0x28] sm:$0xf] }
  0x21   : > { %v463_v30 = vrot.slane %v461_v18, 4  ;;  %v469_v31 = vrot.slane %v467_v19, 5  ;;  %v283_v32 = vshll.u32 %v3962_v7, 16  ;;  %v454_v36 = vor.u32 %v453_v22, %v450_v17 }
  0x22   : > { %v278_v26 = vsel %vm3926_vm3, %v273_v16, %v277_v0  ;;  %v282_v37 = vrot.slane %v280_v25, 4  ;;  %v289_v38 = vshll.u32 %v3971_v20, 16  ;;  %v293_v43 = vshrl.u32 %v3971_v20, 16  ;;  %v4012_v0 = vld [vmem:[%s3887_s23 + $0x24] sm:$0xf] }
  0x23   : > { %v3987_v35 = vcombine.low %v268_v21, %v278_v26  ;;  %v464_v41 = vor.u32 %v463_v30, %v459_v23  ;;  %v285_v42 = vrot.slane %v283_v32, 5  ;;  %v299_v44 = vshll.u32 %v3978_v24, 16  ;;  %v4027_v21 = vld [vmem:[%s5350_s1 + $0x18] sm:$0xff]   ;;  %v4032_v26 = vld [vmem:[%s3887_s23 + $0x2c] sm:$0x1] }
  0x24   : > { %v455_v46 = vrot.slane %v454_v36, 4  ;;  %v291_v47 = vrot.slane %v289_v38, 5  ;;  %v472_v48 = vshrl.u32 %v3985_v34, 16  ;;  %v475_v49 = vshll.u32 %v3985_v34, 16  ;;  %v4040_v38 = vld [vmem:[%s3887_s23 + $0x84] sm:$0xf] }
  0x25   : > { %5403 = vst [vmem:[#allocation7_spill] sm:$0xff] %v3987_v35  ;;  %3489 = vmatmul.mubr.msk.bf16.vlgmr.msra.gmra.mxu0 %vm672_vm2, %v3987_v35  ;;  %v465_v50 = vrot.slane %v464_v41, 4  ;;  %v286_v52 = vor.u32 %v285_v42, %v282_v37  ;;  %v295_v53 = vrot.slane %v293_v43, 4  ;;  %v301_v54 = vrot.slane %v299_v44, 5  ;;  %v4186_v35 = vld [vmem:[%s3887_s23 + $0xb0] sm:$0x1] }
  0x26   : > { %3555 = vmatpush3.bf16.msra.mxu0 %v3879_v2  ;;  %v460_v57 = vsel %vm3926_vm3, %v455_v46, %v459_v23  ;;  %v474_v58 = vrot.slane %v472_v48, 4  ;;  %v477_v62 = vrot.slane %v475_v49, 5  ;;  %v481_v63 = vshll.u32 %v3998_v45, 16  ;;  %v4047_v46 = vld [vmem:[%s3887_s23 + $0x88] sm:$0xf]  ;;  %5417 = vst [vmem:[#allocation21_spill] sm:$0xff] %v4186_v35 }
  0x27   : > { %3622 = vmatprep.subr.bf16.mxu0 %v3993_v40  ;;  %v470_v2 = vsel %vm3926_vm3, %v465_v50, %v469_v31  ;;  %v287_v6 = vrot.slane %v286_v52, 4  ;;  %v296_v9 = vor.u32 %v295_v53, %v291_v47  ;;  %v485_v11 = vshrl.u32 %v3998_v45, 16  ;;  %v4208_v45 = vld [vmem:[%s3887_s23 + $0x5c] sm:$0x1] }
  0x28   : > { %v4021_v16 = vcombine.low %v460_v57, %v470_v2  ;;  %v478_v17 = vor.u32 %v477_v62, %v474_v58  ;;  %v483_v18 = vrot.slane %v481_v63, 5  ;;  %v491_v19 = vshll.u32 %v4006_v55, 16 }
  0x29   : > { %v292_v22 = vsel %vm3926_vm3, %v287_v6, %v291_v47  ;;  %v297_v23 = vrot.slane %v296_v9, 4  ;;  %v487_v25 = vrot.slane %v485_v11, 4  ;;  %v304_v30 = vshrl.u32 %v4012_v0, 16  ;;  %v4065_v6 = vld [vmem:[%s3887_s23 + $0x30] sm:$0xf] }
  0x2a   : > { %5406 = vst [vmem:[#allocation10_spill] sm:$0xff] %v4021_v16  ;;  %3505 = vmatmul.mubr.msk.bf16.vlgmr.msra.gmra.mxu1 %vm672_vm2, %v4021_v16  ;;  %v479_v31 = vrot.slane %v478_v17, 4  ;;  %v493_v32 = vrot.slane %v491_v19, 5  ;;  %v307_v36 = vshll.u32 %v4012_v0, 16  ;;  %v313_v37 = vshll.u32 %v4019_v15, 16 }
  0x2b   : > { %3521 = vmatpush3.bf16.msra.mxu1 %v3872_v1  ;;  %v302_v41 = vsel %vm3926_vm3, %v297_v23, %v301_v54  ;;  %v488_v42 = vor.u32 %v487_v25, %v483_v18  ;;  %v306_v43 = vrot.slane %v304_v30, 4  ;;  %v317_v44 = vshrl.u32 %v4019_v15, 16  ;;  %v4056_v54 = vld [vmem:[%s3887_s23 + $0x8c] sm:$0x1]  ;;  %v4070_v19 = vld [vmem:[%s3887_s23 + $0x34] sm:$0xf] }
  0x2c   : > { %v4049_v47 = vcombine.low %v292_v22, %v302_v41  ;;  %v484_v48 = vsel %vm3926_vm3, %v479_v31, %v483_v18  ;;  %v309_v49 = vrot.slane %v307_v36, 5  ;;  %v315_v50 = vrot.slane %v313_v37, 5  ;;  %3588 = vmatprep.subr.bf16.mxu1 %v4027_v21  ;;  %v4075_v31 = vld [vmem:[%s3887_s23 + $0x38] sm:$0x1] }
  0x2d   : > { %v489_v1 = vrot.slane %v488_v42, 4  ;;  %v319_v52 = vrot.slane %v317_v44, 4  ;;  %v323_v53 = vshll.u32 %v4032_v26, 16  ;;  %v496_v57 = vshrl.u32 %v4040_v38, 16 }
  0x2e   : > { %5407 = vst [vmem:[#allocation11_spill] sm:$0xff] %v4049_v47  ;;  %3492 = vmatprep.mubr.msk.bf16.mxu0 %vm672_vm2, %v4049_v47  ;;  %v310_v58 = vor.u32 %v309_v49, %v306_v43  ;;  %v499_v62 = vshll.u32 %v4040_v38, 16  ;;  %v505_v63 = vshll.u32 %v4047_v46, 16  ;;  %v509_v2 = vshrl.u32 %v4047_v46, 16 }
  0x2f   : > { %v494_v9 = vsel %vm3926_vm3, %v489_v1, %v493_v32  ;;  %v320_v11 = vor.u32 %v319_v52, %v315_v50  ;;  %v325_v17 = vrot.slane %v323_v53, 5  ;;  %v498_v18 = vrot.slane %v496_v57, 4  ;;  %v4080_v32 = vld [vmem:[%s3887_s23 + $0x90] sm:$0xf]  ;;  %v4089_v1 = vld [vmem:[%s3887_s23 + $0x94] sm:$0xf] }
  0x30   : > { %v4072_v22 = vcombine.low %v484_v48, %v494_v9  ;;  %v311_v23 = vrot.slane %v310_v58, 4  ;;  %v501_v25 = vrot.slane %v499_v62, 5  ;;  %v507_v30 = vrot.slane %v505_v63, 5 }
  0x31   : > { %v321_v36 = vrot.slane %v320_v11, 4  ;;  %v511_v37 = vrot.slane %v509_v2, 4  ;;  %v515_v41 = vshll.u32 %v4056_v54, 16  ;;  %v328_v42 = vshrl.u32 %v4065_v6, 16 }
  0x32   : > { %5408 = vst [vmem:[#allocation12_spill] sm:$0xff] %v4072_v22  ;;  %3508 = vmatprep.mubr.msk.bf16.mxu1 %vm672_vm2, %v4072_v22  ;;  %v316_v43 = vsel %vm3926_vm3, %v311_v23, %v315_v50  ;;  %v502_v44 = vor.u32 %v501_v25, %v498_v18  ;;  %v331_v48 = vshll.u32 %v4065_v6, 16  ;;  %v337_v49 = vshll.u32 %v4070_v19, 16  ;;  %v4096_v50 = vld [vmem:[%s3887_s23 + $0x98] sm:$0x1] }
  0x33   : > { %v326_v52 = vsel %vm3926_vm3, %v321_v36, %v325_v17  ;;  %v512_v53 = vor.u32 %v511_v37, %v507_v30  ;;  %v517_v57 = vrot.slane %v515_v41, 5  ;;  %v330_v58 = vrot.slane %v328_v42, 4  ;;  %v4108_v42 = vld [vmem:[%s3887_s23 + $0x3c] sm:$0xf]  ;;  %v4137_v22 = vld [vmem:[%s3887_s23 + $0xa0] sm:$0xf] }
  0x34   : > { %v4093_v62 = vcombine.low %v316_v43, %v326_v52  ;;  %v503_v63 = vrot.slane %v502_v44, 4  ;;  %v333_v2 = vrot.slane %v331_v48, 5  ;;  %v339_v9 = vrot.slane %v337_v49, 5  ;;  %v4113_v52 = vld [vmem:[%s3887_s23 + $0x40] sm:$0xf] }
  0x35   : > { %v513_v11 = vrot.slane %v512_v53, 4  ;;  %v341_v18 = vshrl.u32 %v4070_v19, 16  ;;  %v347_v23 = vshll.u32 %v4075_v31, 16  ;;  %v520_v25 = vshrl.u32 %v4080_v32, 16 }
  0x36   : > { %5409 = vst [vmem:[#allocation13_spill] sm:$0xff] %v4093_v62  ;;  %3493 = vmatmul.mubr.msk.bf16.gmra.mxu0 %vm672_vm2, %v4093_v62  ;;  %v508_v17 = vsel %vm3926_vm3, %v503_v63, %v507_v30  ;;  %v334_v36 = vor.u32 %v333_v2, %v330_v58  ;;  %v523_v37 = vshll.u32 %v4080_v32, 16  ;;  %v529_v41 = vshll.u32 %v4089_v1, 16 }
  0x37   : > { %v518_v43 = vsel %vm3926_vm3, %v513_v11, %v517_v57  ;;  %v343_v44 = vrot.slane %v341_v18, 4  ;;  %v349_v48 = vrot.slane %v347_v23, 5  ;;  %v522_v49 = vrot.slane %v520_v25, 4  ;;  %v4125_v18 = vld [vmem:[%s3887_s23 + $0x44] sm:$0x1] }
  0x38   : > { %v4115_v53 = vcombine.low %v508_v17, %v518_v43  ;;  %v335_v30 = vrot.slane %v334_v36, 4  ;;  %v525_v58 = vrot.slane %v523_v37, 5  ;;  %v531_v63 = vrot.slane %v529_v41, 5  ;;  %v4130_v17 = vld [vmem:[%s3887_s23 + $0x9c] sm:$0xf] }
  0x39   : > { %v344_v2 = vor.u32 %v343_v44, %v339_v9  ;;  %v533_v33 = vshrl.u32 %v4089_v1, 16  ;;  %v539_v60 = vshll.u32 %v4096_v50, 16  ;;  %v352_v12 = vshrl.u32 %v4108_v42, 16 }
  0x3a   : > { %5410 = vst [vmem:[#allocation14_spill] sm:$0xff] %v4115_v53  ;;  %3509 = vmatmul.mubr.msk.bf16.gmra.mxu1 %vm672_vm2, %v4115_v53  ;;  %v340_v57 = vsel %vm3926_vm3, %v335_v30, %v339_v9  ;;  %v526_v11 = vor.u32 %v525_v58, %v522_v49  ;;  %v355_v23 = vshll.u32 %v4108_v42, 16  ;;  %v361_v25 = vshll.u32 %v4113_v52, 16 }
  0x3b   : > { %v345_v36 = vrot.slane %v344_v2, 4  ;;  %v535_v37 = vrot.slane %v533_v33, 4  ;;  %v541_v41 = vrot.slane %v539_v60, 5  ;;  %v354_v43 = vrot.slane %v352_v12, 4 }
  0x3c   : > { %v527_v44 = vrot.slane %v526_v11, 4  ;;  %v357_v59 = vrot.slane %v355_v23, 5  ;;  %v363_v53 = vrot.slane %v361_v25, 5  ;;  %v365_v9 = vshrl.u32 %v4113_v52, 16  ;;  %v4145_v23 = vld [vmem:[%s3887_s23 + $0xa4] sm:$0x1] }
  0x3d   : > { %v350_v49 = vsel %vm3926_vm3, %v345_v36, %v349_v48  ;;  %v536_v30 = vor.u32 %v535_v37, %v531_v63  ;;  %v371_v58 = vshll.u32 %v4125_v18, 16  ;;  %v544_v2 = vshrl.u32 %v4130_v17, 16  ;;  %5412 = vst [vmem:[#allocation16_spill] sm:$0xff] %v4145_v23  ;;  %v4148_v25 = vld [vmem:[%s3887_s23 + $0x48] sm:$0xf] }
  0x3e   : > { %v4140_v33 = vcombine.low %v340_v57, %v350_v49  ;;  %v532_v12 = vsel %vm3926_vm3, %v527_v44, %v531_v63  ;;  %v358_v60 = vor.u32 %v357_v59, %v354_v43  ;;  %v367_v11 = vrot.slane %v365_v9, 4 }
  0x3f   : > { %v537_v48 = vrot.slane %v536_v30, 4  ;;  %v373_v36 = vrot.slane %v371_v58, 5  ;;  %v546_v37 = vrot.slane %v544_v2, 4  ;;  %v547_v16 = vshll.u32 %v4130_v17, 16  ;;  %v4159_v30 = vld [vmem:[%s3887_s23 + $0x4c] sm:$0xf] }
  0x40   : > { %5411 = vst [vmem:[#allocation15_spill] sm:$0xff] %v4140_v33  ;;  %3496 = vmatprep.mubr.msk.bf16.mxu0 %vm672_vm2, %v4140_v33  ;;  %v359_v57 = vrot.slane %v358_v60, 4  ;;  %v368_v49 = vor.u32 %v367_v11, %v363_v53  ;;  %v553_v63 = vshll.u32 %v4137_v22, 16  ;;  %v557_v59 = vshrl.u32 %v4137_v22, 16  ;;  %v4167_v33 = vld [vmem:[%s3887_s23 + $0x50] sm:$0x1] }
  0x41   : > { %v542_v43 = vsel %vm3926_vm3, %v537_v48, %v541_v41  ;;  %v549_v44 = vrot.slane %v547_v16, 5  ;;  %v563_v9 = vshll.u32 %v4145_v23, 16  ;;  %v376_v58 = vshrl.u32 %v4148_v25, 16  ;;  %v4170_v48 = vld [vmem:[%s3887_s23 + $0xa8] sm:$0xf] }
  0x42   : > { %v4162_v2 = vcombine.low %v532_v12, %v542_v43  ;;  %v364_v60 = vsel %vm3926_vm3, %v359_v57, %v363_v53  ;;  %v369_v11 = vrot.slane %v368_v49, 4  ;;  %v555_v8 = vrot.slane %v553_v63, 5  ;;  %5414 = vst [vmem:[#allocation18_spill] sm:$0xff] %v4170_v48 }
  0x43   : > { %v550_v62 = vor.u32 %v549_v44, %v546_v37  ;;  %v559_v47 = vrot.slane %v557_v59, 4  ;;  %v565_v41 = vrot.slane %v563_v9, 5  ;;  %v378_v16 = vrot.slane %v376_v58, 4  ;;  %v4183_v44 = vld [vmem:[%s3887_s23 + $0xac] sm:$0xf] }
  0x44   : > { %5413 = vst [vmem:[#allocation17_spill] sm:$0xff] %v4162_v2  ;;  %3512 = vmatprep.mubr.msk.bf16.mxu1 %vm672_vm2, %v4162_v2  ;;  %v374_v12 = vsel %vm3926_vm3, %v369_v11, %v373_v36  ;;  %v379_v53 = vshll.u32 %v4148_v25, 16  ;;  %v385_v57 = vshll.u32 %v4159_v30, 16  ;;  %v389_v49 = vshrl.u32 %v4159_v30, 16  ;;  %5416 = vst [vmem:[#allocation20_spill] sm:$0xff] %v4183_v44 }
  0x45   : > { %v4179_v63 = vcombine.low %v364_v60, %v374_v12  ;;  %v551_v37 = vrot.slane %v550_v62, 4  ;;  %v560_v59 = vor.u32 %v559_v47, %v555_v8  ;;  %v395_v43 = vshll.u32 %v4167_v33, 16 }
  0x46   : > { %v381_v9 = vrot.slane %v379_v53, 5  ;;  %v387_v58 = vrot.slane %v385_v57, 5  ;;  %v391_v2 = vrot.slane %v389_v49, 4  ;;  %v568_v36 = vshrl.u32 %v4170_v48, 16  ;;  %v4196_v49 = vld [vmem:[%s3887_s23 + $0x54] sm:$0xf] }
  0x47   : > { %5415 = vst [vmem:[#allocation19_spill] sm:$0xff] %v4179_v63  ;;  %3497 = vmatmul.mubr.msk.bf16.gmra.mxu0 %vm672_vm2, %v4179_v63  ;;  %v556_v62 = vsel %vm3926_vm3, %v551_v37, %v555_v8  ;;  %v561_v47 = vrot.slane %v560_v59, 4  ;;  %v397_v60 = vrot.slane %v395_v43, 5  ;;  %v571_v11 = vshll.u32 %v4170_v48, 16  ;;  %v4203_v59 = vld [vmem:[%s3887_s23 + $0x58] sm:$0xf] }
  0x48   : > { %v382_v12 = vor.u32 %v381_v9, %v378_v16  ;;  %v392_v55 = vor.u32 %v391_v2, %v387_v58  ;;  %v570_v53 = vrot.slane %v568_v36, 4  ;;  %v577_v57 = vshll.u32 %v4183_v44, 16 }
  0x49   : > { %v566_v63 = vsel %vm3926_vm3, %v561_v47, %v565_v41  ;;  %v573_v34 = vrot.slane %v571_v11, 5  ;;  %v581_v8 = vshrl.u32 %v4183_v44, 16  ;;  %v587_v37 = vshll.u32 %v4186_v35, 16 }
  0x4a   : > { %v4205_v2 = vcombine.low %v556_v62, %v566_v63  ;;  %v383_v16 = vrot.slane %v382_v12, 4  ;;  %v393_v43 = vrot.slane %v392_v55, 4  ;;  %v579_v9 = vrot.slane %v577_v57, 5 }
  0x4b   : > { %v574_v36 = vor.u32 %v573_v34, %v570_v53  ;;  %v583_v61 = vrot.slane %v581_v8, 4  ;;  %v589_v51 = vrot.slane %v587_v37, 5  ;;  %v400_v41 = vshrl.u32 %v4196_v49, 16  ;;  %v4220_v34 = vld [vmem:[%s3887_s23 + $0xb4] sm:$0xf] }
  0x4c   : > { %5418 = vst [vmem:[#allocation22_spill] sm:$0xff] %v4205_v2  ;;  %3513 = vmatmul.mubr.msk.bf16.gmra.mxu1 %vm672_vm2, %v4205_v2  ;;  %v388_v47 = vsel %vm3926_vm3, %v383_v16, %v387_v58  ;;  %v398_v63 = vsel %vm3926_vm3, %v393_v43, %v397_v60  ;;  %v403_v55 = vshll.u32 %v4196_v49, 16  ;;  %v409_v62 = vshll.u32 %v4203_v59, 16  ;;  %5419 = vst [vmem:[#allocation23_spill] sm:$0xff] %v4220_v34  ;;  %v4225_v8 = vld [vmem:[%s3887_s23 + $0xb8] sm:$0xf] }
  0x4d   : > { %v4222_v11 = vcombine.low %v388_v47, %v398_v63  ;;  %v575_v12 = vrot.slane %v574_v36, 4  ;;  %v584_v53 = vor.u32 %v583_v61, %v579_v9  ;;  %v402_v57 = vrot.slane %v400_v41, 4 }
  0x4e   : > { %v405_v37 = vrot.slane %v403_v55, 5  ;;  %v411_v2 = vrot.slane %v409_v62, 5  ;;  %v413_v58 = vshrl.u32 %v4203_v59, 16  ;;  %v419_v60 = vshll.u32 %v4208_v45, 16  ;;  %v4236_v55 = vld [vmem:[%s3887_s23 + $0xbc] sm:$0x1] }
  0x4f   : > { %5420 = vst [vmem:[#allocation24_spill] sm:$0xff] %v4222_v11  ;;  %3500 = vmatprep.mubr.msk.bf16.mxu0 %vm672_vm2, %v4222_v11  ;;  %v580_v16 = vsel %vm3926_vm3, %v575_v12, %v579_v9  ;;  %v585_v43 = vrot.slane %v584_v53, 4  ;;  %v592_v36 = vshrl.u32 %v4220_v34, 16  ;;  %v595_v61 = vshll.u32 %v4220_v34, 16 }
  0x50   : > { %v406_v41 = vor.u32 %v405_v37, %v402_v57  ;;  %v415_v47 = vrot.slane %v413_v58, 4  ;;  %v421_v63 = vrot.slane %v419_v60, 5  ;;  %v601_v62 = vshll.u32 %v4225_v8, 16 }
  0x51   : > { %v590_v35 = vsel %vm3926_vm3, %v585_v43, %v589_v51  ;;  %v594_v48 = vrot.slane %v592_v36, 4  ;;  %v597_v11 = vrot.slane %v595_v61, 5  ;;  %v605_v44 = vshrl.u32 %v4225_v8, 16 }
  0x52   : > { %v4242_v9 = vcombine.low %v580_v16, %v590_v35  ;;  %v407_v12 = vrot.slane %v406_v41, 4  ;;  %v416_v53 = vor.u32 %v415_v47, %v411_v2  ;;  %v603_v23 = vrot.slane %v601_v62, 5 }
  0x53   : > { %v598_v34 = vor.u32 %v597_v11, %v594_v48  ;;  %v607_v57 = vrot.slane %v605_v44, 4  ;;  %v611_v37 = vshll.u32 %v4236_v55, 16  ;;  %v3156_v51 = vrot.slane %v3890_v3, 9 }
  0x54   : > { %3516 = vmatprep.mubr.msk.bf16.mxu1 %vm672_vm2, %v4242_v9  ;;  %v412_v35 = vsel %vm3926_vm3, %v407_v12, %v411_v2  ;;  %v417_v60 = vrot.slane %v416_v53, 4  ;;  %v1198_v48 = vrot.slane %v3893_v4, 5  ;;  %v4259_v44 = vcombine.low %v3919_v27, %v3922_v28 }
  0x55   : > { %v599_v11 = vrot.slane %v598_v34, 4  ;;  %v608_v16 = vor.u32 %v607_v57, %v603_v23  ;;  %v613_v43 = vrot.slane %v611_v37, 5  ;;  %v3157_v36 = vrot.slane %v3919_v27, 9 }
  0x56   : > { %v422_v61 = vsel %vm3926_vm3, %v417_v60, %v421_v63  ;;  %v1199_v41 = vsel %vm4247_vm6, %v3156_v51, %v1198_v48  ;;  %v1200_v47 = vrot.slane %v1198_v48, 4  ;;  %v5423_v2 = vrot.slane %v3922_v28, 5 }
  0x57   : > { %v4268_v12 = vcombine.low %v412_v35, %v422_v61  ;;  %v604_v53 = vsel %vm3926_vm3, %v599_v11, %v603_v23  ;;  %v609_v34 = vrot.slane %v608_v16, 4  ;;  %v5425_v63 = vrot.slane %v3896_v5, 5 }
  0x58   : > { %v1207_v62 = vrot.slane %v5423_v2, 4  ;;  %v5424_v57 = vmov %v5423_v2  ;;  %v5426_v51 = vrot.slane %v3933_v39, 5  ;;  %v4286_v60 = vcombine.low %v3962_v7, %v3971_v20 }
  0x59   : > { %v1206_v27 = vsel %vm4247_vm6, %v3157_v36, %v5424_v57  ;;  %v1202_v37 = vsel %vm4247_vm6, %v1200_v47, %v5425_v63  ;;  %v3158_v23 = vrot.slane %v3962_v7, 9  ;;  %3501 = vmatmul.mubr.msk.bf16.gmra.mxu0 %vm672_vm2, %v4268_v12  ;;  %v614_v5 = vsel %vm3926_vm3, %v609_v34, %v613_v43  ;;  %v4322_v63 = vld [vmem:[%s5350_s1 + $0x30] sm:$0xff]  }
  0x5a   : > { %v1209_v35 = vsel %vm4247_vm6, %v1207_v62, %v5426_v51  ;;  %v3174_v28 = vcombine.low %v1199_v41, %v1202_v37  ;;  %v1212_v39 = vrot.slane %v3971_v20, 5  ;;  %v4296_v11 = vcombine.low %v604_v53, %v614_v5 }
  0x5b   : > { %v4293_v48 = vcombine.low %v1206_v27, %v1209_v35  ;;  %v1215_v16 = vrot.slane %v3978_v24, 5  ;;  %v1219_v61 = vrot.slane %v4019_v15, 5  ;;  %v3159_v43 = vrot.slane %v4012_v0, 9 }
  0x5c   : > { %5427 = vst [vmem:[#allocation25_spill] sm:$0xff] %v4296_v11  ;;  %3556 = vmatprep.mubr.msk.bf16.mxu0 %vm672_vm2, %v3174_v28  ;;  %v1213_v7 = vsel %vm4247_vm6, %v3158_v23, %v1212_v39  ;;  %v1214_v36 = vrot.slane %v1212_v39, 4  ;;  %3517 = vmatmul.mubr.msk.bf16.gmra.mxu1 %vm672_vm2, %v4296_v11  ;;  %v3160_v41 = vrot.slane %v4065_v6, 9  ;;  %v1226_v20 = vrot.slane %v4070_v19, 5 }
  0x5d   : > { %v5428_v24 = vcombine.low %v3890_v3, %v3893_v4  ;;  %v1221_v2 = vrot.slane %v1219_v61, 4  ;;  %v1222_v62 = vrot.slane %v4032_v26, 5  ;;  %v1229_v53 = vrot.slane %v4075_v31, 5 }
  0x5e   : > { %v1216_v47 = vsel %vm4247_vm6, %v1214_v36, %v1215_v16  ;;  %v1228_v57 = vrot.slane %v1226_v20, 4  ;;  %v1233_v27 = vrot.slane %v4113_v52, 5  ;;  %v1220_v3 = vsel %vm4247_vm6, %v3159_v43, %v1219_v61  ;;  %v4345_v16 = vld [vmem:[%s5350_s1 + $0x28] sm:$0xff]  }
  0x5f   : > { %3522 = vmatprep.mubr.msk.bf16.mxu1 %vm672_vm2, %v5428_v24  ;;  %v4316_v34 = vcombine.low %v1213_v7, %v1216_v47  ;;  %v1227_v4 = vsel %vm4247_vm6, %v3160_v41, %v1226_v20  ;;  %v1240_v26 = vrot.slane %v4159_v30, 5  ;;  %v1223_v31 = vsel %vm4247_vm6, %v1221_v2, %v1222_v62 }
  0x60   : > { %v1230_v37 = vsel %vm4247_vm6, %v1228_v57, %v1229_v53  ;;  %v3161_v51 = vrot.slane %v4108_v42, 9  ;;  %v1236_v35 = vrot.slane %v4125_v18, 5  ;;  %v1235_v23 = vrot.slane %v1233_v27, 4 }
  0x61   : > { %3557 = vmatmul.mubr.msk.bf16.vlgmr.msra.gmra.mxu0 %vm672_vm2, %v4293_v48  ;;  %v3162_v5 = vrot.slane %v4148_v25, 9  ;;  %v1242_v28 = vrot.slane %v1240_v26, 4  ;;  %v1243_v39 = vrot.slane %v4167_v33, 5  ;;  %v4355_v18 = vcombine.low %v1227_v4, %v1230_v37 }
  0x62   : > { %3623 = vmatpush3.bf16.msra.mxu0 %v3993_v40  ;;  %3560 = vmatprep.mubr.msk.bf16.mxu0 %vm672_vm2, %v4316_v34  ;;  %v4353_v40 = vcombine.low %v1220_v3, %v1223_v31  ;;  %v1234_v33 = vsel %vm4247_vm6, %v3161_v51, %v1233_v27  ;;  %v1237_v7 = vsel %vm4247_vm6, %v1235_v23, %v1236_v35  ;;  %v1257_v43 = vrot.slane %v3911_v14, 5 }
  0x63   : > { %3690 = vmatprep.subr.bf16.mxu0 %v4322_v63  ;;  %v1241_v36 = vsel %vm4247_vm6, %v3162_v5, %v1240_v26  ;;  %v1244_v61 = vsel %vm4247_vm6, %v1242_v28, %v1243_v39  ;;  %v3163_v41 = vrot.slane %v4196_v49, 9  ;;  %v3164_v20 = vrot.slane %v3903_v10, 9  ;;  %v5429_v5 = vld [vmem:[#allocation16_spill] sm:$0xff] }
  0x64   : > { %3523 = vmatmul.mubr.msk.bf16.vlgmr.msra.gmra.mxu1 %vm672_vm2, %v4259_v44  ;;  %v1254_v24 = vrot.slane %v3908_v13, 5  ;;  %v4373_v47 = vcombine.low %v4012_v0, %v4019_v15  ;;  %v4377_v2 = vcombine.low %v4065_v6, %v4070_v19  ;;  %v4381_v62 = vcombine.low %v4108_v42, %v4113_v52  ;;  %v5430_v39 = vld [vmem:[#allocation20_spill] sm:$0xff] }
  0x65   : > { %3589 = vmatpush3.bf16.msra.mxu1 %v4027_v21  ;;  %3526 = vmatprep.mubr.msk.bf16.mxu1 %vm672_vm2, %v4286_v60  ;;  %v1247_v21 = vrot.slane %v4203_v59, 5  ;;  %v4385_v14 = vcombine.low %v4148_v25, %v4159_v30  ;;  %v4389_v53 = vcombine.low %v1234_v33, %v1237_v7  ;;  %v4391_v57 = vcombine.low %v1241_v36, %v1244_v61  ;;  %v5431_v33 = vld [vmem:[#allocation18_spill] sm:$0xff] }
  0x66   : > { %3656 = vmatprep.subr.bf16.mxu1 %v4345_v16  ;;  %v1250_v0 = vrot.slane %v4208_v45, 5  ;;  %v4396_v15 = vcombine.low %v4040_v38, %v4047_v46  ;;  %v3167_v19 = vrot.slane %v4040_v38, 9  ;;  %v1275_v42 = vrot.slane %v4047_v46, 5 }
  0x67   : > { %v1249_v6 = vrot.slane %v1247_v21, 4  ;;  %v1278_v52 = vrot.slane %v4056_v54, 5  ;;  %v1248_v25 = vsel %vm4247_vm6, %v3163_v41, %v1247_v21  ;;  %v1255_v45 = vsel %vm4247_vm6, %v3164_v20, %v1254_v24  ;;  %v5432_v21 = vld [vmem:[#allocation21_spill] sm:$0xff] }
  0x68   : > { %v1256_v30 = vrot.slane %v1254_v24, 4  ;;  %v4409_v27 = vcombine.low %v4080_v32, %v4089_v1  ;;  %v1276_v38 = vsel %vm4247_vm6, %v3167_v19, %v1275_v42  ;;  %v1277_v46 = vrot.slane %v1275_v42, 4 }
  0x69   : > { %3561 = vmatmul.mubr.msk.bf16.gmra.mxu0 %vm672_vm2, %v4353_v40  ;;  %v3168_v54 = vrot.slane %v4080_v32, 9  ;;  %v1282_v3 = vrot.slane %v4089_v1, 5  ;;  %v1261_v4 = vrot.slane %v3948_v56, 5  ;;  %v1285_v26 = vrot.slane %v4096_v50, 5 }
  0x6a   : > { %3564 = vmatprep.mubr.msk.bf16.mxu0 %vm672_vm2, %v4355_v18  ;;  %v4423_v31 = vcombine.low %v4130_v17, %v4137_v22  ;;  %v3169_v37 = vrot.slane %v4130_v17, 9  ;;  %v1251_v51 = vsel %vm4247_vm6, %v1249_v6, %v1250_v0  ;;  %v1279_v32 = vsel %vm4247_vm6, %v1277_v46, %v1278_v52  ;;  %v5433_v0 = vld [vmem:[#allocation23_spill] sm:$0xff] }
  0x6b   : > { %v1283_v1 = vsel %vm4247_vm6, %v3168_v54, %v1282_v3  ;;  %v1284_v35 = vrot.slane %v1282_v3, 4  ;;  %v4432_v23 = vcombine.low %v1276_v38, %v1279_v32  ;;  %v1289_v50 = vrot.slane %v4137_v22, 5  ;;  %v5434_v54 = vld [vmem:[#allocation8_spill] sm:$0xff] }
  0x6c   : > { %3527 = vmatmul.mubr.msk.bf16.gmra.mxu1 %vm672_vm2, %v4373_v47  ;;  %v1292_v28 = vrot.slane %v5429_v5, 5  ;;  %v4438_v7 = vcombine.low %v5431_v33, %v5430_v39  ;;  %v3170_v36 = vrot.slane %v5431_v33, 9  ;;  %v1296_v61 = vrot.slane %v5430_v39, 5  ;;  %v5436_v39 = vld [vmem:[#allocation4_spill] sm:$0xff] }
  0x6d   : > { %3530 = vmatprep.mubr.msk.bf16.mxu1 %vm672_vm2, %v4377_v2  ;;  %v1286_v17 = vsel %vm4247_vm6, %v1284_v35, %v1285_v26  ;;  %v1299_v41 = vrot.slane %v5432_v21, 5  ;;  %v1290_v22 = vsel %vm4247_vm6, %v3169_v37, %v1289_v50  ;;  %v1291_v24 = vrot.slane %v1289_v50, 4 }
  0x6e   : > { %v4447_v20 = vcombine.low %v1283_v1, %v1286_v17  ;;  %v4453_v6 = vcombine.low %v5433_v0, %v4225_v8  ;;  %v1297_v19 = vsel %vm4247_vm6, %v3170_v36, %v1296_v61  ;;  %v1298_v42 = vrot.slane %v1296_v61, 4  ;;  %v5437_v36 = vld [vmem:[#allocation6_spill] sm:$0xff] }
  0x6f   : > { %v3171_v52 = vrot.slane %v5433_v0, 9  ;;  %v1303_v38 = vrot.slane %v4225_v8, 5  ;;  %v1258_v46 = vsel %vm4247_vm6, %v1256_v30, %v1257_v43  ;;  %v1268_v3 = vrot.slane %v5434_v54, 5  ;;  %v5435_v30 = vld [vmem:[#allocation3_spill] sm:$0xff] }
  0x70   : > { %v1293_v26 = vsel %vm4247_vm6, %v1291_v24, %v1292_v28  ;;  %v1306_v37 = vrot.slane %v4236_v55, 5  ;;  %v1300_v1 = vsel %vm4247_vm6, %v1298_v42, %v1299_v41  ;;  %v4477_v43 = vcombine.low %v1248_v25, %v1251_v51  ;;  %v5438_v41 = vld [vmem:[#allocation9_spill] sm:$0xff] }
  0x71   : > { %3565 = vmatmul.mubr.msk.bf16.gmra.mxu0 %vm672_vm2, %v4389_v53  ;;  %v4469_v32 = vcombine.low %v1290_v22, %v1293_v26  ;;  %v1304_v8 = vsel %vm4247_vm6, %v3171_v52, %v1303_v38  ;;  %v1305_v35 = vrot.slane %v1303_v38, 4  ;;  %v3165_v50 = vrot.slane %v5435_v30, 9  ;;  %v4556_v52 = vld [vmem:[%s3887_s23 + $0xc0] sm:$0xf]  ;;  %v222_v38 = vld [vmem:[%s3887_s23 + $0xc8] sm:$0x1] }
  0x72   : > { %3568 = vmatprep.mubr.msk.bf16.mxu0 %vm672_vm2, %v4391_v57  ;;  %v4480_v55 = vcombine.low %v1297_v19, %v1300_v1  ;;  %v4482_v5 = vcombine.low %v1255_v45, %v1258_v46  ;;  %v1263_v28 = vrot.slane %v1261_v4, 4  ;;  %v1264_v33 = vrot.slane %v5436_v39, 5  ;;  %v5439_v1 = vld [vmem:[#allocation7_spill] sm:$0xff]  ;;  %v5444_v39 = vld [vmem:[#allocation24_spill] sm:$0xff] }
  0x73   : > { %v1307_v17 = vsel %vm4247_vm6, %v1305_v35, %v1306_v37  ;;  %v3166_v61 = vrot.slane %v5437_v36, 9  ;;  %v1270_v21 = vrot.slane %v1268_v3, 4  ;;  %v1271_v22 = vrot.slane %v5438_v41, 5  ;;  %v3828_v35 = vld [vmem:[%s5350_s1 + $0x40] sm:$0xff]  }
  0x74   : > { %3531 = vmatmul.mubr.msk.bf16.gmra.mxu1 %vm672_vm2, %v4381_v62  ;;  %v4489_v24 = vcombine.low %v1304_v8, %v1307_v17  ;;  %v4493_v25 = vcombine.low %v4196_v49, %v4203_v59  ;;  %v4499_v45 = vcombine.low %v3903_v10, %v3908_v13  ;;  %v1262_v51 = vsel %vm4247_vm6, %v3165_v50, %v1261_v4  ;;  %v5441_v50 = vld [vmem:[#allocation13_spill] sm:$0xff]  ;;  %v5447_v17 = vld [vmem:[#allocation12_spill] sm:$0xff] }
  0x75   : > { %3534 = vmatprep.mubr.msk.bf16.mxu1 %vm672_vm2, %v4385_v14  ;;  %v1265_v0 = vsel %vm4247_vm6, %v1263_v28, %v1264_v33  ;;  %v1269_v49 = vsel %vm4247_vm6, %v3166_v61, %v1268_v3  ;;  %v1272_v59 = vsel %vm4247_vm6, %v1270_v21, %v1271_v22  ;;  %v4521_v4 = vcombine.low %v5435_v30, %v3948_v56  ;;  %v4550_v56 = vld [vmem:[%s3887_s23 + $0xc4] sm:$0xf]  ;;  %v5440_v30 = vld [vmem:[#allocation11_spill] sm:$0xff]  ;;  %v3827_v28 = vld [vmem:[%s5350_s1 + $0x38] sm:$0xff]  }
  0x76   : > { %v4515_v10 = vcombine.low %v1262_v51, %v1265_v0  ;;  %v4517_v13 = vcombine.low %v1269_v49, %v1272_v59  ;;  %v4527_v19 = vcombine.low %v5437_v36, %v5434_v54  ;;  %v2051_v42 = vrot.slane %v4550_v56, 5  ;;  %v5446_v33 = vld [vmem:[#allocation10_spill] sm:$0xff] }
  0x77   : > { %v3247_v46 = vrot.slane %v4556_v52, 9  ;;  %v2054_v3 = vrot.slane %v222_v38, 5  ;;  %v5448_v36 = vld [vmem:[#allocation14_spill] sm:$0xff]  ;;  %v1817_v61 = vshrl.u32 %v4556_v52, 16  ;;  %v1820_v21 = vshll.u32 %v4556_v52, 16 }
  0x78   : > { %v2053_v54 = vrot.slane %v2051_v42, 4  ;;  %v1830_v41 = vshrl.u32 %v4550_v56, 16  ;;  %v1826_v22 = vshll.u32 %v4550_v56, 16 }
  0x79   : > { %3569 = vmatmul.mubr.msk.bf16.gmra.mxu0 %vm672_vm2, %v4477_v43  ;;  %v2052_v26 = vsel %vm4247_vm6, %v3247_v46, %v2051_v42  ;;  %v1819_v51 = vrot.slane %v1817_v61, 4  ;;  %v1822_v0 = vrot.slane %v1820_v21, 5  ;;  %v5449_v42 = vld [vmem:[#allocation17_spill] sm:$0xff]  ;;  %v5450_v46 = vld [vmem:[#allocation22_spill] sm:$0xff] }
  0x7a   : > { %3572 = vmatprep.mubr.msk.bf16.mxu0 %vm672_vm2, %v4482_v5  ;;  %v2055_v37 = vsel %vm4247_vm6, %v2053_v54, %v2054_v3  ;;  %v1828_v49 = vrot.slane %v1826_v22, 5  ;;  %v1832_v59 = vrot.slane %v1830_v41, 4  ;;  %v3209_v22 = vcombine.low %v4556_v52, %v4550_v56 }
  0x7b   : > { %v4568_v8 = vcombine.low %v2052_v26, %v2055_v37  ;;  %v1823_v54 = vor.u32 %v1822_v0, %v1819_v51  ;;  %v1836_v26 = vshll.u32 %v222_v38, 16 }
  0x7c   : > { %3535 = vmatmul.mubr.msk.bf16.gmra.mxu1 %vm672_vm2, %v4493_v25  ;;  %v1833_v3 = vor.u32 %v1832_v59, %v1828_v49 }
  0x7d   : > { %3538 = vmatprep.mubr.msk.bf16.mxu1 %vm672_vm2, %v4499_v45  ;;  %v1824_v37 = vrot.slane %v1823_v54, 4  ;;  %v1838_v61 = vrot.slane %v1836_v26, 5  ;;  %v4754_v54 = vld [vmem:[%s3887_s23 + $0xd0] sm:$0xf] }
  0x7f   : > { %v1829_v21 = vsel %vm3926_vm3, %v1824_v37, %v1828_v49 }
  0x81   : > { %3573 = vmatmul.mubr.msk.bf16.gmra.mxu0 %vm672_vm2, %v4515_v10 }
  0x82   : > { %3576 = vmatprep.mubr.msk.bf16.mxu0 %vm672_vm2, %v4517_v13 }
  0x84   : > { %3539 = vmatmul.mubr.msk.bf16.gmra.mxu1 %vm672_vm2, %v4521_v4 }
  0x85   : > { %3542 = vmatprep.mubr.msk.bf16.mxu1 %vm672_vm2, %v4527_v19 }
  0x89   : > { %3577 = vmatmul.mubr.msk.bf16.gmra.mxu0 %vm672_vm2, %v4432_v23 }
  0x8a   : > { %3580 = vmatprep.mubr.msk.bf16.mxu0 %vm672_vm2, %v4447_v20 }
  0x8c   : > { %3543 = vmatmul.mubr.msk.bf16.gmra.mxu1 %vm672_vm2, %v4396_v15 }
  0x8d   : > { %3546 = vmatprep.mubr.msk.bf16.mxu1 %vm672_vm2, %v4409_v27 }
  0x91   : > { %3581 = vmatmul.mubr.msk.bf16.gmra.mxu0 %vm672_vm2, %v4469_v32 }
  0x92   : > { %3584 = vmatprep.mubr.msk.bf16.mxu0 %vm672_vm2, %v4480_v55 }
  0x94   : > { %3547 = vmatmul.mubr.msk.bf16.gmra.mxu1 %vm672_vm2, %v4423_v31 }
  0x95   : > { %3550 = vmatprep.mubr.msk.bf16.mxu1 %vm672_vm2, %v4438_v7 }
  0x99   : > { %3585 = vmatmul.mubr.msk.bf16.gmra.mxu0 %vm672_vm2, %v4489_v24 }
  0x9a   : > { %3624 = vmatprep.mubr.msk.bf16.mxu0 %vm672_vm2, %v5439_v1  ;;  %v1834_v1 = vrot.slane %v1833_v3, 4 }
  0x9c   : > { %3551 = vmatmul.mubr.msk.bf16.gmra.mxu1 %vm672_vm2, %v4453_v6  ;;  %v1839_v38 = vsel %vm3926_vm3, %v1834_v1, %v1838_v61 }
  0x9d   : > { %3590 = vmatprep.mubr.msk.bf16.mxu1 %vm672_vm2, %v4259_v44  ;;  %v5442_v44 = vld [vmem:[#allocation15_spill] sm:$0xff]  ;;  %v4646_v41 = vcombine.low %v1829_v21, %v1839_v38 }
  0x9f   : > { %5451 = vst [vmem:[#allocation16_spill] sm:$0xff] %v4646_v41 }
  0xa1   : > { %3625 = vmatmul.mubr.msk.bf16.vlgmr.msra.gmra.mxu0 %vm672_vm2, %v5440_v30 }
  0xa2   : > { %3691 = vmatpush3.bf16.msra.mxu0 %v4322_v63  ;;  %3628 = vmatprep.mubr.msk.bf16.mxu0 %vm672_vm2, %v5441_v50  ;;  %v5443_v63 = vld [vmem:[#allocation19_spill] sm:$0xff] }
  0xa3   : > { %3758 = vmatprep.subr.bf16.mxu0 %v3828_v35 }
  0xa4   : > { %3591 = vmatmul.mubr.msk.bf16.vlgmr.msra.gmra.mxu1 %vm672_vm2, %v4286_v60 }
  0xa5   : > { %3657 = vmatpush3.bf16.msra.mxu1 %v4345_v16  ;;  %3594 = vmatprep.mubr.msk.bf16.mxu1 %vm672_vm2, %v4373_v47  ;;  %v5445_v16 = vld [vmem:[#allocation5_spill] sm:$0xff] }
  0xa6   : > { %3724 = vmatprep.subr.bf16.mxu1 %v3827_v28 }
  0xa9   : > { %3629 = vmatmul.mubr.msk.bf16.gmra.mxu0 %vm672_vm2, %v5442_v44 }
  0xaa   : > { %3632 = vmatprep.mubr.msk.bf16.mxu0 %vm672_vm2, %v5443_v63 }
  0xac   : > { %3595 = vmatmul.mubr.msk.bf16.gmra.mxu1 %vm672_vm2, %v4377_v2 }
  0xad   : > { %3598 = vmatprep.mubr.msk.bf16.mxu1 %vm672_vm2, %v4381_v62 }
  0xb1   : > { %3633 = vmatmul.mubr.msk.bf16.gmra.mxu0 %vm672_vm2, %v5444_v39 }
  0xb2   : > { %3636 = vmatprep.mubr.msk.bf16.mxu0 %vm672_vm2, %v4268_v12 }
  0xb4   : > { %3599 = vmatmul.mubr.msk.bf16.gmra.mxu1 %vm672_vm2, %v4385_v14 }
  0xb5   : > { %3602 = vmatprep.mubr.msk.bf16.mxu1 %vm672_vm2, %v4493_v25 }
  0xb9   : > { %3637 = vmatmul.mubr.msk.bf16.gmra.mxu0 %vm672_vm2, %v5445_v16 }
  0xba   : > { %3640 = vmatprep.mubr.msk.bf16.mxu0 %vm672_vm2, %v5446_v33 }
  0xbc   : > { %3603 = vmatmul.mubr.msk.bf16.gmra.mxu1 %vm672_vm2, %v4499_v45 }
  0xbd   : > { %3606 = vmatprep.mubr.msk.bf16.mxu1 %vm672_vm2, %v4521_v4 }
  0xc1   : > { %3641 = vmatmul.mubr.msk.bf16.gmra.mxu0 %vm672_vm2, %v5447_v17 }
  0xc2   : > { %3644 = vmatprep.mubr.msk.bf16.mxu0 %vm672_vm2, %v5448_v36 }
  0xc4   : > { %3607 = vmatmul.mubr.msk.bf16.gmra.mxu1 %vm672_vm2, %v4527_v19 }
  0xc5   : > { %3610 = vmatprep.mubr.msk.bf16.mxu1 %vm672_vm2, %v4396_v15 }
  0xc9   : > { %3645 = vmatmul.mubr.msk.bf16.gmra.mxu0 %vm672_vm2, %v5449_v42 }
  0xca   : > { %3648 = vmatprep.mubr.msk.bf16.mxu0 %vm672_vm2, %v5450_v46 }
  0xcc   : > { %3611 = vmatmul.mubr.msk.bf16.gmra.mxu1 %vm672_vm2, %v4409_v27 }
  0xcd   : > { %3614 = vmatprep.mubr.msk.bf16.mxu1 %vm672_vm2, %v4423_v31 }
  0xd1   : > { %3649 = vmatmul.mubr.msk.bf16.gmra.mxu0 %vm672_vm2, %v4242_v9 }
  0xd2   : > { %3652 = vmatprep.mubr.msk.bf16.mxu0 %vm672_vm2, %v4296_v11 }
  0xd4   : > { %3615 = vmatmul.mubr.msk.bf16.gmra.mxu1 %vm672_vm2, %v4438_v7 }
  0xd5   : > { %3618 = vmatprep.mubr.msk.bf16.mxu1 %vm672_vm2, %v4453_v6 }
  0xd9   : > { %3653 = vmatmul.mubr.msk.bf16.gmra.mxu0 %vm672_vm2, %v4646_v41 }
  0xda   : > { %3692 = vmatprep.mubr.msk.bf16.mxu0 %vm672_vm2, %v4286_v60 }
  0xdc   : > { %3619 = vmatmul.mubr.msk.bf16.gmra.mxu1 %vm672_vm2, %v3209_v22 }
  0xdd   : > { %3658 = vmatprep.mubr.msk.bf16.mxu1 %vm672_vm2, %v4293_v48 }
  0xe1   : > { %3693 = vmatmul.mubr.msk.bf16.vlgmr.msra.gmra.mxu0 %vm672_vm2, %v4373_v47 }
  0xe2   : > { %3759 = vmatpush3.bf16.msra.mxu0 %v3828_v35  ;;  %3696 = vmatprep.mubr.msk.bf16.mxu0 %vm672_vm2, %v4377_v2 }
  0xe4   : > { %3659 = vmatmul.mubr.msk.bf16.vlgmr.msra.gmra.mxu1 %vm672_vm2, %v4316_v34 }
  0xe5   : > { %3725 = vmatpush3.bf16.msra.mxu1 %v3827_v28  ;;  %3662 = vmatprep.mubr.msk.bf16.mxu1 %vm672_vm2, %v4353_v40  ;;  %v4667_v60 = vpop.f32.mrf.mxu0 }
  0xe7   : > { %v4677_v47 = vpop.f32.mrf.mxu0 }
  0xe9   : > { %3697 = vmatmul.mubr.msk.bf16.gmra.mxu0 %vm672_vm2, %v4381_v62  ;;  %v4683_v62 = vpop.f32.mrf.mxu0 }
  0xea   : > { %3700 = vmatprep.mubr.msk.bf16.mxu0 %vm672_vm2, %v4385_v14  ;;  %v4673_v48 = vpop.f32.mrf.mxu1 }
  0xeb   : > { %v4693_v56 = vpop.f32.mrf.mxu0 }
  0xec   : > { %3663 = vmatmul.mubr.msk.bf16.gmra.mxu1 %vm672_vm2, %v4355_v18  ;;  %v4679_v2 = vpop.f32.mrf.mxu1 }
  0xed   : > { %3666 = vmatprep.mubr.msk.bf16.mxu1 %vm672_vm2, %v4389_v53 }
  0xee   : > { %v4689_v14 = vpop.f32.mrf.mxu1 }
  0xf0   : > { %v4695_v52 = vpop.f32.mrf.mxu1 }
  0xf1   : > { %3701 = vmatmul.mubr.msk.bf16.gmra.mxu0 %vm672_vm2, %v4493_v25 }
  0xf2   : > { %3704 = vmatprep.mubr.msk.bf16.mxu0 %vm672_vm2, %v4499_v45 }
  0xf4   : > { %3667 = vmatmul.mubr.msk.bf16.gmra.mxu1 %vm672_vm2, %v4391_v57 }
  0xf5   : > { %3670 = vmatprep.mubr.msk.bf16.mxu1 %vm672_vm2, %v4477_v43 }
  0xf6   : > { %v4699_v25 = vpop.f32.mrf.mxu0 }
  0xf8   : > { %v4709_v35 = vpop.f32.mrf.mxu0 }
  0xf9   : > { %3705 = vmatmul.mubr.msk.bf16.gmra.mxu0 %vm672_vm2, %v4521_v4 }
  0xfa   : > { %3708 = vmatprep.mubr.msk.bf16.mxu0 %vm672_vm2, %v4527_v19  ;;  %v4705_v45 = vpop.f32.mrf.mxu1  ;;  %v4715_v4 = vpop.f32.mrf.mxu0 }
  0xfc   : > { %3671 = vmatmul.mubr.msk.bf16.gmra.mxu1 %vm672_vm2, %v4482_v5  ;;  %v4711_v28 = vpop.f32.mrf.mxu1  ;;  %v4725_v51 = vpop.f32.mrf.mxu0 }
  0xfd   : > { %3674 = vmatprep.mubr.msk.bf16.mxu1 %vm672_vm2, %v4515_v10 }
  0xfe   : > { %v4721_v19 = vpop.f32.mrf.mxu1 }
 0x100   : > { %v4727_v0 = vpop.f32.mrf.mxu1 }
 0x101   : > { %3709 = vmatmul.mubr.msk.bf16.gmra.mxu0 %vm672_vm2, %v4396_v15 }
 0x102   : > { %3712 = vmatprep.mubr.msk.bf16.mxu0 %vm672_vm2, %v4409_v27 }
 0x104   : > { %3675 = vmatmul.mubr.msk.bf16.gmra.mxu1 %vm672_vm2, %v4517_v13 }
 0x105   : > { %3678 = vmatprep.mubr.msk.bf16.mxu1 %vm672_vm2, %v4432_v23 }
 0x107   : > { %v4731_v15 = vpop.f32.mrf.mxu0 }
 0x109   : > { %3713 = vmatmul.mubr.msk.bf16.gmra.mxu0 %vm672_vm2, %v4423_v31  ;;  %v4741_v49 = vpop.f32.mrf.mxu0 }
 0x10a   : > { %3716 = vmatprep.mubr.msk.bf16.mxu0 %vm672_vm2, %v4438_v7  ;;  %v4751_v7 = vld [vmem:[%s3887_s23 + $0xcc] sm:$0xf] }
 0x10b   : > { %v4747_v31 = vpop.f32.mrf.mxu0 }
 0x10c   : > { %3679 = vmatmul.mubr.msk.bf16.gmra.mxu1 %vm672_vm2, %v4447_v20  ;;  %v4737_v27 = vpop.f32.mrf.mxu1 }
 0x10d   : > { %5452 = vst [vmem:[#allocation20_spill] sm:$0xff] %v4737_v27  ;;  %3682 = vmatprep.mubr.msk.bf16.mxu1 %vm672_vm2, %v4469_v32  ;;  %v4760_v26 = vpop.f32.mrf.mxu0 }
 0x10e   : > { %v4743_v59 = vpop.f32.mrf.mxu1 }
 0x10f   : > { %5453 = vst [vmem:[#allocation18_spill] sm:$0xff] %v4743_v59 }
 0x110   : > { %v4758_v3 = vpop.f32.mrf.mxu1 }
 0x111   : > { %3717 = vmatmul.mubr.msk.bf16.gmra.mxu0 %vm672_vm2, %v4453_v6  ;;  %5454 = vst [vmem:[#allocation21_spill] sm:$0xff] %v4758_v3  ;;  %v3270_v6 = vcombine.low %v4751_v7, %v4754_v54 }
 0x112   : > { %3720 = vmatprep.mubr.msk.bf16.mxu0 %vm672_vm2, %v3209_v22  ;;  %v4766_v37 = vpop.f32.mrf.mxu1 }
 0x113   : > { %5455 = vst [vmem:[#allocation23_spill] sm:$0xff] %v4766_v37 }
 0x114   : > { %3683 = vmatmul.mubr.msk.bf16.gmra.mxu1 %vm672_vm2, %v4480_v55 }
 0x115   : > { %3686 = vmatprep.mubr.msk.bf16.mxu1 %vm672_vm2, %v4489_v24 }
 0x119   : > { %v4768_v1 = vpop.f32.mrf.mxu0  ;;  %3721 = vmatmul.mubr.msk.bf16.gmra.mxu0 %vm672_vm2, %v3270_v6 }
 0x11a   : > { %3760 = vmatprep.mubr.msk.bf16.mxu0 %vm672_vm2, %v4316_v34 }
 0x11b   : > { %v4773_v61 = vpop.f32.mrf.mxu0 }
 0x11c   : > { %v4775_v21 = vpop.f32.mrf.mxu1  ;;  %3687 = vmatmul.mubr.msk.bf16.gmra.mxu1 %vm672_vm2, %v4568_v8 }
 0x11d   : > { %5456 = vst [vmem:[#allocation8_spill] sm:$0xff] %v4775_v21  ;;  %v4779_v38 = vpop.f32.mrf.mxu0  ;;  %3726 = vmatprep.mubr.msk.bf16.mxu1 %vm672_vm2, %v5440_v30 }
 0x11e   : > { %v4783_v22 = vpop.f32.mrf.mxu1 }
 0x11f   : > { %5457 = vst [vmem:[#allocation3_spill] sm:$0xff] %v4783_v22  ;;  %v4785_v37 = vpop.f32.mrf.mxu0 }
 0x120   : > { %v4787_v6 = vpop.f32.mrf.mxu1 }
 0x121   : > { %5458 = vst [vmem:[#allocation4_spill] sm:$0xff] %v4787_v6  ;;  %v3558_v3 = vpop.f32.mrf.mxu0  ;;  %3761 = vmatmul.mubr.msk.bf16.vlgmr.msra.gmra.mxu0 %vm672_vm2, %v4353_v40 }
 0x122   : > { %v4791_v34 = vpop.f32.mrf.mxu1  ;;  %3764 = vmatprep.mubr.msk.bf16.mxu0 %vm672_vm2, %v4355_v18 }
 0x123   : > { %5459 = vst [vmem:[#allocation6_spill] sm:$0xff] %v4791_v34  ;;  %v1447_v21 = vpop.f32.mrf.mxu0 }
 0x124   : > { %v3524_v59 = vpop.f32.mrf.mxu1  ;;  %3727 = vmatmul.mubr.msk.bf16.vlgmr.msra.gmra.mxu1 %vm672_vm2, %v5441_v50 }
 0x125   : > { %v1059_v30 = vadd.f32 %v3524_v59, %v4667_v60  ;;  %v3559_v22 = vpop.f32.mrf.mxu0  ;;  %3730 = vmatprep.mubr.msk.bf16.mxu1 %vm672_vm2, %v5442_v44 }
 0x126   : > { %v1050_v6 = vpop.f32.mrf.mxu1 }
 0x127   : > { %v4800_v41 = vadd.f32 %v3558_v3, %v1059_v30  ;;  %v1051_v40 = vadd.f32 %v1050_v6, %v4677_v47  ;;  %v1450_v34 = vpop.f32.mrf.mxu0 }
 0x128   : > { %v3525_v27 = vpop.f32.mrf.mxu1 }
 0x129   : > { %v4803_v29 = vadd.f32 %v1447_v21, %v1051_v40  ;;  %v1062_v18 = vadd.f32 %v3525_v27, %v4683_v62  ;;  %v3562_v11 = vpop.f32.mrf.mxu0  ;;  %3765 = vmatmul.mubr.msk.bf16.gmra.mxu0 %vm672_vm2, %v4389_v53 }
 0x12a   : > { %v1053_v50 = vpop.f32.mrf.mxu1  ;;  %3768 = vmatprep.mubr.msk.bf16.mxu0 %vm672_vm2, %v4391_v57 }
 0x12b   : > { %v4810_v44 = vadd.f32 %v3559_v22, %v1062_v18  ;;  %v1054_v60 = vadd.f32 %v1053_v50, %v4693_v56  ;;  %v1463_v59 = vpop.f32.mrf.mxu0 }
 0x12c   : > { %v3528_v47 = vpop.f32.mrf.mxu1  ;;  %3731 = vmatmul.mubr.msk.bf16.gmra.mxu1 %vm672_vm2, %v5443_v63 }
 0x12d   : > { %v4815_v3 = vadd.f32 %v1450_v34, %v1054_v60  ;;  %v1075_v62 = vadd.f32 %v3528_v47, %v4699_v25  ;;  %v3563_v27 = vpop.f32.mrf.mxu0  ;;  %3734 = vmatprep.mubr.msk.bf16.mxu1 %vm672_vm2, %v5444_v39 }
 0x12e   : > { %v1066_v53 = vpop.f32.mrf.mxu1 }
 0x12f   : > { %v4820_v21 = vadd.f32 %v3562_v11, %v1075_v62  ;;  %v1067_v57 = vadd.f32 %v1066_v53, %v4709_v35  ;;  %v1466_v22 = vpop.f32.mrf.mxu0 }
 0x130   : > { %v3529_v56 = vpop.f32.mrf.mxu1 }
 0x131   : > { %v4823_v6 = vadd.f32 %v1463_v59, %v1067_v57  ;;  %v1078_v30 = vadd.f32 %v3529_v56, %v4715_v4  ;;  %v3566_v63 = vpop.f32.mrf.mxu0  ;;  %3769 = vmatmul.mubr.msk.bf16.gmra.mxu0 %vm672_vm2, %v4477_v43 }
 0x132   : > { %v1069_v25 = vpop.f32.mrf.mxu1  ;;  %3772 = vmatprep.mubr.msk.bf16.mxu0 %vm672_vm2, %v4482_v5 }
 0x133   : > { %v4830_v39 = vadd.f32 %v3563_v27, %v1078_v30  ;;  %v1070_v11 = vadd.f32 %v1069_v25, %v4725_v51  ;;  %v1479_v34 = vpop.f32.mrf.mxu0 }
 0x134   : > { %v3532_v35 = vpop.f32.mrf.mxu1  ;;  %3735 = vmatmul.mubr.msk.bf16.gmra.mxu1 %vm672_vm2, %v4268_v12 }
 0x135   : > { %v4835_v40 = vadd.f32 %v1466_v22, %v1070_v11  ;;  %v1091_v4 = vadd.f32 %v3532_v35, %v4731_v15  ;;  %v3567_v18 = vpop.f32.mrf.mxu0  ;;  %3738 = vmatprep.mubr.msk.bf16.mxu1 %vm672_vm2, %v5445_v16 }
 0x136   : > { %v1082_v43 = vpop.f32.mrf.mxu1 }
 0x137   : > { %v4840_v50 = vadd.f32 %v3566_v63, %v1091_v4  ;;  %v1083_v5 = vadd.f32 %v1082_v43, %v4741_v49  ;;  %v1482_v60 = vpop.f32.mrf.mxu0 }
 0x138   : > { %v3533_v51 = vpop.f32.mrf.mxu1 }
 0x139   : > { %v4843_v59 = vadd.f32 %v1479_v34, %v1083_v5  ;;  %v1094_v47 = vadd.f32 %v3533_v51, %v4747_v31  ;;  %v3570_v12 = vpop.f32.mrf.mxu0  ;;  %3773 = vmatmul.mubr.msk.bf16.gmra.mxu0 %vm672_vm2, %v4515_v10  ;;  %v2478_v34 = vshll.u32 %v4751_v7, 16 }
 0x13a   : > { %v1085_v15 = vpop.f32.mrf.mxu1  ;;  %3776 = vmatprep.mubr.msk.bf16.mxu0 %vm672_vm2, %v4517_v13 }
 0x13b   : > { %v4850_v16 = vadd.f32 %v3567_v18, %v1094_v47  ;;  %v1086_v62 = vadd.f32 %v1085_v15, %v4760_v26  ;;  %v1495_v27 = vpop.f32.mrf.mxu0  ;;  %v2480_v51 = vrot.slane %v2478_v34, 5 }
 0x13c   : > { %v3536_v49 = vpop.f32.mrf.mxu1  ;;  %3739 = vmatmul.mubr.msk.bf16.gmra.mxu1 %vm672_vm2, %v5446_v33 }
 0x13d   : > { %v4855_v53 = vadd.f32 %v1482_v60, %v1086_v62  ;;  %v1107_v31 = vadd.f32 %v3536_v49, %v4768_v1  ;;  %v3571_v57 = vpop.f32.mrf.mxu0  ;;  %3742 = vmatprep.mubr.msk.bf16.mxu1 %vm672_vm2, %v5447_v17 }
 0x13e   : > { %v1098_v10 = vpop.f32.mrf.mxu1 }
 0x13f   : > { %v4860_v22 = vadd.f32 %v3570_v12, %v1107_v31  ;;  %v1099_v13 = vadd.f32 %v1098_v10, %v4773_v61  ;;  %v1498_v56 = vpop.f32.mrf.mxu0  ;;  %v2475_v61 = vshrl.u32 %v4751_v7, 16 }
 0x140   : > { %v3537_v26 = vpop.f32.mrf.mxu1 }
 0x141   : > { %v4863_v30 = vadd.f32 %v1495_v27, %v1099_v13  ;;  %v1110_v63 = vadd.f32 %v3537_v26, %v4779_v38  ;;  %v3574_v33 = vpop.f32.mrf.mxu0  ;;  %3777 = vmatmul.mubr.msk.bf16.gmra.mxu0 %vm672_vm2, %v4432_v23  ;;  %v2484_v38 = vshll.u32 %v4754_v54, 16  ;;  %v2488_v23 = vshrl.u32 %v4754_v54, 16 }
 0x142   : > { %v1101_v1 = vpop.f32.mrf.mxu1  ;;  %3780 = vmatprep.mubr.msk.bf16.mxu0 %vm672_vm2, %v4447_v20 }
 0x143   : > { %v4870_v17 = vadd.f32 %v3571_v57, %v1110_v63  ;;  %v1102_v25 = vadd.f32 %v1101_v1, %v4785_v37  ;;  %v1511_v11 = vpop.f32.mrf.mxu0  ;;  %v2486_v12 = vrot.slane %v2484_v38, 5  ;;  %v2490_v15 = vrot.slane %v2488_v23, 4 }
 0x144   : > { %v3540_v35 = vpop.f32.mrf.mxu1  ;;  %3743 = vmatmul.mubr.msk.bf16.gmra.mxu1 %vm672_vm2, %v5448_v36  ;;  %v2477_v36 = vrot.slane %v2475_v61, 4  ;;  %v3308_v63 = vrot.slane %v4751_v7, 9 }
 0x145   : > { %v4879_v4 = vadd.f32 %v1498_v56, %v1102_v25  ;;  %v1123_v20 = vadd.f32 %v3540_v35, %v4673_v48  ;;  %v3575_v18 = vpop.f32.mrf.mxu0  ;;  %3746 = vmatprep.mubr.msk.bf16.mxu1 %vm672_vm2, %v5449_v42  ;;  %v2709_v42 = vrot.slane %v4754_v54, 5 }
 0x146   : > { %v1114_v37 = vpop.f32.mrf.mxu1 }
 0x147   : > { %v4884_v43 = vadd.f32 %v3574_v33, %v1123_v20  ;;  %v1115_v5 = vadd.f32 %v1114_v37, %v4679_v2  ;;  %v1514_v60 = vpop.f32.mrf.mxu0  ;;  %v225_v2 = vld [vmem:[%s3887_s23 + $0xd4] sm:$0x1] }
 0x148   : > { %v3541_v47 = vpop.f32.mrf.mxu1  ;;  %v2494_v26 = vshll.u32 %v225_v2, 16  ;;  %v2712_v1 = vrot.slane %v225_v2, 5 }
 0x149   : > { %v4887_v62 = vadd.f32 %v1511_v11, %v1115_v5  ;;  %v1126_v48 = vadd.f32 %v3541_v47, %v4689_v14  ;;  %v3578_v27 = vpop.f32.mrf.mxu0  ;;  %3781 = vmatmul.mubr.msk.bf16.gmra.mxu0 %vm672_vm2, %v4469_v32  ;;  %v2481_v14 = vor.u32 %v2480_v51, %v2477_v36 }
 0x14a   : > { %v1117_v49 = vpop.f32.mrf.mxu1  ;;  %3784 = vmatprep.mubr.msk.bf16.mxu0 %vm672_vm2, %v4480_v55  ;;  %v2491_v55 = vor.u32 %v2490_v15, %v2486_v12  ;;  %v2496_v7 = vrot.slane %v2494_v26, 5 }
 0x14b   : > { %v4896_v31 = vadd.f32 %v3575_v18, %v1126_v48  ;;  %v1118_v57 = vadd.f32 %v1117_v49, %v4695_v52  ;;  %v1527_v10 = vpop.f32.mrf.mxu0  ;;  %v2711_v52 = vrot.slane %v2709_v42, 4  ;;  %v2482_v34 = vrot.slane %v2481_v14, 4  ;;  %v5463_v48 = vld [vmem:[#allocation16_spill] sm:$0xff]  ;;  %v5464_v49 = vld [vmem:[#allocation18_spill] sm:$0xff]  ;;  %v5465_v14 = vld [vmem:[#allocation21_spill] sm:$0xff] }
 0x14c   : > { %v3544_v13 = vpop.f32.mrf.mxu1  ;;  %3747 = vmatmul.mubr.msk.bf16.gmra.mxu1 %vm672_vm2, %v5450_v46 }
 0x14d   : > { %v4901_v56 = vadd.f32 %v1514_v60, %v1118_v57  ;;  %v1139_v32 = vadd.f32 %v3544_v13, %v4705_v45  ;;  %v3579_v54 = vpop.f32.mrf.mxu0  ;;  %3750 = vmatprep.mubr.msk.bf16.mxu1 %vm672_vm2, %v4242_v9  ;;  %v2492_v9 = vrot.slane %v2491_v55, 4  ;;  %v2713_v20 = vsel %vm4247_vm6, %v2711_v52, %v2712_v1  ;;  %v5460_v60 = vld [vmem:[#allocation25_spill] sm:$0xff] }
 0x14e   : > { %v1130_v33 = vpop.f32.mrf.mxu1  ;;  %v2487_v36 = vsel %vm3926_vm3, %v2482_v34, %v2486_v12 }
 0x14f   : > { %v4907_v25 = vadd.f32 %v3578_v27, %v1139_v32  ;;  %v1131_v46 = vadd.f32 %v1130_v33, %v4711_v28  ;;  %v1530_v11 = vpop.f32.mrf.mxu0  ;;  %v2710_v28 = vsel %vm4247_vm6, %v3308_v63, %v2709_v42  ;;  %v2497_v58 = vsel %vm3926_vm3, %v2492_v9, %v2496_v7  ;;  %v5466_v63 = vld [vmem:[#allocation23_spill] sm:$0xff] }
 0x150   : > { %v3545_v61 = vpop.f32.mrf.mxu1  ;;  %v3290_v12 = vcombine.low %v2487_v36, %v2497_v58  ;;  %v5468_v9 = vld [vmem:[#allocation3_spill] sm:$0xff]  ;;  %v5470_v36 = vld [vmem:[#allocation6_spill] sm:$0xff] }
 0x151   : > { %v4910_v35 = vadd.f32 %v1527_v10, %v1131_v46  ;;  %v1142_v45 = vadd.f32 %v3545_v61, %v4721_v19  ;;  %v3582_v38 = vpop.f32.mrf.mxu0  ;;  %3785 = vmatmul.mubr.msk.bf16.gmra.mxu0 %vm672_vm2, %v4489_v24 }
 0x152   : > { %v1133_v23 = vpop.f32.mrf.mxu1  ;;  %3788 = vmatprep.mubr.msk.bf16.mxu0 %vm672_vm2, %v4568_v8  ;;  %v5462_v8 = vld [vmem:[#allocation20_spill] sm:$0xff] }
 0x153   : > { %v4921_v18 = vadd.f32 %v3579_v54, %v1142_v45  ;;  %v1134_v19 = vadd.f32 %v1133_v23, %v4727_v0  ;;  %v1543_v37 = vpop.f32.mrf.mxu0  ;;  %v3311_v0 = vcombine.low %v2710_v28, %v2713_v20 }
 0x154   : > { %v3548_v5 = vpop.f32.mrf.mxu1  ;;  %3751 = vmatmul.mubr.msk.bf16.gmra.mxu1 %vm672_vm2, %v5460_v60 }
 0x155   : > { %v4928_v51 = vadd.f32 %v1530_v11, %v1134_v19  ;;  %v1155_v47 = vadd.f32 %v3548_v5, %v5462_v8  ;;  %v3583_v15 = vpop.f32.mrf.mxu0  ;;  %3754 = vmatprep.mubr.msk.bf16.mxu1 %vm672_vm2, %v5463_v48  ;;  %v5467_v11 = vld [vmem:[#allocation8_spill] sm:$0xff] }
 0x156   : > { %v1146_v27 = vpop.f32.mrf.mxu1  ;;  %v5469_v19 = vld [vmem:[#allocation4_spill] sm:$0xff] }
 0x157   : > { %v4935_v42 = vadd.f32 %v3582_v38, %v1155_v47  ;;  %v1147_v2 = vadd.f32 %v1146_v27, %v5464_v49  ;;  %v1546_v57 = vpop.f32.mrf.mxu0 }
 0x158   : > { %v3549_v10 = vpop.f32.mrf.mxu1 }
 0x159   : > { %v4938_v13 = vadd.f32 %v1543_v37, %v1147_v2  ;;  %v1158_v32 = vadd.f32 %v3549_v10, %v5465_v14  ;;  %v3586_v54 = vpop.f32.mrf.mxu0  ;;  %3789 = vmatmul.mubr.msk.bf16.gmra.mxu0 %vm672_vm2, %v3311_v0 }
 0x15a   : > { %v1149_v55 = vpop.f32.mrf.mxu1 }
 0x15b   : > { %v4942_v26 = vadd.f32 %v3583_v15, %v1158_v32  ;;  %v1150_v33 = vadd.f32 %v1149_v55, %v5466_v63  ;;  %v1559_v52 = vpop.f32.mrf.mxu0 }
 0x15c   : > { %v3552_v1 = vpop.f32.mrf.mxu1  ;;  %3755 = vmatmul.mubr.msk.bf16.gmra.mxu1 %vm672_vm2, %v3290_v12 }
 0x15d   : > { %v4946_v46 = vadd.f32 %v1546_v57, %v1150_v33  ;;  %v1171_v61 = vadd.f32 %v3552_v1, %v5467_v11  ;;  %v3587_v34 = vpop.f32.mrf.mxu0 }
 0x15e   : > { %v1162_v45 = vpop.f32.mrf.mxu1 }
 0x15f   : > { %v4949_v38 = vadd.f32 %v3586_v54, %v1171_v61  ;;  %v1163_v7 = vadd.f32 %v1162_v45, %v5468_v9  ;;  %v1562_v23 = vpop.f32.mrf.mxu0 }
 0x160   : > { %v3553_v28 = vpop.f32.mrf.mxu1 }
 0x161   : > { %v4952_v20 = vadd.f32 %v1559_v52, %v1163_v7  ;;  %v1174_v37 = vadd.f32 %v3553_v28, %v5469_v19  ;;  %v3626_v5 = vpop.f32.mrf.mxu0 }
 0x162   : > { %v1165_v60 = vpop.f32.mrf.mxu1 }
 0x163   : > { %v4955_v24 = vadd.f32 %v3587_v34, %v1174_v37  ;;  %v1166_v8 = vadd.f32 %v1165_v60, %v5470_v36  ;;  %v1889_v47 = vpop.f32.mrf.mxu0 }
 0x164   : > { %v3592_v15 = vpop.f32.mrf.mxu1 }
 0x165   : > { %v4958_v48 = vadd.f32 %v1562_v23, %v1166_v8  ;;  %v1786_v58 = vadd.f32 %v3592_v15, %v4800_v41  ;;  %v3627_v0 = vpop.f32.mrf.mxu0 }
 0x166   : > { %v1657_v27 = vpop.f32.mrf.mxu1 }
 0x167   : > { %v4961_v49 = vadd.f32 %v3626_v5, %v1786_v58  ;;  %v1784_v2 = vadd.f32 %v1657_v27, %v4803_v29  ;;  %v1892_v57 = vpop.f32.mrf.mxu0 }
 0x168   : > { %v3593_v10 = vpop.f32.mrf.mxu1 }
 0x169   : > { %v4964_v12 = vadd.f32 %v1889_v47, %v1784_v2  ;;  %v1787_v14 = vadd.f32 %v3593_v10, %v4810_v44  ;;  %v3630_v32 = vpop.f32.mrf.mxu0 }
 0x16a   : > { %v1660_v54 = vpop.f32.mrf.mxu1 }
 0x16b   : > { %v4967_v55 = vadd.f32 %v3627_v0, %v1787_v14  ;;  %v1785_v63 = vadd.f32 %v1660_v54, %v4815_v3  ;;  %v1905_v33 = vpop.f32.mrf.mxu0 }
 0x16c   : > { %v3596_v41 = vpop.f32.mrf.mxu1 }
 0x16d   : > { %v4970_v52 = vadd.f32 %v1892_v57, %v1785_v63  ;;  %v1790_v1 = vadd.f32 %v3596_v41, %v4820_v21  ;;  %v3631_v11 = vpop.f32.mrf.mxu0 }
 0x16e   : > { %v1673_v29 = vpop.f32.mrf.mxu1 }
 0x16f   : > { %v4973_v61 = vadd.f32 %v3630_v32, %v1790_v1  ;;  %v1788_v34 = vadd.f32 %v1673_v29, %v4823_v6  ;;  %v1908_v45 = vpop.f32.mrf.mxu0 }
 0x170   : > { %v3597_v44 = vpop.f32.mrf.mxu1 }
 0x171   : > { %v4976_v9 = vadd.f32 %v1905_v33, %v1788_v34  ;;  %v1791_v7 = vadd.f32 %v3597_v44, %v4830_v39  ;;  %v3634_v23 = vpop.f32.mrf.mxu0 }
 0x172   : > { %v1676_v3 = vpop.f32.mrf.mxu1 }
 0x173   : > { %v4979_v28 = vadd.f32 %v3631_v11, %v1791_v7  ;;  %v1789_v19 = vadd.f32 %v1676_v3, %v4835_v40  ;;  %v1921_v37 = vpop.f32.mrf.mxu0 }
 0x174   : > { %v3600_v21 = vpop.f32.mrf.mxu1 }
 0x175   : > { %v4982_v5 = vadd.f32 %v1908_v45, %v1789_v19  ;;  %v1794_v60 = vadd.f32 %v3600_v21, %v4840_v50  ;;  %v3635_v36 = vpop.f32.mrf.mxu0 }
 0x176   : > { %v1689_v6 = vpop.f32.mrf.mxu1 }
 0x177   : > { %v4985_v8 = vadd.f32 %v3634_v23, %v1794_v60  ;;  %v1792_v47 = vadd.f32 %v1689_v6, %v4843_v59  ;;  %v1924_v15 = vpop.f32.mrf.mxu0 }
 0x178   : > { %v3601_v39 = vpop.f32.mrf.mxu1 }
 0x179   : > { %v4988_v58 = vadd.f32 %v1921_v37, %v1792_v47  ;;  %v1795_v0 = vadd.f32 %v3601_v39, %v4850_v16  ;;  %v3638_v27 = vpop.f32.mrf.mxu0 }
 0x17a   : > { %v1692_v40 = vpop.f32.mrf.mxu1 }
 0x17b   : > { %v4991_v2 = vadd.f32 %v3635_v36, %v1795_v0  ;;  %v1793_v57 = vadd.f32 %v1692_v40, %v4855_v53  ;;  %v1937_v10 = vpop.f32.mrf.mxu0 }
 0x17c   : > { %v3604_v50 = vpop.f32.mrf.mxu1 }
 0x17d   : > { %v4994_v14 = vadd.f32 %v1924_v15, %v1793_v57  ;;  %v1798_v32 = vadd.f32 %v3604_v50, %v4860_v22  ;;  %v3639_v54 = vpop.f32.mrf.mxu0 }
 0x17e   : > { %v1705_v59 = vpop.f32.mrf.mxu1 }
 0x17f   : > { %v4997_v63 = vadd.f32 %v3638_v27, %v1798_v32  ;;  %v1796_v33 = vadd.f32 %v1705_v59, %v4863_v30  ;;  %v1940_v41 = vpop.f32.mrf.mxu0 }
 0x180   : > { %v3605_v16 = vpop.f32.mrf.mxu1 }
 0x181   : > { %v5000_v1 = vadd.f32 %v1937_v10, %v1796_v33  ;;  %v1799_v11 = vadd.f32 %v3605_v16, %v4870_v17  ;;  %v3642_v29 = vpop.f32.mrf.mxu0 }
 0x182   : > { %v1708_v53 = vpop.f32.mrf.mxu1 }
 0x183   : > { %v5003_v34 = vadd.f32 %v3639_v54, %v1799_v11  ;;  %v1797_v45 = vadd.f32 %v1708_v53, %v4879_v4  ;;  %v1953_v44 = vpop.f32.mrf.mxu0 }
 0x184   : > { %v3608_v22 = vpop.f32.mrf.mxu1 }
 0x185   : > { %v5006_v7 = vadd.f32 %v1940_v41, %v1797_v45  ;;  %v1802_v23 = vadd.f32 %v3608_v22, %v4884_v43  ;;  %v3643_v3 = vpop.f32.mrf.mxu0 }
 0x186   : > { %v1721_v30 = vpop.f32.mrf.mxu1 }
 0x187   : > { %v5009_v19 = vadd.f32 %v3642_v29, %v1802_v23  ;;  %v1800_v37 = vadd.f32 %v1721_v30, %v4887_v62  ;;  %v1956_v21 = vpop.f32.mrf.mxu0 }
 0x188   : > { %v3609_v17 = vpop.f32.mrf.mxu1 }
 0x189   : > { %v5012_v60 = vadd.f32 %v1953_v44, %v1800_v37  ;;  %v1803_v36 = vadd.f32 %v3609_v17, %v4896_v31  ;;  %v3646_v6 = vpop.f32.mrf.mxu0 }
 0x18a   : > { %v1724_v4 = vpop.f32.mrf.mxu1 }
 0x18b   : > { %v5015_v47 = vadd.f32 %v3643_v3, %v1803_v36  ;;  %v1801_v15 = vadd.f32 %v1724_v4, %v4901_v56  ;;  %v1969_v39 = vpop.f32.mrf.mxu0 }
 0x18c   : > { %v3612_v43 = vpop.f32.mrf.mxu1 }
 0x18d   : > { %5471 = vst [vmem:[#allocation9_spill] sm:$0xff] %v5015_v47  ;;  %v5018_v0 = vadd.f32 %v1956_v21, %v1801_v15  ;;  %v1806_v27 = vadd.f32 %v3612_v43, %v4907_v25  ;;  %v3647_v40 = vpop.f32.mrf.mxu0 }
 0x18e   : > { %v1737_v62 = vpop.f32.mrf.mxu1 }
 0x18f   : > { %5472 = vst [vmem:[#allocation7_spill] sm:$0xff] %v5018_v0  ;;  %v5021_v57 = vadd.f32 %v3646_v6, %v1806_v27  ;;  %v1804_v10 = vadd.f32 %v1737_v62, %v4910_v35  ;;  %v1972_v50 = vpop.f32.mrf.mxu0 }
 0x190   : > { %v3613_v31 = vpop.f32.mrf.mxu1 }
 0x191   : > { %5473 = vst [vmem:[#allocation11_spill] sm:$0xff] %v5021_v57  ;;  %v5024_v32 = vadd.f32 %v1969_v39, %v1804_v10  ;;  %v1807_v54 = vadd.f32 %v3613_v31, %v4921_v18  ;;  %v3650_v59 = vpop.f32.mrf.mxu0 }
 0x192   : > { %v1740_v56 = vpop.f32.mrf.mxu1 }
 0x193   : > { %5474 = vst [vmem:[#allocation13_spill] sm:$0xff] %v5024_v32  ;;  %v5027_v33 = vadd.f32 %v3647_v40, %v1807_v54  ;;  %v1805_v41 = vadd.f32 %v1740_v56, %v4928_v51  ;;  %v1985_v16 = vpop.f32.mrf.mxu0 }
 0x194   : > { %v3616_v25 = vpop.f32.mrf.mxu1 }
 0x195   : > { %5475 = vst [vmem:[#allocation15_spill] sm:$0xff] %v5027_v33  ;;  %v5030_v11 = vadd.f32 %v1972_v50, %v1805_v41  ;;  %v1810_v29 = vadd.f32 %v3616_v25, %v4935_v42  ;;  %v3651_v53 = vpop.f32.mrf.mxu0 }
 0x196   : > { %v1753_v35 = vpop.f32.mrf.mxu1 }
 0x197   : > { %5476 = vst [vmem:[#allocation19_spill] sm:$0xff] %v5030_v11  ;;  %v5033_v45 = vadd.f32 %v3650_v59, %v1810_v29  ;;  %v1808_v44 = vadd.f32 %v1753_v35, %v4938_v13  ;;  %v1988_v22 = vpop.f32.mrf.mxu0 }
 0x198   : > { %v3617_v18 = vpop.f32.mrf.mxu1 }
 0x199   : > { %5477 = vst [vmem:[#allocation24_spill] sm:$0xff] %v5033_v45  ;;  %v5036_v23 = vadd.f32 %v1985_v16, %v1808_v44  ;;  %v1811_v3 = vadd.f32 %v3617_v18, %v4942_v26  ;;  %v3654_v30 = vpop.f32.mrf.mxu0 }
 0x19a   : > { %v1756_v51 = vpop.f32.mrf.mxu1 }
 0x19b   : > { %5478 = vst [vmem:[#allocation5_spill] sm:$0xff] %v5036_v23  ;;  %v5039_v37 = vadd.f32 %v3651_v53, %v1811_v3  ;;  %v1809_v21 = vadd.f32 %v1756_v51, %v4946_v46  ;;  %v2001_v17 = vpop.f32.mrf.mxu0 }
 0x19c   : > { %v3620_v42 = vpop.f32.mrf.mxu1 }
 0x19d   : > { %5479 = vst [vmem:[#allocation10_spill] sm:$0xff] %v5039_v37  ;;  %v5042_v36 = vadd.f32 %v1988_v22, %v1809_v21  ;;  %v1814_v6 = vadd.f32 %v3620_v42, %v4949_v38  ;;  %v3655_v4 = vpop.f32.mrf.mxu0 }
 0x19e   : > { %v1769_v13 = vpop.f32.mrf.mxu1 }
 0x19f   : > { %5480 = vst [vmem:[#allocation12_spill] sm:$0xff] %v5042_v36  ;;  %v5045_v15 = vadd.f32 %v3654_v30, %v1814_v6  ;;  %v1812_v39 = vadd.f32 %v1769_v13, %v4952_v20  ;;  %v2004_v43 = vpop.f32.mrf.mxu0 }
 0x1a0   : > { %v3621_v26 = vpop.f32.mrf.mxu1 }
 0x1a1   : > { %5481 = vst [vmem:[#allocation14_spill] sm:$0xff] %v5045_v15  ;;  %v5048_v27 = vadd.f32 %v2001_v17, %v1812_v39  ;;  %v1815_v40 = vadd.f32 %v3621_v26, %v4955_v24  ;;  %v5051_v62 = vpop.f32.mrf.mxu0 }
 0x1a2   : > { %v1772_v46 = vpop.f32.mrf.mxu1 }
 0x1a3   : > { %5482 = vst [vmem:[#allocation17_spill] sm:$0xff] %v5048_v27  ;;  %v5053_v10 = vadd.f32 %v3655_v4, %v1815_v40  ;;  %v1813_v50 = vadd.f32 %v1772_v46, %v4958_v48  ;;  %v5056_v38 = vpop.f32.mrf.mxu0 }
 0x1a4   : > { %v3660_v31 = vpop.f32.mrf.mxu1 }
 0x1a5   : > { %5483 = vst [vmem:[#allocation22_spill] sm:$0xff] %v5053_v10  ;;  %v5058_v54 = vadd.f32 %v2004_v43, %v1813_v50  ;;  %v5060_v59 = vpop.f32.mrf.mxu0 }
 0x1a6   : > { %v2105_v20 = vpop.f32.mrf.mxu1 }
 0x1a7   : > { %5484 = vst [vmem:[#allocation25_spill] sm:$0xff] %v5058_v54  ;;  %v5062_v56 = vpop.f32.mrf.mxu0 }
 0x1a8   : > { %v3661_v41 = vpop.f32.mrf.mxu1 }
 0x1a9   : > { %v5064_v16 = vpop.f32.mrf.mxu0 }
 0x1aa   : > { %v5066_v24 = vpop.f32.mrf.mxu1 }
 0x1ab   : > { %v5068_v25 = vpop.f32.mrf.mxu0 }
 0x1ac   : > { %v5070_v29 = vpop.f32.mrf.mxu1 }
 0x1ad   : > { %v5072_v48 = vpop.f32.mrf.mxu0 }
 0x1ae   : > { %v5074_v53 = vpop.f32.mrf.mxu1 }
 0x1af   : > { %v5076_v35 = vpop.f32.mrf.mxu0 }
 0x1b0   : > { %v5078_v44 = vpop.f32.mrf.mxu1 }
 0x1b1   : > { %v5080_v22 = vpop.f32.mrf.mxu0 }
 0x1b2   : > { %v5082_v18 = vpop.f32.mrf.mxu1 }
 0x1b3   : > { %v5084_v3 = vpop.f32.mrf.mxu0 }
 0x1b4   : > { %v5086_v30 = vpop.f32.mrf.mxu1 }
 0x1b5   : > { %v5088_v51 = vpop.f32.mrf.mxu0 }
 0x1b6   : > { %v5090_v21 = vpop.f32.mrf.mxu1 }
 0x1b7   : > { %v5092_v17 = vpop.f32.mrf.mxu0 }
 0x1b8   : > { %v5094_v42 = vpop.f32.mrf.mxu1 }
 0x1b9   : > { %v5096_v6 = vpop.f32.mrf.mxu0 }
 0x1ba   : > { %v5098_v4 = vpop.f32.mrf.mxu1 }
 0x1bb   : > { %v5100_v13 = vpop.f32.mrf.mxu0 }
 0x1bc   : > { %v5102_v39 = vpop.f32.mrf.mxu1 }
 0x1bd   : > { %v5104_v43 = vpop.f32.mrf.mxu0 }
 0x1be   : > { %v5106_v26 = vpop.f32.mrf.mxu1 }
 0x1bf   : > { %v5108_v40 = vpop.f32.mrf.mxu0 }
 0x1c0   : > { %v5110_v46 = vpop.f32.mrf.mxu1 }
 0x1c1   : > { %v5112_v50 = vpop.f32.mrf.mxu0 }
 0x1c2   : > { %v5114_v54 = vpop.f32.mrf.mxu1 }
 0x1c3   : > { %v5116_v10 = vpop.f32.mrf.mxu0 }
 0x1c4   : > { %5485 = vst [vmem:[#allocation2_spill] sm:$0xff] %v5116_v10  ;;  %v5118_v27 = vpop.f32.mrf.mxu1 }
 0x1c5   : > { %v5120_v15 = vpop.f32.mrf.mxu0 }
 0x1c6   : > { %5486 = vst [vmem:[#allocation20_spill] sm:$0xff] %v5120_v15  ;;  %v5122_v36 = vpop.f32.mrf.mxu1 }
 0x1c7   : > { %v5124_v37 = vpop.f32.mrf.mxu0 }
 0x1c8   : > { %5487 = vst [vmem:[#allocation16_spill] sm:$0xff] %v5124_v37  ;;  %v5126_v23 = vpop.f32.mrf.mxu1 }
 0x1c9   : > { %5488 = vst [vmem:[#allocation18_spill] sm:$0xff] %v5126_v23  ;;  %v5128_v45 = vpop.f32.mrf.mxu0 }
 0x1ca   : > { %5489 = vst [vmem:[#allocation21_spill] sm:$0xff] %v5128_v45  ;;  %v5130_v11 = vpop.f32.mrf.mxu1 }
 0x1cb   : > { %5490 = vst [vmem:[#allocation23_spill] sm:$0xff] %v5130_v11  ;;  %v5132_v33 = vpop.f32.mrf.mxu0 }
 0x1cc   : > { %5491 = vst [vmem:[#allocation8_spill] sm:$0xff] %v5132_v33  ;;  %v5134_v32 = vpop.f32.mrf.mxu1 }
 0x1cd   : > { %5492 = vst [vmem:[#allocation3_spill] sm:$0xff] %v5134_v32  ;;  %v5136_v57 = vpop.f32.mrf.mxu0 }
 0x1ce   : > { %5493 = vst [vmem:[#allocation4_spill] sm:$0xff] %v5136_v57  ;;  %v5138_v0 = vpop.f32.mrf.mxu1 }
 0x1cf   : > { %5494 = vst [vmem:[#allocation6_spill] sm:$0xff] %v5138_v0  ;;  %v5140_v10 = vpop.f32.mrf.mxu0 }
 0x1d0   : > { %5495 = vst [vmem:[#allocation26_spill] sm:$0xff] %v5140_v10  ;;  %v5142_v15 = vpop.f32.mrf.mxu1 }
 0x1d1   : > { %5496 = vst [vmem:[#allocation27_spill] sm:$0xff] %v5142_v15  ;;  %v5144_v47 = vpop.f32.mrf.mxu0 }
 0x1d2   : > { %5497 = vst [vmem:[#allocation28_spill] sm:$0xff] %v5144_v47  ;;  %v5146_v37 = vpop.f32.mrf.mxu1 }
 0x1d3   : > { %5498 = vst [vmem:[#allocation29_spill] sm:$0xff] %v5146_v37  ;;  %v5148_v23 = vpop.f32.mrf.mxu0 }
 0x1d4   : > { %5499 = vst [vmem:[#allocation30_spill] sm:$0xff] %v5148_v23  ;;  %v5150_v45 = vpop.f32.mrf.mxu1 }
 0x1d5   : > { %5500 = vst [vmem:[#allocation31_spill] sm:$0xff] %v5150_v45  ;;  %v5152_v11 = vpop.f32.mrf.mxu0 }
 0x1d6   : > { %5501 = vst [vmem:[#allocation32_spill] sm:$0xff] %v5152_v11  ;;  %v5154_v33 = vpop.f32.mrf.mxu1  ;;  %v2234_v11 = vadd.f32 %v3660_v31, %v4961_v49  ;;  %v2233_v49 = vadd.f32 %v5066_v24, %v4970_v52  ;;  %v2236_v52 = vadd.f32 %v5074_v53, %v4976_v9 }
 0x1d7   : > { %5502 = vst [vmem:[#allocation33_spill] sm:$0xff] %v5154_v33  ;;  %v5156_v32 = vpop.f32.mrf.mxu0 }
 0x1d8   : > { %5503 = vst [vmem:[#allocation34_spill] sm:$0xff] %v5156_v32  ;;  %v5158_v57 = vpop.f32.mrf.mxu1  ;;  %v2232_v32 = vadd.f32 %v2105_v20, %v4964_v12  ;;  %v5190_v12 = vld [vmem:[%s5351_s2] ss:$0 sm:$0xff]  ;;  %v2446_v53 = vadd.f32 %v5068_v25, %v2236_v52 }
 0x1d9   : > { %5504 = vst [vmem:[#allocation35_spill] sm:$0xff] %v5158_v57  ;;  %v5160_v0 = vpop.f32.mrf.mxu0 }
 0x1da   : > { %5505 = vst [vmem:[#allocation36_spill] sm:$0xff] %v5160_v0  ;;  %v5162_v10 = vpop.f32.mrf.mxu1 }
 0x1db   : > { %5506 = vst [vmem:[#allocation37_spill] sm:$0xff] %v5162_v10  ;;  %v5164_v15 = vpop.f32.mrf.mxu0 }
 0x1dc   : > { %5507 = vst [vmem:[#allocation38_spill] sm:$0xff] %v5164_v15  ;;  %v5166_v47 = vpop.f32.mrf.mxu1  ;;  %v2444_v15 = vadd.f32 %v5051_v62, %v2234_v11 }
 0x1dd   : > { %5508 = vst [vmem:[#allocation39_spill] sm:$0xff] %v5166_v47  ;;  %v5168_v37 = vpop.f32.mrf.mxu0  ;;  %v2235_v47 = vadd.f32 %v3661_v41, %v4967_v55 }
 0x1de   : > { %5509 = vst [vmem:[#allocation40_spill] sm:$0xff] %v5168_v37  ;;  %v5170_v23 = vpop.f32.mrf.mxu1 }
 0x1df   : > { %5510 = vst [vmem:[#allocation41_spill] sm:$0xff] %v5170_v23  ;;  %v5173_v45 = vpop.f32.mrf.mxu0  ;;  %v2442_v23 = vadd.f32 %v5056_v38, %v2232_v32  ;;  %v2445_v55 = vadd.f32 %v5060_v59, %v2235_v47  ;;  %v2239_v47 = vadd.f32 %v5078_v44, %v4979_v28 }
 0x1e0   : > { %5511 = vst [vmem:[#allocation42_spill] sm:$0xff] %v5173_v45  ;;  %v5175_v33 = vpop.f32.mrf.mxu1 }
 0x1e1   : > { %5512 = vst [vmem:[#allocation43_spill] sm:$0xff] %v5175_v33  ;;  %v3762_v0 = vpop.f32.mrf.mxu0  ;;  %v2238_v33 = vadd.f32 %v5070_v29, %v4973_v61 }
 0x1e2   : > { %v5178_v57 = vpop.f32.mrf.mxu1 }
 0x1e3   : > { %v2763_v10 = vpop.f32.mrf.mxu0  ;;  %v2448_v29 = vadd.f32 %v5064_v16, %v2238_v33  ;;  %v2237_v33 = vadd.f32 %v5082_v18, %v4982_v5 }
 0x1e4   : > { %v3728_v37 = vpop.f32.mrf.mxu1 }
 0x1e5   : > { %v2676_v31 = vadd.f32 %v3728_v37, %v2444_v15  ;;  %v3763_v45 = vpop.f32.mrf.mxu0  ;;  %v2443_v15 = vadd.f32 %v5062_v56, %v2233_v49 }
 0x1e6   : > { %v2547_v11 = vpop.f32.mrf.mxu1 }
 0x1e7   : > { %v2892_v62 = vadd.f32 %v3762_v0, %v2676_v31  ;;  %v2674_v20 = vadd.f32 %v2547_v11, %v2442_v23  ;;  %v2766_v32 = vpop.f32.mrf.mxu0 }
 0x1e8   : > { %v3729_v37 = vpop.f32.mrf.mxu1 }
 0x1e9   : > { %v2931_v61 = vadd.f32 %v5190_v12, %v2892_v62  ;;  %v2890_v38 = vadd.f32 %v2763_v10, %v2674_v20  ;;  %v2677_v41 = vadd.f32 %v3729_v37, %v2445_v55  ;;  %v3766_v24 = vpop.f32.mrf.mxu0  ;;  %v2449_v55 = vadd.f32 %v5072_v48, %v2239_v47 }
 0x1ea   : > { %v2550_v9 = vpop.f32.mrf.mxu1  ;;  %v2447_v37 = vadd.f32 %v5076_v35, %v2237_v33  ;;  %v2246_v33 = vadd.f32 %v5102_v39, %v4997_v63 }
 0x1eb   : > { %v2963_v0 = vmax.f32 %v2931_v61, 0.0  ;;  %v2929_v23 = vadd.f32 %v5190_v12, %v2890_v38  ;;  %v2893_v59 = vadd.f32 %v3763_v45, %v2677_v41  ;;  %v2675_v10 = vadd.f32 %v2550_v9, %v2443_v15  ;;  %v2779_v56 = vpop.f32.mrf.mxu0 }
 0x1ec   : > { %v3732_v28 = vpop.f32.mrf.mxu1  ;;  %v2242_v45 = vadd.f32 %v5086_v30, %v4985_v8 }
 0x1ed   : > { %2995 = vst [vmem:[%s5204_s15 + $0x10] sm:$0xff] %v2963_v0  ;;  %v2961_v16 = vmax.f32 %v2929_v23, 0.0  ;;  %v2932_v44 = vadd.f32 %v5190_v12, %v2893_v59  ;;  %v2891_v49 = vadd.f32 %v2766_v32, %v2675_v10  ;;  %v2680_v31 = vadd.f32 %v3732_v28, %v2448_v29  ;;  %v3767_v11 = vpop.f32.mrf.mxu0 }
 0x1ee   : > { %v2563_v62 = vpop.f32.mrf.mxu1  ;;  %v2240_v32 = vadd.f32 %v5090_v21, %v4988_v58  ;;  %v2452_v41 = vadd.f32 %v5080_v22, %v2242_v45  ;;  %v2241_v23 = vadd.f32 %v5098_v4, %v4994_v14 }
 0x1ef   : > { %2993 = vst [vmem:[%s5204_s15] sm:$0xff] %v2961_v16  ;;  %v2964_v25 = vmax.f32 %v2932_v44, 0.0  ;;  %v2930_v20 = vadd.f32 %v5190_v12, %v2891_v49  ;;  %v2896_v5 = vadd.f32 %v3766_v24, %v2680_v31  ;;  %v2678_v18 = vadd.f32 %v2563_v62, %v2446_v53  ;;  %v2782_v52 = vpop.f32.mrf.mxu0 }
 0x1f0   : > { %v3733_v15 = vpop.f32.mrf.mxu1  ;;  %v2243_v24 = vadd.f32 %v5094_v42, %v4991_v2  ;;  %v2450_v0 = vadd.f32 %v5084_v3, %v2240_v32  ;;  %v2451_v49 = vadd.f32 %v5092_v17, %v2241_v23  ;;  %v2244_v31 = vadd.f32 %v5106_v26, %v5000_v1 }
 0x1f1   : > { %2996 = vst [vmem:[%s5204_s15 + $0x18] sm:$0xff] %v2964_v25  ;;  %v2962_v48 = vmax.f32 %v2930_v20, 0.0  ;;  %v2935_v61 = vadd.f32 %v5190_v12, %v2896_v5  ;;  %v2894_v8 = vadd.f32 %v2779_v56, %v2678_v18  ;;  %v2681_v30 = vadd.f32 %v3733_v15, %v2449_v55  ;;  %v3770_v38 = vpop.f32.mrf.mxu0 }
 0x1f2   : > { %v2566_v29 = vpop.f32.mrf.mxu1  ;;  %v2453_v53 = vadd.f32 %v5088_v51, %v2243_v24  ;;  %v2456_v62 = vadd.f32 %v5096_v6, %v2246_v33  ;;  %v2247_v25 = vadd.f32 %v5110_v46, %v5003_v34 }
 0x1f3   : > { %2994 = vst [vmem:[%s5204_s15 + $0x8] sm:$0xff] %v2962_v48  ;;  %v2967_v35 = vmax.f32 %v2935_v61, 0.0  ;;  %v2933_v47 = vadd.f32 %v5190_v12, %v2894_v8  ;;  %v2897_v58 = vadd.f32 %v3767_v11, %v2681_v30  ;;  %v2679_v21 = vadd.f32 %v2566_v29, %v2447_v37  ;;  %v2795_v9 = vpop.f32.mrf.mxu0 }
 0x1f4   : > { %v3736_v59 = vpop.f32.mrf.mxu1  ;;  %v2245_v37 = vadd.f32 %v5114_v54, %v5006_v7  ;;  %v2457_v61 = vadd.f32 %v5104_v43, %v2247_v25  ;;  %v2250_v8 = vadd.f32 %v5118_v27, %v5009_v19  ;;  %v2248_v29 = vadd.f32 %v5122_v36, %v5012_v60 }
 0x1f5   : > { %2999 = vst [vmem:[%s5204_s15 + $0x30] sm:$0xff] %v2967_v35  ;;  %v2965_v22 = vmax.f32 %v2933_v47, 0.0  ;;  %v2936_v10 = vadd.f32 %v5190_v12, %v2897_v58  ;;  %v2895_v2 = vadd.f32 %v2782_v52, %v2679_v21  ;;  %v2684_v42 = vadd.f32 %v3736_v59, %v2452_v41  ;;  %v3771_v56 = vpop.f32.mrf.mxu0 }
 0x1f6   : > { %v2579_v28 = vpop.f32.mrf.mxu1  ;;  %v2454_v52 = vadd.f32 %v5100_v13, %v2244_v31  ;;  %v2455_v24 = vadd.f32 %v5108_v40, %v2245_v37  ;;  %v2460_v21 = vadd.f32 %v5112_v50, %v2250_v8  ;;  %v5519_v31 = vld [vmem:[#allocation11_spill] sm:$0xff] }
 0x1f7   : > { %2997 = vst [vmem:[%s5204_s15 + $0x20] sm:$0xff] %v2965_v22  ;;  %v2968_v3 = vmax.f32 %v2936_v10, 0.0  ;;  %v2934_v16 = vadd.f32 %v5190_v12, %v2895_v2  ;;  %v2900_v14 = vadd.f32 %v3770_v38, %v2684_v42  ;;  %v2682_v4 = vadd.f32 %v2579_v28, %v2450_v0  ;;  %v2798_v44 = vpop.f32.mrf.mxu0  ;;  %v5514_v0 = vld [vmem:[#allocation18_spill] sm:$0xff] }
 0x1f8   : > { %v3737_v11 = vpop.f32.mrf.mxu1  ;;  %v5515_v2 = vld [vmem:[#allocation2_spill] sm:$0xff] }
 0x1f9   : > { %3000 = vst [vmem:[%s5204_s15 + $0x38] sm:$0xff] %v2968_v3  ;;  %v2966_v51 = vmax.f32 %v2934_v16, 0.0  ;;  %v2939_v55 = vadd.f32 %v5190_v12, %v2900_v14  ;;  %v2898_v63 = vadd.f32 %v2795_v9, %v2682_v4  ;;  %v2685_v39 = vadd.f32 %v3737_v11, %v2453_v53  ;;  %v3774_v45 = vpop.f32.mrf.mxu0  ;;  %v5513_v9 = vld [vmem:[#allocation9_spill] sm:$0xff]  ;;  %v5517_v53 = vld [vmem:[#allocation23_spill] sm:$0xff] }
 0x1fa   : > { %v2582_v20 = vpop.f32.mrf.mxu1  ;;  %v2251_v23 = vadd.f32 %v5514_v0, %v5513_v9  ;;  %v2458_v42 = vadd.f32 %v5515_v2, %v2248_v29  ;;  %v5520_v11 = vld [vmem:[#allocation3_spill] sm:$0xff] }
 0x1fb   : > { %2998 = vst [vmem:[%s5204_s15 + $0x28] sm:$0xff] %v2966_v51  ;;  %v2971_v17 = vmax.f32 %v2939_v55, 0.0  ;;  %v2937_v5 = vadd.f32 %v5190_v12, %v2898_v63  ;;  %v2901_v1 = vadd.f32 %v3771_v56, %v2685_v39  ;;  %v2683_v26 = vadd.f32 %v2582_v20, %v2451_v49  ;;  %v2811_v18 = vpop.f32.mrf.mxu0  ;;  %v5516_v56 = vld [vmem:[#allocation7_spill] sm:$0xff]  ;;  %v5521_v20 = vld [vmem:[#allocation16_spill] sm:$0xff] }
 0x1fc   : > { %v3740_v32 = vpop.f32.mrf.mxu1  ;;  %v2249_v33 = vadd.f32 %v5517_v53, %v5516_v56  ;;  %v2254_v51 = vadd.f32 %v5520_v11, %v5519_v31 }
 0x1fd   : > { %3003 = vst [vmem:[%s5204_s15 + $0x50] sm:$0xff] %v2971_v17  ;;  %v2969_v6 = vmax.f32 %v2937_v5, 0.0  ;;  %v2940_v15 = vadd.f32 %v5190_v12, %v2901_v1  ;;  %v2899_v34 = vadd.f32 %v2798_v44, %v2683_v26  ;;  %v2688_v46 = vadd.f32 %v3740_v32, %v2456_v62  ;;  %v3775_v48 = vpop.f32.mrf.mxu0  ;;  %v5518_v44 = vld [vmem:[#allocation20_spill] sm:$0xff]  ;;  %v5522_v5 = vld [vmem:[#allocation13_spill] sm:$0xff]  ;;  %v5523_v1 = vld [vmem:[#allocation6_spill] sm:$0xff] }
 0x1fe   : > { %v2595_v30 = vpop.f32.mrf.mxu1  ;;  %v2461_v49 = vadd.f32 %v5518_v44, %v2251_v23  ;;  %v2459_v17 = vadd.f32 %v5521_v20, %v2249_v33  ;;  %v2252_v26 = vadd.f32 %v5523_v1, %v5522_v5  ;;  %v5530_v23 = vld [vmem:[#allocation4_spill] sm:$0xff]  ;;  %v5533_v33 = vld [vmem:[#allocation26_spill] sm:$0xff] }
 0x1ff   : > { %3001 = vst [vmem:[%s5204_s15 + $0x40] sm:$0xff] %v2969_v6  ;;  %v2972_v13 = vmax.f32 %v2940_v15, 0.0  ;;  %v2938_v38 = vadd.f32 %v5190_v12, %v2899_v34  ;;  %v2904_v7 = vadd.f32 %v3774_v45, %v2688_v46  ;;  %v2686_v54 = vadd.f32 %v2595_v30, %v2454_v52  ;;  %v2814_v41 = vpop.f32.mrf.mxu0  ;;  %v5524_v34 = vld [vmem:[#allocation21_spill] sm:$0xff] }
 0x200   : > { %v3741_v35 = vpop.f32.mrf.mxu1  ;;  %v2464_v46 = vadd.f32 %v5524_v34, %v2254_v51  ;;  %v5536_v51 = vld [vmem:[#allocation28_spill] sm:$0xff] }
 0x201   : > { %3004 = vst [vmem:[%s5204_s15 + $0x58] sm:$0xff] %v2972_v13  ;;  %v2970_v43 = vmax.f32 %v2938_v38, 0.0  ;;  %v2943_v47 = vadd.f32 %v5190_v12, %v2904_v7  ;;  %v2902_v19 = vadd.f32 %v2811_v18, %v2686_v54  ;;  %v2689_v27 = vadd.f32 %v3741_v35, %v2457_v61  ;;  %v3778_v58 = vpop.f32.mrf.mxu0  ;;  %v5526_v61 = vld [vmem:[#allocation27_spill] sm:$0xff] }
 0x202   : > { %v2598_v59 = vpop.f32.mrf.mxu1  ;;  %v5528_v35 = vld [vmem:[#allocation19_spill] sm:$0xff] }
 0x203   : > { %3002 = vst [vmem:[%s5204_s15 + $0x48] sm:$0xff] %v2970_v43  ;;  %v2975_v40 = vmax.f32 %v2943_v47, 0.0  ;;  %v2941_v22 = vadd.f32 %v5190_v12, %v2902_v19  ;;  %v2905_v60 = vadd.f32 %v3775_v48, %v2689_v27  ;;  %v2687_v36 = vadd.f32 %v2598_v59, %v2455_v24  ;;  %v2827_v10 = vpop.f32.mrf.mxu0  ;;  %v5525_v48 = vld [vmem:[#allocation15_spill] sm:$0xff]  ;;  %v5527_v24 = vld [vmem:[#allocation8_spill] sm:$0xff]  ;;  %v5529_v43 = vld [vmem:[#allocation29_spill] sm:$0xff] }
 0x204   : > { %v3744_v28 = vpop.f32.mrf.mxu1  ;;  %v2255_v8 = vadd.f32 %v5526_v61, %v5525_v48  ;;  %v2462_v29 = vadd.f32 %v5527_v24, %v2252_v26  ;;  %v2253_v47 = vadd.f32 %v5529_v43, %v5528_v35  ;;  %v5539_v26 = vld [vmem:[#allocation30_spill] sm:$0xff] }
 0x205   : > { %3007 = vst [vmem:[%s5204_s15 + $0x70] sm:$0xff] %v2975_v40  ;;  %v2973_v50 = vmax.f32 %v2941_v22, 0.0  ;;  %v2944_v3 = vadd.f32 %v5190_v12, %v2905_v60  ;;  %v2903_v16 = vadd.f32 %v2814_v41, %v2687_v36  ;;  %v2692_v14 = vadd.f32 %v3744_v28, %v2460_v21  ;;  %v3779_v4 = vpop.f32.mrf.mxu0  ;;  %v5531_v40 = vld [vmem:[#allocation24_spill] sm:$0xff]  ;;  %v5532_v22 = vld [vmem:[#allocation31_spill] sm:$0xff] }
 0x206   : > { %v2611_v55 = vpop.f32.mrf.mxu1  ;;  %v2465_v59 = vadd.f32 %v5530_v23, %v2255_v8  ;;  %v2258_v60 = vadd.f32 %v5532_v22, %v5531_v40  ;;  %v2463_v28 = vadd.f32 %v5533_v33, %v2253_v47  ;;  %v5542_v8 = vld [vmem:[#allocation32_spill] sm:$0xff]  ;;  %v5545_v47 = vld [vmem:[#allocation34_spill] sm:$0xff] }
 0x207   : > { %3005 = vst [vmem:[%s5204_s15 + $0x60] sm:$0xff] %v2973_v50  ;;  %v2976_v63 = vmax.f32 %v2944_v3, 0.0  ;;  %v2942_v39 = vadd.f32 %v5190_v12, %v2903_v16  ;;  %v2908_v45 = vadd.f32 %v3778_v58, %v2692_v14  ;;  %v2690_v62 = vadd.f32 %v2611_v55, %v2458_v42  ;;  %v2830_v25 = vpop.f32.mrf.mxu0  ;;  %v5534_v50 = vld [vmem:[#allocation5_spill] sm:$0xff] }
 0x208   : > { %v3745_v18 = vpop.f32.mrf.mxu1  ;;  %v5535_v3 = vld [vmem:[#allocation33_spill] sm:$0xff]  ;;  %v2468_v55 = vadd.f32 %v5536_v51, %v2258_v60  ;;  %v5548_v60 = vld [vmem:[#allocation36_spill] sm:$0xff] }
 0x209   : > { %3008 = vst [vmem:[%s5204_s15 + $0x78] sm:$0xff] %v2976_v63  ;;  %v2974_v52 = vmax.f32 %v2942_v39, 0.0  ;;  %v2947_v37 = vadd.f32 %v5190_v12, %v2908_v45  ;;  %v2906_v32 = vadd.f32 %v2827_v10, %v2690_v62  ;;  %v2693_v6 = vadd.f32 %v3745_v18, %v2461_v49  ;;  %v3782_v15 = vpop.f32.mrf.mxu0  ;;  %v5537_v63 = vld [vmem:[#allocation10_spill] sm:$0xff]  ;;  %v5538_v39 = vld [vmem:[#allocation35_spill] sm:$0xff] }
 0x20a   : > { %v2614_v30 = vpop.f32.mrf.mxu1  ;;  %v2256_v16 = vadd.f32 %v5535_v3, %v5534_v50  ;;  %v2259_v45 = vadd.f32 %v5538_v39, %v5537_v63  ;;  %v5551_v3 = vld [vmem:[#allocation38_spill] sm:$0xff]  ;;  %v5553_v63 = vld [vmem:[#allocation40_spill] sm:$0xff] }
 0x20b   : > { %3006 = vst [vmem:[%s5204_s15 + $0x68] sm:$0xff] %v2974_v52  ;;  %v2979_v13 = vmax.f32 %v2947_v37, 0.0  ;;  %v2945_v38 = vadd.f32 %v5190_v12, %v2906_v32  ;;  %v2909_v7 = vadd.f32 %v3779_v4, %v2693_v6  ;;  %v2691_v54 = vadd.f32 %v2614_v30, %v2459_v17  ;;  %v2843_v41 = vpop.f32.mrf.mxu0  ;;  %v5540_v52 = vld [vmem:[#allocation12_spill] sm:$0xff]  ;;  %v5541_v37 = vld [vmem:[#allocation37_spill] sm:$0xff] }
 0x20c   : > { %v3748_v19 = vpop.f32.mrf.mxu1  ;;  %v2466_v18 = vadd.f32 %v5539_v26, %v2256_v16  ;;  %v2257_v32 = vadd.f32 %v5541_v37, %v5540_v52  ;;  %v2469_v30 = vadd.f32 %v5542_v8, %v2259_v45 }
 0x20d   : > { %3011 = vst [vmem:[%s5204_s15 + $0x90] sm:$0xff] %v2979_v13  ;;  %v2977_v27 = vmax.f32 %v2945_v38, 0.0  ;;  %v2948_v58 = vadd.f32 %v5190_v12, %v2909_v7  ;;  %v2907_v21 = vadd.f32 %v2830_v25, %v2691_v54  ;;  %v2696_v9 = vadd.f32 %v3748_v19, %v2464_v46  ;;  %v3783_v0 = vpop.f32.mrf.mxu0  ;;  %v5543_v13 = vld [vmem:[#allocation14_spill] sm:$0xff]  ;;  %v5544_v38 = vld [vmem:[#allocation39_spill] sm:$0xff] }
 0x20e   : > { %v2627_v36 = vpop.f32.mrf.mxu1  ;;  %v2262_v7 = vadd.f32 %v5544_v38, %v5543_v13  ;;  %v2467_v19 = vadd.f32 %v5545_v47, %v2257_v32 }
 0x20f   : > { %3009 = vst [vmem:[%s5204_s15 + $0x80] sm:$0xff] %v2977_v27  ;;  %v2980_v10 = vmax.f32 %v2948_v58, 0.0  ;;  %v2946_v2 = vadd.f32 %v5190_v12, %v2907_v21  ;;  %v2912_v42 = vadd.f32 %v3782_v15, %v2696_v9  ;;  %v2694_v56 = vadd.f32 %v2627_v36, %v2462_v29  ;;  %v2846_v53 = vpop.f32.mrf.mxu0  ;;  %v5546_v27 = vld [vmem:[#allocation17_spill] sm:$0xff] }
 0x210   : > { %v3749_v14 = vpop.f32.mrf.mxu1  ;;  %v5547_v58 = vld [vmem:[#allocation41_spill] sm:$0xff]  ;;  %v2472_v36 = vadd.f32 %v5548_v60, %v2262_v7 }
 0x211   : > { %3012 = vst [vmem:[%s5204_s15 + $0x98] sm:$0xff] %v2980_v10  ;;  %v2978_v4 = vmax.f32 %v2946_v2, 0.0  ;;  %v2951_v44 = vadd.f32 %v5190_v12, %v2912_v42  ;;  %v2910_v49 = vadd.f32 %v2843_v41, %v2694_v56  ;;  %v2697_v31 = vadd.f32 %v3749_v14, %v2465_v59  ;;  %v3786_v11 = vpop.f32.mrf.mxu0  ;;  %v5549_v10 = vld [vmem:[#allocation22_spill] sm:$0xff]  ;;  %v5550_v2 = vld [vmem:[#allocation43_spill] sm:$0xff]  ;;  %v5552_v14 = vld [vmem:[#allocation25_spill] sm:$0xff] }
 0x212   : > { %v2630_v62 = vpop.f32.mrf.mxu1  ;;  %v2260_v21 = vadd.f32 %v5547_v58, %v5546_v27  ;;  %v2263_v42 = vadd.f32 %v5550_v2, %v5549_v10 }
 0x213   : > { %3010 = vst [vmem:[%s5204_s15 + $0x88] sm:$0xff] %v2978_v4  ;;  %v2983_v25 = vmax.f32 %v2951_v44, 0.0  ;;  %v2949_v20 = vadd.f32 %v5190_v12, %v2910_v49  ;;  %v2913_v17 = vadd.f32 %v3783_v0, %v2697_v31  ;;  %v2695_v5 = vadd.f32 %v2630_v62, %v2463_v28  ;;  %v2859_v1 = vpop.f32.mrf.mxu0 }
 0x214   : > { %v3752_v6 = vpop.f32.mrf.mxu1  ;;  %v2470_v16 = vadd.f32 %v5551_v3, %v2260_v21  ;;  %v2261_v4 = vadd.f32 %v5178_v57, %v5552_v14  ;;  %v2473_v39 = vadd.f32 %v5553_v63, %v2263_v42  ;;  %v5554_v57 = vld [vmem:[#allocation42_spill] sm:$0xff] }
 0x215   : > { %3015 = vst [vmem:[%s5204_s15 + $0xb0] sm:$0xff] %v2983_v25  ;;  %v2981_v15 = vmax.f32 %v2949_v20, 0.0  ;;  %v2952_v34 = vadd.f32 %v5190_v12, %v2913_v17  ;;  %v2911_v46 = vadd.f32 %v2846_v53, %v2695_v5  ;;  %v2700_v48 = vadd.f32 %v3752_v6, %v2468_v55  ;;  %v3787_v61 = vpop.f32.mrf.mxu0 }
 0x216   : > { %v2643_v54 = vpop.f32.mrf.mxu1  ;;  %v2471_v5 = vadd.f32 %v5554_v57, %v2261_v4 }
 0x217   : > { %3013 = vst [vmem:[%s5204_s15 + $0xa0] sm:$0xff] %v2981_v15  ;;  %v2984_v41 = vmax.f32 %v2952_v34, 0.0  ;;  %v2950_v24 = vadd.f32 %v5190_v12, %v2911_v46  ;;  %v2916_v29 = vadd.f32 %v3786_v11, %v2700_v48  ;;  %v2698_v35 = vadd.f32 %v2643_v54, %v2466_v18  ;;  %v2862_v43 = vpop.f32.mrf.mxu0 }
 0x218   : > { %v3753_v9 = vpop.f32.mrf.mxu1 }
 0x219   : > { %3016 = vst [vmem:[%s5204_s15 + $0xb8] sm:$0xff] %v2984_v41  ;;  %v2982_v0 = vmax.f32 %v2950_v24, 0.0  ;;  %v2955_v23 = vadd.f32 %v5190_v12, %v2916_v29  ;;  %v2914_v59 = vadd.f32 %v2859_v1, %v2698_v35  ;;  %v2701_v40 = vadd.f32 %v3753_v9, %v2469_v30  ;;  %v3790_v22 = vpop.f32.mrf.mxu0 }
 0x21a   : > { %v2646_v56 = vpop.f32.mrf.mxu1 }
 0x21b   : > { %3014 = vst [vmem:[%s5204_s15 + $0xa8] sm:$0xff] %v2982_v0  ;;  %v2987_v53 = vmax.f32 %v2955_v23, 0.0  ;;  %v2953_v33 = vadd.f32 %v5190_v12, %v2914_v59  ;;  %v2917_v28 = vadd.f32 %v3787_v61, %v2701_v40  ;;  %v2699_v50 = vadd.f32 %v2646_v56, %v2467_v19  ;;  %v2875_v49 = vpop.f32.mrf.mxu0 }
 0x21c   : > { %v3756_v44 = vpop.f32.mrf.mxu1 }
 0x21d   : > { %3019 = vst [vmem:[%s5204_s15 + $0xd0] sm:$0xff] %v2987_v53  ;;  %v2985_v31 = vmax.f32 %v2953_v33, 0.0  ;;  %v2956_v11 = vadd.f32 %v5190_v12, %v2917_v28  ;;  %v2915_v51 = vadd.f32 %v2862_v43, %v2699_v50  ;;  %v2704_v55 = vadd.f32 %v3756_v44, %v2472_v36  ;;  %v3791_v26 = vpop.f32.mrf.mxu0 }
 0x21e   : > { %v2659_v45 = vpop.f32.mrf.mxu1 }
 0x21f   : > { %3017 = vst [vmem:[%s5204_s15 + $0xc0] sm:$0xff] %v2985_v31  ;;  %v2988_v62 = vmax.f32 %v2956_v11, 0.0  ;;  %v2954_v25 = vadd.f32 %v5190_v12, %v2915_v51  ;;  %v2920_v20 = vadd.f32 %v3790_v22, %v2704_v55  ;;  %v2702_v17 = vadd.f32 %v2659_v45, %v2470_v16  ;;  %v2878_v61 = vpop.f32.mrf.mxu0 }
 0x220   : > { %v3757_v1 = vpop.f32.mrf.mxu1 }
 0x221   : > { %3020 = vst [vmem:[%s5204_s15 + $0xd8] sm:$0xff] %v2988_v62  ;;  %v2986_v18 = vmax.f32 %v2954_v25, 0.0  ;;  %v2959_v52 = vadd.f32 %v5190_v12, %v2920_v20  ;;  %v2918_v37 = vadd.f32 %v2875_v49, %v2702_v17  ;;  %v2705_v32 = vadd.f32 %v3757_v1, %v2473_v39 }
 0x222   : > { %v2662_v6 = vpop.f32.mrf.mxu1 }
 0x223   : > { %3018 = vst [vmem:[%s5204_s15 + $0xc8] sm:$0xff] %v2986_v18  ;;  %v2991_v15 = vmax.f32 %v2959_v52, 0.0  ;;  %v2957_v34 = vadd.f32 %v5190_v12, %v2918_v37  ;;  %v2921_v46 = vadd.f32 %v3791_v26, %v2705_v32  ;;  %v2703_v48 = vadd.f32 %v2662_v6, %v2471_v5 }
 0x225   : > { %3023 = vst [vmem:[%s5204_s15 + $0xf0] sm:$0xff] %v2991_v15  ;;  %v2989_v8 = vmax.f32 %v2957_v34, 0.0  ;;  %v2960_v30 = vadd.f32 %v5190_v12, %v2921_v46  ;;  %v2919_v13 = vadd.f32 %v2878_v61, %v2703_v48 }
 0x227   : > { %3021 = vst [vmem:[%s5204_s15 + $0xe0] sm:$0xff] %v2989_v8  ;;  %v2992_v38 = vmax.f32 %v2960_v30, 0.0  ;;  %v2958_v7 = vadd.f32 %v5190_v12, %v2919_v13 }
 0x229   : > { %3024 = vst [vmem:[%s5204_s15 + $0xf8] sm:$0xff] %v2992_v38  ;;  %v2990_v54 = vmax.f32 %v2958_v7, 0.0 }
 0x22b   : > { %3022 = vst [vmem:[%s5204_s15 + $0xe8] sm:$0xff] %v2990_v54 }
 0x22c PF: > { %s13_s12 = sadd.s32 1, %s3836_s12  }
 0x22d   : > { %p10_p4 = scmp.ge.s32.totalorder %s13_s12, 4  }
 0x22f   :  { %12 = sbr.rel (!%p10_p4) target bundleno = 1 (0x1), region = 70 }

// kernel: inception_forward.7
= control target key start
LH: loop header
LB: loop body
LE: loop exit
PB: predicated region body
PF: predicated region fallthrough
CT: control target
= control target key end

     0   :  { %s8977_s12 = smov 0   ;;  %s12800_s0 = inlined_call_operand.vmem [shape: bf16[2,20,20,8], index: 0, kind: input, shape index: {}]   ;;  %s12801_s1 = inlined_call_operand.vmem [shape: bf16[5,5,8,128], index: 1, kind: input, shape index: {}]   ;;  %s12802_s2 = inlined_call_operand.vmem [shape: f32[1,128], index: 2, kind: input, shape index: {}]   ;;  %s12803_s3 = inlined_call_operand.vmem [shape: f32[2,256,128], index: 3, kind: output, shape index: {}]  }
   0x1 LB: > { %s7009_s13 = sadd.s32 4294967295, %s8955_s12   ;;  %p7013_p0 = scmp.ge.s32.totalorder %s8955_s12, 1  ;;  %s8955_s12 = sphi %s8977_s12, %s13_s12  }
   0x2   : > { %p137_p1 = scmp.lt.s32.totalorder %s8955_s12, 3 }
   0x4   : > { %p138_p2 = pnand %p7013_p0, %p137_p1 }
   0x6   : > { %141 = sbr.rel (%p138_p2) target bundleno = 1084 (0x43c), region = 32 }
   0xb   : > { %v7017_v0 = vld [vmem:[%s12801_s1 + $0x4] sm:$0xf]  ;;  %vm719_vm0 = vcmask 1043456   ;;  %p161_p3 = scmp.lt.s32.totalorder %s7009_s13, 1  ;;  %v8994_v2 = vld [vmem:[%s12801_s1] sm:$0xf] }
   0xc   : > { %8863 = vmatprep.subr.msk.bf16.mxu1 %vm719_vm0, %v7017_v0  ;;  %8862 = vmatprep.subr.msk.bf16.mxu0 %vm719_vm0, %v7017_v0  ;;  %v721_v1 = vsel %vm719_vm0, %v7017_v0, 0  ;;  %v9001_v3 = vld [vmem:[%s12801_s1 + $0x8] sm:$0xf]  ;;  %vm233_vm1 = vsmask.f32 3328  ;;  %vm670_vm3 = vcmask 64512  }
   0xd   : > { %8861 = vmatpush3.bf16.msra.mxu1 %v721_v1  ;;  %8011 = vmatpush3.bf16.msra.mxu0 %v721_v1  ;;  %s13800_s13 = smov (!%p161_p3, %s7009_s13), 1  ;;  %vm234_vm2 = vsmask.f32 7440  ;;  %v13145_v24 = vmov 0  ;;  %vm1192_vm5 = vcmask 1042432   ;;  %vm1193_vm6 = vcmask 1046532  }
   0xe   : > { %8864 = vmatprep.subr.msk.bf16.mxu1 %vm719_vm0, %v8994_v2  ;;  %8865 = vmatprep.subr.msk.bf16.mxu0 %vm719_vm0, %v9001_v3  ;;  %s8888_s20 = smul.u32 240, %s13800_s13  ;;  %vm9051_vm4 = vmor %vm233_vm1, %vm234_vm2  ;;  %vm1601_vm8 = vsmask.f32 2304  ;;  %vm1602_vm9 = vsmask.f32 6416  ;;  %vm2138_vm11 = vcmask 1041408  }
   0xf   : > { %v13146_v24 = vsel %vm9051_vm4, 4294967295, %v13145_v24  ;;  %vm9530_vm7 = vmor %vm1192_vm5, %vm1193_vm6  ;;  %vm2139_vm12 = vcmask 1045508  }
  0x10   : > { %s9011_s23 = scalar_lea.vmem %s12800_s0, %s8888_s20  ;;  %13147 = vst [vmem:[#allocation3_spill] sm:$0xff] %v13146_v24  ;;  %vm9804_vm10 = vmor %vm1601_vm8, %vm1602_vm9  ;;  %s7584_s20 = sshll.u32 %s13800_s13, 8 }
  0x11   : > { %v9014_v4 = vld [vmem:[%s9011_s23] sm:$0xf]  ;;  %v9017_v5 = vld [vmem:[%s9011_s23 + $0x4] sm:$0xf]  ;;  %v9020_v6 = vld [vmem:[%s9011_s23 + $0x8] sm:$0x3]  ;;  %s12655_s22 = scalar_lea.vmem %s12803_s3, %s7584_s20 }
  0x12   : > { %v12847_v7 = vshrl.u32 %v9014_v4, 16  ;;  %v12843_v8 = vshll.u32 %v9014_v4, 16  ;;  %v12840_v9 = vshll.u32 %v9017_v5, 16  ;;  %v12841_v10 = vshrl.u32 %v9017_v5, 16  ;;  %v9027_v11 = vld [vmem:[%s9011_s23 + $0x60] sm:$0xf]  ;;  %vm9851_vm13 = vmor %vm2138_vm11, %vm2139_vm12 }
  0x13   : > { %v12837_v12 = vshll.u32 %v9020_v6, 16  ;;  %v12818_v13 = vshrl.u32 %v9027_v11, 16  ;;  %v9040_v18 = vld [vmem:[%s9011_s23 + $0x64] sm:$0xf]  ;;  %v9043_v19 = vld [vmem:[%s9011_s23 + $0x68] sm:$0x3] }
  0x14   : > { %v239_v14 = vrot.slane %v12847_v7, 4  ;;  %v242_v15 = vrot.slane %v12843_v8, 5  ;;  %v248_v16 = vrot.slane %v12840_v9, 5  ;;  %v252_v17 = vrot.slane %v12841_v10, 4  ;;  %13144 = vst [vmem:[#allocation2_spill] sm:$0xff] %v9043_v19 }
  0x15   : > { %v9046_v20 = vld [vmem:[%s9011_s23 + $0xc] sm:$0xf]  ;;  %v258_v23 = vrot.slane %v12837_v12, 5  ;;  %v431_v25 = vrot.slane %v12818_v13, 4  ;;  %v12817_v26 = vshll.u32 %v9027_v11, 16  ;;  %v12815_v27 = vshll.u32 %v9040_v18, 16 }
  0x16   : > { %v243_v21 = vor.u32 %v242_v15, %v239_v14  ;;  %v253_v22 = vor.u32 %v252_v17, %v248_v16  ;;  %v12816_v28 = vshrl.u32 %v9040_v18, 16  ;;  %v12814_v31 = vshll.u32 %v9043_v19, 16  ;;  %v9062_v32 = vld [vmem:[%s9011_s23 + $0x10] sm:$0xf]  ;;  %v9072_v37 = vld [vmem:[%s9011_s23 + $0x14] sm:$0x3] }
  0x17   : > { %v261_v33 = vshrl.u32 %v9046_v20, 16  ;;  %v434_v34 = vrot.slane %v12817_v26, 5  ;;  %v440_v35 = vrot.slane %v12815_v27, 5  ;;  %v264_v38 = vshll.u32 %v9046_v20, 16  ;;  %v9090_v58 = vld [vmem:[%s9011_s23 + $0x6c] sm:$0xf] }
  0x18   : > { %v244_v29 = vrot.slane %v243_v21, 4  ;;  %v254_v30 = vrot.slane %v253_v22, 4  ;;  %v444_v36 = vrot.slane %v12816_v28, 4  ;;  %v450_v41 = vrot.slane %v12814_v31, 5  ;;  %13148 = vst [vmem:[#allocation4_spill] sm:$0xff] %v9090_v58 }
  0x19   : > { %v263_v42 = vrot.slane %v261_v33, 4  ;;  %v435_v44 = vor.u32 %v434_v34, %v431_v25  ;;  %v266_v46 = vrot.slane %v264_v38, 5  ;;  %v270_v47 = vshll.u32 %v9062_v32, 16  ;;  %v9103_v15 = vld [vmem:[%s9011_s23 + $0x70] sm:$0xf] }
  0x1a   : > { %v249_v39 = vsel %vm9051_vm4, %v244_v29, %v248_v16  ;;  %v259_v40 = vsel %vm9051_vm4, %v254_v30, %v258_v23  ;;  %v445_v45 = vor.u32 %v444_v36, %v440_v35  ;;  %v274_v48 = vshrl.u32 %v9062_v32, 16  ;;  %13150 = vst [vmem:[#allocation6_spill] sm:$0xff] %v9103_v15  ;;  %v9106_v16 = vld [vmem:[%s9011_s23 + $0x74] sm:$0x3]  ;;  %v9121_v30 = vld [vmem:[%s9011_s23 + $0x18] sm:$0xf] }
  0x1b   : > { %v7018_v43 = vcombine.low %v249_v39, %v259_v40  ;;  %v12838_v49 = vshll.u32 %v9072_v37, 16  ;;  %v9084_v50 = vrot.slane %v261_v33, 5  ;;  %v436_v51 = vrot.slane %v435_v44, 4  ;;  %13151 = vst [vmem:[#allocation7_spill] sm:$0xff] %v9106_v16  ;;  %v9129_v36 = vld [vmem:[%s9011_s23 + $0x1c] sm:$0xf] }
  0x1c   : > { %v446_v52 = vrot.slane %v445_v45, 4  ;;  %v267_v53 = vor.u32 %v266_v46, %v263_v42  ;;  %v9087_v54 = vrot.slane %v264_v38, 6  ;;  %v272_v55 = vrot.slane %v270_v47, 5  ;;  %v9141_v42 = vld [vmem:[%s9011_s23 + $0x78] sm:$0xf] }
  0x1d   : > { %8012 = vmatprep.mubr.msk.bf16.mxu0 %vm670_vm3, %v7018_v43  ;;  %v276_v56 = vrot.slane %v274_v48, 4  ;;  %v1623_v57 = vrot.slane %v274_v48, 5  ;;  %v441_v59 = vsel %vm9051_vm4, %v436_v51, %v440_v35  ;;  %v282_v1 = vrot.slane %v12838_v49, 5  ;;  %13152 = vst [vmem:[#allocation8_spill] sm:$0xff] %v9141_v42  ;;  %v9252_v26 = vld [vmem:[%s9011_s23 + $0x8c] sm:$0x3] }
  0x1e   : > { %v451_v60 = vsel %vm9051_vm4, %v446_v52, %v450_v41  ;;  %v268_v61 = vrot.slane %v267_v53, 4  ;;  %v1624_v14 = vrot.slane %v270_v47, 6  ;;  %v12809_v17 = vshrl.u32 %v9090_v58, 16  ;;  %v9138_v41 = vld [vmem:[%s9011_s23 + $0x20] sm:$0x3]  ;;  %13160 = vst [vmem:[#allocation16_spill] sm:$0xff] %v9252_v26 }
  0x1f   : > { %v9098_v63 = vcombine.low %v441_v59, %v451_v60  ;;  %v277_v0 = vor.u32 %v276_v56, %v272_v55  ;;  %v9111_v21 = vsel %vm719_vm0, %v8994_v2, 0  ;;  %v12808_v29 = vshll.u32 %v9090_v58, 16  ;;  %v9157_v52 = vld [vmem:[%s12801_s1 + $0x10] sm:$0xf]  ;;  %v9346_v7 = vld [vmem:[%s9011_s23 + $0x44] sm:$0x3] }
  0x20   : > { %v273_v22 = vsel %vm9051_vm4, %v268_v61, %v272_v55  ;;  %v9117_v25 = vor.u32 %v1624_v14, %v1623_v57  ;;  %v455_v33 = vrot.slane %v12809_v17, 4  ;;  %v12805_v2 = vshll.u32 %v9103_v15, 16  ;;  %v9164_v57 = vld [vmem:[%s9011_s23 + $0x7c] sm:$0xf]  ;;  %v9174_v14 = vld [vmem:[%s9011_s23 + $0x80] sm:$0x3] }
  0x21   : > { %13149 = vst [vmem:[#allocation5_spill] sm:$0xff] %v9098_v63  ;;  %8028 = vmatprep.mubr.msk.bf16.mxu1 %vm670_vm3, %v9098_v63  ;;  %v278_v23 = vrot.slane %v277_v0, 4  ;;  %v12807_v34 = vshrl.u32 %v9103_v15, 16  ;;  %v12804_v35 = vshll.u32 %v9106_v16, 16  ;;  %v458_v39 = vrot.slane %v12808_v29, 5  ;;  %13154 = vst [vmem:[#allocation10_spill] sm:$0xff] %v9164_v57 }
  0x22   : > { %v1406_v40 = vsel %vm719_vm0, %v9001_v3, 0  ;;  %v464_v44 = vrot.slane %v12805_v2, 5  ;;  %v12831_v3 = vshrl.u32 %v9121_v30, 16  ;;  %v12830_v48 = vshll.u32 %v9121_v30, 16  ;;  %13155 = vst [vmem:[#allocation11_spill] sm:$0xff] %v9174_v14  ;;  %13169 = vst [vmem:[#allocation25_spill] sm:$0xff] %v9346_v7 }
  0x23   : > { %v283_v38 = vsel %vm9051_vm4, %v278_v23, %v282_v1  ;;  %v468_v45 = vrot.slane %v12807_v34, 4  ;;  %v474_v46 = vrot.slane %v12804_v35, 5  ;;  %v459_v47 = vor.u32 %v458_v39, %v455_v33  ;;  %v9196_v29 = vld [vmem:[%s9011_s23 + $0x28] sm:$0xf] }
  0x24   : > { %v9143_v43 = vcombine.low %v273_v22, %v283_v38  ;;  %v12828_v51 = vshll.u32 %v9129_v36, 16  ;;  %v12829_v55 = vshrl.u32 %v9129_v36, 16  ;;  %v12819_v56 = vshll.u32 %v9138_v41, 16 }
  0x25   : > { %v469_v53 = vor.u32 %v468_v45, %v464_v44  ;;  %v12806_v59 = vshrl.u32 %v9141_v42, 16  ;;  %v460_v60 = vrot.slane %v459_v47, 4  ;;  %v287_v61 = vrot.slane %v12831_v3, 4 }
  0x26   : > { %13153 = vst [vmem:[#allocation9_spill] sm:$0xff] %v9143_v43  ;;  %8013 = vmatmul.mubr.msk.bf16.vlgmr.msra.gmra.mxu0 %vm670_vm3, %v9143_v43  ;;  %v290_v0 = vrot.slane %v12830_v48, 5  ;;  %v296_v1 = vrot.slane %v12828_v51, 5  ;;  %v300_v23 = vrot.slane %v12829_v55, 4  ;;  %v306_v33 = vrot.slane %v12819_v56, 5 }
  0x27   : > { %8079 = vmatpush3.bf16.msra.mxu0 %v1406_v40  ;;  %v470_v22 = vrot.slane %v469_v53, 4  ;;  %v479_v38 = vrot.slane %v12806_v59, 4  ;;  %v465_v39 = vsel %vm9051_vm4, %v460_v60, %v464_v44  ;;  %v12813_v45 = vshll.u32 %v9141_v42, 16  ;;  %v9189_v53 = vld [vmem:[%s9011_s23 + $0x24] sm:$0xf] }
  0x28   : > { %8867 = vmatprep.subr.msk.bf16.mxu0 %vm719_vm0, %v9157_v52  ;;  %v291_v40 = vor.u32 %v290_v0, %v287_v61  ;;  %v12810_v47 = vshll.u32 %v9164_v57, 16  ;;  %v301_v2 = vor.u32 %v300_v23, %v296_v1  ;;  %v12812_v59 = vshrl.u32 %v9164_v57, 16  ;;  %v9257_v56 = vld [vmem:[%s9011_s23 + $0x30] sm:$0xf] }
  0x29   : > { %v475_v35 = vsel %vm9051_vm4, %v470_v22, %v474_v46  ;;  %v12811_v34 = vshll.u32 %v9174_v14, 16  ;;  %v482_v61 = vrot.slane %v12813_v45, 5  ;;  %v12823_v23 = vshrl.u32 %v9189_v53, 16 }
  0x2a   : > { %v9198_v44 = vcombine.low %v465_v39, %v475_v35  ;;  %v292_v60 = vrot.slane %v291_v40, 4  ;;  %v488_v0 = vrot.slane %v12810_v47, 5  ;;  %v302_v17 = vrot.slane %v301_v2, 4  ;;  %v9212_v35 = vld [vmem:[%s12801_s1 + $0xc] sm:$0xf] }
  0x2b   : > { %v492_v46 = vrot.slane %v12812_v59, 4  ;;  %v498_v22 = vrot.slane %v12811_v34, 5  ;;  %v483_v39 = vor.u32 %v482_v61, %v479_v38  ;;  %v9219_v40 = vld [vmem:[%s9011_s23 + $0x2c] sm:$0x3]  ;;  %v12822_v47 = vshll.u32 %v9189_v53, 16 }
  0x2c   : > { %13156 = vst [vmem:[#allocation12_spill] sm:$0xff] %v9198_v44  ;;  %8029 = vmatmul.mubr.msk.bf16.vlgmr.msra.gmra.mxu1 %vm670_vm3, %v9198_v44  ;;  %v297_v2 = vsel %vm9051_vm4, %v292_v60, %v296_v1  ;;  %v12820_v34 = vshll.u32 %v9196_v29, 16  ;;  %v9224_v59 = vld [vmem:[%s9011_s23 + $0x84] sm:$0xf]  ;;  %v307_v45 = vsel %vm9051_vm4, %v302_v17, %v306_v33  ;;  %v311_v27 = vrot.slane %v12823_v23, 4 }
  0x2d   : > { %13157 = vst [vmem:[#allocation13_spill] sm:$0xff] %v9224_v59  ;;  %8045 = vmatpush3.bf16.msra.mxu1 %v9111_v21  ;;  %v493_v31 = vor.u32 %v492_v46, %v488_v0  ;;  %v12821_v1 = vshrl.u32 %v9196_v29, 16  ;;  %v9233_v38 = vld [vmem:[%s9011_s23 + $0x88] sm:$0xf]  ;;  %v9235_v60 = vcombine.low %v297_v2, %v307_v45  ;;  %v484_v61 = vrot.slane %v483_v39, 4 }
  0x2e   : > { %13158 = vst [vmem:[#allocation14_spill] sm:$0xff] %v9233_v38  ;;  %v314_v28 = vrot.slane %v12822_v47, 5  ;;  %v320_v21 = vrot.slane %v12820_v34, 5  ;;  %8866 = vmatprep.subr.msk.bf16.mxu1 %vm719_vm0, %v9212_v35  ;;  %v12824_v46 = vshll.u32 %v9219_v40, 16  ;;  %v12825_v45 = vshrl.u32 %v9224_v59, 16 }
  0x2f   : > { %13159 = vst [vmem:[#allocation15_spill] sm:$0xff] %v9235_v60  ;;  %v494_v17 = vrot.slane %v493_v31, 4  ;;  %v324_v33 = vrot.slane %v12821_v1, 4  ;;  %8016 = vmatprep.mubr.msk.bf16.mxu0 %vm670_vm3, %v9235_v60  ;;  %v489_v2 = vsel %vm9051_vm4, %v484_v61, %v488_v0  ;;  %v12826_v13 = vshll.u32 %v9224_v59, 16 }
  0x30   : > { %v315_v39 = vor.u32 %v314_v28, %v311_v27  ;;  %v12827_v31 = vshll.u32 %v9233_v38, 16  ;;  %v330_v47 = vrot.slane %v12824_v46, 5  ;;  %v503_v0 = vrot.slane %v12825_v45, 4  ;;  %v9266_v27 = vld [vmem:[%s9011_s23 + $0x34] sm:$0xf] }
  0x31   : > { %v499_v34 = vsel %vm9051_vm4, %v494_v17, %v498_v22  ;;  %v325_v1 = vor.u32 %v324_v33, %v320_v21  ;;  %v506_v23 = vrot.slane %v12826_v13, 5  ;;  %v12832_v33 = vshrl.u32 %v9233_v38, 16 }
  0x32   : > { %v9268_v28 = vcombine.low %v489_v2, %v499_v34  ;;  %v316_v61 = vrot.slane %v315_v39, 4  ;;  %v512_v22 = vrot.slane %v12827_v31, 5  ;;  %v12833_v46 = vshll.u32 %v9252_v26, 16  ;;  %v9282_v39 = vld [vmem:[%s9011_s23 + $0x38] sm:$0x3] }
  0x33   : > { %v326_v17 = vrot.slane %v325_v1, 4  ;;  %v12836_v45 = vshrl.u32 %v9257_v56, 16  ;;  %v507_v2 = vor.u32 %v506_v23, %v503_v0  ;;  %13162 = vst [vmem:[#allocation18_spill] sm:$0xff] %v9282_v39  ;;  %v12834_v13 = vshll.u32 %v9257_v56, 16  ;;  %v9287_v1 = vld [vmem:[%s9011_s23 + $0x90] sm:$0xf] }
  0x34   : > { %13161 = vst [vmem:[#allocation17_spill] sm:$0xff] %v9268_v28  ;;  %8032 = vmatprep.mubr.msk.bf16.mxu1 %vm670_vm3, %v9268_v28  ;;  %v321_v34 = vsel %vm9051_vm4, %v316_v61, %v320_v21  ;;  %v12835_v31 = vshll.u32 %v9266_v27, 16  ;;  %13163 = vst [vmem:[#allocation19_spill] sm:$0xff] %v9287_v1  ;;  %v516_v55 = vrot.slane %v12832_v33, 4  ;;  %v522_v48 = vrot.slane %v12833_v46, 5 }
  0x35   : > { %v331_v51 = vsel %vm9051_vm4, %v326_v17, %v330_v47  ;;  %v335_v23 = vrot.slane %v12836_v45, 4  ;;  %v9298_v21 = vld [vmem:[%s9011_s23 + $0x94] sm:$0xf]  ;;  %v508_v61 = vrot.slane %v507_v2, 4  ;;  %v338_v3 = vrot.slane %v12834_v13, 5 }
  0x36   : > { %13164 = vst [vmem:[#allocation20_spill] sm:$0xff] %v9298_v21  ;;  %v9300_v0 = vcombine.low %v321_v34, %v331_v51  ;;  %v344_v47 = vrot.slane %v12835_v31, 5  ;;  %v517_v17 = vor.u32 %v516_v55, %v512_v22  ;;  %v12839_v33 = vshrl.u32 %v9266_v27, 16  ;;  %v9314_v2 = vld [vmem:[%s9011_s23 + $0x98] sm:$0x3] }
  0x37   : > { %v12842_v46 = vshll.u32 %v9282_v39, 16  ;;  %v12844_v62 = vshrl.u32 %v9287_v1, 16  ;;  %v513_v51 = vsel %vm9051_vm4, %v508_v61, %v512_v22  ;;  %v339_v34 = vor.u32 %v338_v3, %v335_v23  ;;  %13166 = vst [vmem:[#allocation22_spill] sm:$0xff] %v9314_v2  ;;  %v9319_v31 = vld [vmem:[%s9011_s23 + $0x3c] sm:$0xf] }
  0x38   : > { %13165 = vst [vmem:[#allocation21_spill] sm:$0xff] %v9300_v0  ;;  %8017 = vmatmul.mubr.msk.bf16.gmra.mxu0 %vm670_vm3, %v9300_v0  ;;  %v12845_v13 = vshll.u32 %v9287_v1, 16  ;;  %v12846_v55 = vshll.u32 %v9298_v21, 16  ;;  %v518_v45 = vrot.slane %v517_v17, 4  ;;  %v348_v12 = vrot.slane %v12839_v33, 4 }
  0x39   : > { %v354_v49 = vrot.slane %v12842_v46, 5  ;;  %v527_v3 = vrot.slane %v12844_v62, 4  ;;  %v340_v22 = vrot.slane %v339_v34, 4  ;;  %v12849_v17 = vshrl.u32 %v9298_v21, 16  ;;  %v9336_v46 = vld [vmem:[%s9011_s23 + $0x40] sm:$0xf] }
  0x3a   : > { %v530_v23 = vrot.slane %v12845_v13, 5  ;;  %v536_v61 = vrot.slane %v12846_v55, 5  ;;  %v523_v33 = vsel %vm9051_vm4, %v518_v45, %v522_v48  ;;  %v349_v9 = vor.u32 %v348_v12, %v344_v47  ;;  %13167 = vst [vmem:[#allocation23_spill] sm:$0xff] %v9336_v46  ;;  %v9349_v48 = vld [vmem:[%s9011_s23 + $0x9c] sm:$0xf] }
  0x3b   : > { %v12848_v10 = vshll.u32 %v9314_v2, 16  ;;  %v12850_v8 = vshrl.u32 %v9319_v31, 16  ;;  %v9339_v62 = vcombine.low %v513_v51, %v523_v33  ;;  %v345_v34 = vsel %vm9051_vm4, %v340_v22, %v344_v47  ;;  %13170 = vst [vmem:[#allocation26_spill] sm:$0xff] %v9349_v48  ;;  %v9407_v0 = vld [vmem:[%s9011_s23 + $0x50] sm:$0x3] }
  0x3c   : > { %v531_v13 = vor.u32 %v530_v23, %v527_v3  ;;  %v540_v55 = vrot.slane %v12849_v17, 4  ;;  %v350_v12 = vrot.slane %v349_v9, 4  ;;  %v12855_v51 = vshll.u32 %v9319_v31, 16  ;;  %13179 = vst [vmem:[#allocation33_spill] sm:$0xff] %v9407_v0 }
  0x3d   : > { %13168 = vst [vmem:[#allocation24_spill] sm:$0xff] %v9339_v62  ;;  %v546_v45 = vrot.slane %v12848_v10, 5  ;;  %v359_v33 = vrot.slane %v12850_v8, 4  ;;  %8033 = vmatmul.mubr.msk.bf16.gmra.mxu1 %vm670_vm3, %v9339_v62  ;;  %v12861_v22 = vshll.u32 %v9336_v46, 16  ;;  %v9366_v8 = vld [vmem:[%s9011_s23 + $0xa0] sm:$0xf] }
  0x3e   : > { %v532_v47 = vrot.slane %v531_v13, 4  ;;  %v541_v3 = vor.u32 %v540_v55, %v536_v61  ;;  %v355_v9 = vsel %vm9051_vm4, %v350_v12, %v354_v49  ;;  %v362_v10 = vrot.slane %v12855_v51, 5  ;;  %13171 = vst [vmem:[#allocation27_spill] sm:$0xff] %v9366_v8  ;;  %v9376_v49 = vld [vmem:[%s9011_s23 + $0xa4] sm:$0x3] }
  0x3f   : > { %v12860_v28 = vshrl.u32 %v9349_v48, 16  ;;  %v9369_v62 = vcombine.low %v345_v34, %v355_v9  ;;  %v368_v23 = vrot.slane %v12861_v22, 5  ;;  %13173 = vst [vmem:[#allocation29_spill] sm:$0xff] %v9376_v49  ;;  %v13174_v51 = vshrl.u32 %v9336_v46, 16  ;;  %v9385_v9 = vld [vmem:[%s9011_s23 + $0x48] sm:$0xf] }
  0x40   : > { %v537_v13 = vsel %vm9051_vm4, %v532_v47, %v536_v61  ;;  %v542_v55 = vrot.slane %v541_v3, 4  ;;  %v363_v12 = vor.u32 %v362_v10, %v359_v33  ;;  %v13175_v44 = vshll.u32 %v9346_v7, 16  ;;  %13176 = vst [vmem:[#allocation30_spill] sm:$0xff] %v9385_v9  ;;  %v9398_v22 = vld [vmem:[%s9011_s23 + $0x4c] sm:$0xf] }
  0x41   : > { %13172 = vst [vmem:[#allocation28_spill] sm:$0xff] %v9369_v62  ;;  %v372_v17 = vrot.slane %v13174_v51, 4  ;;  %v551_v34 = vrot.slane %v12860_v28, 4  ;;  %8020 = vmatprep.mubr.msk.bf16.mxu0 %vm670_vm3, %v9369_v62  ;;  %v12867_v10 = vshll.u32 %v9349_v48, 16  ;;  %v12866_v33 = vshll.u32 %v9366_v8, 16  ;;  %13178 = vst [vmem:[#allocation32_spill] sm:$0xff] %v9398_v22 }
  0x42   : > { %v378_v63 = vrot.slane %v13175_v44, 5  ;;  %v547_v61 = vsel %vm9051_vm4, %v542_v55, %v546_v45  ;;  %v12870_v51 = vshrl.u32 %v9366_v8, 16  ;;  %v364_v44 = vrot.slane %v363_v12, 4  ;;  %v9421_v8 = vld [vmem:[%s9011_s23 + $0xa8] sm:$0xf] }
  0x43   : > { %v9394_v47 = vcombine.low %v537_v13, %v547_v61  ;;  %v373_v3 = vor.u32 %v372_v17, %v368_v23  ;;  %v12876_v28 = vshll.u32 %v9376_v49, 16  ;;  %v554_v62 = vrot.slane %v12867_v10, 5  ;;  %13180 = vst [vmem:[#allocation34_spill] sm:$0xff] %v9421_v8 }
  0x44   : > { %v560_v45 = vrot.slane %v12866_v33, 5  ;;  %v564_v55 = vrot.slane %v12870_v51, 4  ;;  %v12877_v13 = vshrl.u32 %v9385_v9, 16  ;;  %v369_v17 = vsel %vm9051_vm4, %v364_v44, %v368_v23 }
  0x45   : > { %13177 = vst [vmem:[#allocation31_spill] sm:$0xff] %v9394_v47  ;;  %8036 = vmatprep.mubr.msk.bf16.mxu1 %vm670_vm3, %v9394_v47  ;;  %v374_v12 = vrot.slane %v373_v3, 4  ;;  %v570_v61 = vrot.slane %v12876_v28, 5  ;;  %v12880_v33 = vshll.u32 %v9385_v9, 16  ;;  %v555_v10 = vor.u32 %v554_v62, %v551_v34  ;;  %v9430_v62 = vld [vmem:[%s9011_s23 + $0xac] sm:$0xf] }
  0x46   : > { %v565_v60 = vor.u32 %v564_v55, %v560_v45  ;;  %v383_v51 = vrot.slane %v12877_v13, 4  ;;  %v12884_v43 = vshll.u32 %v9398_v22, 16  ;;  %v12885_v44 = vshrl.u32 %v9398_v22, 16  ;;  %13181 = vst [vmem:[#allocation35_spill] sm:$0xff] %v9430_v62 }
  0x47   : > { %v379_v47 = vsel %vm9051_vm4, %v374_v12, %v378_v63  ;;  %v386_v23 = vrot.slane %v12880_v33, 5  ;;  %v12883_v3 = vshll.u32 %v9407_v0, 16  ;;  %v556_v55 = vrot.slane %v555_v10, 4  ;;  %v9441_v33 = vld [vmem:[%s9011_s23 + $0xb0] sm:$0x3] }
  0x48   : > { %v9432_v34 = vcombine.low %v369_v17, %v379_v47  ;;  %v566_v28 = vrot.slane %v565_v60, 4  ;;  %v392_v13 = vrot.slane %v12884_v43, 5  ;;  %v396_v63 = vrot.slane %v12885_v44, 4  ;;  %13183 = vst [vmem:[#allocation37_spill] sm:$0xff] %v9441_v33  ;;  %v9453_v17 = vld [vmem:[%s9011_s23 + $0x54] sm:$0xf] }
  0x49   : > { %v387_v49 = vor.u32 %v386_v23, %v383_v51  ;;  %v402_v12 = vrot.slane %v12883_v3, 5  ;;  %v12889_v48 = vshrl.u32 %v9421_v8, 16  ;;  %v561_v60 = vsel %vm9051_vm4, %v556_v55, %v560_v45  ;;  %v9460_v45 = vld [vmem:[%s9011_s23 + $0x58] sm:$0xf] }
  0x4a   : > { %13182 = vst [vmem:[#allocation36_spill] sm:$0xff] %v9432_v34  ;;  %8021 = vmatmul.mubr.msk.bf16.gmra.mxu0 %vm670_vm3, %v9432_v34  ;;  %v571_v10 = vsel %vm9051_vm4, %v566_v28, %v570_v61  ;;  %v12888_v51 = vshll.u32 %v9421_v8, 16  ;;  %v12890_v47 = vshll.u32 %v9430_v62, 16  ;;  %v397_v43 = vor.u32 %v396_v63, %v392_v13 }
  0x4b   : > { %v9455_v23 = vcombine.low %v561_v60, %v571_v10  ;;  %v388_v3 = vrot.slane %v387_v49, 4  ;;  %v575_v44 = vrot.slane %v12889_v48, 4  ;;  %v12897_v55 = vshrl.u32 %v9430_v62, 16  ;;  %v9473_v60 = vld [vmem:[%s9011_s23 + $0x5c] sm:$0x3] }
  0x4c   : > { %v578_v28 = vrot.slane %v12888_v51, 5  ;;  %v584_v61 = vrot.slane %v12890_v47, 5  ;;  %v12898_v34 = vshll.u32 %v9441_v33, 16  ;;  %v398_v63 = vrot.slane %v397_v43, 4  ;;  %13185 = vst [vmem:[#allocation39_spill] sm:$0xff] %v9473_v60 }
  0x4d   : > { %13184 = vst [vmem:[#allocation38_spill] sm:$0xff] %v9455_v23  ;;  %8037 = vmatmul.mubr.msk.bf16.gmra.mxu1 %vm670_vm3, %v9455_v23  ;;  %v393_v49 = vsel %vm9051_vm4, %v388_v3, %v392_v13  ;;  %v12905_v10 = vshrl.u32 %v9453_v17, 16  ;;  %v12907_v51 = vshll.u32 %v9453_v17, 16  ;;  %v588_v47 = vrot.slane %v12897_v55, 4  ;;  %v9483_v23 = vld [vmem:[%s9011_s23 + $0xb4] sm:$0xf] }
  0x4e   : > { %v579_v48 = vor.u32 %v578_v28, %v575_v44  ;;  %v594_v8 = vrot.slane %v12898_v34, 5  ;;  %13186 = vst [vmem:[#allocation40_spill] sm:$0xff] %v9483_v23  ;;  %v403_v43 = vsel %vm9051_vm4, %v398_v63, %v402_v12  ;;  %v12906_v3 = vshrl.u32 %v9460_v45, 16  ;;  %v9493_v28 = vld [vmem:[%s9011_s23 + $0xb8] sm:$0xf] }
  0x4f   : > { %v407_v13 = vrot.slane %v12905_v10, 4  ;;  %v410_v44 = vrot.slane %v12907_v51, 5  ;;  %13187 = vst [vmem:[#allocation41_spill] sm:$0xff] %v9493_v28  ;;  %v9495_v55 = vcombine.low %v393_v49, %v403_v43  ;;  %v589_v2 = vor.u32 %v588_v47, %v584_v61 }
  0x50   : > { %v580_v34 = vrot.slane %v579_v48, 4  ;;  %v13189_v33 = vshll.u32 %v9460_v45, 16  ;;  %v420_v12 = vrot.slane %v12906_v3, 4  ;;  %v12912_v63 = vshll.u32 %v9473_v60, 16  ;;  %v9508_v48 = vld [vmem:[%s9011_s23 + $0xbc] sm:$0x3] }
  0x51   : > { %13188 = vst [vmem:[#allocation42_spill] sm:$0xff] %v9495_v55  ;;  %v411_v26 = vor.u32 %v410_v44, %v407_v13  ;;  %v12916_v10 = vshrl.u32 %v9483_v23, 16  ;;  %8024 = vmatprep.mubr.msk.bf16.mxu0 %vm670_vm3, %v9495_v55  ;;  %v590_v43 = vrot.slane %v589_v2, 4  ;;  %13190 = vst [vmem:[#allocation43_spill] sm:$0xff] %v9508_v48  ;;  %v12914_v47 = vshll.u32 %v9483_v23, 16 }
  0x52   : > { %v416_v62 = vrot.slane %v13189_v33, 5  ;;  %v585_v49 = vsel %vm9051_vm4, %v580_v34, %v584_v61  ;;  %v12913_v33 = vshll.u32 %v9493_v28, 16  ;;  %v426_v3 = vrot.slane %v12912_v63, 5 }
  0x53   : > { %v412_v13 = vrot.slane %v411_v26, 4  ;;  %v599_v51 = vrot.slane %v12916_v10, 4  ;;  %v595_v55 = vsel %vm9051_vm4, %v590_v43, %v594_v8  ;;  %v602_v2 = vrot.slane %v12914_v47, 5 }
  0x54   : > { %v421_v44 = vor.u32 %v420_v12, %v416_v62  ;;  %v608_v34 = vrot.slane %v12913_v33, 5  ;;  %v12915_v61 = vshrl.u32 %v9493_v28, 16  ;;  %v9523_v1 = vcombine.low %v585_v49, %v595_v55 }
  0x55   : > { %v417_v26 = vsel %vm9051_vm4, %v412_v13, %v416_v62  ;;  %v12923_v63 = vshll.u32 %v9508_v48, 16  ;;  %v13192_v8 = vmov 0  ;;  %v603_v43 = vor.u32 %v602_v2, %v599_v51 }
  0x56   : > { %13191 = vst [vmem:[#allocation44_spill] sm:$0xff] %v9523_v1  ;;  %v422_v12 = vrot.slane %v421_v44, 4  ;;  %v13193_v8 = vsel %vm9530_vm7, 4294967295, %v13192_v8  ;;  %v612_v33 = vrot.slane %v12915_v61, 4  ;;  %v7082_v47 = vrot.slane %v9014_v4, 9  ;;  %8040 = vmatprep.mubr.msk.bf16.mxu1 %vm670_vm3, %v9523_v1 }
  0x57   : > { %13194 = vst [vmem:[#allocation45_spill] sm:$0xff] %v13193_v8  ;;  %v1197_v55 = vrot.slane %v9017_v5, 5  ;;  %v618_v49 = vrot.slane %v12923_v63, 5  ;;  %v1200_v13 = vrot.slane %v9020_v6, 5  ;;  %v604_v51 = vrot.slane %v603_v43, 4 }
  0x58   : > { %v427_v62 = vsel %vm9051_vm4, %v422_v12, %v426_v3  ;;  %v613_v2 = vor.u32 %v612_v33, %v608_v34  ;;  %v7083_v23 = vrot.slane %v9046_v20, 9  ;;  %v1204_v1 = vrot.slane %v9062_v32, 5 }
  0x59   : > { %v9545_v44 = vcombine.low %v417_v26, %v427_v62  ;;  %v1198_v61 = vsel %vm9530_vm7, %v7082_v47, %v1197_v55  ;;  %v1199_v10 = vrot.slane %v1197_v55, 4  ;;  %v1207_v28 = vrot.slane %v9072_v37, 5 }
  0x5a   : > { %v609_v3 = vsel %vm9051_vm4, %v604_v51, %v608_v34  ;;  %v614_v26 = vrot.slane %v613_v2, 4  ;;  %v7084_v12 = vrot.slane %v9121_v30, 9  ;;  %v1205_v47 = vsel %vm9530_vm7, %v7083_v23, %v1204_v1 }
  0x5b   : > { %13195 = vst [vmem:[#allocation46_spill] sm:$0xff] %v9545_v44  ;;  %8025 = vmatmul.mubr.msk.bf16.gmra.mxu0 %vm670_vm3, %v9545_v44  ;;  %v1201_v33 = vsel %vm9530_vm7, %v1199_v10, %v1200_v13  ;;  %v1206_v43 = vrot.slane %v1204_v1, 4  ;;  %v1211_v55 = vrot.slane %v9129_v36, 5  ;;  %v7050_v63 = vcombine.low %v9014_v4, %v9017_v5 }
  0x5c   : > { %v619_v62 = vsel %vm9051_vm4, %v614_v26, %v618_v49  ;;  %v7099_v44 = vcombine.low %v1198_v61, %v1201_v33  ;;  %v1214_v34 = vrot.slane %v9138_v41, 5  ;;  %v7085_v49 = vrot.slane %v9189_v53, 9 }
  0x5d   : > { %v9567_v51 = vcombine.low %v609_v3, %v619_v62  ;;  %v1208_v10 = vsel %vm9530_vm7, %v1206_v43, %v1207_v28  ;;  %v1212_v23 = vsel %vm9530_vm7, %v7084_v12, %v1211_v55  ;;  %v1213_v1 = vrot.slane %v1211_v55, 4 }
  0x5e   : > { %8080 = vmatprep.mubr.msk.bf16.mxu0 %vm670_vm3, %v7099_v44  ;;  %v9574_v13 = vcombine.low %v1205_v47, %v1208_v10  ;;  %v1218_v2 = vrot.slane %v9196_v29, 5  ;;  %v1221_v28 = vrot.slane %v9219_v40, 5  ;;  %v7086_v3 = vrot.slane %v9257_v56, 9 }
  0x5f   : > { %13196 = vst [vmem:[#allocation47_spill] sm:$0xff] %v9567_v51  ;;  %8041 = vmatmul.mubr.msk.bf16.gmra.mxu1 %vm670_vm3, %v9567_v51  ;;  %v1215_v61 = vsel %vm9530_vm7, %v1213_v1, %v1214_v34  ;;  %v1225_v26 = vrot.slane %v9266_v27, 5  ;;  %v2352_v44 = vsel %vm719_vm0, %v9157_v52, 0  ;;  %v1228_v47 = vrot.slane %v9282_v39, 5 }
  0x60   : > { %13197 = vst [vmem:[#allocation48_spill] sm:$0xff] %v9574_v13  ;;  %8046 = vmatprep.mubr.msk.bf16.mxu1 %vm670_vm3, %v7050_v63  ;;  %v9588_v12 = vcombine.low %v1212_v23, %v1215_v61  ;;  %v1220_v33 = vrot.slane %v1218_v2, 4  ;;  %v13199_v43 = vshrl.u32 %v9014_v4, 16  ;;  %v1628_v62 = vshrl.u32 %v9072_v37, 16  ;;  %v9601_v63 = vld [vmem:[%s12801_s1 + $0x18] sm:$0xf] }
  0x61   : > { %v1943_v34 = vsel %vm719_vm0, %v9212_v35, 0  ;;  %v1227_v10 = vrot.slane %v1225_v26, 4  ;;  %v13200_v52 = vshll.u32 %v9014_v4, 16  ;;  %v9609_v1 = vcombine.low %v9046_v20, %v9062_v32 }
  0x62   : > { %13198 = vst [vmem:[#allocation49_spill] sm:$0xff] %v9588_v12  ;;  %v9593_v55 = vrot.slane %v13199_v43, 5  ;;  %v9615_v35 = vcombine.low %v9121_v30, %v9129_v36  ;;  %v1232_v61 = vrot.slane %v9336_v46, 5  ;;  %v1219_v4 = vsel %vm9530_vm7, %v7085_v49, %v1218_v2 }
  0x63   : > { %v9605_v23 = vrot.slane %v13200_v52, 6  ;;  %13201 = vst [vmem:[#allocation50_spill] sm:$0xff] %v9609_v1  ;;  %8081 = vmatmul.mubr.msk.bf16.vlgmr.msra.gmra.mxu0 %vm670_vm3, %v9574_v13  ;;  %v1222_v20 = vsel %vm9530_vm7, %v1220_v33, %v1221_v28  ;;  %v1226_v43 = vsel %vm9530_vm7, %v7086_v3, %v1225_v26  ;;  %v7087_v52 = vrot.slane %v9319_v31, 9 }
  0x64   : > { %13202 = vst [vmem:[#allocation51_spill] sm:$0xff] %v9615_v35  ;;  %8147 = vmatpush3.bf16.msra.mxu0 %v2352_v44  ;;  %8084 = vmatprep.mubr.msk.bf16.mxu0 %vm670_vm3, %v9588_v12  ;;  %v1229_v13 = vsel %vm9530_vm7, %v1227_v10, %v1228_v47  ;;  %v1234_v24 = vrot.slane %v1232_v61, 4  ;;  %v1235_v44 = vrot.slane %v9346_v7, 5  ;;  %v1239_v51 = vrot.slane %v9398_v22, 5 }
  0x65   : > { %8869 = vmatprep.subr.msk.bf16.mxu0 %vm719_vm0, %v9601_v63  ;;  %v13203_v49 = vshrl.u32 %v9017_v5, 16  ;;  %v13204_v28 = vshll.u32 %v9017_v5, 16  ;;  %v9641_v26 = vrot.slane %v1628_v62, 5  ;;  %v13205_v33 = vshll.u32 %v9072_v37, 16  ;;  %v9662_v62 = vld [vmem:[%s12801_s1 + $0x14] sm:$0xf] }
  0x66   : > { %v13206_v10 = vshll.u32 %v9020_v6, 16  ;;  %v13207_v7 = vor.u32 %v9087_v54, %v9084_v50  ;;  %v1246_v5 = vrot.slane %v9460_v45, 5  ;;  %v7088_v50 = vrot.slane %v9385_v9, 9 }
  0x67   : > { %v9635_v2 = vrot.slane %v13203_v49, 5  ;;  %v9639_v3 = vrot.slane %v13204_v28, 6  ;;  %v9645_v47 = vrot.slane %v13205_v33, 6  ;;  %v9656_v49 = vcombine.low %v1219_v4, %v1222_v20  ;;  %8047 = vmatmul.mubr.msk.bf16.vlgmr.msra.gmra.mxu1 %vm670_vm3, %v9609_v1 }
  0x68   : > { %v9649_v12 = vrot.slane %v13206_v10, 6  ;;  %v9654_v39 = vrot.slane %v13207_v7, 4  ;;  %v9667_v28 = vcombine.low %v1226_v43, %v1229_v13  ;;  %v1233_v7 = vsel %vm9530_vm7, %v7087_v52, %v1232_v61  ;;  %8113 = vmatpush3.bf16.msra.mxu1 %v1943_v34  ;;  %8050 = vmatprep.mubr.msk.bf16.mxu1 %vm670_vm3, %v9615_v35 }
  0x69   : > { %13208 = vst [vmem:[#allocation52_spill] sm:$0xff] %v9656_v49  ;;  %v1236_v54 = vsel %vm9530_vm7, %v1234_v24, %v1235_v44  ;;  %v1241_v4 = vrot.slane %v1239_v51, 4  ;;  %v1242_v20 = vrot.slane %v9407_v0, 5  ;;  %v1253_v33 = vrot.slane %v9040_v18, 5  ;;  %8868 = vmatprep.subr.msk.bf16.mxu1 %vm719_vm0, %v9662_v62 }
  0x6a   : > { %13209 = vst [vmem:[#allocation53_spill] sm:$0xff] %v9667_v28  ;;  %v7089_v43 = vrot.slane %v9453_v17, 9  ;;  %v1248_v61 = vrot.slane %v1246_v5, 4  ;;  %v1249_v52 = vrot.slane %v9473_v60, 5  ;;  %v9686_v34 = vcombine.low %v9189_v53, %v9196_v29 }
  0x6b   : > { %8085 = vmatmul.mubr.msk.bf16.gmra.mxu0 %vm670_vm3, %v9656_v49  ;;  %v9692_v24 = vcombine.low %v9257_v56, %v9266_v27  ;;  %v9696_v44 = vcombine.low %v9319_v31, %v9336_v46  ;;  %v1260_v10 = vrot.slane %v9103_v15, 5  ;;  %v9701_v37 = vcombine.low %v1233_v7, %v1236_v54 }
  0x6c   : > { %13210 = vst [vmem:[#allocation54_spill] sm:$0xff] %v9686_v34  ;;  %8088 = vmatprep.mubr.msk.bf16.mxu0 %vm670_vm3, %v9667_v28  ;;  %v9705_v13 = vcombine.low %v9385_v9, %v9398_v22  ;;  %v1240_v49 = vsel %vm9530_vm7, %v7088_v50, %v1239_v51  ;;  %v1267_v35 = vrot.slane %v9164_v57, 5  ;;  %v1243_v1 = vsel %vm9530_vm7, %v1241_v4, %v1242_v20 }
  0x6d   : > { %13211 = vst [vmem:[#allocation55_spill] sm:$0xff] %v9692_v24  ;;  %13212 = vst [vmem:[#allocation56_spill] sm:$0xff] %v9696_v44  ;;  %v7090_v60 = vrot.slane %v9027_v11, 9  ;;  %v1255_v0 = vrot.slane %v1253_v33, 4  ;;  %v1256_v46 = vrot.slane %v9043_v19, 5  ;;  %v1247_v7 = vsel %vm9530_vm7, %v7089_v43, %v1246_v5 }
  0x6e   : > { %13213 = vst [vmem:[#allocation57_spill] sm:$0xff] %v9701_v37  ;;  %13214 = vst [vmem:[#allocation58_spill] sm:$0xff] %v9705_v13  ;;  %v1250_v54 = vsel %vm9530_vm7, %v1248_v61, %v1249_v52  ;;  %v7091_v28 = vrot.slane %v9090_v58, 9  ;;  %v1263_v51 = vrot.slane %v9106_v16, 5  ;;  %v1262_v50 = vrot.slane %v1260_v10, 4 }
  0x6f   : > { %v7092_v22 = vrot.slane %v9141_v42, 9  ;;  %v1269_v9 = vrot.slane %v1267_v35, 4  ;;  %v1270_v4 = vrot.slane %v9174_v14, 5  ;;  %8051 = vmatmul.mubr.msk.bf16.gmra.mxu1 %vm670_vm3, %v9686_v34  ;;  %v9724_v20 = vcombine.low %v1240_v49, %v1243_v1 }
  0x70   : > { %v9728_v5 = vcombine.low %v9453_v17, %v9460_v45  ;;  %v9732_v43 = vcombine.low %v9027_v11, %v9040_v18  ;;  %v1274_v61 = vrot.slane %v9233_v38, 5  ;;  %8054 = vmatprep.mubr.msk.bf16.mxu1 %vm670_vm3, %v9692_v24  ;;  %v1254_v52 = vsel %vm9530_vm7, %v7090_v60, %v1253_v33 }
  0x71   : > { %13215 = vst [vmem:[#allocation59_spill] sm:$0xff] %v9724_v20  ;;  %v1257_v1 = vsel %vm9530_vm7, %v1255_v0, %v1256_v46  ;;  %v9743_v49 = vcombine.low %v9090_v58, %v9103_v15  ;;  %v1281_v34 = vrot.slane %v9298_v21, 5  ;;  %v9746_v14 = vcombine.low %v1247_v7, %v1250_v54  ;;  %v13221_v7 = vld [vmem:[#allocation19_spill] sm:$0xff] }
  0x72   : > { %13216 = vst [vmem:[#allocation60_spill] sm:$0xff] %v9728_v5  ;;  %13217 = vst [vmem:[#allocation61_spill] sm:$0xff] %v9732_v43  ;;  %v1261_v16 = vsel %vm9530_vm7, %v7091_v28, %v1260_v10  ;;  %v9752_v24 = vcombine.low %v9141_v42, %v9164_v57  ;;  %v7093_v60 = vrot.slane %v9224_v59, 9  ;;  %v1264_v46 = vsel %vm9530_vm7, %v1262_v50, %v1263_v51  ;;  %v13224_v57 = vld [vmem:[#allocation16_spill] sm:$0xff] }
  0x73   : > { %13218 = vst [vmem:[#allocation62_spill] sm:$0xff] %v9743_v49  ;;  %13219 = vst [vmem:[#allocation63_spill] sm:$0xff] %v9746_v14  ;;  %8089 = vmatmul.mubr.msk.bf16.gmra.mxu0 %vm670_vm3, %v9701_v37  ;;  %v1268_v0 = vsel %vm9530_vm7, %v7092_v22, %v1267_v35  ;;  %v1271_v33 = vsel %vm9530_vm7, %v1269_v9, %v1270_v4  ;;  %v7094_v28 = vrot.slane %v13221_v7, 9  ;;  %v1276_v37 = vrot.slane %v1274_v61, 4  ;;  %v13226_v9 = vld [vmem:[#allocation22_spill] sm:$0xff] }
  0x74   : > { %13220 = vst [vmem:[#allocation64_spill] sm:$0xff] %v9752_v24  ;;  %8092 = vmatprep.mubr.msk.bf16.mxu0 %vm670_vm3, %v9724_v20  ;;  %v9766_v10 = vcombine.low %v1254_v52, %v1257_v1  ;;  %v9770_v54 = vcombine.low %v9224_v59, %v9233_v38  ;;  %v1277_v51 = vrot.slane %v13224_v57, 5  ;;  %v9775_v22 = vcombine.low %v13221_v7, %v9298_v21  ;;  %v13227_v4 = vld [vmem:[#allocation26_spill] sm:$0xff]  ;;  %v13230_v20 = vld [vmem:[#allocation27_spill] sm:$0xff]  ;;  %v13232_v7 = vld [vmem:[#allocation41_spill] sm:$0xff] }
  0x75   : > { %v1283_v35 = vrot.slane %v1281_v34, 4  ;;  %v1284_v50 = vrot.slane %v13226_v9, 5  ;;  %v7095_v42 = vrot.slane %v13227_v4, 9  ;;  %v9779_v15 = vcombine.low %v1261_v16, %v1264_v46  ;;  %v13231_v59 = vld [vmem:[#allocation35_spill] sm:$0xff]  ;;  %v13233_v46 = vld [vmem:[#allocation29_spill] sm:$0xff] }
  0x76   : > { %13222 = vst [vmem:[#allocation65_spill] sm:$0xff] %v9766_v10  ;;  %13223 = vst [vmem:[#allocation66_spill] sm:$0xff] %v9770_v54  ;;  %v9781_v52 = vcombine.low %v1268_v0, %v1271_v33  ;;  %v1275_v1 = vsel %vm9530_vm7, %v7093_v60, %v1274_v61  ;;  %v1288_v38 = vrot.slane %v13230_v20, 5  ;;  %v1282_v57 = vsel %vm9530_vm7, %v7094_v28, %v1281_v34  ;;  %v13234_v33 = vld [vmem:[#allocation34_spill] sm:$0xff] }
  0x77   : > { %13225 = vst [vmem:[#allocation67_spill] sm:$0xff] %v9775_v22  ;;  %13228 = vst [vmem:[#allocation26_spill] sm:$0xff] %v9779_v15  ;;  %v1295_v21 = vrot.slane %v13231_v59, 5  ;;  %v1302_v58 = vrot.slane %v13232_v7, 5  ;;  %8055 = vmatmul.mubr.msk.bf16.gmra.mxu1 %vm670_vm3, %v9696_v44  ;;  %v1278_v16 = vsel %vm9530_vm7, %v1276_v37, %v1277_v51  ;;  %v1291_v0 = vrot.slane %v13233_v46, 5 }
  0x78   : > { %13229 = vst [vmem:[#allocation68_spill] sm:$0xff] %v9781_v52  ;;  %v1606_v61 = vor.u32 %v9605_v23, %v9593_v55  ;;  %8058 = vmatprep.mubr.msk.bf16.mxu1 %vm670_vm3, %v9705_v13  ;;  %v1285_v34 = vsel %vm9530_vm7, %v1283_v35, %v1284_v50  ;;  %v1289_v60 = vsel %vm9530_vm7, %v7095_v42, %v1288_v38  ;;  %v7096_v28 = vrot.slane %v13234_v33, 9  ;;  %v13238_v23 = vld [vmem:[#allocation37_spill] sm:$0xff]  ;;  %v13239_v35 = vld [vmem:[#allocation40_spill] sm:$0xff] }
  0x79   : > { %v13235_v37 = vmov 0  ;;  %v1610_v51 = vor.u32 %v9639_v3, %v9635_v2  ;;  %v1290_v55 = vrot.slane %v1288_v38, 4  ;;  %v1298_v44 = vrot.slane %v13238_v23, 5 }
  0x7a   : > { %v13236_v37 = vsel %vm9804_vm10, 4294967295, %v13235_v37  ;;  %v1607_v13 = vrot.slane %v1606_v61, 4  ;;  %v1613_v46 = vshrl.u32 %v9020_v6, 16  ;;  %v1297_v42 = vrot.slane %v1295_v21, 4  ;;  %v8917_v61 = vld [vmem:[%s9011_s23 + $0x4] sm:$0xf] }
  0x7b   : > { %13237 = vst [vmem:[#allocation27_spill] sm:$0xff] %v13236_v37  ;;  %8093 = vmatmul.mubr.msk.bf16.gmra.mxu0 %vm670_vm3, %v9746_v14  ;;  %v7097_v50 = vrot.slane %v13239_v35, 9  ;;  %v1304_v9 = vrot.slane %v1302_v58, 4  ;;  %v1305_v19 = vrot.slane %v9508_v48, 5  ;;  %v1612_v2 = vrot.slane %v1610_v51, 4 }
  0x7c   : > { %8096 = vmatprep.mubr.msk.bf16.mxu0 %vm670_vm3, %v9766_v10  ;;  %v1611_v38 = vsel %vm9804_vm10, %v1607_v13, %v1610_v51  ;;  %v1615_v3 = vrot.slane %v1613_v46, 5  ;;  %v2143_v6 = vrot.slane %v8917_v61, 6  ;;  %v1626_v14 = vsel %vm9804_vm10, %v9654_v39, %v9117_v25 }
  0x7d   : > { %v13240_v48 = vor.u32 %v9645_v47, %v9641_v26  ;;  %v13241_v10 = vrot.slane %v9117_v25, 4  ;;  %v1292_v46 = vsel %vm9530_vm7, %v1290_v55, %v1291_v0  ;;  %v1296_v51 = vsel %vm9530_vm7, %v7096_v28, %v1295_v21 }
  0x7e   : > { %v1617_v61 = vor.u32 %v9649_v12, %v1615_v3  ;;  %v1299_v39 = vsel %vm9530_vm7, %v1297_v42, %v1298_v44  ;;  %v1303_v26 = vsel %vm9530_vm7, %v7097_v50, %v1302_v58  ;;  %v1306_v25 = vsel %vm9530_vm7, %v1304_v9, %v1305_v19  ;;  %v8919_v44 = vld [vmem:[%s9011_s23 + $0x8] sm:$0x3] }
  0x7f   : > { %v1633_v13 = vsel %vm9804_vm10, %v13241_v10, %v13240_v48  ;;  %v8918_v48 = vld [vmem:[%s9011_s23] sm:$0xf]  ;;  %8059 = vmatmul.mubr.msk.bf16.gmra.mxu1 %vm670_vm3, %v9728_v5  ;;  %v2145_v12 = vrot.slane %v2143_v6, 4  ;;  %v2146_v10 = vrot.slane %v8919_v44, 6  ;;  %v2150_v58 = vrot.slane %v9062_v32, 6 }
  0x80   : > { %v9837_v23 = vcombine.low %v1626_v14, %v1633_v13  ;;  %v7164_v47 = vrot.slane %v8918_v48, 10  ;;  %v1618_v21 = vsel %vm9804_vm10, %v1612_v2, %v1617_v61  ;;  %v13242_v14 = vmov 0  ;;  %8062 = vmatprep.mubr.msk.bf16.mxu1 %vm670_vm3, %v9732_v43  ;;  %v8920_v13 = vld [vmem:[%s9011_s23 + $0xc] sm:$0xf] }
  0x81   : > { %v13243_v14 = vsel %vm9851_vm13, 4294967295, %v13242_v14  ;;  %v9859_v19 = vcombine.low %v1275_v1, %v1278_v16  ;;  %v9863_v9 = vcombine.low %v13227_v4, %v13230_v20  ;;  %v9867_v0 = vcombine.low %v13234_v33, %v13231_v59 }
  0x82   : > { %13244 = vst [vmem:[#allocation35_spill] sm:$0xff] %v13243_v14  ;;  %v9869_v28 = vcombine.low %v1611_v38, %v1618_v21  ;;  %v9871_v55 = vcombine.low %v1282_v57, %v1285_v34  ;;  %v9875_v32 = vcombine.low %v13239_v35, %v13232_v7  ;;  %v13250_v1 = vshrl.u32 %v9121_v30, 16  ;;  %v13402_v14 = vld [vmem:[#allocation31_spill] sm:$0xff] }
  0x83   : > { %13245 = vst [vmem:[#allocation41_spill] sm:$0xff] %v9859_v19  ;;  %13246 = vst [vmem:[#allocation34_spill] sm:$0xff] %v9863_v9  ;;  %v13251_v42 = vshll.u32 %v9121_v30, 16  ;;  %8097 = vmatmul.mubr.msk.bf16.gmra.mxu0 %vm670_vm3, %v9779_v15  ;;  %v9883_v2 = vcombine.low %v1289_v60, %v1292_v46  ;;  %v9885_v3 = vcombine.low %v1296_v51, %v1299_v39  ;;  %v7165_v61 = vrot.slane %v8920_v13, 10  ;;  %v8921_v60 = vld [vmem:[%s9011_s23 + $0x14] sm:$0x3] }
  0x84   : > { %13247 = vst [vmem:[#allocation40_spill] sm:$0xff] %v9867_v0  ;;  %13248 = vst [vmem:[#allocation69_spill] sm:$0xff] %v9871_v55  ;;  %v1634_v16 = vrot.slane %v13250_v1, 5  ;;  %v9887_v38 = vcombine.low %v1303_v26, %v1306_v25  ;;  %v9891_v57 = vsel %vm9851_vm13, %v7164_v47, %v2143_v6  ;;  %8100 = vmatprep.mubr.msk.bf16.mxu0 %vm670_vm3, %v9781_v52  ;;  %v2152_v48 = vrot.slane %v2150_v58, 4 }
  0x85   : > { %13249 = vst [vmem:[#allocation70_spill] sm:$0xff] %v9875_v32  ;;  %v1635_v50 = vrot.slane %v13251_v42, 6  ;;  %13252 = vst [vmem:[#allocation71_spill] sm:$0xff] %v9883_v2  ;;  %v9897_v34 = vsel %vm9851_vm13, %v2145_v12, %v2146_v10  ;;  %v2153_v46 = vrot.slane %v8921_v60, 6  ;;  %v9903_v51 = vsel %vm719_vm0, %v9662_v62, 0 }
  0x86   : > { %13253 = vst [vmem:[#allocation72_spill] sm:$0xff] %v9885_v3  ;;  %13254 = vst [vmem:[#allocation73_spill] sm:$0xff] %v9887_v38  ;;  %v13255_v39 = vshrl.u32 %v9129_v36, 16  ;;  %v13256_v26 = vshll.u32 %v9129_v36, 16  ;;  %v1643_v47 = vshrl.u32 %v9138_v41, 16  ;;  %v2157_v12 = vrot.slane %v9129_v36, 6 }
  0x87   : > { %v1636_v21 = vor.u32 %v1635_v50, %v1634_v16  ;;  %v13257_v44 = vshrl.u32 %v9189_v53, 16  ;;  %v13258_v1 = vshll.u32 %v9189_v53, 16  ;;  %v9919_v13 = vsel %vm719_vm0, %v9601_v63, 0  ;;  %8063 = vmatmul.mubr.msk.bf16.gmra.mxu1 %vm670_vm3, %v9743_v49 }
  0x88   : > { %v1638_v6 = vrot.slane %v13255_v39, 5  ;;  %v1639_v25 = vrot.slane %v13256_v26, 6  ;;  %v13259_v60 = vshrl.u32 %v9196_v29, 16  ;;  %v13260_v16 = vshll.u32 %v9196_v29, 16  ;;  %8066 = vmatprep.mubr.msk.bf16.mxu1 %vm670_vm3, %v9752_v24 }
  0x89   : > { %v1649_v10 = vrot.slane %v13257_v44, 5  ;;  %v1650_v42 = vrot.slane %v13258_v1, 6  ;;  %v2151_v36 = vsel %vm9851_vm13, %v7165_v61, %v2150_v58  ;;  %v2154_v26 = vsel %vm9851_vm13, %v2152_v48, %v2153_v46 }
  0x8a   : > { %v1653_v39 = vrot.slane %v13259_v60, 5  ;;  %v1654_v50 = vrot.slane %v13260_v16, 6  ;;  %v13261_v44 = vshll.u32 %v9138_v41, 16  ;;  %v1658_v63 = vshrl.u32 %v9219_v40, 16 }
  0x8b   : > { %v9936_v60 = vor.u32 %v1639_v25, %v1638_v6  ;;  %v1645_v16 = vrot.slane %v1643_v47, 5  ;;  %v7166_v62 = vrot.slane %v9121_v30, 10  ;;  %v2160_v8 = vrot.slane %v9138_v41, 6  ;;  %8101 = vmatmul.mubr.msk.bf16.gmra.mxu0 %vm670_vm3, %v9859_v19 }
  0x8c   : > { %v1646_v1 = vrot.slane %v13261_v44, 6  ;;  %v9940_v52 = vrot.slane %v1636_v21, 4  ;;  %v2159_v58 = vrot.slane %v2157_v12, 4  ;;  %v1651_v61 = vor.u32 %v1650_v42, %v1649_v10  ;;  %8104 = vmatprep.mubr.msk.bf16.mxu0 %vm670_vm3, %v9871_v55 }
  0x8d   : > { %v13262_v48 = vshrl.u32 %v9257_v56, 16  ;;  %v9946_v44 = vor.u32 %v1654_v50, %v1653_v39  ;;  %v13263_v6 = vshll.u32 %v9219_v40, 16  ;;  %v13264_v47 = vshll.u32 %v9257_v56, 16  ;;  %v13267_v39 = vld [vmem:[#allocation18_spill] sm:$0xff] }
  0x8e   : > { %v13265_v41 = vshrl.u32 %v9266_v27, 16  ;;  %v1660_v10 = vrot.slane %v1658_v63, 5  ;;  %v2164_v42 = vrot.slane %v9196_v29, 6  ;;  %v1673_v50 = vshrl.u32 %v13267_v39, 16 }
  0x8f   : > { %v1664_v46 = vrot.slane %v13262_v48, 5  ;;  %v1661_v25 = vrot.slane %v13263_v6, 6  ;;  %v1665_v30 = vrot.slane %v13264_v47, 6  ;;  %v13266_v48 = vshll.u32 %v9266_v27, 16  ;;  %8067 = vmatmul.mubr.msk.bf16.gmra.mxu1 %vm670_vm3, %v9770_v54 }
  0x90   : > { %v1668_v21 = vrot.slane %v13265_v41, 5  ;;  %v1642_v15 = vrot.slane %v9936_v60, 4  ;;  %v1647_v6 = vor.u32 %v1646_v1, %v1645_v16  ;;  %v2158_v47 = vsel %vm9851_vm13, %v7166_v62, %v2157_v12  ;;  %8070 = vmatprep.mubr.msk.bf16.mxu1 %vm670_vm3, %v9775_v22 }
  0x91   : > { %v1669_v19 = vrot.slane %v13266_v48, 6  ;;  %v1666_v24 = vor.u32 %v1665_v30, %v1664_v46  ;;  %v2161_v41 = vsel %vm9851_vm13, %v2159_v58, %v2160_v8  ;;  %v1675_v55 = vrot.slane %v1673_v50, 5 }
  0x92   : > { %v13268_v63 = vshll.u32 %v13267_v39, 16  ;;  %v9967_v43 = vcombine.low %v2151_v36, %v2154_v26  ;;  %v1641_v48 = vsel %vm9804_vm10, %v9940_v52, %v9936_v60  ;;  %v1652_v1 = vrot.slane %v1651_v61, 4 }
  0x93   : > { %v1670_v49 = vor.u32 %v1669_v19, %v1668_v21  ;;  %v7167_v16 = vrot.slane %v9189_v53, 10  ;;  %v1657_v8 = vrot.slane %v9946_v44, 4  ;;  %v1662_v19 = vor.u32 %v1661_v25, %v1660_v10  ;;  %8105 = vmatmul.mubr.msk.bf16.gmra.mxu0 %vm670_vm3, %v9883_v2 }
  0x94   : > { %v1676_v29 = vrot.slane %v13268_v63, 6  ;;  %13269 = vst [vmem:[#allocation18_spill] sm:$0xff] %v9967_v43  ;;  %v2166_v12 = vrot.slane %v2164_v42, 4  ;;  %v2167_v62 = vrot.slane %v9219_v40, 6  ;;  %v1648_v36 = vsel %vm9804_vm10, %v1642_v15, %v1647_v6  ;;  %v13273_v40 = vld [vmem:[#allocation23_spill] sm:$0xff]  ;;  %8108 = vmatprep.mubr.msk.bf16.mxu0 %vm670_vm3, %v9885_v3 }
  0x95   : > { %v9982_v26 = vcombine.low %v2158_v47, %v2161_v41  ;;  %v1667_v52 = vrot.slane %v1666_v24, 4  ;;  %v2171_v53 = vrot.slane %v9266_v27, 6  ;;  %v1672_v60 = vrot.slane %v1670_v49, 4 }
  0x96   : > { %v1677_v58 = vor.u32 %v1676_v29, %v1675_v55  ;;  %v13271_v61 = vshrl.u32 %v9319_v31, 16  ;;  %v13272_v25 = vshll.u32 %v9319_v31, 16  ;;  %v1656_v15 = vsel %vm9804_vm10, %v1652_v1, %v9946_v44  ;;  %v13276_v55 = vld [vmem:[#allocation25_spill] sm:$0xff]  ;;  %v13277_v1 = vld [vmem:[#allocation30_spill] sm:$0xff] }
  0x97   : > { %13270 = vst [vmem:[#allocation74_spill] sm:$0xff] %v9982_v26  ;;  %v13274_v21 = vshrl.u32 %v13273_v40, 16  ;;  %v13275_v27 = vshll.u32 %v13273_v40, 16  ;;  %v1688_v50 = vshrl.u32 %v13276_v55, 16  ;;  %v1663_v6 = vsel %vm9804_vm10, %v1657_v8, %v1662_v19  ;;  %v13280_v19 = vld [vmem:[#allocation32_spill] sm:$0xff]  ;;  %8071 = vmatmul.mubr.msk.bf16.gmra.mxu1 %vm670_vm3, %v9863_v9 }
  0x98   : > { %v1679_v46 = vrot.slane %v13271_v61, 5  ;;  %v1680_v30 = vrot.slane %v13272_v25, 6  ;;  %v2165_v47 = vsel %vm9851_vm13, %v7167_v16, %v2164_v42  ;;  %v2168_v44 = vsel %vm9851_vm13, %v2166_v12, %v2167_v62  ;;  %8074 = vmatprep.mubr.msk.bf16.mxu1 %vm670_vm3, %v9867_v0 }
  0x99   : > { %v1683_v24 = vrot.slane %v13274_v21, 5  ;;  %v1684_v10 = vrot.slane %v13275_v27, 6  ;;  %v7168_v41 = vrot.slane %v9257_v56, 10  ;;  %v1671_v63 = vsel %vm9804_vm10, %v1667_v52, %v1670_v49 }
  0x9a   : > { %v2174_v29 = vrot.slane %v13267_v39, 6  ;;  %v13278_v61 = vshrl.u32 %v13277_v1, 16  ;;  %v13279_v21 = vshll.u32 %v13277_v1, 16  ;;  %v1678_v8 = vsel %vm9804_vm10, %v1672_v60, %v1677_v58 }
  0x9b   : > { %v2173_v42 = vrot.slane %v2171_v53, 4  ;;  %v1681_v16 = vor.u32 %v1680_v30, %v1679_v46  ;;  %v13281_v12 = vshrl.u32 %v13280_v19, 16  ;;  %v1685_v56 = vor.u32 %v1684_v10, %v1683_v24  ;;  %v13285_v46 = vld [vmem:[#allocation33_spill] sm:$0xff]  ;;  %8109 = vmatmul.mubr.msk.bf16.gmra.mxu0 %vm670_vm3, %v9887_v38 }
  0x9c   : > { %v1694_v25 = vrot.slane %v13278_v61, 5  ;;  %v1695_v27 = vrot.slane %v13279_v21, 6  ;;  %v1690_v3 = vrot.slane %v1688_v50, 5  ;;  %v13282_v49 = vshll.u32 %v13276_v55, 16 }
  0x9d   : > { %v1698_v62 = vrot.slane %v13281_v12, 5  ;;  %v13283_v39 = vshll.u32 %v13280_v19, 16  ;;  %v10025_v61 = vcombine.low %v1641_v48, %v1648_v36  ;;  %v2178_v60 = vrot.slane %v13273_v40, 6 }
  0x9e   : > { %v1691_v52 = vrot.slane %v13282_v49, 6  ;;  %v1696_v58 = vor.u32 %v1695_v27, %v1694_v25  ;;  %v1703_v30 = vshrl.u32 %v13285_v46, 16  ;;  %v10031_v24 = vcombine.low %v1656_v15, %v1663_v6 }
  0x9f   : > { %v1699_v2 = vrot.slane %v13283_v39, 6  ;;  %13284 = vst [vmem:[#allocation23_spill] sm:$0xff] %v10025_v61  ;;  %v10033_v10 = vcombine.low %v2165_v47, %v2168_v44  ;;  %v13288_v21 = vshll.u32 %v13285_v46, 16  ;;  %v10037_v49 = vcombine.low %v1671_v63, %v1678_v8  ;;  %8075 = vmatmul.mubr.msk.bf16.gmra.mxu1 %vm670_vm3, %v9875_v32 }
  0xa0   : > { %13286 = vst [vmem:[#allocation25_spill] sm:$0xff] %v10031_v24  ;;  %v2172_v48 = vsel %vm9851_vm13, %v7168_v41, %v2171_v53  ;;  %v2175_v36 = vsel %vm9851_vm13, %v2173_v42, %v2174_v29  ;;  %v1705_v40 = vrot.slane %v1703_v30, 5  ;;  %v1682_v15 = vrot.slane %v1681_v16, 4  ;;  %8114 = vmatprep.mubr.msk.bf16.mxu1 %vm670_vm3, %v9869_v28  ;;  %v10093_v28 = vld [vmem:[%s12801_s1 + $0x20] sm:$0xf] }
  0xa1   : > { %13287 = vst [vmem:[#allocation30_spill] sm:$0xff] %v10033_v10  ;;  %v1700_v50 = vor.u32 %v1699_v2, %v1698_v62  ;;  %v1706_v12 = vrot.slane %v13288_v21, 6  ;;  %13289 = vst [vmem:[#allocation32_spill] sm:$0xff] %v10037_v49  ;;  %v1687_v6 = vrot.slane %v1685_v56, 4  ;;  %v1692_v47 = vor.u32 %v1691_v52, %v1690_v3 }
  0xa2   : > { %v7169_v2 = vrot.slane %v9319_v31, 10  ;;  %v13290_v44 = vcombine.low %v9891_v57, %v9897_v34  ;;  %v2180_v63 = vrot.slane %v2178_v60, 4  ;;  %v2181_v53 = vrot.slane %v13276_v55, 6  ;;  %v13296_v55 = vld [vmem:[#allocation39_spill] sm:$0xff] }
  0xa3   : > { %v1697_v41 = vrot.slane %v1696_v58, 4  ;;  %v2185_v29 = vrot.slane %v13280_v19, 6  ;;  %v1702_v25 = vrot.slane %v1700_v50, 4  ;;  %v1707_v27 = vor.u32 %v1706_v12, %v1705_v40 }
  0xa4   : > { %8148 = vmatprep.mubr.msk.bf16.mxu0 %vm670_vm3, %v13290_v44  ;;  %v13291_v8 = vshrl.u32 %v9453_v17, 16  ;;  %v13292_v3 = vshll.u32 %v9453_v17, 16  ;;  %v10056_v31 = vcombine.low %v2172_v48, %v2175_v36  ;;  %v13294_v57 = vshrl.u32 %v9460_v45, 16 }
  0xa5   : > { %v13295_v62 = vshll.u32 %v9460_v45, 16  ;;  %v1718_v39 = vshrl.u32 %v13296_v55, 16  ;;  %v1686_v19 = vsel %vm9804_vm10, %v1682_v15, %v1685_v56  ;;  %v1693_v58 = vsel %vm9804_vm10, %v1687_v6, %v1692_v47  ;;  %8149 = vmatmul.mubr.msk.bf16.vlgmr.msra.gmra.mxu0 %vm670_vm3, %v9967_v43 }
  0xa6   : > { %v1709_v42 = vrot.slane %v13291_v8, 5  ;;  %v1710_v16 = vrot.slane %v13292_v3, 6  ;;  %13293 = vst [vmem:[#allocation33_spill] sm:$0xff] %v10056_v31  ;;  %v1713_v34 = vrot.slane %v13294_v57, 5  ;;  %v2179_v30 = vsel %vm9851_vm13, %v7169_v2, %v2178_v60  ;;  %v8922_v8 = vld [vmem:[%s9011_s23 + $0x68] sm:$0x3]  ;;  %8215 = vmatpush3.bf16.msra.mxu0 %v9919_v13  ;;  %8152 = vmatprep.mubr.msk.bf16.mxu0 %vm670_vm3, %v9982_v26 }
  0xa7   : > { %v1714_v52 = vrot.slane %v13295_v62, 6  ;;  %v7170_v21 = vrot.slane %v13277_v1, 10  ;;  %v2182_v12 = vsel %vm9851_vm13, %v2180_v63, %v2181_v53  ;;  %v1701_v48 = vsel %vm9804_vm10, %v1697_v41, %v1700_v50  ;;  %v8923_v57 = vld [vmem:[%s9011_s23 + $0x64] sm:$0xf]  ;;  %8871 = vmatprep.subr.msk.bf16.mxu0 %vm719_vm0, %v10093_v28  ;;  %8115 = vmatmul.mubr.msk.bf16.vlgmr.msra.gmra.mxu1 %vm670_vm3, %v9837_v23 }
  0xa8   : > { %v2187_v36 = vrot.slane %v2185_v29, 4  ;;  %v2188_v56 = vrot.slane %v13285_v46, 6  ;;  %v1708_v60 = vsel %vm9804_vm10, %v1702_v25, %v1707_v27  ;;  %v1711_v1 = vor.u32 %v1710_v16, %v1709_v42  ;;  %8181 = vmatpush3.bf16.msra.mxu1 %v9903_v51  ;;  %8118 = vmatprep.mubr.msk.bf16.mxu1 %vm670_vm3, %v10025_v61 }
  0xa9   : > { %v13297_v40 = vshll.u32 %v13296_v55, 16  ;;  %v2192_v6 = vrot.slane %v9460_v45, 6  ;;  %v10084_v47 = vor.u32 %v1714_v52, %v1713_v34  ;;  %v1720_v50 = vrot.slane %v1718_v39, 5 }
  0xaa   : > { %v13298_v2 = vshrl.u32 %v9027_v11, 16  ;;  %v13299_v46 = vshll.u32 %v9027_v11, 16  ;;  %v10097_v53 = vcombine.low %v1686_v19, %v1693_v58  ;;  %v13301_v45 = vshrl.u32 %v9040_v18, 16 }
  0xab   : > { %v1721_v15 = vrot.slane %v13297_v40, 6  ;;  %v13302_v25 = vshll.u32 %v9040_v18, 16  ;;  %v1733_v42 = vshrl.u32 %v8922_v8, 16  ;;  %v10107_v11 = vcombine.low %v2179_v30, %v2182_v12  ;;  %v13305_v12 = vld [vmem:[#allocation2_spill] sm:$0xff] }
  0xac   : > { %v1724_v44 = vrot.slane %v13298_v2, 5  ;;  %v1725_v63 = vrot.slane %v13299_v46, 6  ;;  %13300 = vst [vmem:[#allocation39_spill] sm:$0xff] %v10097_v53  ;;  %v1728_v41 = vrot.slane %v13301_v45, 5  ;;  %v2186_v3 = vsel %vm9851_vm13, %v7170_v21, %v2185_v29  ;;  %v13311_v45 = vld [vmem:[#allocation6_spill] sm:$0xff] }
  0xad   : > { %v1729_v27 = vrot.slane %v13302_v25, 6  ;;  %13303 = vst [vmem:[#allocation75_spill] sm:$0xff] %v10107_v11  ;;  %v2189_v16 = vsel %vm9851_vm13, %v2187_v36, %v2188_v56  ;;  %v2199_v34 = vrot.slane %v8923_v57, 6  ;;  %v10114_v18 = vcombine.low %v1701_v48, %v1708_v60  ;;  %v8924_v56 = vld [vmem:[%s9011_s23 + $0x60] sm:$0xf]  ;;  %8153 = vmatmul.mubr.msk.bf16.gmra.mxu0 %vm670_vm3, %v10033_v10 }
  0xae   : > { %v1712_v62 = vrot.slane %v1711_v1, 4  ;;  %v7171_v52 = vrot.slane %v9453_v17, 10  ;;  %v2194_v13 = vrot.slane %v2192_v6, 4  ;;  %v1717_v39 = vrot.slane %v10084_v47, 4  ;;  %v10129_v17 = vld [vmem:[%s12801_s1 + $0x1c] sm:$0xf]  ;;  %8156 = vmatprep.mubr.msk.bf16.mxu0 %vm670_vm3, %v10056_v31 }
  0xaf   : > { %13304 = vst [vmem:[#allocation76_spill] sm:$0xff] %v10114_v18  ;;  %v1722_v19 = vor.u32 %v1721_v15, %v1720_v50  ;;  %v2195_v29 = vrot.slane %v13296_v55, 6  ;;  %v1726_v58 = vor.u32 %v1725_v63, %v1724_v44  ;;  %v10121_v30 = vor.u32 %v1729_v27, %v1728_v41  ;;  %v13307_v55 = vld [vmem:[#allocation4_spill] sm:$0xff]  ;;  %8870 = vmatprep.subr.msk.bf16.mxu1 %vm719_vm0, %v10129_v17 }
  0xb0   : > { %v1735_v21 = vrot.slane %v1733_v42, 5  ;;  %v13306_v36 = vshll.u32 %v13305_v12, 16  ;;  %v7172_v60 = vrot.slane %v8924_v56, 10  ;;  %v2201_v1 = vrot.slane %v2199_v34, 4  ;;  %8119 = vmatmul.mubr.msk.bf16.gmra.mxu1 %vm670_vm3, %v10031_v24 }
  0xb1   : > { %v2202_v40 = vrot.slane %v8922_v8, 6  ;;  %v13308_v15 = vshrl.u32 %v13307_v55, 16  ;;  %v13309_v2 = vshll.u32 %v13307_v55, 16  ;;  %v10140_v46 = vcombine.low %v2186_v3, %v2189_v16  ;;  %8122 = vmatprep.mubr.msk.bf16.mxu1 %vm670_vm3, %v10037_v49  ;;  %v8933_v49 = vld [vmem:[%s9011_s23 + $0x84] sm:$0xf] }
  0xb2   : > { %v1736_v48 = vrot.slane %v13306_v36, 6  ;;  %v2193_v63 = vsel %vm9851_vm13, %v7171_v52, %v2192_v6  ;;  %v13312_v41 = vshrl.u32 %v13311_v45, 16  ;;  %v13313_v27 = vshll.u32 %v13311_v45, 16 }
  0xb3   : > { %v1739_v50 = vrot.slane %v13308_v15, 5  ;;  %v1740_v44 = vrot.slane %v13309_v2, 6  ;;  %13310 = vst [vmem:[#allocation2_spill] sm:$0xff] %v10140_v46  ;;  %v1716_v42 = vsel %vm9804_vm10, %v1712_v62, %v10084_v47  ;;  %v1723_v51 = vsel %vm9804_vm10, %v1717_v39, %v1722_v19  ;;  %v10165_v62 = vld [vmem:[%s9011_s23 + $0x74] sm:$0x3] }
  0xb4   : > { %v1743_v25 = vrot.slane %v13312_v41, 5  ;;  %v1744_v8 = vrot.slane %v13313_v27, 6  ;;  %v2196_v3 = vsel %vm9851_vm13, %v2194_v13, %v2195_v29  ;;  %v10155_v16 = vrot.slane %v1726_v58, 4  ;;  %v13314_v19 = vld [vmem:[#allocation8_spill] sm:$0xff] }
  0xb5   : > { %v1732_v6 = vrot.slane %v10121_v30, 4  ;;  %v1737_v57 = vor.u32 %v1736_v48, %v1735_v21  ;;  %v2200_v47 = vsel %vm9851_vm13, %v7172_v60, %v2199_v34  ;;  %v1748_v52 = vshrl.u32 %v10165_v62, 16  ;;  %v13318_v48 = vld [vmem:[#allocation10_spill] sm:$0xff]  ;;  %8157 = vmatmul.mubr.msk.bf16.gmra.mxu0 %vm670_vm3, %v10107_v11 }
  0xb6   : > { %v2203_v13 = vsel %vm9851_vm13, %v2201_v1, %v2202_v40  ;;  %v1741_v39 = vor.u32 %v1740_v44, %v1739_v50  ;;  %v13315_v29 = vshrl.u32 %v13314_v19, 16  ;;  %v13316_v21 = vshll.u32 %v13314_v19, 16  ;;  %v13322_v50 = vld [vmem:[#allocation7_spill] sm:$0xff]  ;;  %8160 = vmatprep.mubr.msk.bf16.mxu0 %vm670_vm3, %v10140_v46 }
  0xb7   : > { %v10176_v36 = vcombine.low %v2193_v63, %v2196_v3  ;;  %v10178_v34 = vor.u32 %v1744_v8, %v1743_v25  ;;  %v13319_v56 = vshrl.u32 %v13318_v48, 16  ;;  %v13320_v55 = vshll.u32 %v13318_v48, 16  ;;  %v10193_v63 = vld [vmem:[%s9011_s23 + $0x80] sm:$0x3]  ;;  %v8927_v8 = vld [vmem:[%s9011_s23 + $0x70] sm:$0xf] }
  0xb8   : > { %v1754_v58 = vrot.slane %v13315_v29, 5  ;;  %v1755_v12 = vrot.slane %v13316_v21, 6  ;;  %v10184_v1 = vcombine.low %v1716_v42, %v1723_v51  ;;  %v13323_v2 = vshll.u32 %v13322_v50, 16  ;;  %v8928_v3 = vld [vmem:[%s9011_s23 + $0x6c] sm:$0xf]  ;;  %8123 = vmatmul.mubr.msk.bf16.gmra.mxu1 %vm670_vm3, %v10097_v53 }
  0xb9   : > { %13317 = vst [vmem:[#allocation4_spill] sm:$0xff] %v10176_v36  ;;  %v1758_v60 = vrot.slane %v13319_v56, 5  ;;  %v1759_v15 = vrot.slane %v13320_v55, 6  ;;  %v1763_v45 = vshrl.u32 %v10193_v63, 16  ;;  %v10198_v41 = vsel %vm9804_vm10, %v1732_v6, %v1737_v57  ;;  %v13328_v55 = vld [vmem:[#allocation11_spill] sm:$0xff]  ;;  %8126 = vmatprep.mubr.msk.bf16.mxu1 %vm670_vm3, %v10114_v18 }
  0xba   : > { %13321 = vst [vmem:[#allocation6_spill] sm:$0xff] %v10184_v1  ;;  %v1751_v44 = vrot.slane %v13323_v2, 6  ;;  %v10200_v25 = vcombine.low %v2200_v47, %v2203_v13  ;;  %v1750_v27 = vrot.slane %v1748_v52, 5  ;;  %v2206_v42 = vrot.slane %v8927_v8, 6  ;;  %v13325_v47 = vld [vmem:[#allocation13_spill] sm:$0xff] }
  0xbb   : > { %v10205_v51 = vrot.slane %v1741_v39, 4  ;;  %v7173_v19 = vrot.slane %v8928_v3, 10  ;;  %v2209_v29 = vrot.slane %v10165_v62, 6  ;;  %v1756_v21 = vor.u32 %v1755_v12, %v1754_v58  ;;  %v8929_v2 = vld [vmem:[%s9011_s23 + $0x7c] sm:$0xf]  ;;  %v13330_v12 = vld [vmem:[#allocation14_spill] sm:$0xff] }
  0xbc   : > { %13324 = vst [vmem:[#allocation8_spill] sm:$0xff] %v10200_v25  ;;  %v1747_v6 = vrot.slane %v10178_v34, 4  ;;  %v10212_v57 = vor.u32 %v1759_v15, %v1758_v60  ;;  %v13326_v52 = vshrl.u32 %v13325_v47, 16  ;;  %v13327_v48 = vshll.u32 %v13325_v47, 16 }
  0xbd   : > { %v1765_v56 = vrot.slane %v1763_v45, 5  ;;  %v13329_v50 = vshll.u32 %v13328_v55, 16  ;;  %v2213_v58 = vrot.slane %v8929_v2, 6  ;;  %v13331_v8 = vshrl.u32 %v13330_v12, 16  ;;  %v13333_v2 = vld [vmem:[#allocation16_spill] sm:$0xff]  ;;  %8161 = vmatmul.mubr.msk.bf16.gmra.mxu0 %vm670_vm3, %v10176_v36 }
  0xbe   : > { %v1769_v13 = vrot.slane %v13326_v52, 5  ;;  %v1770_v39 = vrot.slane %v13327_v48, 6  ;;  %v1752_v60 = vor.u32 %v1751_v44, %v1750_v27  ;;  %v2208_v15 = vrot.slane %v2206_v42, 4  ;;  %v8930_v48 = vld [vmem:[%s9011_s23 + $0x8c] sm:$0x3]  ;;  %8164 = vmatprep.mubr.msk.bf16.mxu0 %vm670_vm3, %v10200_v25  ;;  %v13405_v25 = vld [vmem:[#allocation44_spill] sm:$0xff] }
  0xbf   : > { %v1766_v62 = vrot.slane %v13329_v50, 6  ;;  %v1773_v3 = vrot.slane %v13331_v8, 5  ;;  %v13332_v52 = vshll.u32 %v13330_v12, 16  ;;  %v1778_v45 = vshrl.u32 %v8930_v48, 16  ;;  %v8931_v8 = vld [vmem:[%s9011_s23 + $0x88] sm:$0xf] }
  0xc0   : > { %v1757_v55 = vrot.slane %v1756_v21, 4  ;;  %v1771_v50 = vor.u32 %v1770_v39, %v1769_v13  ;;  %v13334_v40 = vshll.u32 %v13333_v2, 16  ;;  %v2220_v10 = vrot.slane %v8931_v8, 6  ;;  %v8932_v44 = vld [vmem:[%s9011_s23 + $0x78] sm:$0xf]  ;;  %v13335_v13 = vld [vmem:[#allocation19_spill] sm:$0xff]  ;;  %8127 = vmatmul.mubr.msk.bf16.gmra.mxu1 %vm670_vm3, %v10184_v1 }
  0xc1   : > { %v1774_v47 = vrot.slane %v13332_v52, 6  ;;  %v1762_v11 = vrot.slane %v10212_v57, 4  ;;  %v7174_v27 = vrot.slane %v8932_v44, 10  ;;  %v2216_v12 = vrot.slane %v10193_v63, 6 }
  0xc2   : > { %v1781_v31 = vrot.slane %v13334_v40, 6  ;;  %v1767_v26 = vor.u32 %v1766_v62, %v1765_v56  ;;  %v2215_v43 = vrot.slane %v2213_v58, 4  ;;  %v1780_v38 = vrot.slane %v1778_v45, 5 }
  0xc3   : > { %v1775_v52 = vor.u32 %v1774_v47, %v1773_v3  ;;  %v7175_v24 = vrot.slane %v8933_v49, 10  ;;  %v2222_v46 = vrot.slane %v2220_v10, 4  ;;  %v2223_v21 = vrot.slane %v8930_v48, 6 }
  0xc4   : > { %v13336_v39 = vshrl.u32 %v13335_v13, 16  ;;  %v13337_v40 = vshll.u32 %v13335_v13, 16  ;;  %v2207_v63 = vsel %vm9851_vm13, %v7173_v19, %v2206_v42  ;;  %v1772_v3 = vrot.slane %v1771_v50, 4  ;;  %v13338_v19 = vld [vmem:[#allocation20_spill] sm:$0xff] }
  0xc5   : > { %v1777_v56 = vrot.slane %v1775_v52, 4  ;;  %v1782_v62 = vor.u32 %v1781_v31, %v1780_v38  ;;  %v1746_v49 = vsel %vm9804_vm10, %v10205_v51, %v10178_v34  ;;  %v1753_v47 = vsel %vm9804_vm10, %v1747_v6, %v1752_v60 }
  0xc6   : > { %v1784_v2 = vrot.slane %v13336_v39, 5  ;;  %v1785_v8 = vrot.slane %v13337_v40, 6  ;;  %v2210_v48 = vsel %vm9851_vm13, %v2208_v15, %v2209_v29  ;;  %v1761_v38 = vsel %vm9804_vm10, %v1757_v55, %v10212_v57  ;;  %v8934_v15 = vld [vmem:[%s9011_s23 + $0x98] sm:$0x3] }
  0xc7   : > { %v1768_v31 = vsel %vm9804_vm10, %v1762_v11, %v1767_v26  ;;  %v2214_v42 = vsel %vm9851_vm13, %v7174_v27, %v2213_v58  ;;  %v13339_v34 = vshrl.u32 %v13338_v19, 16  ;;  %v13340_v45 = vshll.u32 %v13338_v19, 16  ;;  %v8937_v19 = vld [vmem:[%s9011_s23 + $0xa4] sm:$0x3] }
  0xc8   : > { %v2217_v29 = vsel %vm9851_vm13, %v2215_v43, %v2216_v12  ;;  %v2221_v57 = vsel %vm9851_vm13, %v7175_v24, %v2220_v10  ;;  %v2224_v26 = vsel %vm9851_vm13, %v2222_v46, %v2223_v21  ;;  %v1786_v11 = vor.u32 %v1785_v8, %v1784_v2  ;;  %v8935_v43 = vld [vmem:[%s9011_s23 + $0x94] sm:$0xf]  ;;  %v8936_v2 = vld [vmem:[%s9011_s23 + $0x90] sm:$0xf] }
  0xc9   : > { %v1788_v51 = vrot.slane %v13339_v34, 5  ;;  %v1789_v6 = vrot.slane %v13340_v45, 6  ;;  %v1776_v58 = vsel %vm9804_vm10, %v1772_v3, %v1775_v52  ;;  %v1783_v60 = vsel %vm9804_vm10, %v1777_v56, %v1782_v62  ;;  %v8938_v45 = vld [vmem:[%s9011_s23 + $0xa0] sm:$0xf] }
  0xca   : > { %v1793_v55 = vshrl.u32 %v8934_v15, 16  ;;  %v2227_v50 = vrot.slane %v8935_v43, 6  ;;  %v13341_v24 = vsel %vm9804_vm10, %v10155_v16, %v10121_v30  ;;  %v10290_v46 = vcombine.low %v1746_v49, %v1753_v47  ;;  %v13349_v30 = vld [vmem:[#allocation22_spill] sm:$0xff] }
  0xcb   : > { %v10288_v10 = vcombine.low %v13341_v24, %v10198_v41  ;;  %v10292_v44 = vcombine.low %v2207_v63, %v2210_v48  ;;  %v10294_v27 = vcombine.low %v1761_v38, %v1768_v31  ;;  %v10296_v12 = vcombine.low %v2214_v42, %v2217_v29  ;;  %v13359_v24 = vld [vmem:[#allocation29_spill] sm:$0xff] }
  0xcc   : > { %13343 = vst [vmem:[#allocation7_spill] sm:$0xff] %v10290_v46  ;;  %v10298_v52 = vcombine.low %v2221_v57, %v2224_v26  ;;  %v10300_v21 = vor.u32 %v1789_v6, %v1788_v51  ;;  %v10302_v13 = vcombine.low %v1776_v58, %v1783_v60  ;;  %v10304_v39 = vrot.slane %v1786_v11, 4 }
  0xcd   : > { %13342 = vst [vmem:[#allocation10_spill] sm:$0xff] %v10288_v10  ;;  %13344 = vst [vmem:[#allocation13_spill] sm:$0xff] %v10292_v44  ;;  %v13350_v16 = vshll.u32 %v13349_v30, 16  ;;  %v7176_v40 = vrot.slane %v8936_v2, 10  ;;  %v1795_v8 = vrot.slane %v1793_v55, 5  ;;  %v2229_v63 = vrot.slane %v2227_v50, 4  ;;  %8130 = vmatprep.mubr.msk.bf16.mxu1 %vm670_vm3, %v10288_v10  ;;  %8165 = vmatmul.mubr.msk.bf16.gmra.mxu0 %vm670_vm3, %v10292_v44 }
  0xce   : > { %13345 = vst [vmem:[#allocation11_spill] sm:$0xff] %v10294_v27  ;;  %13346 = vst [vmem:[#allocation14_spill] sm:$0xff] %v10296_v12  ;;  %v2230_v3 = vrot.slane %v8934_v15, 6  ;;  %v13351_v56 = vshrl.u32 %v13227_v4, 16  ;;  %v13352_v49 = vshll.u32 %v13227_v4, 16  ;;  %v13353_v48 = vshrl.u32 %v13230_v20, 16  ;;  %8168 = vmatprep.mubr.msk.bf16.mxu0 %vm670_vm3, %v10296_v12  ;;  %8131 = vmatmul.mubr.msk.bf16.gmra.mxu1 %vm670_vm3, %v10290_v46 }
  0xcf   : > { %13347 = vst [vmem:[#allocation16_spill] sm:$0xff] %v10298_v52  ;;  %13348 = vst [vmem:[#allocation19_spill] sm:$0xff] %v10302_v13  ;;  %v1796_v41 = vrot.slane %v13350_v16, 6  ;;  %v13354_v31 = vshll.u32 %v13230_v20, 16  ;;  %v1808_v34 = vshrl.u32 %v8937_v19, 16  ;;  %v1792_v51 = vrot.slane %v10300_v21, 4  ;;  %8134 = vmatprep.mubr.msk.bf16.mxu1 %vm670_vm3, %v10294_v27 }
  0xd0   : > { %v1799_v62 = vrot.slane %v13351_v56, 5  ;;  %v1800_v47 = vrot.slane %v13352_v49, 6  ;;  %v1803_v38 = vrot.slane %v13353_v48, 5  ;;  %v2234_v6 = vrot.slane %v8938_v45, 6  ;;  %v8940_v56 = vld [vmem:[%s9011_s23 + $0x9c] sm:$0xf] }
  0xd1   : > { %v1804_v42 = vrot.slane %v13354_v31, 6  ;;  %v13355_v29 = vshrl.u32 %v13234_v33, 16  ;;  %v13356_v26 = vshll.u32 %v13234_v33, 16  ;;  %v1791_v20 = vsel %vm9804_vm10, %v10304_v39, %v10300_v21  ;;  %v8939_v39 = vld [vmem:[%s9011_s23 + $0xb0] sm:$0x3] }
  0xd2   : > { %v2228_v11 = vsel %vm9851_vm13, %v7176_v40, %v2227_v50  ;;  %v13357_v58 = vshrl.u32 %v13231_v59, 16  ;;  %v13358_v15 = vshll.u32 %v13231_v59, 16  ;;  %v1797_v55 = vor.u32 %v1796_v41, %v1795_v8  ;;  %v8941_v45 = vld [vmem:[%s9011_s23 + $0xac] sm:$0xf] }
  0xd3   : > { %v1814_v57 = vrot.slane %v13355_v29, 5  ;;  %v1815_v4 = vrot.slane %v13356_v26, 6  ;;  %v2231_v43 = vsel %vm9851_vm13, %v2229_v63, %v2230_v3  ;;  %v13360_v30 = vshll.u32 %v13359_v24, 16  ;;  %v13361_v26 = vld [vmem:[#allocation37_spill] sm:$0xff] }
  0xd4   : > { %v1818_v60 = vrot.slane %v13357_v58, 5  ;;  %v1819_v33 = vrot.slane %v13358_v15, 6  ;;  %v1823_v50 = vshrl.u32 %v8939_v39, 16  ;;  %v1801_v16 = vor.u32 %v1800_v47, %v1799_v62  ;;  %v8942_v58 = vld [vmem:[%s9011_s23 + $0xa8] sm:$0xf] }
  0xd5   : > { %v1811_v21 = vrot.slane %v13360_v30, 6  ;;  %v1805_v2 = vor.u32 %v1804_v42, %v1803_v38  ;;  %v1810_v40 = vrot.slane %v1808_v34, 5  ;;  %v7177_v59 = vrot.slane %v8940_v56, 10  ;;  %8169 = vmatmul.mubr.msk.bf16.gmra.mxu0 %vm670_vm3, %v10298_v52 }
  0xd6   : > { %v2236_v49 = vrot.slane %v2234_v6, 4  ;;  %v2237_v48 = vrot.slane %v8937_v19, 6  ;;  %v1816_v31 = vor.u32 %v1815_v4, %v1814_v57  ;;  %v2241_v29 = vrot.slane %v8941_v45, 6  ;;  %8135 = vmatmul.mubr.msk.bf16.gmra.mxu1 %vm670_vm3, %v10302_v13 }
  0xd7   : > { %v1820_v41 = vor.u32 %v1819_v33, %v1818_v60  ;;  %v1825_v8 = vrot.slane %v1823_v50, 5  ;;  %v13362_v63 = vshll.u32 %v13361_v26, 16  ;;  %v7178_v15 = vrot.slane %v8942_v58, 10 }
  0xd8   : > { %v1798_v62 = vsel %vm9804_vm10, %v1792_v51, %v1797_v55  ;;  %v10356_v47 = vcombine.low %v2228_v11, %v2231_v43  ;;  %v2243_v38 = vrot.slane %v2241_v29, 4  ;;  %v2244_v42 = vrot.slane %v8939_v39, 6 }
  0xd9   : > { %v1826_v3 = vrot.slane %v13362_v63, 6  ;;  %v1802_v19 = vrot.slane %v1801_v16, 4  ;;  %v1807_v34 = vrot.slane %v1805_v2, 4  ;;  %v1812_v57 = vor.u32 %v1811_v21, %v1810_v40  ;;  %v8943_v40 = vld [vmem:[%s9011_s23 + $0xbc] sm:$0x3] }
  0xda   : > { %13363 = vst [vmem:[#allocation20_spill] sm:$0xff] %v10356_v47  ;;  %v2235_v4 = vsel %vm9851_vm13, %v7177_v59, %v2234_v6  ;;  %v2238_v60 = vsel %vm9851_vm13, %v2236_v49, %v2237_v48  ;;  %v1817_v33 = vrot.slane %v1816_v31, 4  ;;  %v13364_v51 = vshrl.u32 %v13239_v35, 16  ;;  %8172 = vmatprep.mubr.msk.bf16.mxu0 %vm670_vm3, %v10356_v47  ;;  %v8944_v59 = vld [vmem:[%s9011_s23 + $0xb8] sm:$0xf] }
  0xdb   : > { %v13365_v55 = vshll.u32 %v13239_v35, 16  ;;  %v1822_v24 = vrot.slane %v1820_v41, 4  ;;  %v1827_v30 = vor.u32 %v1826_v3, %v1825_v8  ;;  %v2242_v21 = vsel %vm9851_vm13, %v7178_v15, %v2241_v29 }
  0xdc   : > { %v1829_v11 = vrot.slane %v13364_v51, 5  ;;  %v13366_v6 = vshrl.u32 %v13232_v7, 16  ;;  %v2245_v50 = vsel %vm9851_vm13, %v2243_v38, %v2244_v42  ;;  %v13367_v35 = vshll.u32 %v13232_v7, 16 }
  0xdd   : > { %v1830_v43 = vrot.slane %v13365_v55, 6  ;;  %v1838_v56 = vshrl.u32 %v8943_v40, 16  ;;  %v2248_v49 = vrot.slane %v8944_v59, 6  ;;  %v10382_v48 = vcombine.low %v1791_v20, %v1798_v62  ;;  %v13371_v20 = vld [vmem:[#allocation43_spill] sm:$0xff]  ;;  %v10400_v62 = vld [vmem:[%s9011_s23 + $0xc0] sm:$0xf] }
  0xde   : > { %v1833_v39 = vrot.slane %v13366_v6, 5  ;;  %v1834_v16 = vrot.slane %v13367_v35, 6  ;;  %v1806_v31 = vsel %vm9804_vm10, %v1802_v19, %v1805_v2  ;;  %v1813_v45 = vsel %vm9804_vm10, %v1807_v34, %v1812_v57  ;;  %v8945_v2 = vld [vmem:[%s9011_s23 + $0xb4] sm:$0xf]  ;;  %v10405_v34 = vld [vmem:[%s9011_s23 + $0xc4] sm:$0xf] }
  0xdf   : > { %13368 = vst [vmem:[#allocation22_spill] sm:$0xff] %v10382_v48  ;;  %v10388_v29 = vcombine.low %v2235_v4, %v2238_v60  ;;  %v1821_v7 = vsel %vm9804_vm10, %v1817_v33, %v1820_v41  ;;  %v1831_v8 = vor.u32 %v1830_v43, %v1829_v11  ;;  %v1828_v26 = vsel %vm9804_vm10, %v1822_v24, %v1827_v30  ;;  %v10416_v33 = vld [vmem:[%s9011_s23 + $0xc8] sm:$0x3] }
  0xe0   : > { %v10394_v63 = vcombine.low %v2242_v21, %v2245_v50  ;;  %v13372_v3 = vshll.u32 %v13371_v20, 16  ;;  %v7179_v15 = vrot.slane %v8945_v2, 10  ;;  %v1835_v38 = vor.u32 %v1834_v16, %v1833_v39  ;;  %8138 = vmatprep.mubr.msk.bf16.mxu1 %vm670_vm3, %v10382_v48 }
  0xe1   : > { %13369 = vst [vmem:[#allocation29_spill] sm:$0xff] %v10388_v29  ;;  %v1840_v42 = vrot.slane %v1838_v56, 5  ;;  %v2250_v41 = vrot.slane %v2248_v49, 4  ;;  %v2251_v19 = vrot.slane %v8943_v40, 6  ;;  %v10409_v57 = vcombine.low %v1806_v31, %v1813_v45  ;;  %8173 = vmatmul.mubr.msk.bf16.gmra.mxu0 %vm670_vm3, %v10388_v29 }
  0xe2   : > { %13370 = vst [vmem:[#allocation37_spill] sm:$0xff] %v10394_v63  ;;  %v1841_v58 = vrot.slane %v13372_v3, 6  ;;  %v10411_v4 = vcombine.low %v1821_v7, %v1828_v26  ;;  %v1832_v60 = vrot.slane %v1831_v8, 4  ;;  %v13030_v51 = vshrl.u32 %v10400_v62, 16  ;;  %8176 = vmatprep.mubr.msk.bf16.mxu0 %vm670_vm3, %v10394_v63 }
  0xe3   : > { %13373 = vst [vmem:[#allocation43_spill] sm:$0xff] %v10409_v57  ;;  %v13029_v11 = vshll.u32 %v10400_v62, 16  ;;  %v13028_v55 = vshll.u32 %v10405_v34, 16  ;;  %v1837_v43 = vrot.slane %v1835_v38, 4  ;;  %v2249_v30 = vsel %vm9851_vm13, %v7179_v15, %v2248_v49  ;;  %8139 = vmatmul.mubr.msk.bf16.gmra.mxu1 %vm670_vm3, %v10409_v57 }
  0xe4   : > { %13374 = vst [vmem:[#allocation77_spill] sm:$0xff] %v10411_v4  ;;  %v1842_v24 = vor.u32 %v1841_v58, %v1840_v42  ;;  %v2252_v21 = vsel %vm9851_vm13, %v2250_v41, %v2251_v19  ;;  %v13027_v6 = vshrl.u32 %v10405_v34, 16  ;;  %v3193_v39 = vrot.slane %v13030_v51, 5  ;;  %8142 = vmatprep.mubr.msk.bf16.mxu1 %vm670_vm3, %v10411_v4  ;;  %v13377_v58 = vld [vmem:[#allocation9_spill] sm:$0xff]  ;;  %v13379_v19 = vld [vmem:[#allocation50_spill] sm:$0xff] }
  0xe5   : > { %v3194_v50 = vrot.slane %v13029_v11, 6  ;;  %v3198_v35 = vrot.slane %v13028_v55, 6  ;;  %v13026_v16 = vshll.u32 %v10416_v33, 16  ;;  %v10435_v40 = vcombine.low %v2249_v30, %v2252_v21  ;;  %v13381_v30 = vld [vmem:[#allocation21_spill] sm:$0xff]  ;;  %v13394_v55 = vld [vmem:[#allocation62_spill] sm:$0xff] }
  0xe6   : > { %v3197_v56 = vrot.slane %v13027_v6, 5  ;;  %v3202_v59 = vshrl.u32 %v10416_v33, 16  ;;  %v1836_v49 = vsel %vm9804_vm10, %v1832_v60, %v1835_v38  ;;  %v1843_v45 = vsel %vm9804_vm10, %v1837_v43, %v1842_v24  ;;  %v10471_v43 = vld [vmem:[%s12801_s1 + $0x28] sm:$0xf]  ;;  %v13395_v11 = vld [vmem:[#allocation17_spill] sm:$0xff] }
  0xe7   : > { %13375 = vst [vmem:[#allocation78_spill] sm:$0xff] %v10435_v40  ;;  %v3205_v31 = vrot.slane %v13026_v16, 6  ;;  %v3195_v7 = vor.u32 %v3194_v50, %v3193_v39  ;;  %v10452_v3 = vcombine.low %v1836_v49, %v1843_v45  ;;  %v3217_v60 = vsel %vm719_vm0, %v10093_v28, 0  ;;  %v13380_v24 = vld [vmem:[#allocation15_spill] sm:$0xff]  ;;  %v10484_v28 = vld [vmem:[%s12801_s1 + $0x24] sm:$0xf] }
  0xe8   : > { %v3199_v8 = vor.u32 %v3198_v35, %v3197_v56  ;;  %v3204_v26 = vrot.slane %v3202_v59, 5  ;;  %v2998_v21 = vsel %vm719_vm0, %v10129_v17, 0  ;;  %v13382_v39 = vld [vmem:[#allocation51_spill] sm:$0xff]  ;;  %v13383_v50 = vld [vmem:[#allocation54_spill] sm:$0xff]  ;;  %v13384_v35 = vld [vmem:[#allocation28_spill] sm:$0xff]  ;;  %v10494_v56 = vpop.f32.mrf.mxu0  ;;  %v13400_v37 = vshll.u32 %v10405_v34, 16 }
  0xe9   : > { %8177 = vmatmul.mubr.msk.bf16.gmra.mxu0 %vm670_vm3, %v10435_v40  ;;  %v3196_v20 = vrot.slane %v3195_v7, 4  ;;  %13376 = vst [vmem:[#allocation79_spill] sm:$0xff] %v10452_v3  ;;  %v13385_v17 = vld [vmem:[#allocation36_spill] sm:$0xff]  ;;  %v13386_v49 = vld [vmem:[#allocation55_spill] sm:$0xff]  ;;  %v13388_v7 = vld [vmem:[#allocation42_spill] sm:$0xff] }
  0xea   : > { %8216 = vmatprep.mubr.msk.bf16.mxu0 %vm670_vm3, %v13377_v58  ;;  %v3201_v2 = vrot.slane %v3199_v8, 4  ;;  %v3206_v15 = vor.u32 %v3205_v31, %v3204_v26  ;;  %v10498_v59 = vpop.f32.mrf.mxu0  ;;  %v13387_v45 = vld [vmem:[#allocation56_spill] sm:$0xff]  ;;  %v13389_v26 = vld [vmem:[#allocation46_spill] sm:$0xff]  ;;  %v13393_v16 = vld [vmem:[#allocation61_spill] sm:$0xff]  ;;  %v2765_v40 = vrot.slane %v13400_v37, 5 }
  0xeb   : > { %v3200_v38 = vsel %vm9804_vm10, %v3196_v20, %v3199_v8  ;;  %8143 = vmatmul.mubr.msk.bf16.gmra.mxu1 %vm670_vm3, %v10452_v3 }
  0xec   : > { %v3207_v42 = vsel %vm9804_vm10, %v3201_v2, %v3206_v15  ;;  %8182 = vmatprep.mubr.msk.bf16.mxu1 %vm670_vm3, %v13379_v19  ;;  %v10502_v31 = vpop.f32.mrf.mxu1  ;;  %v10508_v8 = vpop.f32.mrf.mxu0  ;;  %v13390_v2 = vld [vmem:[#allocation58_spill] sm:$0xff]  ;;  %v13392_v19 = vld [vmem:[#allocation12_spill] sm:$0xff] }
  0xed   : > { %v10460_v41 = vcombine.low %v3200_v38, %v3207_v42  ;;  %v13391_v38 = vld [vmem:[#allocation5_spill] sm:$0xff] }
  0xee   : > { %v10512_v20 = vpop.f32.mrf.mxu1  ;;  %v10514_v58 = vpop.f32.mrf.mxu0 }
  0xef   : > { %13378 = vst [vmem:[#allocation9_spill] sm:$0xff] %v10460_v41 }
  0xf0   : > { %v10518_v15 = vpop.f32.mrf.mxu1 }
  0xf1   : > { %8217 = vmatmul.mubr.msk.bf16.vlgmr.msra.gmra.mxu0 %vm670_vm3, %v13380_v24  ;;  %v13399_v24 = vshll.u32 %v10400_v62, 16 }
  0xf2   : > { %8283 = vmatpush3.bf16.msra.mxu0 %v3217_v60  ;;  %8220 = vmatprep.mubr.msk.bf16.mxu0 %vm670_vm3, %v13381_v30  ;;  %v10528_v60 = vpop.f32.mrf.mxu1 }
  0xf3   : > { %8873 = vmatprep.subr.msk.bf16.mxu0 %vm719_vm0, %v10471_v43  ;;  %8183 = vmatmul.mubr.msk.bf16.vlgmr.msra.gmra.mxu1 %vm670_vm3, %v13382_v39 }
  0xf4   : > { %8249 = vmatpush3.bf16.msra.mxu1 %v2998_v21  ;;  %8186 = vmatprep.mubr.msk.bf16.mxu1 %vm670_vm3, %v13383_v50 }
  0xf5   : > { %8872 = vmatprep.subr.msk.bf16.mxu1 %vm719_vm0, %v10484_v28 }
  0xf8   : > { %v10524_v42 = vpop.f32.mrf.mxu0 }
  0xf9   : > { %8221 = vmatmul.mubr.msk.bf16.gmra.mxu0 %vm670_vm3, %v13384_v35  ;;  %v13398_v35 = vshrl.u32 %v10400_v62, 16 }
  0xfa   : > { %8224 = vmatprep.mubr.msk.bf16.mxu0 %vm670_vm3, %v13385_v17  ;;  %v10530_v21 = vpop.f32.mrf.mxu0 }
  0xfb   : > { %8187 = vmatmul.mubr.msk.bf16.gmra.mxu1 %vm670_vm3, %v13386_v49  ;;  %v2756_v30 = vrot.slane %v13398_v35, 4  ;;  %v13403_v35 = vld [vmem:[#allocation38_spill] sm:$0xff] }
  0xfc   : > { %8190 = vmatprep.mubr.msk.bf16.mxu1 %vm670_vm3, %v13387_v45  ;;  %v10540_v51 = vpop.f32.mrf.mxu0 }
  0xfd   : > { %v10534_v6 = vpop.f32.mrf.mxu1 }
 0x101   : > { %8225 = vmatmul.mubr.msk.bf16.gmra.mxu0 %vm670_vm3, %v13388_v7  ;;  %v13397_v7 = vld [vmem:[#allocation64_spill] sm:$0xff] }
 0x102   : > { %8228 = vmatprep.mubr.msk.bf16.mxu0 %vm670_vm3, %v13389_v26  ;;  %v10546_v26 = vpop.f32.mrf.mxu0 }
 0x103   : > { %8191 = vmatmul.mubr.msk.bf16.gmra.mxu1 %vm670_vm3, %v13390_v2 }
 0x104   : > { %8194 = vmatprep.mubr.msk.bf16.mxu1 %vm670_vm3, %v9728_v5  ;;  %v13415_v5 = vld [vmem:[#allocation52_spill] sm:$0xff] }
 0x109   : > { %8229 = vmatmul.mubr.msk.bf16.gmra.mxu0 %vm670_vm3, %v13391_v38  ;;  %v13396_v38 = vld [vmem:[#allocation24_spill] sm:$0xff] }
 0x10a   : > { %8232 = vmatprep.mubr.msk.bf16.mxu0 %vm670_vm3, %v13392_v19  ;;  %v10544_v19 = vpop.f32.mrf.mxu1  ;;  %v10564_v29 = vpop.f32.mrf.mxu0 }
 0x10b   : > { %8195 = vmatmul.mubr.msk.bf16.gmra.mxu1 %vm670_vm3, %v13393_v16 }
 0x10c   : > { %8198 = vmatprep.mubr.msk.bf16.mxu1 %vm670_vm3, %v13394_v55  ;;  %v10550_v17 = vpop.f32.mrf.mxu1  ;;  %v10570_v12 = vpop.f32.mrf.mxu0 }
 0x10e   : > { %v10566_v47 = vpop.f32.mrf.mxu1 }
 0x110   : > { %v10574_v37 = vpop.f32.mrf.mxu1 }
 0x111   : > { %8233 = vmatmul.mubr.msk.bf16.gmra.mxu0 %vm670_vm3, %v13395_v11  ;;  %v2759_v11 = vrot.slane %v13399_v24, 5 }
 0x112   : > { %8236 = vmatprep.mubr.msk.bf16.mxu0 %vm670_vm3, %v13396_v38  ;;  %v13401_v38 = vshrl.u32 %v10405_v34, 16 }
 0x113   : > { %8199 = vmatmul.mubr.msk.bf16.gmra.mxu1 %vm670_vm3, %v13397_v7  ;;  %v2760_v24 = vor.u32 %v2759_v11, %v2756_v30  ;;  %v10582_v11 = vpop.f32.mrf.mxu0  ;;  %v13406_v30 = vld [vmem:[#allocation47_spill] sm:$0xff]  ;;  %v3428_v7 = vsel %vm719_vm0, %v10484_v28, 0 }
 0x114   : > { %v2769_v63 = vrot.slane %v13401_v38, 4  ;;  %8202 = vmatprep.mubr.msk.bf16.mxu1 %vm670_vm3, %v9770_v54 }
 0x115   : > { %v2761_v38 = vrot.slane %v2760_v24, 4 }
 0x116   : > { %v2770_v52 = vor.u32 %v2769_v63, %v2765_v40  ;;  %v10584_v63 = vpop.f32.mrf.mxu1 }
 0x117   : > { %v2766_v24 = vsel %vm9051_vm4, %v2761_v38, %v2765_v40 }
 0x118   : > { %v2771_v54 = vrot.slane %v2770_v52, 4 }
 0x119   : > { %8237 = vmatmul.mubr.msk.bf16.gmra.mxu0 %vm670_vm3, %v13402_v14  ;;  %v13404_v14 = vshll.u32 %v10416_v33, 16 }
 0x11a   : > { %8240 = vmatprep.mubr.msk.bf16.mxu0 %vm670_vm3, %v13403_v35  ;;  %v13410_v35 = vld [vmem:[#allocation48_spill] sm:$0xff] }
 0x11b   : > { %8203 = vmatmul.mubr.msk.bf16.gmra.mxu1 %vm670_vm3, %v9775_v22  ;;  %v2775_v44 = vrot.slane %v13404_v14, 5  ;;  %v10592_v14 = vpop.f32.mrf.mxu0 }
 0x11c   : > { %8206 = vmatprep.mubr.msk.bf16.mxu1 %vm670_vm3, %v9863_v9 }
 0x11d   : > { %v2776_v52 = vsel %vm9051_vm4, %v2771_v54, %v2775_v44  ;;  %v10602_v9 = vpop.f32.mrf.mxu0  ;;  %v10610_v54 = vcombine.low %v10400_v62, %v10405_v34 }
 0x11e   : > { %v10594_v22 = vcombine.low %v2766_v24, %v2776_v52 }
 0x11f   : > { %13409 = vst [vmem:[#allocation51_spill] sm:$0xff] %v10610_v54  ;;  %v10614_v44 = vpop.f32.mrf.mxu0 }
 0x120   : > { %13408 = vst [vmem:[#allocation50_spill] sm:$0xff] %v10594_v22 }
 0x121   : > { %8241 = vmatmul.mubr.msk.bf16.gmra.mxu0 %vm670_vm3, %v13405_v25  ;;  %v10598_v25 = vpop.f32.mrf.mxu1  ;;  %v10616_v38 = vpop.f32.mrf.mxu0 }
 0x122   : > { %8244 = vmatprep.mubr.msk.bf16.mxu0 %vm670_vm3, %v13406_v30 }
 0x123   : > { %8207 = vmatmul.mubr.msk.bf16.gmra.mxu1 %vm670_vm3, %v9867_v0  ;;  %v10606_v40 = vpop.f32.mrf.mxu1  ;;  %v10622_v52 = vpop.f32.mrf.mxu0  ;;  %v13412_v0 = vld [vmem:[#allocation25_spill] sm:$0xff] }
 0x124   : > { %8210 = vmatprep.mubr.msk.bf16.mxu1 %vm670_vm3, %v9875_v32 }
 0x125   : > { %v10618_v24 = vpop.f32.mrf.mxu1  ;;  %v8082_v32 = vpop.f32.mrf.mxu0 }
 0x127   : > { %v10628_v30 = vpop.f32.mrf.mxu1 }
 0x129   : > { %8245 = vmatmul.mubr.msk.bf16.gmra.mxu0 %vm670_vm3, %v10594_v22  ;;  %v3634_v22 = vsel %vm719_vm0, %v10471_v43, 0 }
 0x12a   : > { %8284 = vmatprep.mubr.msk.bf16.mxu0 %vm670_vm3, %v9837_v23  ;;  %v10633_v23 = vld [vmem:[%s12801_s1 + $0x30] sm:$0xf] }
 0x12b   : > { %8211 = vmatmul.mubr.msk.bf16.gmra.mxu1 %vm670_vm3, %v10610_v54  ;;  %v10637_v54 = vpop.f32.mrf.mxu1 }
 0x12c   : > { %8250 = vmatprep.mubr.msk.bf16.mxu1 %vm670_vm3, %v13410_v35  ;;  %13411 = vst [vmem:[#allocation48_spill] sm:$0xff] %v10637_v54  ;;  %v1442_v35 = vpop.f32.mrf.mxu0  ;;  %v13417_v54 = vld [vmem:[#allocation32_spill] sm:$0xff] }
 0x12d   : > { %v10643_v43 = vpop.f32.mrf.mxu1 }
 0x12e   : > { %13413 = vst [vmem:[#allocation80_spill] sm:$0xff] %v10643_v43  ;;  %v8083_v55 = vpop.f32.mrf.mxu0 }
 0x12f   : > { %v8048_v36 = vpop.f32.mrf.mxu1 }
 0x130   : > { %v1445_v16 = vpop.f32.mrf.mxu0 }
 0x131   : > { %8285 = vmatmul.mubr.msk.bf16.vlgmr.msra.gmra.mxu0 %vm670_vm3, %v10025_v61  ;;  %v10650_v61 = vld [vmem:[%s12801_s1 + $0x2c] sm:$0xf]  ;;  %v1049_v2 = vpop.f32.mrf.mxu1 }
 0x132   : > { %8351 = vmatpush3.bf16.msra.mxu0 %v3634_v22  ;;  %8288 = vmatprep.mubr.msk.bf16.mxu0 %vm670_vm3, %v13412_v0  ;;  %v13414_v22 = vld [vmem:[#allocation49_spill] sm:$0xff]  ;;  %v1058_v0 = vadd.f32 %v8048_v36, %v10494_v56  ;;  %v1050_v45 = vadd.f32 %v1049_v2, %v10498_v59  ;;  %v8086_v43 = vpop.f32.mrf.mxu0 }
 0x133   : > { %8875 = vmatprep.subr.msk.bf16.mxu0 %vm719_vm0, %v10633_v23  ;;  %8251 = vmatmul.mubr.msk.bf16.vlgmr.msra.gmra.mxu1 %vm670_vm3, %v13414_v22  ;;  %v8049_v22 = vpop.f32.mrf.mxu1  ;;  %v13418_v2 = vld [vmem:[#allocation53_spill] sm:$0xff] }
 0x134   : > { %8317 = vmatpush3.bf16.msra.mxu1 %v3428_v7  ;;  %8254 = vmatprep.mubr.msk.bf16.mxu1 %vm670_vm3, %v13415_v5  ;;  %v10659_v28 = vadd.f32 %v8082_v32, %v1058_v0  ;;  %v10666_v36 = vadd.f32 %v1442_v35, %v1050_v45  ;;  %v1061_v56 = vadd.f32 %v8049_v22, %v10508_v8  ;;  %v1458_v7 = vpop.f32.mrf.mxu0  ;;  %v13419_v45 = vld [vmem:[#allocation57_spill] sm:$0xff] }
 0x135   : > { %8874 = vmatprep.subr.msk.bf16.mxu1 %vm719_vm0, %v10650_v61  ;;  %v1052_v5 = vpop.f32.mrf.mxu1 }
 0x136   : > { %13416 = vst [vmem:[#allocation81_spill] sm:$0xff] %v10659_v28  ;;  %v10669_v49 = vadd.f32 %v8083_v55, %v1061_v56  ;;  %v1053_v0 = vadd.f32 %v1052_v5, %v10514_v58  ;;  %v8087_v32 = vpop.f32.mrf.mxu0 }
 0x137   : > { %v8052_v59 = vpop.f32.mrf.mxu1 }
 0x138   : > { %v1074_v28 = vadd.f32 %v8052_v59, %v10524_v42  ;;  %v13420_v59 = vld [vmem:[#allocation59_spill] sm:$0xff] }
 0x139   : > { %8289 = vmatmul.mubr.msk.bf16.gmra.mxu0 %vm670_vm3, %v13417_v54  ;;  %v10674_v54 = vadd.f32 %v1445_v16, %v1053_v0  ;;  %v1065_v8 = vpop.f32.mrf.mxu1 }
 0x13a   : > { %8292 = vmatprep.mubr.msk.bf16.mxu0 %vm670_vm3, %v10097_v53  ;;  %v1461_v53 = vpop.f32.mrf.mxu0  ;;  %v10679_v35 = vadd.f32 %v8086_v43, %v1074_v28  ;;  %v1066_v55 = vadd.f32 %v1065_v8, %v10530_v21 }
 0x13b   : > { %8255 = vmatmul.mubr.msk.bf16.gmra.mxu1 %vm670_vm3, %v13418_v2  ;;  %v8053_v5 = vpop.f32.mrf.mxu1 }
 0x13c   : > { %8258 = vmatprep.mubr.msk.bf16.mxu1 %vm670_vm3, %v13419_v45  ;;  %v8090_v22 = vpop.f32.mrf.mxu0  ;;  %v10686_v16 = vadd.f32 %v1458_v7, %v1066_v55  ;;  %v1077_v58 = vadd.f32 %v8053_v5, %v10540_v51  ;;  %v13421_v7 = vld [vmem:[#allocation63_spill] sm:$0xff] }
 0x13d   : > { %v1068_v56 = vpop.f32.mrf.mxu1 }
 0x13e   : > { %v1474_v42 = vpop.f32.mrf.mxu0  ;;  %v10689_v0 = vadd.f32 %v8087_v32, %v1077_v58  ;;  %v1069_v43 = vadd.f32 %v1068_v56, %v10546_v26 }
 0x13f   : > { %v8056_v21 = vpop.f32.mrf.mxu1 }
 0x140   : > { %v8091_v28 = vpop.f32.mrf.mxu0  ;;  %v10694_v8 = vadd.f32 %v1461_v53, %v1069_v43 }
 0x141   : > { %8293 = vmatmul.mubr.msk.bf16.gmra.mxu0 %vm670_vm3, %v10114_v18  ;;  %v1090_v18 = vadd.f32 %v8056_v21, %v10564_v29  ;;  %v1081_v51 = vpop.f32.mrf.mxu1  ;;  %v13422_v21 = vld [vmem:[#allocation65_spill] sm:$0xff] }
 0x142   : > { %8296 = vmatprep.mubr.msk.bf16.mxu0 %vm670_vm3, %v10184_v1  ;;  %v1477_v1 = vpop.f32.mrf.mxu0  ;;  %v1082_v32 = vadd.f32 %v1081_v51, %v10570_v12 }
 0x143   : > { %8259 = vmatmul.mubr.msk.bf16.gmra.mxu1 %vm670_vm3, %v13420_v59  ;;  %v10699_v55 = vadd.f32 %v8090_v22, %v1090_v18  ;;  %v8057_v26 = vpop.f32.mrf.mxu1 }
 0x144   : > { %8262 = vmatprep.mubr.msk.bf16.mxu1 %vm670_vm3, %v13421_v7  ;;  %v8094_v5 = vpop.f32.mrf.mxu0  ;;  %v10706_v53 = vadd.f32 %v1474_v42, %v1082_v32  ;;  %v1093_v29 = vadd.f32 %v8057_v26, %v10582_v11  ;;  %v13423_v42 = vld [vmem:[#allocation26_spill] sm:$0xff] }
 0x145   : > { %v1084_v56 = vpop.f32.mrf.mxu1 }
 0x146   : > { %v1490_v58 = vpop.f32.mrf.mxu0  ;;  %v10709_v43 = vadd.f32 %v8091_v28, %v1093_v29  ;;  %v1085_v18 = vadd.f32 %v1084_v56, %v10592_v14 }
 0x147   : > { %v8060_v12 = vpop.f32.mrf.mxu1 }
 0x148   : > { %v8095_v22 = vpop.f32.mrf.mxu0  ;;  %v10714_v51 = vadd.f32 %v1477_v1, %v1085_v18 }
 0x149   : > { %8297 = vmatmul.mubr.msk.bf16.gmra.mxu0 %vm670_vm3, %v10288_v10  ;;  %v1106_v10 = vadd.f32 %v8060_v12, %v10602_v9  ;;  %v1097_v11 = vpop.f32.mrf.mxu1  ;;  %v13424_v12 = vld [vmem:[#allocation68_spill] sm:$0xff] }
 0x14a   : > { %8300 = vmatprep.mubr.msk.bf16.mxu0 %vm670_vm3, %v10290_v46  ;;  %v1493_v46 = vpop.f32.mrf.mxu0  ;;  %v1098_v28 = vadd.f32 %v1097_v11, %v10614_v44 }
 0x14b   : > { %8263 = vmatmul.mubr.msk.bf16.gmra.mxu1 %vm670_vm3, %v13422_v21  ;;  %v10719_v32 = vadd.f32 %v8094_v5, %v1106_v10  ;;  %v8061_v14 = vpop.f32.mrf.mxu1 }
 0x14c   : > { %8266 = vmatprep.mubr.msk.bf16.mxu1 %vm670_vm3, %v13423_v42  ;;  %v8098_v26 = vpop.f32.mrf.mxu0  ;;  %v10726_v1 = vadd.f32 %v1490_v58, %v1098_v28  ;;  %v1109_v9 = vadd.f32 %v8061_v14, %v10616_v38  ;;  %v13425_v58 = vld [vmem:[#allocation41_spill] sm:$0xff] }
 0x14d   : > { %v1100_v56 = vpop.f32.mrf.mxu1 }
 0x14e   : > { %v1506_v29 = vpop.f32.mrf.mxu0  ;;  %v10729_v18 = vadd.f32 %v8095_v22, %v1109_v9  ;;  %v1101_v10 = vadd.f32 %v1100_v56, %v10622_v52 }
 0x14f   : > { %v8064_v44 = vpop.f32.mrf.mxu1 }
 0x150   : > { %v8099_v5 = vpop.f32.mrf.mxu0  ;;  %v10734_v11 = vadd.f32 %v1493_v46, %v1101_v10 }
 0x151   : > { %8301 = vmatmul.mubr.msk.bf16.gmra.mxu0 %vm670_vm3, %v10294_v27  ;;  %v1122_v27 = vadd.f32 %v8064_v44, %v10502_v31  ;;  %v1113_v38 = vpop.f32.mrf.mxu1  ;;  %v13426_v44 = vld [vmem:[#allocation69_spill] sm:$0xff] }
 0x152   : > { %8304 = vmatprep.mubr.msk.bf16.mxu0 %vm670_vm3, %v10302_v13  ;;  %v1509_v13 = vpop.f32.mrf.mxu0  ;;  %v1114_v22 = vadd.f32 %v1113_v38, %v10512_v20 }
 0x153   : > { %8267 = vmatmul.mubr.msk.bf16.gmra.mxu1 %vm670_vm3, %v13424_v12  ;;  %v10739_v28 = vadd.f32 %v8098_v26, %v1122_v27  ;;  %v8065_v52 = vpop.f32.mrf.mxu1 }
 0x154   : > { %8270 = vmatprep.mubr.msk.bf16.mxu1 %vm670_vm3, %v13425_v58  ;;  %v8102_v14 = vpop.f32.mrf.mxu0  ;;  %v10746_v46 = vadd.f32 %v1506_v29, %v1114_v22  ;;  %v1125_v31 = vadd.f32 %v8065_v52, %v10518_v15  ;;  %v13427_v29 = vld [vmem:[#allocation71_spill] sm:$0xff]  ;;  %v2984_v15 = vrot.slane %v10405_v34, 5 }
 0x155   : > { %v1116_v56 = vpop.f32.mrf.mxu1 }
 0x156   : > { %v1522_v9 = vpop.f32.mrf.mxu0  ;;  %v10749_v10 = vadd.f32 %v8099_v5, %v1125_v31  ;;  %v1117_v27 = vadd.f32 %v1116_v56, %v10528_v60 }
 0x157   : > { %v8068_v20 = vpop.f32.mrf.mxu1 }
 0x158   : > { %v8103_v26 = vpop.f32.mrf.mxu0  ;;  %v10754_v38 = vadd.f32 %v1509_v13, %v1117_v27  ;;  %v7249_v13 = vrot.slane %v10400_v62, 9 }
 0x159   : > { %8305 = vmatmul.mubr.msk.bf16.gmra.mxu0 %vm670_vm3, %v10382_v48  ;;  %v1138_v48 = vadd.f32 %v8068_v20, %v10534_v6  ;;  %v1129_v22 = vpop.f32.mrf.mxu1  ;;  %v2986_v20 = vrot.slane %v2984_v15, 4 }
 0x15a   : > { %8308 = vmatprep.mubr.msk.bf16.mxu0 %vm670_vm3, %v10409_v57  ;;  %v1525_v57 = vpop.f32.mrf.mxu0  ;;  %v1130_v60 = vadd.f32 %v1129_v22, %v10544_v19  ;;  %v2985_v58 = vsel %vm9530_vm7, %v7249_v13, %v2984_v15 }
 0x15b   : > { %8271 = vmatmul.mubr.msk.bf16.gmra.mxu1 %vm670_vm3, %v13426_v44  ;;  %v10760_v5 = vadd.f32 %v8102_v14, %v1138_v48  ;;  %v8069_v31 = vpop.f32.mrf.mxu1  ;;  %v2987_v48 = vrot.slane %v10416_v33, 5  ;;  %v13428_v44 = vld [vmem:[#allocation72_spill] sm:$0xff] }
 0x15c   : > { %8274 = vmatprep.mubr.msk.bf16.mxu1 %vm670_vm3, %v13427_v29  ;;  %v8106_v52 = vpop.f32.mrf.mxu0  ;;  %v10768_v6 = vadd.f32 %v1522_v9, %v1130_v60  ;;  %v1141_v56 = vadd.f32 %v8069_v31, %v10550_v17  ;;  %v13429_v17 = vld [vmem:[#allocation73_spill] sm:$0xff] }
 0x15d   : > { %v1132_v14 = vpop.f32.mrf.mxu1 }
 0x15e   : > { %v1538_v27 = vpop.f32.mrf.mxu0  ;;  %v10772_v19 = vadd.f32 %v8103_v26, %v1141_v56  ;;  %v1133_v22 = vadd.f32 %v1132_v14, %v10566_v47  ;;  %v2988_v26 = vsel %vm9530_vm7, %v2986_v20, %v2987_v48 }
 0x15f   : > { %v8072_v29 = vpop.f32.mrf.mxu1 }
 0x160   : > { %v1154_v9 = vadd.f32 %v8072_v29, %v10574_v37  ;;  %v10791_v37 = vcombine.low %v2985_v58, %v2988_v26 }
 0x161   : > { %8309 = vmatmul.mubr.msk.bf16.gmra.mxu0 %vm670_vm3, %v10411_v4  ;;  %v8107_v4 = vpop.f32.mrf.mxu0  ;;  %v1145_v47 = vpop.f32.mrf.mxu1 }
 0x162   : > { %8312 = vmatprep.mubr.msk.bf16.mxu0 %vm670_vm3, %v10452_v3  ;;  %v10777_v3 = vadd.f32 %v1525_v57, %v1133_v22  ;;  %v10786_v56 = vadd.f32 %v8106_v52, %v1154_v9  ;;  %v1146_v14 = vadd.f32 %v1145_v47, %v10584_v63  ;;  %13431 = vst [vmem:[#allocation82_spill] sm:$0xff] %v10791_v37 }
 0x163   : > { %8275 = vmatmul.mubr.msk.bf16.gmra.mxu1 %vm670_vm3, %v13428_v44  ;;  %v1541_v60 = vpop.f32.mrf.mxu0  ;;  %v8073_v57 = vpop.f32.mrf.mxu1 }
 0x164   : > { %8278 = vmatprep.mubr.msk.bf16.mxu1 %vm670_vm3, %v13429_v17  ;;  %v10795_v29 = vadd.f32 %v1538_v27, %v1146_v14  ;;  %v1157_v15 = vadd.f32 %v8073_v57, %v10598_v25  ;;  %v13432_v27 = vld [vmem:[#allocation18_spill] sm:$0xff]  ;;  %v4074_v25 = vsel %vm719_vm0, %v10633_v23, 0  ;;  %v13433_v14 = vld [vmem:[#allocation55_spill] sm:$0xff]  ;;  %v13434_v57 = vld [vmem:[#allocation48_spill] sm:$0xff] }
 0x165   : > { %v8110_v44 = vpop.f32.mrf.mxu0  ;;  %v1148_v20 = vpop.f32.mrf.mxu1 }
 0x166   : > { %v10798_v52 = vadd.f32 %v8107_v4, %v1157_v15  ;;  %v1149_v63 = vadd.f32 %v1148_v20, %v10606_v40  ;;  %v10813_v40 = vld [vmem:[%s12801_s1 + $0x38] sm:$0xf] }
 0x167   : > { %v1554_v13 = vpop.f32.mrf.mxu0  ;;  %v8076_v22 = vpop.f32.mrf.mxu1 }
 0x168   : > { %v10803_v58 = vadd.f32 %v1541_v60, %v1149_v63  ;;  %v1170_v9 = vadd.f32 %v8076_v22, %v10618_v24  ;;  %v13435_v22 = vld [vmem:[#allocation80_spill] sm:$0xff] }
 0x169   : > { %8313 = vmatmul.mubr.msk.bf16.gmra.mxu0 %vm670_vm3, %v10460_v41  ;;  %v8111_v48 = vpop.f32.mrf.mxu0  ;;  %v1161_v4 = vpop.f32.mrf.mxu1 }
 0x16a   : > { %8352 = vmatprep.mubr.msk.bf16.mxu0 %vm670_vm3, %v13382_v39  ;;  %v10815_v26 = vadd.f32 %v8110_v44, %v1170_v9  ;;  %v1162_v60 = vadd.f32 %v1161_v4, %v10628_v30  ;;  %v3862_v30 = vsel %vm719_vm0, %v10650_v61, 0  ;;  %v13436_v4 = vld [vmem:[#allocation74_spill] sm:$0xff] }
 0x16b   : > { %8279 = vmatmul.mubr.msk.bf16.gmra.mxu1 %vm670_vm3, %v10791_v37  ;;  %v1557_v39 = vpop.f32.mrf.mxu0  ;;  %v8077_v24 = vpop.f32.mrf.mxu1 }
 0x16c   : > { %8318 = vmatprep.mubr.msk.bf16.mxu1 %vm670_vm3, %v13432_v27  ;;  %v10822_v23 = vadd.f32 %v1554_v13, %v1162_v60  ;;  %v1173_v15 = vadd.f32 %v8077_v24, %v13434_v57  ;;  %v10835_v13 = vld [vmem:[%s12801_s1 + $0x34] sm:$0xf]  ;;  %v13437_v24 = vld [vmem:[#allocation81_spill] sm:$0xff] }
 0x16d   : > { %v8150_v47 = vpop.f32.mrf.mxu0  ;;  %v1164_v44 = vpop.f32.mrf.mxu1 }
 0x16e   : > { %v10829_v63 = vadd.f32 %v8111_v48, %v1173_v15  ;;  %v1165_v9 = vadd.f32 %v1164_v44, %v13435_v22  ;;  %v13438_v48 = vld [vmem:[#allocation30_spill] sm:$0xff] }
 0x16f   : > { %v2388_v20 = vpop.f32.mrf.mxu0 }
 0x170   : > { %v10839_v60 = vadd.f32 %v1557_v39, %v1165_v9  ;;  %v13440_v9 = vld [vmem:[#allocation58_spill] sm:$0xff] }
 0x171   : > { %8353 = vmatmul.mubr.msk.bf16.vlgmr.msra.gmra.mxu0 %vm670_vm3, %v13383_v50  ;;  %v8151_v27 = vpop.f32.mrf.mxu0  ;;  %v13439_v50 = vld [vmem:[#allocation56_spill] sm:$0xff] }
 0x172   : > { %8419 = vmatpush3.bf16.msra.mxu0 %v4074_v25  ;;  %8356 = vmatprep.mubr.msk.bf16.mxu0 %vm670_vm3, %v13433_v14  ;;  %v8116_v25 = vpop.f32.mrf.mxu1 }
 0x173   : > { %8877 = vmatprep.subr.msk.bf16.mxu0 %vm719_vm0, %v10813_v40  ;;  %8319 = vmatmul.mubr.msk.bf16.vlgmr.msra.gmra.mxu1 %vm670_vm3, %v13436_v4  ;;  %v2108_v57 = vadd.f32 %v8116_v25, %v13437_v24  ;;  %v2391_v61 = vpop.f32.mrf.mxu0 }
 0x174   : > { %8385 = vmatpush3.bf16.msra.mxu1 %v3862_v30  ;;  %8322 = vmatprep.mubr.msk.bf16.mxu1 %vm670_vm3, %v13438_v48  ;;  %v1979_v15 = vpop.f32.mrf.mxu1 }
 0x175   : > { %8876 = vmatprep.subr.msk.bf16.mxu1 %vm719_vm0, %v10835_v13  ;;  %v10846_v44 = vadd.f32 %v8150_v47, %v2108_v57  ;;  %v2106_v22 = vadd.f32 %v1979_v15, %v10666_v36  ;;  %v8154_v14 = vpop.f32.mrf.mxu0  ;;  %v13441_v15 = vld [vmem:[#allocation33_spill] sm:$0xff] }
 0x176   : > { %v8117_v39 = vpop.f32.mrf.mxu1 }
 0x177   : > { %v10853_v30 = vadd.f32 %v2388_v20, %v2106_v22  ;;  %v2109_v25 = vadd.f32 %v8117_v39, %v10669_v49  ;;  %v2404_v24 = vpop.f32.mrf.mxu0  ;;  %v13442_v20 = vld [vmem:[#allocation75_spill] sm:$0xff] }
 0x178   : > { %v1982_v41 = vpop.f32.mrf.mxu1 }
 0x179   : > { %8357 = vmatmul.mubr.msk.bf16.gmra.mxu0 %vm670_vm3, %v13439_v50  ;;  %v10856_v48 = vadd.f32 %v8151_v27, %v2109_v25  ;;  %v2107_v47 = vadd.f32 %v1982_v41, %v10674_v54  ;;  %v8155_v57 = vpop.f32.mrf.mxu0  ;;  %v13443_v41 = vld [vmem:[#allocation60_spill] sm:$0xff]  ;;  %v13444_v25 = vld [vmem:[#allocation61_spill] sm:$0xff] }
 0x17a   : > { %8360 = vmatprep.mubr.msk.bf16.mxu0 %vm670_vm3, %v13440_v9  ;;  %v8120_v36 = vpop.f32.mrf.mxu1 }
 0x17b   : > { %8323 = vmatmul.mubr.msk.bf16.gmra.mxu1 %vm670_vm3, %v13441_v15  ;;  %v10861_v50 = vadd.f32 %v2391_v61, %v2107_v47  ;;  %v2112_v4 = vadd.f32 %v8120_v36, %v10679_v35  ;;  %v2407_v9 = vpop.f32.mrf.mxu0 }
 0x17c   : > { %8326 = vmatprep.mubr.msk.bf16.mxu1 %vm670_vm3, %v13442_v20  ;;  %v1995_v49 = vpop.f32.mrf.mxu1 }
 0x17d   : > { %v10866_v22 = vadd.f32 %v8154_v14, %v2112_v4  ;;  %v2110_v27 = vadd.f32 %v1995_v49, %v10686_v16  ;;  %v8158_v39 = vpop.f32.mrf.mxu0  ;;  %v13445_v49 = vld [vmem:[#allocation2_spill] sm:$0xff] }
 0x17e   : > { %v8121_v54 = vpop.f32.mrf.mxu1 }
 0x17f   : > { %v10873_v61 = vadd.f32 %v2404_v24, %v2110_v27  ;;  %v2113_v35 = vadd.f32 %v8121_v54, %v10689_v0  ;;  %v2420_v47 = vpop.f32.mrf.mxu0  ;;  %v13446_v24 = vld [vmem:[#allocation4_spill] sm:$0xff] }
 0x180   : > { %v1998_v36 = vpop.f32.mrf.mxu1 }
 0x181   : > { %8361 = vmatmul.mubr.msk.bf16.gmra.mxu0 %vm670_vm3, %v13443_v41  ;;  %v10876_v20 = vadd.f32 %v8155_v57, %v2113_v35  ;;  %v2111_v14 = vadd.f32 %v1998_v36, %v10694_v8  ;;  %v8159_v4 = vpop.f32.mrf.mxu0  ;;  %v13447_v8 = vld [vmem:[#allocation62_spill] sm:$0xff]  ;;  %v13448_v36 = vld [vmem:[#allocation64_spill] sm:$0xff] }
 0x182   : > { %8364 = vmatprep.mubr.msk.bf16.mxu0 %vm670_vm3, %v13444_v25  ;;  %v8124_v16 = vpop.f32.mrf.mxu1 }
 0x183   : > { %8327 = vmatmul.mubr.msk.bf16.gmra.mxu1 %vm670_vm3, %v13445_v49  ;;  %v10881_v41 = vadd.f32 %v2407_v9, %v2111_v14  ;;  %v2116_v15 = vadd.f32 %v8124_v16, %v10699_v55  ;;  %v2423_v25 = vpop.f32.mrf.mxu0 }
 0x184   : > { %8330 = vmatprep.mubr.msk.bf16.mxu1 %vm670_vm3, %v13446_v24  ;;  %v2011_v0 = vpop.f32.mrf.mxu1 }
 0x185   : > { %v10886_v27 = vadd.f32 %v8158_v39, %v2116_v15  ;;  %v2114_v57 = vadd.f32 %v2011_v0, %v10706_v53  ;;  %v8162_v54 = vpop.f32.mrf.mxu0  ;;  %v13449_v0 = vld [vmem:[#allocation8_spill] sm:$0xff] }
 0x186   : > { %v8125_v35 = vpop.f32.mrf.mxu1 }
 0x187   : > { %v10893_v9 = vadd.f32 %v2420_v47, %v2114_v57  ;;  %v2117_v55 = vadd.f32 %v8125_v35, %v10709_v43  ;;  %v2436_v14 = vpop.f32.mrf.mxu0  ;;  %v13450_v47 = vld [vmem:[#allocation13_spill] sm:$0xff] }
 0x188   : > { %v2014_v16 = vpop.f32.mrf.mxu1 }
 0x189   : > { %8365 = vmatmul.mubr.msk.bf16.gmra.mxu0 %vm670_vm3, %v13447_v8  ;;  %v10896_v24 = vadd.f32 %v8159_v4, %v2117_v55  ;;  %v2115_v15 = vadd.f32 %v2014_v16, %v10714_v51  ;;  %v8163_v39 = vpop.f32.mrf.mxu0  ;;  %v13451_v51 = vld [vmem:[#allocation66_spill] sm:$0xff]  ;;  %v13452_v16 = vld [vmem:[#allocation67_spill] sm:$0xff] }
 0x18a   : > { %8368 = vmatprep.mubr.msk.bf16.mxu0 %vm670_vm3, %v13448_v36  ;;  %v8128_v53 = vpop.f32.mrf.mxu1 }
 0x18b   : > { %8331 = vmatmul.mubr.msk.bf16.gmra.mxu1 %vm670_vm3, %v13449_v0  ;;  %v10901_v8 = vadd.f32 %v2423_v25, %v2115_v15  ;;  %v2120_v49 = vadd.f32 %v8128_v53, %v10719_v32  ;;  %v2439_v36 = vpop.f32.mrf.mxu0 }
 0x18c   : > { %8334 = vmatprep.mubr.msk.bf16.mxu1 %vm670_vm3, %v13450_v47  ;;  %v2027_v43 = vpop.f32.mrf.mxu1 }
 0x18d   : > { %v10906_v57 = vadd.f32 %v8162_v54, %v2120_v49  ;;  %v2118_v4 = vadd.f32 %v2027_v43, %v10726_v1  ;;  %v8166_v35 = vpop.f32.mrf.mxu0  ;;  %v13453_v43 = vld [vmem:[#allocation14_spill] sm:$0xff] }
 0x18e   : > { %v8129_v55 = vpop.f32.mrf.mxu1 }
 0x18f   : > { %v10913_v25 = vadd.f32 %v2436_v14, %v2118_v4  ;;  %v2121_v32 = vadd.f32 %v8129_v55, %v10729_v18  ;;  %v2452_v15 = vpop.f32.mrf.mxu0  ;;  %v13454_v14 = vld [vmem:[#allocation16_spill] sm:$0xff] }
 0x190   : > { %v2030_v53 = vpop.f32.mrf.mxu1 }
 0x191   : > { %8369 = vmatmul.mubr.msk.bf16.gmra.mxu0 %vm670_vm3, %v13451_v51  ;;  %v10916_v47 = vadd.f32 %v8163_v39, %v2121_v32  ;;  %v2119_v49 = vadd.f32 %v2030_v53, %v10734_v11  ;;  %v8167_v54 = vpop.f32.mrf.mxu0  ;;  %v13455_v11 = vld [vmem:[#allocation34_spill] sm:$0xff]  ;;  %v13456_v53 = vld [vmem:[#allocation40_spill] sm:$0xff] }
 0x192   : > { %8372 = vmatprep.mubr.msk.bf16.mxu0 %vm670_vm3, %v13452_v16  ;;  %v8132_v1 = vpop.f32.mrf.mxu1 }
 0x193   : > { %8335 = vmatmul.mubr.msk.bf16.gmra.mxu1 %vm670_vm3, %v13453_v43  ;;  %v10921_v51 = vadd.f32 %v2439_v36, %v2119_v49  ;;  %v2124_v0 = vadd.f32 %v8132_v1, %v10739_v28  ;;  %v2455_v16 = vpop.f32.mrf.mxu0  ;;  %v13462_v43 = vld [vmem:[#allocation70_spill] sm:$0xff] }
 0x194   : > { %8338 = vmatprep.mubr.msk.bf16.mxu1 %vm670_vm3, %v13454_v14  ;;  %v2043_v18 = vpop.f32.mrf.mxu1 }
 0x195   : > { %v10926_v4 = vadd.f32 %v8166_v35, %v2124_v0  ;;  %v2122_v39 = vadd.f32 %v2043_v18, %v10746_v46  ;;  %v8170_v55 = vpop.f32.mrf.mxu0  ;;  %v13458_v18 = vld [vmem:[#allocation20_spill] sm:$0xff] }
 0x196   : > { %v8133_v32 = vpop.f32.mrf.mxu1 }
 0x197   : > { %v10933_v36 = vadd.f32 %v2452_v15, %v2122_v39  ;;  %v2125_v28 = vadd.f32 %v8133_v32, %v10749_v10  ;;  %v2468_v49 = vpop.f32.mrf.mxu0  ;;  %v3414_v15 = vrot.slane %v10405_v34, 6  ;;  %v13460_v32 = vld [vmem:[#allocation29_spill] sm:$0xff]  ;;  %v10957_v34 = vld [vmem:[%s9011_s23 + $0xd0] sm:$0xf] }
 0x198   : > { %v2046_v1 = vpop.f32.mrf.mxu1  ;;  %13463 = vst [vmem:[#allocation81_spill] sm:$0xff] %v10957_v34 }
 0x199   : > { %8373 = vmatmul.mubr.msk.bf16.gmra.mxu0 %vm670_vm3, %v13455_v11  ;;  %v10936_v14 = vadd.f32 %v8167_v54, %v2125_v28  ;;  %v2123_v0 = vadd.f32 %v2046_v1, %v10754_v38  ;;  %v8171_v46 = vpop.f32.mrf.mxu0 }
 0x19a   : > { %8376 = vmatprep.mubr.msk.bf16.mxu0 %vm670_vm3, %v13456_v53  ;;  %v8136_v35 = vpop.f32.mrf.mxu1  ;;  %v7286_v53 = vrot.slane %v10400_v62, 10  ;;  %v10954_v62 = vld [vmem:[%s9011_s23 + $0xcc] sm:$0xf] }
 0x19b   : > { %13457 = vst [vmem:[#allocation18_spill] sm:$0xff] %v10936_v14  ;;  %8339 = vmatmul.mubr.msk.bf16.gmra.mxu1 %vm670_vm3, %v13458_v18  ;;  %v10943_v39 = vadd.f32 %v2455_v16, %v2123_v0  ;;  %v2128_v10 = vadd.f32 %v8136_v35, %v10760_v5  ;;  %v2471_v54 = vpop.f32.mrf.mxu0  ;;  %v10960_v16 = vld [vmem:[%s9011_s23 + $0xd4] sm:$0x3]  ;;  %v13464_v0 = vld [vmem:[#allocation51_spill] sm:$0xff]  ;;  %v13099_v18 = vshrl.u32 %v10954_v62, 16  ;;  %v13100_v31 = vshll.u32 %v10954_v62, 16 }
 0x19c   : > { %8342 = vmatprep.mubr.msk.bf16.mxu1 %vm670_vm3, %v13460_v32  ;;  %v2059_v38 = vpop.f32.mrf.mxu1  ;;  %v10974_v17 = vcombine.low %v10954_v62, %v10957_v34  ;;  %v13472_v35 = vshll.u32 %v10960_v16, 16 }
 0x19d   : > { %13459 = vst [vmem:[#allocation48_spill] sm:$0xff] %v10943_v39  ;;  %v10948_v28 = vadd.f32 %v8170_v55, %v2128_v10  ;;  %v2126_v1 = vadd.f32 %v2059_v38, %v10768_v6  ;;  %v3415_v55 = vsel %vm9851_vm13, %v7286_v53, %v3414_v15  ;;  %v3416_v10 = vrot.slane %v3414_v15, 4 }
 0x19e   : > { %v8137_v5 = vpop.f32.mrf.mxu1  ;;  %v3417_v6 = vrot.slane %v10416_v33, 6  ;;  %13467 = vst [vmem:[#allocation84_spill] sm:$0xff] %v10974_v17  ;;  %v13102_v53 = vshrl.u32 %v10957_v34, 16 }
 0x19f   : > { %13461 = vst [vmem:[#allocation80_spill] sm:$0xff] %v10948_v28  ;;  %v10967_v38 = vadd.f32 %v2468_v49, %v2126_v1  ;;  %v4269_v1 = vrot.slane %v13099_v18, 5  ;;  %v13469_v28 = vld [vmem:[#allocation37_spill] sm:$0xff] }
 0x1a0   : > { %v2062_v37 = vpop.f32.mrf.mxu1 }
 0x1a1   : > { %v8174_v11 = vpop.f32.mrf.mxu0  ;;  %8377 = vmatmul.mubr.msk.bf16.gmra.mxu0 %vm670_vm3, %v13462_v43  ;;  %13466 = vst [vmem:[#allocation83_spill] sm:$0xff] %v10967_v38  ;;  %v2129_v43 = vadd.f32 %v8137_v5, %v10772_v19  ;;  %v2127_v19 = vadd.f32 %v2062_v37, %v10777_v3  ;;  %v4270_v5 = vrot.slane %v13100_v31, 6  ;;  %v4278_v37 = vshrl.u32 %v10960_v16, 16 }
 0x1a2   : > { %8380 = vmatprep.mubr.msk.bf16.mxu0 %vm670_vm3, %v13464_v0  ;;  %v3418_v0 = vsel %vm9851_vm13, %v3416_v10, %v3417_v6  ;;  %v4281_v10 = vrot.slane %v13472_v35, 6 }
 0x1a3   : > { %v2484_v32 = vpop.f32.mrf.mxu0  ;;  %v10979_v49 = vadd.f32 %v8171_v46, %v2129_v43  ;;  %v8140_v38 = vpop.f32.mrf.mxu1  ;;  %8343 = vmatmul.mubr.msk.bf16.gmra.mxu1 %vm670_vm3, %v13469_v28  ;;  %v4273_v43 = vrot.slane %v13102_v53, 5  ;;  %v13470_v46 = vshll.u32 %v10957_v34, 16  ;;  %v10995_v33 = vadd.f32 %v2471_v54, %v2127_v19  ;;  %v13474_v19 = vld [vmem:[#allocation49_spill] sm:$0xff] }
 0x1a4   : > { %v2132_v18 = vadd.f32 %v8140_v38, %v10786_v56  ;;  %v4271_v28 = vor.u32 %v4270_v5, %v4269_v1  ;;  %v4280_v53 = vrot.slane %v4278_v37, 5  ;;  %v11007_v38 = vcombine.low %v3415_v55, %v3418_v0 }
 0x1a5   : > { %13468 = vst [vmem:[#allocation85_spill] sm:$0xff] %v10979_v49  ;;  %v8175_v15 = vpop.f32.mrf.mxu0  ;;  %v4274_v3 = vrot.slane %v13470_v46, 6  ;;  %v13471_v49 = vld [vmem:[#allocation78_spill] sm:$0xff]  ;;  %v2075_v6 = vpop.f32.mrf.mxu1 }
 0x1a6   : > { %8346 = vmatprep.mubr.msk.bf16.mxu1 %vm670_vm3, %v13471_v49  ;;  %v11002_v14 = vadd.f32 %v8174_v11, %v2132_v18  ;;  %v2130_v46 = vadd.f32 %v2075_v6, %v10795_v29  ;;  %v4272_v56 = vrot.slane %v4271_v28, 4  ;;  %13473 = vst [vmem:[#allocation86_spill] sm:$0xff] %v11007_v38  ;;  %v4282_v35 = vor.u32 %v4281_v10, %v4280_v53  ;;  %v13477_v10 = vld [vmem:[#allocation15_spill] sm:$0xff] }
 0x1a7   : > { %v2487_v31 = vpop.f32.mrf.mxu0  ;;  %v4275_v39 = vor.u32 %v4274_v3, %v4273_v43  ;;  %v8141_v54 = vpop.f32.mrf.mxu1 }
 0x1a8   : > { %v11011_v5 = vadd.f32 %v2484_v32, %v2130_v46  ;;  %v2133_v11 = vadd.f32 %v8141_v54, %v10798_v52 }
 0x1a9   : > { %v8178_v34 = vpop.f32.mrf.mxu0  ;;  %8381 = vmatmul.mubr.msk.bf16.gmra.mxu0 %vm670_vm3, %v10974_v17  ;;  %v4277_v1 = vrot.slane %v4275_v39, 4  ;;  %v4276_v29 = vsel %vm9804_vm10, %v4272_v56, %v4275_v39  ;;  %v2078_v3 = vpop.f32.mrf.mxu1 }
 0x1aa   : > { %8420 = vmatprep.mubr.msk.bf16.mxu0 %vm670_vm3, %v13474_v19  ;;  %v11018_v37 = vadd.f32 %v8175_v15, %v2133_v11  ;;  %v2131_v0 = vadd.f32 %v2078_v3, %v10803_v58  ;;  %v4504_v15 = vsel %vm719_vm0, %v10813_v40, 0  ;;  %v11035_v58 = vld [vmem:[%s12801_s1 + $0x40] sm:$0xf]  ;;  %v13478_v19 = vld [vmem:[#allocation52_spill] sm:$0xff] }
 0x1ab   : > { %v2500_v18 = vpop.f32.mrf.mxu0  ;;  %v4283_v28 = vsel %vm9804_vm10, %v4277_v1, %v4282_v35  ;;  %v8144_v53 = vpop.f32.mrf.mxu1  ;;  %8347 = vmatmul.mubr.msk.bf16.gmra.mxu1 %vm670_vm3, %v11007_v38 }
 0x1ac   : > { %v11021_v6 = vcombine.low %v4276_v29, %v4283_v28  ;;  %v11025_v52 = vadd.f32 %v2487_v31, %v2131_v0  ;;  %v2136_v32 = vadd.f32 %v8144_v53, %v10815_v26  ;;  %8386 = vmatprep.mubr.msk.bf16.mxu1 %vm670_vm3, %v13477_v10 }
 0x1ad   : > { %v8179_v55 = vpop.f32.mrf.mxu0  ;;  %v2091_v46 = vpop.f32.mrf.mxu1 }
 0x1ae   : > { %13476 = vst [vmem:[#allocation49_spill] sm:$0xff] %v11021_v6  ;;  %v11037_v56 = vadd.f32 %v8178_v34, %v2136_v32  ;;  %v2134_v31 = vadd.f32 %v2091_v46, %v10822_v23  ;;  %v4293_v23 = vsel %vm719_vm0, %v10835_v13, 0  ;;  %v13505_v6 = vld [vmem:[#allocation82_spill] sm:$0xff] }
 0x1af   : > { %v2503_v39 = vpop.f32.mrf.mxu0  ;;  %v8145_v26 = vpop.f32.mrf.mxu1 }
 0x1b0   : > { %v11044_v40 = vadd.f32 %v2500_v18, %v2134_v31  ;;  %v2137_v1 = vadd.f32 %v8145_v26, %v10829_v63  ;;  %v11057_v18 = vld [vmem:[%s12801_s1 + $0x3c] sm:$0xf] }
 0x1b1   : > { %v8218_v54 = vpop.f32.mrf.mxu0  ;;  %8421 = vmatmul.mubr.msk.bf16.vlgmr.msra.gmra.mxu0 %vm670_vm3, %v13478_v19  ;;  %v2094_v34 = vpop.f32.mrf.mxu1  ;;  %v13479_v63 = vld [vmem:[#allocation21_spill] sm:$0xff] }
 0x1b2   : > { %8487 = vmatpush3.bf16.msra.mxu0 %v4504_v15  ;;  %8424 = vmatprep.mubr.msk.bf16.mxu0 %vm670_vm3, %v13418_v2  ;;  %v11051_v11 = vadd.f32 %v8179_v55, %v2137_v1  ;;  %v2135_v29 = vadd.f32 %v2094_v34, %v10839_v60  ;;  %v13480_v55 = vld [vmem:[#allocation28_spill] sm:$0xff] }
 0x1b3   : > { %v2822_v35 = vpop.f32.mrf.mxu0  ;;  %8879 = vmatprep.subr.msk.bf16.mxu0 %vm719_vm0, %v11035_v58  ;;  %v8184_v28 = vpop.f32.mrf.mxu1  ;;  %8387 = vmatmul.mubr.msk.bf16.vlgmr.msra.gmra.mxu1 %vm670_vm3, %v13479_v63 }
 0x1b4   : > { %v11061_v0 = vadd.f32 %v2503_v39, %v2135_v29  ;;  %v2723_v53 = vadd.f32 %v8184_v28, %v10846_v44  ;;  %8453 = vmatpush3.bf16.msra.mxu1 %v4293_v23  ;;  %8390 = vmatprep.mubr.msk.bf16.mxu1 %vm670_vm3, %v13480_v55  ;;  %v13481_v23 = vld [vmem:[#allocation36_spill] sm:$0xff] }
 0x1b5   : > { %v8219_v3 = vpop.f32.mrf.mxu0  ;;  %v2594_v60 = vpop.f32.mrf.mxu1  ;;  %8878 = vmatprep.subr.msk.bf16.mxu1 %vm719_vm0, %v11057_v18 }
 0x1b6   : > { %v11068_v32 = vadd.f32 %v8218_v54, %v2723_v53  ;;  %v2721_v10 = vadd.f32 %v2594_v60, %v10853_v30 }
 0x1b7   : > { %v2825_v13 = vpop.f32.mrf.mxu0  ;;  %v8185_v39 = vpop.f32.mrf.mxu1 }
 0x1b8   : > { %v11075_v44 = vadd.f32 %v2822_v35, %v2721_v10  ;;  %v2724_v46 = vadd.f32 %v8185_v39, %v10856_v48  ;;  %v13482_v35 = vld [vmem:[#allocation42_spill] sm:$0xff] }
 0x1b9   : > { %v8222_v15 = vpop.f32.mrf.mxu0  ;;  %8425 = vmatmul.mubr.msk.bf16.gmra.mxu0 %vm670_vm3, %v13419_v45  ;;  %v2597_v26 = vpop.f32.mrf.mxu1  ;;  %v13495_v45 = vld [vmem:[#allocation81_spill] sm:$0xff] }
 0x1ba   : > { %8428 = vmatprep.mubr.msk.bf16.mxu0 %vm670_vm3, %v13420_v59  ;;  %v11078_v1 = vadd.f32 %v8219_v3, %v2724_v46  ;;  %v2722_v54 = vadd.f32 %v2597_v26, %v10861_v50  ;;  %v4060_v2 = vrot.slane %v13495_v45, 5  ;;  %v13497_v19 = vshll.u32 %v13495_v45, 16 }
 0x1bb   : > { %v2838_v31 = vpop.f32.mrf.mxu0  ;;  %v8188_v30 = vpop.f32.mrf.mxu1  ;;  %8391 = vmatmul.mubr.msk.bf16.gmra.mxu1 %vm670_vm3, %v13481_v23  ;;  %v13498_v17 = vshrl.u32 %v13495_v45, 16  ;;  %v13503_v23 = vld [vmem:[#allocation83_spill] sm:$0xff] }
 0x1bc   : > { %v11083_v29 = vadd.f32 %v2825_v13, %v2722_v54  ;;  %v2727_v28 = vadd.f32 %v8188_v30, %v10866_v22  ;;  %8394 = vmatprep.mubr.msk.bf16.mxu1 %vm670_vm3, %v13482_v35  ;;  %v13483_v30 = vld [vmem:[#allocation46_spill] sm:$0xff] }
 0x1bd   : > { %v8223_v34 = vpop.f32.mrf.mxu0  ;;  %v2610_v48 = vpop.f32.mrf.mxu1 }
 0x1be   : > { %v11088_v60 = vadd.f32 %v8222_v15, %v2727_v28  ;;  %v2725_v3 = vadd.f32 %v2610_v48, %v10873_v61 }
 0x1bf   : > { %v2841_v53 = vpop.f32.mrf.mxu0  ;;  %v8189_v50 = vpop.f32.mrf.mxu1 }
 0x1c0   : > { %v11095_v13 = vadd.f32 %v2838_v31, %v2725_v3  ;;  %v2728_v22 = vadd.f32 %v8189_v50, %v10876_v20  ;;  %v13484_v31 = vld [vmem:[#allocation5_spill] sm:$0xff] }
 0x1c1   : > { %v8226_v10 = vpop.f32.mrf.mxu0  ;;  %8429 = vmatmul.mubr.msk.bf16.gmra.mxu0 %vm670_vm3, %v13421_v7  ;;  %v2613_v46 = vpop.f32.mrf.mxu1 }
 0x1c2   : > { %8432 = vmatprep.mubr.msk.bf16.mxu0 %vm670_vm3, %v13422_v21  ;;  %v11098_v26 = vadd.f32 %v8223_v34, %v2728_v22  ;;  %v2726_v15 = vadd.f32 %v2613_v46, %v10881_v41 }
 0x1c3   : > { %v2854_v39 = vpop.f32.mrf.mxu0  ;;  %v8192_v61 = vpop.f32.mrf.mxu1  ;;  %8395 = vmatmul.mubr.msk.bf16.gmra.mxu1 %vm670_vm3, %v13483_v30  ;;  %v13501_v30 = vld [vmem:[#allocation80_spill] sm:$0xff] }
 0x1c4   : > { %v11103_v28 = vadd.f32 %v2841_v53, %v2726_v15  ;;  %v2731_v48 = vadd.f32 %v8192_v61, %v10886_v27  ;;  %8398 = vmatprep.mubr.msk.bf16.mxu1 %vm670_vm3, %v13484_v31  ;;  %v13500_v31 = vld [vmem:[#allocation38_spill] sm:$0xff] }
 0x1c5   : > { %v8227_v54 = vpop.f32.mrf.mxu0  ;;  %v2626_v20 = vpop.f32.mrf.mxu1 }
 0x1c6   : > { %v11108_v3 = vadd.f32 %v8226_v10, %v2731_v48  ;;  %v2729_v34 = vadd.f32 %v2626_v20, %v10893_v9  ;;  %v13485_v48 = vld [vmem:[#allocation12_spill] sm:$0xff] }
 0x1c7   : > { %v2857_v21 = vpop.f32.mrf.mxu0  ;;  %v8193_v41 = vpop.f32.mrf.mxu1 }
 0x1c8   : > { %v11115_v53 = vadd.f32 %v2854_v39, %v2729_v34  ;;  %v2732_v27 = vadd.f32 %v8193_v41, %v10896_v24  ;;  %v13486_v39 = vld [vmem:[#allocation17_spill] sm:$0xff] }
 0x1c9   : > { %v8230_v50 = vpop.f32.mrf.mxu0  ;;  %8433 = vmatmul.mubr.msk.bf16.gmra.mxu0 %vm670_vm3, %v13423_v42  ;;  %v2629_v46 = vpop.f32.mrf.mxu1 }
 0x1ca   : > { %8436 = vmatprep.mubr.msk.bf16.mxu0 %vm670_vm3, %v13424_v12  ;;  %v11118_v15 = vadd.f32 %v8227_v54, %v2732_v27  ;;  %v2730_v10 = vadd.f32 %v2629_v46, %v10901_v8  ;;  %v13487_v8 = vld [vmem:[#allocation41_spill] sm:$0xff] }
 0x1cb   : > { %v2870_v22 = vpop.f32.mrf.mxu0  ;;  %v8196_v9 = vpop.f32.mrf.mxu1  ;;  %8399 = vmatmul.mubr.msk.bf16.gmra.mxu1 %vm670_vm3, %v13485_v48  ;;  %v13488_v46 = vld [vmem:[#allocation69_spill] sm:$0xff] }
 0x1cc   : > { %v11123_v20 = vadd.f32 %v2857_v21, %v2730_v10  ;;  %v2735_v42 = vadd.f32 %v8196_v9, %v10906_v57  ;;  %8402 = vmatprep.mubr.msk.bf16.mxu1 %vm670_vm3, %v13486_v39 }
 0x1cd   : > { %v8231_v61 = vpop.f32.mrf.mxu0  ;;  %v2642_v24 = vpop.f32.mrf.mxu1 }
 0x1ce   : > { %v11128_v34 = vadd.f32 %v8230_v50, %v2735_v42  ;;  %v2733_v54 = vadd.f32 %v2642_v24, %v10913_v25  ;;  %v13489_v24 = vld [vmem:[#allocation24_spill] sm:$0xff] }
 0x1cf   : > { %v2873_v12 = vpop.f32.mrf.mxu0  ;;  %v8197_v27 = vpop.f32.mrf.mxu1 }
 0x1d0   : > { %v11135_v21 = vadd.f32 %v2870_v22, %v2733_v54  ;;  %v2736_v57 = vadd.f32 %v8197_v27, %v10916_v47  ;;  %v13490_v22 = vld [vmem:[#allocation31_spill] sm:$0xff] }
 0x1d1   : > { %v8234_v41 = vpop.f32.mrf.mxu0  ;;  %8437 = vmatmul.mubr.msk.bf16.gmra.mxu0 %vm670_vm3, %v13487_v8  ;;  %v2645_v9 = vpop.f32.mrf.mxu1 }
 0x1d2   : > { %8440 = vmatprep.mubr.msk.bf16.mxu0 %vm670_vm3, %v13488_v46  ;;  %v11138_v7 = vadd.f32 %v8231_v61, %v2736_v57  ;;  %v2734_v42 = vadd.f32 %v2645_v9, %v10921_v51  ;;  %v13491_v51 = vld [vmem:[#allocation71_spill] sm:$0xff]  ;;  %v13492_v9 = vld [vmem:[#allocation72_spill] sm:$0xff] }
 0x1d3   : > { %v2886_v10 = vpop.f32.mrf.mxu0  ;;  %v8200_v25 = vpop.f32.mrf.mxu1  ;;  %8403 = vmatmul.mubr.msk.bf16.gmra.mxu1 %vm670_vm3, %v13489_v24 }
 0x1d4   : > { %v11143_v8 = vadd.f32 %v2873_v12, %v2734_v42  ;;  %v2739_v59 = vadd.f32 %v8200_v25, %v10926_v4  ;;  %8406 = vmatprep.mubr.msk.bf16.mxu1 %vm670_vm3, %v13490_v22  ;;  %v13493_v12 = vshrl.u32 %v10954_v62, 16  ;;  %v13494_v42 = vshll.u32 %v10954_v62, 16 }
 0x1d5   : > { %v8235_v50 = vpop.f32.mrf.mxu0  ;;  %v2658_v47 = vpop.f32.mrf.mxu1  ;;  %v3845_v22 = vrot.slane %v13498_v17, 4 }
 0x1d6   : > { %v11148_v54 = vadd.f32 %v8234_v41, %v2739_v59  ;;  %v2737_v61 = vadd.f32 %v2658_v47, %v10933_v36  ;;  %v3832_v4 = vrot.slane %v13493_v12, 4  ;;  %v3835_v25 = vrot.slane %v13494_v42, 5  ;;  %v13496_v41 = vld [vmem:[#allocation18_spill] sm:$0xff]  ;;  %v13499_v12 = vld [vmem:[#allocation48_spill] sm:$0xff] }
 0x1d7   : > { %v2889_v46 = vpop.f32.mrf.mxu0  ;;  %v8201_v57 = vpop.f32.mrf.mxu1 }
 0x1d8   : > { %v11160_v59 = vadd.f32 %v2886_v10, %v2737_v61  ;;  %v2740_v36 = vadd.f32 %v8201_v57, %v13496_v41  ;;  %v3836_v10 = vor.u32 %v3835_v25, %v3832_v4  ;;  %v7341_v61 = vrot.slane %v10954_v62, 9  ;;  %v13504_v25 = vld [vmem:[#allocation73_spill] sm:$0xff] }
 0x1d9   : > { %v8238_v27 = vpop.f32.mrf.mxu0  ;;  %8441 = vmatmul.mubr.msk.bf16.gmra.mxu0 %vm670_vm3, %v13491_v51  ;;  %v3841_v51 = vrot.slane %v13497_v19, 5  ;;  %v4062_v57 = vrot.slane %v4060_v2, 4  ;;  %v4063_v41 = vrot.slane %v10960_v16, 5 }
 0x1da   : > { %8444 = vmatprep.mubr.msk.bf16.mxu0 %vm670_vm3, %v13492_v9  ;;  %v2661_v9 = vpop.f32.mrf.mxu1  ;;  %v11167_v24 = vadd.f32 %v8235_v50, %v2740_v36  ;;  %v13502_v50 = vld [vmem:[#allocation44_spill] sm:$0xff] }
 0x1db   : > { %v2902_v47 = vpop.f32.mrf.mxu0  ;;  %v2738_v39 = vadd.f32 %v2661_v9, %v13499_v12  ;;  %8407 = vmatmul.mubr.msk.bf16.gmra.mxu1 %vm670_vm3, %v13500_v31  ;;  %v3846_v9 = vor.u32 %v3845_v22, %v3841_v51  ;;  %v4064_v22 = vsel %vm9530_vm7, %v4062_v57, %v4063_v41  ;;  %v13511_v57 = vld [vmem:[#allocation50_spill] sm:$0xff] }
 0x1dc   : > { %v8204_v42 = vpop.f32.mrf.mxu1  ;;  %8410 = vmatprep.mubr.msk.bf16.mxu1 %vm670_vm3, %v13502_v50  ;;  %v13508_v50 = vshll.u32 %v10960_v16, 16 }
 0x1dd   : > { %v8239_v48 = vpop.f32.mrf.mxu0  ;;  %v11174_v19 = vadd.f32 %v2889_v46, %v2738_v39  ;;  %v2743_v17 = vadd.f32 %v8204_v42, %v13501_v30  ;;  %v3837_v39 = vrot.slane %v3836_v10, 4  ;;  %v4061_v46 = vsel %vm9530_vm7, %v7341_v61, %v4060_v2  ;;  %v13510_v61 = vld [vmem:[#allocation47_spill] sm:$0xff] }
 0x1de   : > { %v2674_v36 = vpop.f32.mrf.mxu1  ;;  %v11198_v38 = vcombine.low %v4061_v46, %v4064_v22  ;;  %v13514_v22 = vld [vmem:[#allocation74_spill] sm:$0xff] }
 0x1df   : > { %v2905_v35 = vpop.f32.mrf.mxu0  ;;  %v11179_v12 = vadd.f32 %v8238_v27, %v2743_v17  ;;  %v2741_v31 = vadd.f32 %v2674_v36, %v13503_v23  ;;  %v13507_v27 = vld [vmem:[#allocation85_spill] sm:$0xff]  ;;  %v3847_v36 = vrot.slane %v3846_v9, 4 }
 0x1e0   : > { %v8205_v55 = vpop.f32.mrf.mxu1  ;;  %13509 = vst [vmem:[#allocation15_spill] sm:$0xff] %v11198_v38 }
 0x1e1   : > { %v8242_v4 = vpop.f32.mrf.mxu0  ;;  %8445 = vmatmul.mubr.msk.bf16.gmra.mxu0 %vm670_vm3, %v13504_v25  ;;  %v11190_v42 = vadd.f32 %v2902_v47, %v2741_v31  ;;  %v2744_v17 = vadd.f32 %v8205_v55, %v13507_v27  ;;  %v3851_v25 = vrot.slane %v13508_v50, 5 }
 0x1e2   : > { %8448 = vmatprep.mubr.msk.bf16.mxu0 %vm670_vm3, %v13505_v6  ;;  %v2677_v43 = vpop.f32.mrf.mxu1 }
 0x1e3   : > { %v2918_v23 = vpop.f32.mrf.mxu0  ;;  %v11195_v63 = vadd.f32 %v8239_v48, %v2744_v17  ;;  %v2742_v10 = vadd.f32 %v2677_v43, %v10995_v33  ;;  %8411 = vmatmul.mubr.msk.bf16.gmra.mxu1 %vm670_vm3, %v13510_v61  ;;  %v3842_v48 = vsel %vm9051_vm4, %v3837_v39, %v3841_v51  ;;  %v3852_v33 = vsel %vm9051_vm4, %v3847_v36, %v3851_v25 }
 0x1e4   : > { %v8208_v2 = vpop.f32.mrf.mxu1  ;;  %8414 = vmatprep.mubr.msk.bf16.mxu1 %vm670_vm3, %v13511_v57 }
 0x1e5   : > { %v8243_v6 = vpop.f32.mrf.mxu0  ;;  %v11202_v31 = vadd.f32 %v2905_v35, %v2742_v10  ;;  %v2747_v55 = vadd.f32 %v8208_v2, %v11002_v14  ;;  %v11216_v35 = vcombine.low %v3842_v48, %v3852_v33 }
 0x1e6   : > { %v2690_v43 = vpop.f32.mrf.mxu1 }
 0x1e7   : > { %v2921_v47 = vpop.f32.mrf.mxu0  ;;  %v11211_v50 = vadd.f32 %v8242_v4, %v2747_v55  ;;  %v2745_v9 = vadd.f32 %v2690_v43, %v11011_v5  ;;  %13513 = vst [vmem:[#allocation81_spill] sm:$0xff] %v11216_v35  ;;  %v13516_v43 = vld [vmem:[#allocation30_spill] sm:$0xff] }
 0x1e8   : > { %v8209_v14 = vpop.f32.mrf.mxu1 }
 0x1e9   : > { %v8246_v46 = vpop.f32.mrf.mxu0  ;;  %8449 = vmatmul.mubr.msk.bf16.gmra.mxu0 %vm670_vm3, %v11198_v38  ;;  %v11220_v27 = vadd.f32 %v2918_v23, %v2745_v9  ;;  %v2748_v51 = vadd.f32 %v8209_v14, %v11018_v37  ;;  %v13515_v23 = vld [vmem:[#allocation23_spill] sm:$0xff]  ;;  %v4938_v37 = vsel %vm719_vm0, %v11035_v58, 0  ;;  %v13517_v9 = vld [vmem:[#allocation33_spill] sm:$0xff] }
 0x1ea   : > { %8488 = vmatprep.mubr.msk.bf16.mxu0 %vm670_vm3, %v13514_v22  ;;  %v2693_v39 = vpop.f32.mrf.mxu1 }
 0x1eb   : > { %v2934_v25 = vpop.f32.mrf.mxu0  ;;  %v11223_v4 = vadd.f32 %v8243_v6, %v2748_v51  ;;  %v2746_v5 = vadd.f32 %v2693_v39, %v11025_v52  ;;  %8415 = vmatmul.mubr.msk.bf16.gmra.mxu1 %vm670_vm3, %v11216_v35  ;;  %v11238_v52 = vld [vmem:[%s12801_s1 + $0x48] sm:$0xf] }
 0x1ec   : > { %v8212_v36 = vpop.f32.mrf.mxu1  ;;  %8454 = vmatprep.mubr.msk.bf16.mxu1 %vm670_vm3, %v13515_v23 }
 0x1ed   : > { %v8247_v17 = vpop.f32.mrf.mxu0  ;;  %v11228_v10 = vadd.f32 %v2921_v47, %v2746_v5  ;;  %v2751_v2 = vadd.f32 %v8212_v36, %v11037_v56 }
 0x1ee   : > { %v2706_v6 = vpop.f32.mrf.mxu1 }
 0x1ef   : > { %v2937_v55 = vpop.f32.mrf.mxu0  ;;  %v11240_v48 = vadd.f32 %v8246_v46, %v2751_v2  ;;  %v2749_v47 = vadd.f32 %v2706_v6, %v11044_v40  ;;  %v4710_v40 = vsel %vm719_vm0, %v11057_v18, 0 }
 0x1f0   : > { %v8213_v56 = vpop.f32.mrf.mxu1 }
 0x1f1   : > { %v8286_v33 = vpop.f32.mrf.mxu0  ;;  %8489 = vmatmul.mubr.msk.bf16.vlgmr.msra.gmra.mxu0 %vm670_vm3, %v13516_v43  ;;  %v11247_v58 = vadd.f32 %v2934_v25, %v2749_v47  ;;  %v2752_v14 = vadd.f32 %v8213_v56, %v11051_v11  ;;  %v11260_v25 = vld [vmem:[%s12801_s1 + $0x44] sm:$0xf]  ;;  %v13518_v11 = vld [vmem:[#allocation25_spill] sm:$0xff]  ;;  %v13520_v56 = vld [vmem:[#allocation75_spill] sm:$0xff] }
 0x1f2   : > { %8555 = vmatpush3.bf16.msra.mxu0 %v4938_v37  ;;  %8492 = vmatprep.mubr.msk.bf16.mxu0 %vm670_vm3, %v13517_v9  ;;  %v2709_v46 = vpop.f32.mrf.mxu1 }
 0x1f3   : > { %v3253_v22 = vpop.f32.mrf.mxu0  ;;  %8881 = vmatprep.subr.msk.bf16.mxu0 %vm719_vm0, %v11238_v52  ;;  %v11254_v51 = vadd.f32 %v8247_v17, %v2752_v14  ;;  %v2750_v39 = vadd.f32 %v2709_v46, %v11061_v0  ;;  %8455 = vmatmul.mubr.msk.bf16.vlgmr.msra.gmra.mxu1 %vm670_vm3, %v13518_v11  ;;  %v13519_v17 = vld [vmem:[#allocation32_spill] sm:$0xff]  ;;  %v13521_v14 = vld [vmem:[#allocation2_spill] sm:$0xff] }
 0x1f4   : > { %v8252_v36 = vpop.f32.mrf.mxu1  ;;  %8521 = vmatpush3.bf16.msra.mxu1 %v4710_v40  ;;  %8458 = vmatprep.mubr.msk.bf16.mxu1 %vm670_vm3, %v13519_v17 }
 0x1f5   : > { %v8287_v5 = vpop.f32.mrf.mxu0  ;;  %v11264_v2 = vadd.f32 %v2937_v55, %v2750_v39  ;;  %v3163_v23 = vadd.f32 %v8252_v36, %v11068_v32  ;;  %8880 = vmatprep.subr.msk.bf16.mxu1 %vm719_vm0, %v11260_v25 }
 0x1f6   : > { %v3034_v0 = vpop.f32.mrf.mxu1 }
 0x1f7   : > { %v3256_v18 = vpop.f32.mrf.mxu0  ;;  %v11271_v37 = vadd.f32 %v8286_v33, %v3163_v23  ;;  %v3161_v6 = vadd.f32 %v3034_v0, %v11075_v44  ;;  %v13522_v0 = vld [vmem:[#allocation39_spill] sm:$0xff] }
 0x1f8   : > { %v8253_v55 = vpop.f32.mrf.mxu1 }
 0x1f9   : > { %v8290_v47 = vpop.f32.mrf.mxu0  ;;  %8493 = vmatmul.mubr.msk.bf16.gmra.mxu0 %vm670_vm3, %v13520_v56  ;;  %v11278_v32 = vadd.f32 %v3253_v22, %v3161_v6  ;;  %v3164_v46 = vadd.f32 %v8253_v55, %v11078_v1  ;;  %v13523_v22 = vld [vmem:[#allocation76_spill] sm:$0xff] }
 0x1fa   : > { %8496 = vmatprep.mubr.msk.bf16.mxu0 %vm670_vm3, %v13521_v14  ;;  %v3037_v39 = vpop.f32.mrf.mxu1 }
 0x1fb   : > { %v3269_v40 = vpop.f32.mrf.mxu0  ;;  %v11281_v36 = vadd.f32 %v8287_v5, %v3164_v46  ;;  %v3162_v33 = vadd.f32 %v3037_v39, %v11083_v29  ;;  %8459 = vmatmul.mubr.msk.bf16.gmra.mxu1 %vm670_vm3, %v13522_v0  ;;  %v13524_v29 = vld [vmem:[#allocation4_spill] sm:$0xff] }
 0x1fc   : > { %v8256_v44 = vpop.f32.mrf.mxu1  ;;  %8462 = vmatprep.mubr.msk.bf16.mxu1 %vm670_vm3, %v13523_v22  ;;  %v13525_v39 = vld [vmem:[#allocation8_spill] sm:$0xff] }
 0x1fd   : > { %v8291_v23 = vpop.f32.mrf.mxu0  ;;  %v11286_v56 = vadd.f32 %v3256_v18, %v3162_v33  ;;  %v3167_v9 = vadd.f32 %v8256_v44, %v11088_v60 }
 0x1fe   : > { %v3050_v1 = vpop.f32.mrf.mxu1 }
 0x1ff   : > { %v3272_v14 = vpop.f32.mrf.mxu0  ;;  %v11291_v6 = vadd.f32 %v8290_v47, %v3167_v9  ;;  %v3165_v5 = vadd.f32 %v3050_v1, %v11095_v13  ;;  %v13526_v1 = vld [vmem:[#allocation6_spill] sm:$0xff] }
 0x200   : > { %v8257_v46 = vpop.f32.mrf.mxu1 }
 0x201   : > { %v8294_v55 = vpop.f32.mrf.mxu0  ;;  %8497 = vmatmul.mubr.msk.bf16.gmra.mxu0 %vm670_vm3, %v13524_v29  ;;  %v11298_v18 = vadd.f32 %v3269_v40, %v3165_v5  ;;  %v3168_v60 = vadd.f32 %v8257_v46, %v11098_v26  ;;  %v13527_v40 = vld [vmem:[#allocation10_spill] sm:$0xff] }
 0x202   : > { %8500 = vmatprep.mubr.msk.bf16.mxu0 %vm670_vm3, %v13525_v39  ;;  %v3053_v44 = vpop.f32.mrf.mxu1 }
 0x203   : > { %v3285_v33 = vpop.f32.mrf.mxu0  ;;  %v11301_v43 = vadd.f32 %v8291_v23, %v3168_v60  ;;  %v3166_v9 = vadd.f32 %v3053_v44, %v11103_v28  ;;  %8463 = vmatmul.mubr.msk.bf16.gmra.mxu1 %vm670_vm3, %v13526_v1  ;;  %v13528_v28 = vld [vmem:[#allocation13_spill] sm:$0xff]  ;;  %v13529_v44 = vld [vmem:[#allocation14_spill] sm:$0xff]  ;;  %v13544_v1 = vld [vmem:[#allocation79_spill] sm:$0xff] }
 0x204   : > { %v8260_v13 = vpop.f32.mrf.mxu1  ;;  %8466 = vmatprep.mubr.msk.bf16.mxu1 %vm670_vm3, %v13527_v40 }
 0x205   : > { %v8295_v47 = vpop.f32.mrf.mxu0  ;;  %v11306_v29 = vadd.f32 %v3272_v14, %v3166_v9  ;;  %v3171_v30 = vadd.f32 %v8260_v13, %v11108_v3 }
 0x206   : > { %v3066_v26 = vpop.f32.mrf.mxu1 }
 0x207   : > { %v3288_v39 = vpop.f32.mrf.mxu0  ;;  %v11311_v5 = vadd.f32 %v8294_v55, %v3171_v30  ;;  %v3169_v23 = vadd.f32 %v3066_v26, %v11115_v53  ;;  %v13530_v26 = vld [vmem:[#allocation7_spill] sm:$0xff] }
 0x208   : > { %v8261_v60 = vpop.f32.mrf.mxu1 }
 0x209   : > { %v8298_v46 = vpop.f32.mrf.mxu0  ;;  %8501 = vmatmul.mubr.msk.bf16.gmra.mxu0 %vm670_vm3, %v13528_v28  ;;  %v11318_v14 = vadd.f32 %v3285_v33, %v3169_v23  ;;  %v3172_v3 = vadd.f32 %v8261_v60, %v11118_v15  ;;  %v13531_v33 = vld [vmem:[#allocation11_spill] sm:$0xff] }
 0x20a   : > { %8504 = vmatprep.mubr.msk.bf16.mxu0 %vm670_vm3, %v13529_v44  ;;  %v3069_v13 = vpop.f32.mrf.mxu1 }
 0x20b   : > { %v3301_v9 = vpop.f32.mrf.mxu0  ;;  %v11321_v38 = vadd.f32 %v8295_v47, %v3172_v3  ;;  %v3170_v30 = vadd.f32 %v3069_v13, %v11123_v20  ;;  %8467 = vmatmul.mubr.msk.bf16.gmra.mxu1 %vm670_vm3, %v13530_v26  ;;  %v13532_v20 = vld [vmem:[#allocation16_spill] sm:$0xff] }
 0x20c   : > { %v8264_v53 = vpop.f32.mrf.mxu1  ;;  %8470 = vmatprep.mubr.msk.bf16.mxu1 %vm670_vm3, %v13531_v33  ;;  %v13533_v13 = vld [vmem:[#allocation20_spill] sm:$0xff] }
 0x20d   : > { %v8299_v55 = vpop.f32.mrf.mxu0  ;;  %v11326_v28 = vadd.f32 %v3288_v39, %v3170_v30  ;;  %v3175_v40 = vadd.f32 %v8264_v53, %v11128_v34 }
 0x20e   : > { %v3082_v15 = vpop.f32.mrf.mxu1 }
 0x20f   : > { %v3304_v44 = vpop.f32.mrf.mxu0  ;;  %v11331_v23 = vadd.f32 %v8298_v46, %v3175_v40  ;;  %v3173_v47 = vadd.f32 %v3082_v15, %v11135_v21  ;;  %v13534_v15 = vld [vmem:[#allocation19_spill] sm:$0xff] }
 0x210   : > { %v8265_v3 = vpop.f32.mrf.mxu1 }
 0x211   : > { %v8302_v60 = vpop.f32.mrf.mxu0  ;;  %8505 = vmatmul.mubr.msk.bf16.gmra.mxu0 %vm670_vm3, %v13532_v20  ;;  %v11338_v39 = vadd.f32 %v3301_v9, %v3173_v47  ;;  %v3176_v34 = vadd.f32 %v8265_v3, %v11138_v7  ;;  %v13535_v9 = vld [vmem:[#allocation22_spill] sm:$0xff] }
 0x212   : > { %8508 = vmatprep.mubr.msk.bf16.mxu0 %vm670_vm3, %v13533_v13  ;;  %v3085_v53 = vpop.f32.mrf.mxu1 }
 0x213   : > { %v3317_v30 = vpop.f32.mrf.mxu0  ;;  %v11341_v33 = vadd.f32 %v8299_v55, %v3176_v34  ;;  %v3174_v40 = vadd.f32 %v3085_v53, %v11143_v8  ;;  %8471 = vmatmul.mubr.msk.bf16.gmra.mxu1 %vm670_vm3, %v13534_v15  ;;  %v13536_v8 = vld [vmem:[#allocation29_spill] sm:$0xff]  ;;  %v4490_v34 = vrot.slane %v13495_v45, 6  ;;  %v4493_v45 = vrot.slane %v10960_v16, 6 }
 0x214   : > { %v8268_v21 = vpop.f32.mrf.mxu1  ;;  %8474 = vmatprep.mubr.msk.bf16.mxu1 %vm670_vm3, %v13535_v9 }
 0x215   : > { %v8303_v46 = vpop.f32.mrf.mxu0  ;;  %v11346_v20 = vadd.f32 %v3304_v44, %v3174_v40  ;;  %v3179_v26 = vadd.f32 %v8268_v21, %v11148_v54  ;;  %v13537_v44 = vld [vmem:[#allocation37_spill] sm:$0xff]  ;;  %v4492_v9 = vrot.slane %v4490_v34, 4 }
 0x216   : > { %v3098_v7 = vpop.f32.mrf.mxu1 }
 0x217   : > { %v3320_v13 = vpop.f32.mrf.mxu0  ;;  %v11351_v47 = vadd.f32 %v8302_v60, %v3179_v26  ;;  %v3177_v55 = vadd.f32 %v3098_v7, %v11160_v59  ;;  %v7378_v60 = vrot.slane %v10954_v62, 10 }
 0x218   : > { %v8269_v53 = vpop.f32.mrf.mxu1 }
 0x219   : > { %v8306_v3 = vpop.f32.mrf.mxu0  ;;  %8509 = vmatmul.mubr.msk.bf16.gmra.mxu0 %vm670_vm3, %v13536_v8  ;;  %v11359_v54 = vadd.f32 %v3317_v30, %v3177_v55  ;;  %v3180_v40 = vadd.f32 %v8269_v53, %v11167_v24  ;;  %v13539_v53 = vld [vmem:[#allocation77_spill] sm:$0xff] }
 0x21a   : > { %8512 = vmatprep.mubr.msk.bf16.mxu0 %vm670_vm3, %v13537_v44  ;;  %v3101_v26 = vpop.f32.mrf.mxu1  ;;  %v13538_v44 = vld [vmem:[#allocation43_spill] sm:$0xff] }
 0x21b   : > { %v3333_v21 = vpop.f32.mrf.mxu0  ;;  %v11363_v59 = vadd.f32 %v8303_v46, %v3180_v40  ;;  %v3178_v7 = vadd.f32 %v3101_v26, %v11174_v19  ;;  %8475 = vmatmul.mubr.msk.bf16.gmra.mxu1 %vm670_vm3, %v13538_v44  ;;  %v11375_v19 = vld [vmem:[%s9011_s23 + $0xd8] sm:$0xf]  ;;  %v4491_v26 = vsel %vm9851_vm13, %v7378_v60, %v4490_v34 }
 0x21c   : > { %v8272_v15 = vpop.f32.mrf.mxu1  ;;  %8478 = vmatprep.mubr.msk.bf16.mxu1 %vm670_vm3, %v13539_v53  ;;  %v13541_v53 = vld [vmem:[#allocation86_spill] sm:$0xff]  ;;  %v13124_v34 = vshll.u32 %v11375_v19, 16 }
 0x21d   : > { %v8307_v8 = vpop.f32.mrf.mxu0  ;;  %v11369_v30 = vadd.f32 %v3320_v13, %v3178_v7  ;;  %v3183_v24 = vadd.f32 %v8272_v15, %v11179_v12  ;;  %v4494_v12 = vsel %vm9851_vm13, %v4492_v9, %v4493_v45  ;;  %v11387_v15 = vld [vmem:[%s9011_s23 + $0xdc] sm:$0xf] }
 0x21e   : > { %v3114_v62 = vpop.f32.mrf.mxu1  ;;  %v11399_v13 = vcombine.low %v4491_v26, %v4494_v12  ;;  %v13126_v9 = vshll.u32 %v11387_v15, 16  ;;  %v13125_v45 = vshrl.u32 %v11387_v15, 16 }
 0x21f   : > { %v3336_v55 = vpop.f32.mrf.mxu0  ;;  %v11377_v46 = vadd.f32 %v8306_v3, %v3183_v24  ;;  %v3181_v16 = vadd.f32 %v3114_v62, %v11190_v42  ;;  %v11395_v62 = vld [vmem:[%s9011_s23 + $0xe0] sm:$0x3] }
 0x220   : > { %v8273_v7 = vpop.f32.mrf.mxu1  ;;  %13542 = vst [vmem:[#allocation18_spill] sm:$0xff] %v11399_v13  ;;  %v5349_v12 = vrot.slane %v13125_v45, 5  ;;  %v13546_v17 = vshll.u32 %v11395_v62, 16 }
 0x221   : > { %v8310_v40 = vpop.f32.mrf.mxu0  ;;  %8513 = vmatmul.mubr.msk.bf16.gmra.mxu0 %vm670_vm3, %v13471_v49  ;;  %v11391_v3 = vadd.f32 %v3333_v21, %v3181_v16  ;;  %v3184_v42 = vadd.f32 %v8273_v7, %v11195_v63  ;;  %v13123_v49 = vshrl.u32 %v11375_v19, 16  ;;  %v5346_v7 = vrot.slane %v13124_v34, 6  ;;  %v13545_v34 = vld [vmem:[#allocation9_spill] sm:$0xff] }
 0x222   : > { %8516 = vmatprep.mubr.msk.bf16.mxu0 %vm670_vm3, %v13541_v53  ;;  %v3117_v60 = vpop.f32.mrf.mxu1  ;;  %v5357_v45 = vrot.slane %v13546_v17, 6 }
 0x223   : > { %v3349_v24 = vpop.f32.mrf.mxu0  ;;  %v11403_v44 = vadd.f32 %v8307_v8, %v3184_v42  ;;  %v3182_v21 = vadd.f32 %v3117_v60, %v11202_v31  ;;  %v5345_v63 = vrot.slane %v13123_v49, 5  ;;  %8479 = vmatmul.mubr.msk.bf16.gmra.mxu1 %vm670_vm3, %v13544_v1  ;;  %v5350_v8 = vrot.slane %v13126_v9, 6 }
 0x224   : > { %v8276_v53 = vpop.f32.mrf.mxu1  ;;  %v5354_v31 = vshrl.u32 %v11395_v62, 16  ;;  %8482 = vmatprep.mubr.msk.bf16.mxu1 %vm670_vm3, %v13545_v34 }
 0x225   : > { %13543 = vst [vmem:[#allocation48_spill] sm:$0xff] %v11403_v44  ;;  %v8311_v16 = vpop.f32.mrf.mxu0  ;;  %v11418_v42 = vadd.f32 %v3336_v55, %v3182_v21  ;;  %v3187_v60 = vadd.f32 %v8276_v53, %v11211_v50  ;;  %v5347_v22 = vor.u32 %v5346_v7, %v5345_v63  ;;  %v5351_v0 = vor.u32 %v5350_v8, %v5349_v12  ;;  %v13547_v55 = vld [vmem:[#allocation21_spill] sm:$0xff] }
 0x226   : > { %v3130_v1 = vpop.f32.mrf.mxu1  ;;  %v5356_v26 = vrot.slane %v5354_v31, 5 }
 0x227   : > { %v3352_v49 = vpop.f32.mrf.mxu0  ;;  %v11425_v11 = vadd.f32 %v8310_v40, %v3187_v60  ;;  %v3185_v9 = vadd.f32 %v3130_v1, %v11220_v27  ;;  %v5348_v53 = vrot.slane %v5347_v22, 4  ;;  %v5353_v21 = vrot.slane %v5351_v0, 4 }
 0x228   : > { %v8277_v50 = vpop.f32.mrf.mxu1  ;;  %v5358_v63 = vor.u32 %v5357_v45, %v5356_v26 }
 0x229   : > { %v8314_v44 = vpop.f32.mrf.mxu0  ;;  %8517 = vmatmul.mubr.msk.bf16.gmra.mxu0 %vm670_vm3, %v11399_v13  ;;  %v11432_v7 = vadd.f32 %v3349_v24, %v3185_v9  ;;  %v3188_v12 = vadd.f32 %v8277_v50, %v11223_v4  ;;  %v5352_v27 = vsel %vm9804_vm10, %v5348_v53, %v5351_v0  ;;  %v13550_v24 = vld [vmem:[#allocation49_spill] sm:$0xff]  ;;  %v13551_v0 = vld [vmem:[#allocation54_spill] sm:$0xff] }
 0x22a   : > { %8556 = vmatprep.mubr.msk.bf16.mxu0 %vm670_vm3, %v13547_v55  ;;  %v3133_v40 = vpop.f32.mrf.mxu1  ;;  %v5359_v1 = vsel %vm9804_vm10, %v5353_v21, %v5358_v63  ;;  %v13552_v63 = vld [vmem:[#allocation28_spill] sm:$0xff] }
 0x22b   : > { %v3365_v17 = vpop.f32.mrf.mxu0  ;;  %v11439_v31 = vadd.f32 %v8311_v16, %v3188_v12  ;;  %v3186_v60 = vadd.f32 %v3133_v40, %v11228_v10  ;;  %v11442_v22 = vcombine.low %v5352_v27, %v5359_v1  ;;  %8483 = vmatmul.mubr.msk.bf16.gmra.mxu1 %vm670_vm3, %v13550_v24  ;;  %v5369_v16 = vsel %vm719_vm0, %v11238_v52, 0  ;;  %v11456_v10 = vld [vmem:[%s12801_s1 + $0x50] sm:$0xf] }
 0x22c   : > { %v8280_v45 = vpop.f32.mrf.mxu1  ;;  %8522 = vmatprep.mubr.msk.bf16.mxu1 %vm670_vm3, %v13551_v0  ;;  %v13553_v12 = vld [vmem:[#allocation36_spill] sm:$0xff] }
 0x22d   : > { %v8315_v55 = vpop.f32.mrf.mxu0  ;;  %13549 = vst [vmem:[#allocation80_spill] sm:$0xff] %v11442_v22  ;;  %v11446_v4 = vadd.f32 %v3352_v49, %v3186_v60  ;;  %v3191_v9 = vadd.f32 %v8280_v45, %v11240_v48 }
 0x22e   : > { %v3146_v50 = vpop.f32.mrf.mxu1 }
 0x22f   : > { %v3368_v26 = vpop.f32.mrf.mxu0  ;;  %v11458_v53 = vadd.f32 %v8314_v44, %v3191_v9  ;;  %v3189_v49 = vadd.f32 %v3146_v50, %v11247_v58  ;;  %v5150_v58 = vsel %vm719_vm0, %v11260_v25, 0 }
 0x230   : > { %v8281_v48 = vpop.f32.mrf.mxu1 }
 0x231   : > { %v8354_v21 = vpop.f32.mrf.mxu0  ;;  %8557 = vmatmul.mubr.msk.bf16.vlgmr.msra.gmra.mxu0 %vm670_vm3, %v13552_v63  ;;  %v11465_v52 = vadd.f32 %v3365_v17, %v3189_v49  ;;  %v3192_v40 = vadd.f32 %v8281_v48, %v11254_v51  ;;  %v11478_v17 = vld [vmem:[%s12801_s1 + $0x4c] sm:$0xf] }
 0x232   : > { %8623 = vmatpush3.bf16.msra.mxu0 %v5369_v16  ;;  %8560 = vmatprep.mubr.msk.bf16.mxu0 %vm670_vm3, %v13553_v12  ;;  %v3149_v44 = vpop.f32.mrf.mxu1  ;;  %v13554_v51 = vld [vmem:[#allocation55_spill] sm:$0xff] }
 0x233   : > { %v3670_v27 = vpop.f32.mrf.mxu0  ;;  %8883 = vmatprep.subr.msk.bf16.mxu0 %vm719_vm0, %v11456_v10  ;;  %v11472_v1 = vadd.f32 %v8315_v55, %v3192_v40  ;;  %v3190_v60 = vadd.f32 %v3149_v44, %v11264_v2  ;;  %8523 = vmatmul.mubr.msk.bf16.vlgmr.msra.gmra.mxu1 %vm670_vm3, %v13554_v51  ;;  %v13555_v55 = vld [vmem:[#allocation56_spill] sm:$0xff]  ;;  %v13556_v40 = vld [vmem:[#allocation42_spill] sm:$0xff] }
 0x234   : > { %v8320_v9 = vpop.f32.mrf.mxu1  ;;  %8589 = vmatpush3.bf16.msra.mxu1 %v5150_v58  ;;  %8526 = vmatprep.mubr.msk.bf16.mxu1 %vm670_vm3, %v13555_v55  ;;  %v13557_v44 = vld [vmem:[#allocation46_spill] sm:$0xff]  ;;  %v13576_v55 = vld [vmem:[#allocation44_spill] sm:$0xff] }
 0x235   : > { %v8355_v45 = vpop.f32.mrf.mxu0  ;;  %v11482_v0 = vadd.f32 %v3368_v26, %v3190_v60  ;;  %v3593_v16 = vadd.f32 %v8320_v9, %v11271_v37  ;;  %8882 = vmatprep.subr.msk.bf16.mxu1 %vm719_vm0, %v11478_v17  ;;  %v13577_v51 = vld [vmem:[#allocation40_spill] sm:$0xff] }
 0x236   : > { %v3464_v2 = vpop.f32.mrf.mxu1 }
 0x237   : > { %v3673_v25 = vpop.f32.mrf.mxu0  ;;  %v11489_v50 = vadd.f32 %v8354_v21, %v3593_v16  ;;  %v3591_v49 = vadd.f32 %v3464_v2, %v11278_v32  ;;  %v13558_v2 = vld [vmem:[#allocation58_spill] sm:$0xff] }
 0x238   : > { %v8321_v26 = vpop.f32.mrf.mxu1 }
 0x239   : > { %v8358_v48 = vpop.f32.mrf.mxu0  ;;  %8561 = vmatmul.mubr.msk.bf16.gmra.mxu0 %vm670_vm3, %v13556_v40  ;;  %v11496_v37 = vadd.f32 %v3670_v27, %v3591_v49  ;;  %v3594_v58 = vadd.f32 %v8321_v26, %v11281_v36  ;;  %v13559_v27 = vld [vmem:[#allocation60_spill] sm:$0xff] }
 0x23a   : > { %8564 = vmatprep.mubr.msk.bf16.mxu0 %vm670_vm3, %v13557_v44  ;;  %v3467_v9 = vpop.f32.mrf.mxu1 }
 0x23b   : > { %v3686_v60 = vpop.f32.mrf.mxu0  ;;  %v11499_v12 = vadd.f32 %v8355_v45, %v3594_v58  ;;  %v3592_v21 = vadd.f32 %v3467_v9, %v11286_v56  ;;  %8527 = vmatmul.mubr.msk.bf16.gmra.mxu1 %vm670_vm3, %v13558_v2  ;;  %v13560_v56 = vld [vmem:[#allocation5_spill] sm:$0xff]  ;;  %v13561_v9 = vld [vmem:[#allocation12_spill] sm:$0xff] }
 0x23c   : > { %v8324_v32 = vpop.f32.mrf.mxu1  ;;  %8530 = vmatprep.mubr.msk.bf16.mxu1 %vm670_vm3, %v13559_v27  ;;  %v13575_v27 = vld [vmem:[#allocation34_spill] sm:$0xff] }
 0x23d   : > { %v8359_v16 = vpop.f32.mrf.mxu0  ;;  %v11504_v40 = vadd.f32 %v3673_v25, %v3592_v21  ;;  %v3597_v63 = vadd.f32 %v8324_v32, %v11291_v6 }
 0x23e   : > { %v3480_v36 = vpop.f32.mrf.mxu1 }
 0x23f   : > { %v3689_v44 = vpop.f32.mrf.mxu0  ;;  %v11509_v49 = vadd.f32 %v8358_v48, %v3597_v63  ;;  %v3595_v45 = vadd.f32 %v3480_v36, %v11298_v18  ;;  %v13562_v36 = vld [vmem:[#allocation61_spill] sm:$0xff] }
 0x240   : > { %v8325_v58 = vpop.f32.mrf.mxu1 }
 0x241   : > { %v8362_v26 = vpop.f32.mrf.mxu0  ;;  %8565 = vmatmul.mubr.msk.bf16.gmra.mxu0 %vm670_vm3, %v13560_v56  ;;  %v11516_v25 = vadd.f32 %v3686_v60, %v3595_v45  ;;  %v3598_v6 = vadd.f32 %v8325_v58, %v11301_v43  ;;  %v13563_v60 = vld [vmem:[#allocation62_spill] sm:$0xff] }
 0x242   : > { %8568 = vmatprep.mubr.msk.bf16.mxu0 %vm670_vm3, %v13561_v9  ;;  %v3483_v32 = vpop.f32.mrf.mxu1 }
 0x243   : > { %v3702_v21 = vpop.f32.mrf.mxu0  ;;  %v11519_v8 = vadd.f32 %v8359_v16, %v3598_v6  ;;  %v3596_v63 = vadd.f32 %v3483_v32, %v11306_v29  ;;  %8531 = vmatmul.mubr.msk.bf16.gmra.mxu1 %vm670_vm3, %v13562_v36  ;;  %v13564_v29 = vld [vmem:[#allocation17_spill] sm:$0xff]  ;;  %v13565_v32 = vld [vmem:[#allocation24_spill] sm:$0xff] }
 0x244   : > { %v8328_v18 = vpop.f32.mrf.mxu1  ;;  %8534 = vmatprep.mubr.msk.bf16.mxu1 %vm670_vm3, %v13563_v60 }
 0x245   : > { %v8363_v48 = vpop.f32.mrf.mxu0  ;;  %v11524_v56 = vadd.f32 %v3689_v44, %v3596_v63  ;;  %v3601_v13 = vadd.f32 %v8328_v18, %v11311_v5 }
 0x246   : > { %v3496_v43 = vpop.f32.mrf.mxu1 }
 0x247   : > { %v3705_v9 = vpop.f32.mrf.mxu0  ;;  %v11529_v45 = vadd.f32 %v8362_v26, %v3601_v13  ;;  %v3599_v16 = vadd.f32 %v3496_v43, %v11318_v14  ;;  %v13566_v43 = vld [vmem:[#allocation64_spill] sm:$0xff] }
 0x248   : > { %v8329_v6 = vpop.f32.mrf.mxu1 }
 0x249   : > { %v8366_v58 = vpop.f32.mrf.mxu0  ;;  %8569 = vmatmul.mubr.msk.bf16.gmra.mxu0 %vm670_vm3, %v13564_v29  ;;  %v11536_v44 = vadd.f32 %v3702_v21, %v3599_v16  ;;  %v3602_v5 = vadd.f32 %v8329_v6, %v11321_v38  ;;  %v13567_v21 = vld [vmem:[#allocation66_spill] sm:$0xff] }
 0x24a   : > { %8572 = vmatprep.mubr.msk.bf16.mxu0 %vm670_vm3, %v13565_v32  ;;  %v3499_v18 = vpop.f32.mrf.mxu1 }
 0x24b   : > { %v3718_v63 = vpop.f32.mrf.mxu0  ;;  %v11539_v60 = vadd.f32 %v8363_v48, %v3602_v5  ;;  %v3600_v13 = vadd.f32 %v3499_v18, %v11326_v28  ;;  %8535 = vmatmul.mubr.msk.bf16.gmra.mxu1 %vm670_vm3, %v13566_v43  ;;  %v13568_v28 = vld [vmem:[#allocation31_spill] sm:$0xff]  ;;  %v13569_v18 = vld [vmem:[#allocation38_spill] sm:$0xff] }
 0x24c   : > { %v8332_v14 = vpop.f32.mrf.mxu1  ;;  %8538 = vmatprep.mubr.msk.bf16.mxu1 %vm670_vm3, %v13567_v21 }
 0x24d   : > { %v8367_v26 = vpop.f32.mrf.mxu0  ;;  %v11544_v29 = vadd.f32 %v3705_v9, %v3600_v13  ;;  %v3605_v36 = vadd.f32 %v8332_v14, %v11331_v23 }
 0x24e   : > { %v3512_v38 = vpop.f32.mrf.mxu1 }
 0x24f   : > { %v3721_v32 = vpop.f32.mrf.mxu0  ;;  %v11549_v16 = vadd.f32 %v8366_v58, %v3605_v36  ;;  %v3603_v48 = vadd.f32 %v3512_v38, %v11338_v39  ;;  %v13570_v38 = vld [vmem:[#allocation67_spill] sm:$0xff] }
 0x250   : > { %v8333_v5 = vpop.f32.mrf.mxu1 }
 0x251   : > { %v8370_v6 = vpop.f32.mrf.mxu0  ;;  %8573 = vmatmul.mubr.msk.bf16.gmra.mxu0 %vm670_vm3, %v13568_v28  ;;  %v11556_v9 = vadd.f32 %v3718_v63, %v3603_v48  ;;  %v3606_v23 = vadd.f32 %v8333_v5, %v11341_v33  ;;  %v13571_v28 = vshrl.u32 %v11375_v19, 16  ;;  %v13573_v48 = vshll.u32 %v11387_v15, 16 }
 0x252   : > { %8576 = vmatprep.mubr.msk.bf16.mxu0 %vm670_vm3, %v13569_v18  ;;  %v3515_v14 = vpop.f32.mrf.mxu1  ;;  %v13572_v18 = vshll.u32 %v11375_v19, 16  ;;  %v13574_v5 = vshrl.u32 %v11387_v15, 16 }
 0x253   : > { %v3734_v13 = vpop.f32.mrf.mxu0  ;;  %v11559_v21 = vadd.f32 %v8367_v26, %v3606_v23  ;;  %v3604_v36 = vadd.f32 %v3515_v14, %v11346_v20  ;;  %8539 = vmatmul.mubr.msk.bf16.gmra.mxu1 %vm670_vm3, %v13570_v38  ;;  %v4908_v43 = vrot.slane %v13571_v28, 4  ;;  %v4917_v33 = vrot.slane %v13573_v48, 5 }
 0x254   : > { %v8336_v39 = vpop.f32.mrf.mxu1  ;;  %v4911_v63 = vrot.slane %v13572_v18, 5  ;;  %v4921_v26 = vrot.slane %v13574_v5, 4  ;;  %8542 = vmatprep.mubr.msk.bf16.mxu1 %vm670_vm3, %v13575_v27 }
 0x255   : > { %v8371_v58 = vpop.f32.mrf.mxu0  ;;  %v11572_v23 = vadd.f32 %v3721_v32, %v3604_v36  ;;  %v3609_v20 = vadd.f32 %v8336_v39, %v11351_v47 }
 0x256   : > { %v3528_v38 = vpop.f32.mrf.mxu1  ;;  %v4912_v32 = vor.u32 %v4911_v63, %v4908_v43  ;;  %v4922_v36 = vor.u32 %v4921_v26, %v4917_v33  ;;  %v13578_v43 = vshll.u32 %v11395_v62, 16 }
 0x257   : > { %v3737_v14 = vpop.f32.mrf.mxu0  ;;  %v11577_v2 = vadd.f32 %v8370_v6, %v3609_v20  ;;  %v3607_v28 = vadd.f32 %v3528_v38, %v11359_v54 }
 0x258   : > { %v8337_v48 = vpop.f32.mrf.mxu1  ;;  %v4923_v22 = vrot.slane %v4922_v36, 4  ;;  %v4927_v63 = vrot.slane %v13578_v43, 5 }
 0x259   : > { %v8374_v18 = vpop.f32.mrf.mxu0  ;;  %8577 = vmatmul.mubr.msk.bf16.gmra.mxu0 %vm670_vm3, %v13576_v55  ;;  %v11584_v47 = vadd.f32 %v3734_v13, %v3607_v28  ;;  %v3610_v39 = vadd.f32 %v8337_v48, %v11363_v59  ;;  %v4913_v55 = vrot.slane %v4912_v32, 4  ;;  %v13579_v28 = vld [vmem:[#allocation70_spill] sm:$0xff] }
 0x25a   : > { %8580 = vmatprep.mubr.msk.bf16.mxu0 %vm670_vm3, %v13510_v61  ;;  %v3531_v27 = vpop.f32.mrf.mxu1 }
 0x25b   : > { %v3750_v5 = vpop.f32.mrf.mxu0  ;;  %v11587_v6 = vadd.f32 %v8371_v58, %v3610_v39  ;;  %v3608_v54 = vadd.f32 %v3531_v27, %v11369_v30  ;;  %8543 = vmatmul.mubr.msk.bf16.gmra.mxu1 %vm670_vm3, %v13577_v51 }
 0x25c   : > { %v8340_v20 = vpop.f32.mrf.mxu1  ;;  %8546 = vmatprep.mubr.msk.bf16.mxu1 %vm670_vm3, %v13579_v28 }
 0x25d   : > { %v8375_v38 = vpop.f32.mrf.mxu0  ;;  %v11594_v13 = vadd.f32 %v3737_v14, %v3608_v54  ;;  %v3613_v59 = vadd.f32 %v8340_v20, %v11377_v46  ;;  %v4918_v46 = vsel %vm9051_vm4, %v4913_v55, %v4917_v33  ;;  %v4928_v14 = vsel %vm9051_vm4, %v4923_v22, %v4927_v63 }
 0x25e   : > { %v3544_v58 = vpop.f32.mrf.mxu1 }
 0x25f   : > { %v3753_v26 = vpop.f32.mrf.mxu0  ;;  %v11599_v30 = vadd.f32 %v8374_v18, %v3613_v59  ;;  %v3611_v27 = vadd.f32 %v3544_v58, %v11391_v3  ;;  %v13580_v18 = vld [vmem:[#allocation48_spill] sm:$0xff]  ;;  %v11616_v58 = vcombine.low %v4918_v46, %v4928_v14  ;;  %v13584_v46 = vld [vmem:[#allocation25_spill] sm:$0xff] }
 0x260   : > { %v8341_v32 = vpop.f32.mrf.mxu1 }
 0x261   : > { %v8378_v48 = vpop.f32.mrf.mxu0  ;;  %8581 = vmatmul.mubr.msk.bf16.gmra.mxu0 %vm670_vm3, %v13511_v57  ;;  %v11610_v36 = vadd.f32 %v3750_v5, %v3611_v27  ;;  %v3614_v39 = vadd.f32 %v8341_v32, %v13580_v18  ;;  %13581 = vst [vmem:[#allocation83_spill] sm:$0xff] %v11616_v58  ;;  %v13582_v57 = vld [vmem:[#allocation51_spill] sm:$0xff]  ;;  %v13583_v5 = vld [vmem:[#allocation84_spill] sm:$0xff] }
 0x262   : > { %8584 = vmatprep.mubr.msk.bf16.mxu0 %vm670_vm3, %v11216_v35  ;;  %v3547_v3 = vpop.f32.mrf.mxu1 }
 0x263   : > { %v3766_v54 = vpop.f32.mrf.mxu0  ;;  %v11613_v20 = vadd.f32 %v8375_v38, %v3614_v39  ;;  %v3612_v43 = vadd.f32 %v3547_v3, %v11418_v42  ;;  %8547 = vmatmul.mubr.msk.bf16.gmra.mxu1 %vm670_vm3, %v13582_v57 }
 0x264   : > { %v8344_v35 = vpop.f32.mrf.mxu1  ;;  %8550 = vmatprep.mubr.msk.bf16.mxu1 %vm670_vm3, %v13583_v5 }
 0x265   : > { %v8379_v59 = vpop.f32.mrf.mxu0  ;;  %v11620_v55 = vadd.f32 %v3753_v26, %v3612_v43  ;;  %v3617_v22 = vadd.f32 %v8344_v35, %v11425_v11  ;;  %v11632_v26 = vcombine.low %v11375_v19, %v11387_v15 }
 0x266   : > { %v3560_v63 = vpop.f32.mrf.mxu1 }
 0x267   : > { %v3769_v33 = vpop.f32.mrf.mxu0  ;;  %v11625_v38 = vadd.f32 %v8378_v48, %v3617_v22  ;;  %v3615_v42 = vadd.f32 %v3560_v63, %v11432_v7 }
 0x268   : > { %v8345_v32 = vpop.f32.mrf.mxu1 }
 0x269   : > { %v8382_v27 = vpop.f32.mrf.mxu0  ;;  %8585 = vmatmul.mubr.msk.bf16.gmra.mxu0 %vm670_vm3, %v11616_v58  ;;  %v11636_v35 = vadd.f32 %v3766_v54, %v3615_v42  ;;  %v3618_v11 = vadd.f32 %v8345_v32, %v11439_v31  ;;  %v13585_v54 = vld [vmem:[#allocation52_spill] sm:$0xff]  ;;  %v5786_v31 = vsel %vm719_vm0, %v11456_v10, 0 }
 0x26a   : > { %8624 = vmatprep.mubr.msk.bf16.mxu0 %vm670_vm3, %v13584_v46  ;;  %v3563_v14 = vpop.f32.mrf.mxu1  ;;  %v13586_v46 = vld [vmem:[#allocation32_spill] sm:$0xff] }
 0x26b   : > { %v3782_v48 = vpop.f32.mrf.mxu0  ;;  %v11639_v18 = vadd.f32 %v8379_v59, %v3618_v11  ;;  %v3616_v7 = vadd.f32 %v3563_v14, %v11446_v4  ;;  %8551 = vmatmul.mubr.msk.bf16.gmra.mxu1 %vm670_vm3, %v11632_v26  ;;  %v11654_v4 = vld [vmem:[%s12801_s1 + $0x58] sm:$0xf]  ;;  %v13587_v11 = vld [vmem:[#allocation39_spill] sm:$0xff] }
 0x26c   : > { %v8348_v3 = vpop.f32.mrf.mxu1  ;;  %8590 = vmatprep.mubr.msk.bf16.mxu1 %vm670_vm3, %v13585_v54 }
 0x26d   : > { %v8383_v39 = vpop.f32.mrf.mxu0  ;;  %v11644_v43 = vadd.f32 %v3769_v33, %v3616_v7  ;;  %v3621_v22 = vadd.f32 %v8348_v3, %v11458_v53 }
 0x26e   : > { %v3576_v59 = vpop.f32.mrf.mxu1 }
 0x26f   : > { %v3785_v63 = vpop.f32.mrf.mxu0  ;;  %v11656_v42 = vadd.f32 %v8382_v27, %v3621_v22  ;;  %v3619_v33 = vadd.f32 %v3576_v59, %v11465_v52  ;;  %v5580_v52 = vsel %vm719_vm0, %v11478_v17, 0 }
 0x270   : > { %v8349_v53 = vpop.f32.mrf.mxu1 }
 0x271   : > { %v8422_v32 = vpop.f32.mrf.mxu0  ;;  %8625 = vmatmul.mubr.msk.bf16.vlgmr.msra.gmra.mxu0 %vm670_vm3, %v13586_v46  ;;  %v11663_v10 = vadd.f32 %v3782_v48, %v3619_v33  ;;  %v3622_v14 = vadd.f32 %v8349_v53, %v11472_v1  ;;  %v11676_v48 = vld [vmem:[%s12801_s1 + $0x54] sm:$0xf]  ;;  %v13588_v1 = vld [vmem:[#allocation53_spill] sm:$0xff] }
 0x272   : > { %8691 = vmatpush3.bf16.msra.mxu0 %v5786_v31  ;;  %8628 = vmatprep.mubr.msk.bf16.mxu0 %vm670_vm3, %v13587_v11  ;;  %v3579_v27 = vpop.f32.mrf.mxu1  ;;  %v13590_v11 = vld [vmem:[#allocation76_spill] sm:$0xff] }
 0x273   : > { %v4110_v7 = vpop.f32.mrf.mxu0  ;;  %8885 = vmatprep.subr.msk.bf16.mxu0 %vm719_vm0, %v11654_v4  ;;  %v11670_v3 = vadd.f32 %v8383_v39, %v3622_v14  ;;  %v3620_v22 = vadd.f32 %v3579_v27, %v11482_v0  ;;  %8591 = vmatmul.mubr.msk.bf16.vlgmr.msra.gmra.mxu1 %vm670_vm3, %v13588_v1  ;;  %v13589_v39 = vld [vmem:[#allocation57_spill] sm:$0xff] }
 0x274   : > { %v8388_v31 = vpop.f32.mrf.mxu1  ;;  %8657 = vmatpush3.bf16.msra.mxu1 %v5580_v52  ;;  %8594 = vmatprep.mubr.msk.bf16.mxu1 %vm670_vm3, %v13589_v39 }
 0x275   : > { %v8423_v54 = vpop.f32.mrf.mxu0  ;;  %v11680_v59 = vadd.f32 %v3785_v63, %v3620_v22  ;;  %v4027_v33 = vadd.f32 %v8388_v31, %v11489_v50  ;;  %8884 = vmatprep.subr.msk.bf16.mxu1 %vm719_vm0, %v11676_v48  ;;  %v13591_v22 = vld [vmem:[#allocation6_spill] sm:$0xff] }
 0x276   : > { %v3898_v0 = vpop.f32.mrf.mxu1 }
 0x277   : > { %v4113_v17 = vpop.f32.mrf.mxu0  ;;  %v11687_v53 = vadd.f32 %v8422_v32, %v4027_v33  ;;  %v4025_v14 = vadd.f32 %v3898_v0, %v11496_v37  ;;  %v13592_v0 = vld [vmem:[#allocation59_spill] sm:$0xff] }
 0x278   : > { %v8389_v63 = vpop.f32.mrf.mxu1 }
 0x279   : > { %v8426_v27 = vpop.f32.mrf.mxu0  ;;  %8629 = vmatmul.mubr.msk.bf16.gmra.mxu0 %vm670_vm3, %v13590_v11  ;;  %v11694_v50 = vadd.f32 %v4110_v7, %v4025_v14  ;;  %v4028_v52 = vadd.f32 %v8389_v63, %v11499_v12  ;;  %v13593_v7 = vld [vmem:[#allocation63_spill] sm:$0xff] }
 0x27a   : > { %8632 = vmatprep.mubr.msk.bf16.mxu0 %vm670_vm3, %v13591_v22  ;;  %v3901_v46 = vpop.f32.mrf.mxu1 }
 0x27b   : > { %v4126_v31 = vpop.f32.mrf.mxu0  ;;  %v11697_v41 = vadd.f32 %v8423_v54, %v4028_v52  ;;  %v4026_v32 = vadd.f32 %v3901_v46, %v11504_v40  ;;  %8595 = vmatmul.mubr.msk.bf16.gmra.mxu1 %vm670_vm3, %v13592_v0  ;;  %v13594_v40 = vld [vmem:[#allocation10_spill] sm:$0xff]  ;;  %v13595_v52 = vld [vmem:[#allocation7_spill] sm:$0xff] }
 0x27c   : > { %v8392_v37 = vpop.f32.mrf.mxu1  ;;  %8598 = vmatprep.mubr.msk.bf16.mxu1 %vm670_vm3, %v13593_v7 }
 0x27d   : > { %v8427_v33 = vpop.f32.mrf.mxu0  ;;  %v11702_v11 = vadd.f32 %v4113_v17, %v4026_v32  ;;  %v4031_v58 = vadd.f32 %v8392_v37, %v11509_v49 }
 0x27e   : > { %v3914_v12 = vpop.f32.mrf.mxu1 }
 0x27f   : > { %v4129_v22 = vpop.f32.mrf.mxu0  ;;  %v11707_v14 = vadd.f32 %v8426_v27, %v4031_v58  ;;  %v4029_v54 = vadd.f32 %v3914_v12, %v11516_v25  ;;  %v13596_v12 = vld [vmem:[#allocation65_spill] sm:$0xff] }
 0x280   : > { %v8393_v46 = vpop.f32.mrf.mxu1 }
 0x281   : > { %v8430_v63 = vpop.f32.mrf.mxu0  ;;  %8633 = vmatmul.mubr.msk.bf16.gmra.mxu0 %vm670_vm3, %v13594_v40  ;;  %v11714_v17 = vadd.f32 %v4126_v31, %v4029_v54  ;;  %v4032_v49 = vadd.f32 %v8393_v46, %v11519_v8  ;;  %v13597_v31 = vld [vmem:[#allocation26_spill] sm:$0xff] }
 0x282   : > { %8636 = vmatprep.mubr.msk.bf16.mxu0 %vm670_vm3, %v13595_v52  ;;  %v3917_v37 = vpop.f32.mrf.mxu1 }
 0x283   : > { %v4142_v32 = vpop.f32.mrf.mxu0  ;;  %v11717_v61 = vadd.f32 %v8427_v33, %v4032_v49  ;;  %v4030_v58 = vadd.f32 %v3917_v37, %v11524_v56  ;;  %8599 = vmatmul.mubr.msk.bf16.gmra.mxu1 %vm670_vm3, %v13596_v12  ;;  %v13598_v56 = vld [vmem:[#allocation11_spill] sm:$0xff] }
 0x284   : > { %v8396_v25 = vpop.f32.mrf.mxu1  ;;  %8602 = vmatprep.mubr.msk.bf16.mxu1 %vm670_vm3, %v13597_v31  ;;  %v13599_v37 = vld [vmem:[#allocation19_spill] sm:$0xff] }
 0x285   : > { %v8431_v27 = vpop.f32.mrf.mxu0  ;;  %v11722_v40 = vadd.f32 %v4129_v22, %v4030_v58  ;;  %v4035_v7 = vadd.f32 %v8396_v25, %v11529_v45 }
 0x286   : > { %v3930_v8 = vpop.f32.mrf.mxu1 }
 0x287   : > { %v4145_v52 = vpop.f32.mrf.mxu0  ;;  %v11727_v54 = vadd.f32 %v8430_v63, %v4035_v7  ;;  %v4033_v33 = vadd.f32 %v3930_v8, %v11536_v44  ;;  %v13600_v8 = vld [vmem:[#allocation68_spill] sm:$0xff] }
 0x288   : > { %v8397_v49 = vpop.f32.mrf.mxu1 }
 0x289   : > { %v8434_v46 = vpop.f32.mrf.mxu0  ;;  %8637 = vmatmul.mubr.msk.bf16.gmra.mxu0 %vm670_vm3, %v13598_v56  ;;  %v11734_v22 = vadd.f32 %v4142_v32, %v4033_v33  ;;  %v4036_v45 = vadd.f32 %v8397_v49, %v11539_v60  ;;  %v13601_v32 = vld [vmem:[#allocation41_spill] sm:$0xff] }
 0x28a   : > { %8640 = vmatprep.mubr.msk.bf16.mxu0 %vm670_vm3, %v13599_v37  ;;  %v3933_v25 = vpop.f32.mrf.mxu1 }
 0x28b   : > { %v4158_v58 = vpop.f32.mrf.mxu0  ;;  %v11737_v31 = vadd.f32 %v8431_v27, %v4036_v45  ;;  %v4034_v7 = vadd.f32 %v3933_v25, %v11544_v29  ;;  %8603 = vmatmul.mubr.msk.bf16.gmra.mxu1 %vm670_vm3, %v13600_v8  ;;  %v13602_v29 = vld [vmem:[#allocation22_spill] sm:$0xff]  ;;  %v13603_v25 = vld [vmem:[#allocation43_spill] sm:$0xff] }
 0x28c   : > { %v8400_v44 = vpop.f32.mrf.mxu1  ;;  %8606 = vmatprep.mubr.msk.bf16.mxu1 %vm670_vm3, %v13601_v32 }
 0x28d   : > { %v8435_v63 = vpop.f32.mrf.mxu0  ;;  %v11742_v56 = vadd.f32 %v4145_v52, %v4034_v7  ;;  %v4039_v12 = vadd.f32 %v8400_v44, %v11549_v16 }
 0x28e   : > { %v3946_v60 = vpop.f32.mrf.mxu1 }
 0x28f   : > { %v4161_v37 = vpop.f32.mrf.mxu0  ;;  %v11747_v33 = vadd.f32 %v8434_v46, %v4039_v12  ;;  %v4037_v27 = vadd.f32 %v3946_v60, %v11556_v9  ;;  %v13604_v60 = vld [vmem:[#allocation69_spill] sm:$0xff] }
 0x290   : > { %v8401_v45 = vpop.f32.mrf.mxu1 }
 0x291   : > { %v8438_v49 = vpop.f32.mrf.mxu0  ;;  %8641 = vmatmul.mubr.msk.bf16.gmra.mxu0 %vm670_vm3, %v13602_v29  ;;  %v11754_v52 = vadd.f32 %v4158_v58, %v4037_v27  ;;  %v4040_v16 = vadd.f32 %v8401_v45, %v11559_v21  ;;  %v13605_v58 = vld [vmem:[#allocation71_spill] sm:$0xff] }
 0x292   : > { %8644 = vmatprep.mubr.msk.bf16.mxu0 %vm670_vm3, %v13603_v25  ;;  %v3949_v44 = vpop.f32.mrf.mxu1 }
 0x293   : > { %v4174_v7 = vpop.f32.mrf.mxu0  ;;  %v11757_v32 = vadd.f32 %v8435_v63, %v4040_v16  ;;  %v4038_v12 = vadd.f32 %v3949_v44, %v11572_v23  ;;  %8607 = vmatmul.mubr.msk.bf16.gmra.mxu1 %vm670_vm3, %v13604_v60  ;;  %v13606_v23 = vld [vmem:[#allocation77_spill] sm:$0xff]  ;;  %v13607_v44 = vld [vmem:[#allocation79_spill] sm:$0xff] }
 0x294   : > { %v8404_v9 = vpop.f32.mrf.mxu1  ;;  %8610 = vmatprep.mubr.msk.bf16.mxu1 %vm670_vm3, %v13605_v58 }
 0x295   : > { %v8439_v46 = vpop.f32.mrf.mxu0  ;;  %v11762_v29 = vadd.f32 %v4161_v37, %v4038_v12  ;;  %v4043_v8 = vadd.f32 %v8404_v9, %v11577_v2 }
 0x296   : > { %v3962_v21 = vpop.f32.mrf.mxu1 }
 0x297   : > { %v4177_v25 = vpop.f32.mrf.mxu0  ;;  %v11767_v27 = vadd.f32 %v8438_v49, %v4043_v8  ;;  %v4041_v63 = vadd.f32 %v3962_v21, %v11584_v47  ;;  %v13608_v21 = vld [vmem:[#allocation72_spill] sm:$0xff] }
 0x298   : > { %v8405_v16 = vpop.f32.mrf.mxu1 }
 0x299   : > { %v8442_v45 = vpop.f32.mrf.mxu0  ;;  %8645 = vmatmul.mubr.msk.bf16.gmra.mxu0 %vm670_vm3, %v13606_v23  ;;  %v11774_v37 = vadd.f32 %v4174_v7, %v4041_v63  ;;  %v4044_v2 = vadd.f32 %v8405_v16, %v11587_v6  ;;  %v13609_v7 = vld [vmem:[#allocation73_spill] sm:$0xff]  ;;  %v5136_v6 = vrot.slane %v11387_v15, 5 }
 0x29a   : > { %8648 = vmatprep.mubr.msk.bf16.mxu0 %vm670_vm3, %v13607_v44  ;;  %v3965_v9 = vpop.f32.mrf.mxu1 }
 0x29b   : > { %v4190_v12 = vpop.f32.mrf.mxu0  ;;  %v11777_v58 = vadd.f32 %v8439_v46, %v4044_v2  ;;  %v4042_v8 = vadd.f32 %v3965_v9, %v11594_v13  ;;  %8611 = vmatmul.mubr.msk.bf16.gmra.mxu1 %vm670_vm3, %v13608_v21 }
 0x29c   : > { %v8408_v47 = vpop.f32.mrf.mxu1  ;;  %8614 = vmatprep.mubr.msk.bf16.mxu1 %vm670_vm3, %v13609_v7  ;;  %v13610_v7 = vld [vmem:[#allocation82_spill] sm:$0xff] }
 0x29d   : > { %v8443_v49 = vpop.f32.mrf.mxu0  ;;  %v11782_v23 = vadd.f32 %v4177_v25, %v4042_v8  ;;  %v4047_v60 = vadd.f32 %v8408_v47, %v11599_v30  ;;  %v7433_v30 = vrot.slane %v11375_v19, 9  ;;  %v5138_v8 = vrot.slane %v5136_v6, 4 }
 0x29e   : > { %v3978_v63 = vpop.f32.mrf.mxu1 }
 0x29f   : > { %v4193_v44 = vpop.f32.mrf.mxu0  ;;  %v11788_v46 = vadd.f32 %v8442_v45, %v4047_v60  ;;  %v4045_v13 = vadd.f32 %v3978_v63, %v11610_v36  ;;  %v5139_v60 = vrot.slane %v11395_v62, 5  ;;  %v5137_v62 = vsel %vm9530_vm7, %v7433_v30, %v5136_v6 }
 0x2a0   : > { %v8409_v2 = vpop.f32.mrf.mxu1 }
 0x2a1   : > { %v8446_v16 = vpop.f32.mrf.mxu0  ;;  %8649 = vmatmul.mubr.msk.bf16.gmra.mxu0 %vm670_vm3, %v13545_v34  ;;  %v11796_v25 = vadd.f32 %v4190_v12, %v4045_v13  ;;  %v4048_v9 = vadd.f32 %v8409_v2, %v11613_v20  ;;  %v13611_v20 = vld [vmem:[#allocation15_spill] sm:$0xff] }
 0x2a2   : > { %8652 = vmatprep.mubr.msk.bf16.mxu0 %vm670_vm3, %v13550_v24  ;;  %v3981_v45 = vpop.f32.mrf.mxu1 }
 0x2a3   : > { %v4206_v15 = vpop.f32.mrf.mxu0  ;;  %v11800_v36 = vadd.f32 %v8443_v49, %v4048_v9  ;;  %v4046_v47 = vadd.f32 %v3981_v45, %v11620_v55  ;;  %8615 = vmatmul.mubr.msk.bf16.gmra.mxu1 %vm670_vm3, %v13610_v7  ;;  %v5140_v49 = vsel %vm9530_vm7, %v5138_v8, %v5139_v60 }
 0x2a4   : > { %v8412_v34 = vpop.f32.mrf.mxu1  ;;  %8618 = vmatprep.mubr.msk.bf16.mxu1 %vm670_vm3, %v13611_v20 }
 0x2a5   : > { %v8447_v63 = vpop.f32.mrf.mxu0  ;;  %v11805_v24 = vadd.f32 %v4193_v44, %v4046_v47  ;;  %v4051_v19 = vadd.f32 %v8412_v34, %v11625_v38  ;;  %v13613_v44 = vld [vmem:[#allocation80_spill] sm:$0xff]  ;;  %v11819_v38 = vcombine.low %v5137_v62, %v5140_v49  ;;  %v13615_v47 = vld [vmem:[#allocation55_spill] sm:$0xff] }
 0x2a6   : > { %v3994_v55 = vpop.f32.mrf.mxu1 }
 0x2a7   : > { %v4209_v12 = vpop.f32.mrf.mxu0  ;;  %v11814_v2 = vadd.f32 %v8446_v16, %v4051_v19  ;;  %v4049_v9 = vadd.f32 %v3994_v55, %v11636_v35  ;;  %13614 = vst [vmem:[#allocation85_spill] sm:$0xff] %v11819_v38 }
 0x2a8   : > { %v8413_v34 = vpop.f32.mrf.mxu1 }
 0x2a9   : > { %v8450_v45 = vpop.f32.mrf.mxu0  ;;  %8653 = vmatmul.mubr.msk.bf16.gmra.mxu0 %vm670_vm3, %v13613_v44  ;;  %v11823_v20 = vadd.f32 %v4206_v15, %v4049_v9  ;;  %v4052_v6 = vadd.f32 %v8413_v34, %v11639_v18  ;;  %v13616_v15 = vld [vmem:[#allocation30_spill] sm:$0xff]  ;;  %v6226_v18 = vsel %vm719_vm0, %v11654_v4, 0 }
 0x2aa   : > { %8692 = vmatprep.mubr.msk.bf16.mxu0 %vm670_vm3, %v13615_v47  ;;  %v3997_v8 = vpop.f32.mrf.mxu1  ;;  %v13617_v47 = vld [vmem:[#allocation56_spill] sm:$0xff] }
 0x2ab   : > { %v4222_v30 = vpop.f32.mrf.mxu0  ;;  %v11826_v16 = vadd.f32 %v8447_v63, %v4052_v6  ;;  %v4050_v35 = vadd.f32 %v3997_v8, %v11644_v43  ;;  %8619 = vmatmul.mubr.msk.bf16.gmra.mxu1 %vm670_vm3, %v11819_v38  ;;  %v11841_v43 = vld [vmem:[%s12801_s1 + $0x60] sm:$0xf] }
 0x2ac   : > { %v8416_v19 = vpop.f32.mrf.mxu1  ;;  %8658 = vmatprep.mubr.msk.bf16.mxu1 %vm670_vm3, %v13616_v15  ;;  %v13618_v6 = vld [vmem:[#allocation58_spill] sm:$0xff] }
 0x2ad   : > { %v8451_v60 = vpop.f32.mrf.mxu0  ;;  %v11831_v62 = vadd.f32 %v4209_v12, %v4050_v35  ;;  %v4055_v49 = vadd.f32 %v8416_v19, %v11656_v42  ;;  %v13643_v38 = vld [vmem:[#allocation86_spill] sm:$0xff] }
 0x2ae   : > { %v4010_v63 = vpop.f32.mrf.mxu1 }
 0x2af   : > { %v4225_v55 = vpop.f32.mrf.mxu0  ;;  %v11843_v9 = vadd.f32 %v8450_v45, %v4055_v49  ;;  %v4053_v12 = vadd.f32 %v4010_v63, %v11663_v10  ;;  %v6014_v10 = vsel %vm719_vm0, %v11676_v48, 0 }
 0x2b0   : > { %v8417_v42 = vpop.f32.mrf.mxu1 }
 0x2b1   : > { %v8490_v34 = vpop.f32.mrf.mxu0  ;;  %8693 = vmatmul.mubr.msk.bf16.vlgmr.msra.gmra.mxu0 %vm670_vm3, %v13617_v47  ;;  %v11850_v4 = vadd.f32 %v4222_v30, %v4053_v12  ;;  %v4056_v8 = vadd.f32 %v8417_v42, %v11670_v3  ;;  %v11863_v30 = vld [vmem:[%s12801_s1 + $0x5c] sm:$0xf] }
 0x2b2   : > { %8759 = vmatpush3.bf16.msra.mxu0 %v6226_v18  ;;  %8696 = vmatprep.mubr.msk.bf16.mxu0 %vm670_vm3, %v13618_v6  ;;  %v4013_v45 = vpop.f32.mrf.mxu1  ;;  %v13619_v3 = vld [vmem:[#allocation33_spill] sm:$0xff] }
 0x2b3   : > { %v4540_v35 = vpop.f32.mrf.mxu0  ;;  %8887 = vmatprep.subr.msk.bf16.mxu0 %vm719_vm0, %v11841_v43  ;;  %v11857_v19 = vadd.f32 %v8451_v60, %v4056_v8  ;;  %v4054_v49 = vadd.f32 %v4013_v45, %v11680_v59  ;;  %8659 = vmatmul.mubr.msk.bf16.vlgmr.msra.gmra.mxu1 %vm670_vm3, %v13619_v3  ;;  %v13620_v60 = vld [vmem:[#allocation75_spill] sm:$0xff]  ;;  %v13621_v8 = vld [vmem:[#allocation60_spill] sm:$0xff]  ;;  %v13622_v45 = vld [vmem:[#allocation61_spill] sm:$0xff] }
 0x2b4   : > { %v8456_v18 = vpop.f32.mrf.mxu1  ;;  %8725 = vmatpush3.bf16.msra.mxu1 %v6014_v10  ;;  %8662 = vmatprep.mubr.msk.bf16.mxu1 %vm670_vm3, %v13620_v60 }
 0x2b5   : > { %v8491_v15 = vpop.f32.mrf.mxu0  ;;  %v11867_v63 = vadd.f32 %v4225_v55, %v4054_v49  ;;  %v4458_v12 = vadd.f32 %v8456_v18, %v11687_v53  ;;  %8886 = vmatprep.subr.msk.bf16.mxu1 %vm719_vm0, %v11863_v30 }
 0x2b6   : > { %v4329_v59 = vpop.f32.mrf.mxu1 }
 0x2b7   : > { %v4543_v48 = vpop.f32.mrf.mxu0  ;;  %v11874_v47 = vadd.f32 %v8490_v34, %v4458_v12  ;;  %v4456_v42 = vadd.f32 %v4329_v59, %v11694_v50  ;;  %v13623_v59 = vld [vmem:[#allocation2_spill] sm:$0xff] }
 0x2b8   : > { %v8457_v55 = vpop.f32.mrf.mxu1 }
 0x2b9   : > { %v8494_v6 = vpop.f32.mrf.mxu0  ;;  %8697 = vmatmul.mubr.msk.bf16.gmra.mxu0 %vm670_vm3, %v13621_v8  ;;  %v11881_v53 = vadd.f32 %v4540_v35, %v4456_v42  ;;  %v4459_v10 = vadd.f32 %v8457_v55, %v11697_v41  ;;  %v13624_v35 = vld [vmem:[#allocation4_spill] sm:$0xff] }
 0x2ba   : > { %8700 = vmatprep.mubr.msk.bf16.mxu0 %vm670_vm3, %v13622_v45  ;;  %v4332_v18 = vpop.f32.mrf.mxu1 }
 0x2bb   : > { %v4556_v49 = vpop.f32.mrf.mxu0  ;;  %v11884_v44 = vadd.f32 %v8491_v15, %v4459_v10  ;;  %v4457_v34 = vadd.f32 %v4332_v18, %v11702_v11  ;;  %8663 = vmatmul.mubr.msk.bf16.gmra.mxu1 %vm670_vm3, %v13623_v59  ;;  %v13625_v11 = vld [vmem:[#allocation62_spill] sm:$0xff]  ;;  %v13626_v18 = vld [vmem:[#allocation64_spill] sm:$0xff] }
 0x2bc   : > { %v8460_v50 = vpop.f32.mrf.mxu1  ;;  %8666 = vmatprep.mubr.msk.bf16.mxu1 %vm670_vm3, %v13624_v35 }
 0x2bd   : > { %v8495_v12 = vpop.f32.mrf.mxu0  ;;  %v11889_v8 = vadd.f32 %v4543_v48, %v4457_v34  ;;  %v4462_v60 = vadd.f32 %v8460_v50, %v11707_v14 }
 0x2be   : > { %v4345_v41 = vpop.f32.mrf.mxu1 }
 0x2bf   : > { %v4559_v45 = vpop.f32.mrf.mxu0  ;;  %v11894_v42 = vadd.f32 %v8494_v6, %v4462_v60  ;;  %v4460_v15 = vadd.f32 %v4345_v41, %v11714_v17  ;;  %v13627_v41 = vld [vmem:[#allocation8_spill] sm:$0xff] }
 0x2c0   : > { %v8461_v10 = vpop.f32.mrf.mxu1 }
 0x2c1   : > { %v8498_v55 = vpop.f32.mrf.mxu0  ;;  %8701 = vmatmul.mubr.msk.bf16.gmra.mxu0 %vm670_vm3, %v13625_v11  ;;  %v11901_v48 = vadd.f32 %v4556_v49, %v4460_v15  ;;  %v4463_v14 = vadd.f32 %v8461_v10, %v11717_v61  ;;  %v13628_v49 = vld [vmem:[#allocation13_spill] sm:$0xff] }
 0x2c2   : > { %8704 = vmatprep.mubr.msk.bf16.mxu0 %vm670_vm3, %v13626_v18  ;;  %v4348_v50 = vpop.f32.mrf.mxu1 }
 0x2c3   : > { %v4572_v34 = vpop.f32.mrf.mxu0  ;;  %v11904_v35 = vadd.f32 %v8495_v12, %v4463_v14  ;;  %v4461_v60 = vadd.f32 %v4348_v50, %v11722_v40  ;;  %8667 = vmatmul.mubr.msk.bf16.gmra.mxu1 %vm670_vm3, %v13627_v41  ;;  %v13629_v40 = vld [vmem:[#allocation66_spill] sm:$0xff]  ;;  %v13630_v50 = vld [vmem:[#allocation67_spill] sm:$0xff] }
 0x2c4   : > { %v8464_v17 = vpop.f32.mrf.mxu1  ;;  %8670 = vmatprep.mubr.msk.bf16.mxu1 %vm670_vm3, %v13628_v49 }
 0x2c5   : > { %v8499_v6 = vpop.f32.mrf.mxu0  ;;  %v11909_v11 = vadd.f32 %v4559_v45, %v4461_v60  ;;  %v4466_v59 = vadd.f32 %v8464_v17, %v11727_v54 }
 0x2c6   : > { %v4361_v61 = vpop.f32.mrf.mxu1 }
 0x2c7   : > { %v4575_v18 = vpop.f32.mrf.mxu0  ;;  %v11914_v15 = vadd.f32 %v8498_v55, %v4466_v59  ;;  %v4464_v12 = vadd.f32 %v4361_v61, %v11734_v22  ;;  %v13631_v61 = vld [vmem:[#allocation14_spill] sm:$0xff] }
 0x2c8   : > { %v8465_v14 = vpop.f32.mrf.mxu1 }
 0x2c9   : > { %v8502_v10 = vpop.f32.mrf.mxu0  ;;  %8705 = vmatmul.mubr.msk.bf16.gmra.mxu0 %vm670_vm3, %v13629_v40  ;;  %v11921_v45 = vadd.f32 %v4572_v34, %v4464_v12  ;;  %v4467_v54 = vadd.f32 %v8465_v14, %v11737_v31  ;;  %v13632_v34 = vld [vmem:[#allocation16_spill] sm:$0xff] }
 0x2ca   : > { %8708 = vmatprep.mubr.msk.bf16.mxu0 %vm670_vm3, %v13630_v50  ;;  %v4364_v17 = vpop.f32.mrf.mxu1 }
 0x2cb   : > { %v4588_v60 = vpop.f32.mrf.mxu0  ;;  %v11924_v49 = vadd.f32 %v8499_v6, %v4467_v54  ;;  %v4465_v59 = vadd.f32 %v4364_v17, %v11742_v56  ;;  %8671 = vmatmul.mubr.msk.bf16.gmra.mxu1 %vm670_vm3, %v13631_v61  ;;  %v13633_v56 = vld [vmem:[#allocation34_spill] sm:$0xff] }
 0x2cc   : > { %v8468_v22 = vpop.f32.mrf.mxu1  ;;  %8674 = vmatprep.mubr.msk.bf16.mxu1 %vm670_vm3, %v13632_v34 }
 0x2cd   : > { %v8503_v55 = vpop.f32.mrf.mxu0  ;;  %v11929_v40 = vadd.f32 %v4575_v18, %v4465_v59  ;;  %v4470_v41 = vadd.f32 %v8468_v22, %v11747_v33 }
 0x2ce   : > { %v4377_v31 = vpop.f32.mrf.mxu1 }
 0x2cf   : > { %v4591_v50 = vpop.f32.mrf.mxu0  ;;  %v11934_v12 = vadd.f32 %v8502_v10, %v4470_v41  ;;  %v4468_v6 = vadd.f32 %v4377_v31, %v11754_v52  ;;  %v13634_v31 = vld [vmem:[#allocation20_spill] sm:$0xff] }
 0x2d0   : > { %v8469_v54 = vpop.f32.mrf.mxu1 }
 0x2d1   : > { %v8506_v14 = vpop.f32.mrf.mxu0  ;;  %8709 = vmatmul.mubr.msk.bf16.gmra.mxu0 %vm670_vm3, %v13633_v56  ;;  %v11941_v18 = vadd.f32 %v4588_v60, %v4468_v6  ;;  %v4471_v33 = vadd.f32 %v8469_v54, %v11757_v32  ;;  %v13635_v60 = vld [vmem:[#allocation29_spill] sm:$0xff] }
 0x2d2   : > { %8712 = vmatprep.mubr.msk.bf16.mxu0 %vm670_vm3, %v13577_v51  ;;  %v4380_v59 = vpop.f32.mrf.mxu1 }
 0x2d3   : > { %v4604_v17 = vpop.f32.mrf.mxu0  ;;  %v11944_v22 = vadd.f32 %v8503_v55, %v4471_v33  ;;  %v4469_v41 = vadd.f32 %v4380_v59, %v11762_v29  ;;  %8675 = vmatmul.mubr.msk.bf16.gmra.mxu1 %vm670_vm3, %v13634_v31 }
 0x2d4   : > { %v8472_v52 = vpop.f32.mrf.mxu1  ;;  %8678 = vmatprep.mubr.msk.bf16.mxu1 %vm670_vm3, %v13635_v60 }
 0x2d5   : > { %v8507_v10 = vpop.f32.mrf.mxu0  ;;  %v11949_v56 = vadd.f32 %v4591_v50, %v4469_v41  ;;  %v4474_v34 = vadd.f32 %v8472_v52, %v11767_v27  ;;  %v13636_v52 = vld [vmem:[#allocation37_spill] sm:$0xff] }
 0x2d6   : > { %v4393_v32 = vpop.f32.mrf.mxu1 }
 0x2d7   : > { %v4607_v51 = vpop.f32.mrf.mxu0  ;;  %v11954_v6 = vadd.f32 %v8506_v14, %v4474_v34  ;;  %v4472_v55 = vadd.f32 %v4393_v32, %v11774_v37 }
 0x2d8   : > { %v8473_v54 = vpop.f32.mrf.mxu1 }
 0x2d9   : > { %v8510_v29 = vpop.f32.mrf.mxu0  ;;  %8713 = vmatmul.mubr.msk.bf16.gmra.mxu0 %vm670_vm3, %v13579_v28  ;;  %v11961_v27 = vadd.f32 %v4604_v17, %v4472_v55  ;;  %v4475_v50 = vadd.f32 %v8473_v54, %v11777_v58  ;;  %v8946_v28 = vld [vmem:[%s9011_s23 + $0xd8] sm:$0xf]  ;;  %v8947_v17 = vld [vmem:[%s9011_s23 + $0xdc] sm:$0xf]  ;;  %v13638_v54 = vld [vmem:[#allocation78_spill] sm:$0xff] }
 0x2da   : > { %8716 = vmatprep.mubr.msk.bf16.mxu0 %vm670_vm3, %v13582_v57  ;;  %v4396_v59 = vpop.f32.mrf.mxu1  ;;  %v7470_v57 = vrot.slane %v8946_v28, 10  ;;  %v5566_v32 = vrot.slane %v8947_v17, 6  ;;  %v11982_v28 = vld [vmem:[%s9011_s23 + $0xe4] sm:$0xf] }
 0x2db   : > { %v4620_v33 = vpop.f32.mrf.mxu0  ;;  %v11964_v41 = vadd.f32 %v8507_v10, %v4475_v50  ;;  %v4473_v34 = vadd.f32 %v4396_v59, %v11782_v23  ;;  %8679 = vmatmul.mubr.msk.bf16.gmra.mxu1 %vm670_vm3, %v13636_v52  ;;  %v13140_v60 = vshrl.u32 %v11982_v28, 16  ;;  %v13141_v31 = vshll.u32 %v11982_v28, 16 }
 0x2dc   : > { %v8476_v14 = vpop.f32.mrf.mxu1  ;;  %8682 = vmatprep.mubr.msk.bf16.mxu1 %vm670_vm3, %v13638_v54  ;;  %v5568_v17 = vrot.slane %v5566_v32, 4 }
 0x2dd   : > { %v8511_v37 = vpop.f32.mrf.mxu0  ;;  %v11971_v55 = vadd.f32 %v4607_v51, %v4473_v34  ;;  %v4478_v58 = vadd.f32 %v8476_v14, %v11788_v46  ;;  %v11985_v51 = vld [vmem:[%s9011_s23 + $0xe8] sm:$0xf]  ;;  %v11988_v34 = vld [vmem:[%s9011_s23 + $0xec] sm:$0x3] }
 0x2de   : > { %v4409_v23 = vpop.f32.mrf.mxu1  ;;  %v7490_v3 = vcombine.low %v11982_v28, %v11985_v51  ;;  %v13646_v14 = vshll.u32 %v11988_v34, 16 }
 0x2df   : > { %13637 = vst [vmem:[#allocation74_spill] sm:$0xff] %v11971_v55  ;;  %v4623_v10 = vpop.f32.mrf.mxu0  ;;  %v11976_v50 = vadd.f32 %v8510_v29, %v4478_v58  ;;  %v4476_v59 = vadd.f32 %v4409_v23, %v11796_v25  ;;  %v5567_v29 = vsel %vm9851_vm13, %v7470_v57, %v5566_v32  ;;  %v8948_v58 = vld [vmem:[%s9011_s23 + $0xe0] sm:$0x3]  ;;  %v13143_v57 = vshrl.u32 %v11985_v51, 16 }
 0x2e0   : > { %v8477_v46 = vpop.f32.mrf.mxu1  ;;  %v5569_v25 = vrot.slane %v8948_v58, 6 }
 0x2e1   : > { %13639 = vst [vmem:[#allocation23_spill] sm:$0xff] %v11976_v50  ;;  %v8514_v52 = vpop.f32.mrf.mxu0  ;;  %8717 = vmatmul.mubr.msk.bf16.gmra.mxu0 %vm670_vm3, %v13583_v5  ;;  %v11995_v23 = vadd.f32 %v4620_v33, %v4476_v59  ;;  %v4479_v5 = vadd.f32 %v8477_v46, %v11800_v36  ;;  %v6421_v59 = vrot.slane %v13140_v60, 5  ;;  %v6422_v46 = vrot.slane %v13141_v31, 6 }
 0x2e2   : > { %8720 = vmatprep.mubr.msk.bf16.mxu0 %vm670_vm3, %v11632_v26  ;;  %v4412_v61 = vpop.f32.mrf.mxu1  ;;  %v5570_v26 = vsel %vm9851_vm13, %v5568_v17, %v5569_v25  ;;  %v6433_v17 = vrot.slane %v13646_v14, 6 }
 0x2e3   : > { %13641 = vst [vmem:[#allocation21_spill] sm:$0xff] %v11995_v23  ;;  %v4636_v54 = vpop.f32.mrf.mxu0  ;;  %v12005_v58 = vadd.f32 %v8511_v37, %v4479_v5  ;;  %v4477_v33 = vadd.f32 %v4412_v61, %v11805_v24  ;;  %8683 = vmatmul.mubr.msk.bf16.gmra.mxu1 %vm670_vm3, %v13643_v38  ;;  %v6425_v37 = vrot.slane %v13143_v57, 5  ;;  %v13644_v5 = vshll.u32 %v11985_v51, 16 }
 0x2e4   : > { %v8480_v13 = vpop.f32.mrf.mxu1  ;;  %v6430_v61 = vshrl.u32 %v11988_v34, 16  ;;  %v6423_v38 = vor.u32 %v6422_v46, %v6421_v59 }
 0x2e5   : > { %13642 = vst [vmem:[#allocation54_spill] sm:$0xff] %v12005_v58  ;;  %v8515_v36 = vpop.f32.mrf.mxu0  ;;  %v6426_v24 = vrot.slane %v13644_v5, 6  ;;  %v12021_v32 = vadd.f32 %v4623_v10, %v4477_v33  ;;  %v4482_v60 = vadd.f32 %v8480_v13, %v11814_v2  ;;  %v13645_v58 = vld [vmem:[#allocation18_spill] sm:$0xff]  ;;  %v12032_v2 = vcombine.low %v5567_v29, %v5570_v26 }
 0x2e6   : > { %8686 = vmatprep.mubr.msk.bf16.mxu1 %vm670_vm3, %v13645_v58  ;;  %v4425_v25 = vpop.f32.mrf.mxu1  ;;  %v6432_v57 = vrot.slane %v6430_v61, 5  ;;  %v6424_v10 = vrot.slane %v6423_v38, 4 }
 0x2e7   : > { %v4639_v31 = vpop.f32.mrf.mxu0  ;;  %v6427_v23 = vor.u32 %v6426_v24, %v6425_v37  ;;  %v12028_v50 = vadd.f32 %v8514_v52, %v4482_v60  ;;  %v4480_v5 = vadd.f32 %v4425_v25, %v11823_v20  ;;  %v13648_v24 = vld [vmem:[#allocation28_spill] sm:$0xff] }
 0x2e8   : > { %v8481_v13 = vpop.f32.mrf.mxu1  ;;  %v6434_v59 = vor.u32 %v6433_v17, %v6432_v57 }
 0x2e9   : > { %v8518_v55 = vpop.f32.mrf.mxu0  ;;  %8721 = vmatmul.mubr.msk.bf16.gmra.mxu0 %vm670_vm3, %v7490_v3  ;;  %v6429_v33 = vrot.slane %v6427_v23, 4  ;;  %v12036_v14 = vadd.f32 %v4636_v54, %v4480_v5  ;;  %v4483_v46 = vadd.f32 %v8481_v13, %v11826_v16  ;;  %v6428_v20 = vsel %vm9804_vm10, %v6424_v10, %v6427_v23 }
 0x2ea   : > { %8760 = vmatprep.mubr.msk.bf16.mxu0 %vm670_vm3, %v13588_v1  ;;  %v4428_v37 = vpop.f32.mrf.mxu1 }
 0x2eb   : > { %v4652_v60 = vpop.f32.mrf.mxu0  ;;  %v6435_v38 = vsel %vm9804_vm10, %v6429_v33, %v6434_v59  ;;  %v12043_v3 = vadd.f32 %v8515_v36, %v4483_v46  ;;  %v4481_v29 = vadd.f32 %v4428_v37, %v11831_v62  ;;  %8687 = vmatmul.mubr.msk.bf16.gmra.mxu1 %vm670_vm3, %v12032_v2  ;;  %v6656_v36 = vsel %vm719_vm0, %v11841_v43, 0  ;;  %v13649_v59 = vld [vmem:[#allocation36_spill] sm:$0xff]  ;;  %v13651_v37 = vld [vmem:[#allocation63_spill] sm:$0xff] }
 0x2ec   : > { %v12046_v1 = vcombine.low %v6428_v20, %v6435_v38  ;;  %v8484_v57 = vpop.f32.mrf.mxu1  ;;  %8726 = vmatprep.mubr.msk.bf16.mxu1 %vm670_vm3, %v13648_v24 }
 0x2ed   : > { %v8519_v26 = vpop.f32.mrf.mxu0  ;;  %v12050_v16 = vadd.f32 %v4639_v31, %v4481_v29  ;;  %v4486_v54 = vadd.f32 %v8484_v57, %v11843_v9  ;;  %v13652_v29 = vld [vmem:[#allocation65_spill] sm:$0xff] }
 0x2ee   : > { %v4441_v61 = vpop.f32.mrf.mxu1 }
 0x2ef   : > { %v4655_v23 = vpop.f32.mrf.mxu0  ;;  %v12057_v62 = vadd.f32 %v8518_v55, %v4486_v54  ;;  %v4484_v17 = vadd.f32 %v4441_v61, %v11850_v4  ;;  %v6445_v55 = vsel %vm719_vm0, %v11863_v30, 0  ;;  %v13653_v61 = vld [vmem:[#allocation46_spill] sm:$0xff] }
 0x2f0   : > { %v8485_v31 = vpop.f32.mrf.mxu1 }
 0x2f1   : > { %v8558_v25 = vpop.f32.mrf.mxu0  ;;  %8761 = vmatmul.mubr.msk.bf16.vlgmr.msra.gmra.mxu0 %vm670_vm3, %v13589_v39  ;;  %v12064_v9 = vadd.f32 %v4652_v60, %v4484_v17  ;;  %v4487_v5 = vadd.f32 %v8485_v31, %v11857_v19  ;;  %v13650_v60 = vld [vmem:[#allocation42_spill] sm:$0xff] }
 0x2f2   : > { %8827 = vmatpush3.bf16.msra.mxu0 %v6656_v36  ;;  %8764 = vmatprep.mubr.msk.bf16.mxu0 %vm670_vm3, %v13592_v0  ;;  %v4444_v43 = vpop.f32.mrf.mxu1 }
 0x2f3   : > { %v4974_v10 = vpop.f32.mrf.mxu0  ;;  %v12069_v13 = vadd.f32 %v8519_v26, %v4487_v5  ;;  %v4485_v4 = vadd.f32 %v4444_v43, %v11867_v63  ;;  %8727 = vmatmul.mubr.msk.bf16.vlgmr.msra.gmra.mxu1 %vm670_vm3, %v13649_v59  ;;  %v13654_v5 = vld [vmem:[#allocation5_spill] sm:$0xff] }
 0x2f4   : > { %v8524_v39 = vpop.f32.mrf.mxu1  ;;  %8793 = vmatpush3.bf16.msra.mxu1 %v6445_v55  ;;  %8730 = vmatprep.mubr.msk.bf16.mxu1 %vm670_vm3, %v13650_v60 }
 0x2f5   : > { %v8559_v33 = vpop.f32.mrf.mxu0  ;;  %v12074_v46 = vadd.f32 %v4655_v23, %v4485_v4  ;;  %v4875_v0 = vadd.f32 %v8524_v39, %v11874_v47 }
 0x2f6   : > { %v4746_v52 = vpop.f32.mrf.mxu1 }
 0x2f7   : > { %v4977_v19 = vpop.f32.mrf.mxu0  ;;  %v12079_v30 = vadd.f32 %v8558_v25, %v4875_v0  ;;  %v4873_v20 = vadd.f32 %v4746_v52, %v11881_v53 }
 0x2f8   : > { %v8525_v38 = vpop.f32.mrf.mxu1 }
 0x2f9   : > { %v8562_v63 = vpop.f32.mrf.mxu0  ;;  %8765 = vmatmul.mubr.msk.bf16.gmra.mxu0 %vm670_vm3, %v13651_v37  ;;  %v12086_v26 = vadd.f32 %v4974_v10, %v4873_v20  ;;  %v4876_v47 = vadd.f32 %v8525_v38, %v11884_v44  ;;  %v13657_v20 = vld [vmem:[#allocation12_spill] sm:$0xff] }
 0x2fa   : > { %8768 = vmatprep.mubr.msk.bf16.mxu0 %vm670_vm3, %v13652_v29  ;;  %v4749_v54 = vpop.f32.mrf.mxu1  ;;  %v13658_v29 = vld [vmem:[#allocation17_spill] sm:$0xff] }
 0x2fb   : > { %v4990_v57 = vpop.f32.mrf.mxu0  ;;  %v12089_v23 = vadd.f32 %v8559_v33, %v4876_v47  ;;  %v4874_v24 = vadd.f32 %v4749_v54, %v11889_v8  ;;  %8731 = vmatmul.mubr.msk.bf16.gmra.mxu1 %vm670_vm3, %v13653_v61  ;;  %v13655_v8 = vld [vmem:[#allocation26_spill] sm:$0xff]  ;;  %v13656_v33 = vld [vmem:[#allocation68_spill] sm:$0xff] }
 0x2fc   : > { %v8528_v53 = vpop.f32.mrf.mxu1  ;;  %8734 = vmatprep.mubr.msk.bf16.mxu1 %vm670_vm3, %v13654_v5 }
 0x2fd   : > { %v8563_v36 = vpop.f32.mrf.mxu0  ;;  %v12094_v17 = vadd.f32 %v4977_v19, %v4874_v24  ;;  %v4879_v25 = vadd.f32 %v8528_v53, %v11894_v42 }
 0x2fe   : > { %v4762_v44 = vpop.f32.mrf.mxu1 }
 0x2ff   : > { %v4993_v31 = vpop.f32.mrf.mxu0  ;;  %v12099_v10 = vadd.f32 %v8562_v63, %v4879_v25  ;;  %v4877_v43 = vadd.f32 %v4762_v44, %v11901_v48 }
 0x300   : > { %v8529_v4 = vpop.f32.mrf.mxu1 }
 0x301   : > { %v8566_v55 = vpop.f32.mrf.mxu0  ;;  %8769 = vmatmul.mubr.msk.bf16.gmra.mxu0 %vm670_vm3, %v13655_v8  ;;  %v12106_v39 = vadd.f32 %v4990_v57, %v4877_v43  ;;  %v4880_v42 = vadd.f32 %v8529_v4, %v11904_v35  ;;  %v13661_v43 = vld [vmem:[#allocation24_spill] sm:$0xff] }
 0x302   : > { %8772 = vmatprep.mubr.msk.bf16.mxu0 %vm670_vm3, %v13656_v33  ;;  %v4765_v0 = vpop.f32.mrf.mxu1  ;;  %v13662_v33 = vld [vmem:[#allocation31_spill] sm:$0xff] }
 0x303   : > { %v5006_v59 = vpop.f32.mrf.mxu0  ;;  %v12109_v19 = vadd.f32 %v8563_v36, %v4880_v42  ;;  %v4878_v60 = vadd.f32 %v4765_v0, %v11909_v11  ;;  %8735 = vmatmul.mubr.msk.bf16.gmra.mxu1 %vm670_vm3, %v13657_v20  ;;  %v13659_v11 = vld [vmem:[#allocation41_spill] sm:$0xff] }
 0x304   : > { %v8532_v48 = vpop.f32.mrf.mxu1  ;;  %8738 = vmatprep.mubr.msk.bf16.mxu1 %vm670_vm3, %v13658_v29  ;;  %v13660_v36 = vld [vmem:[#allocation69_spill] sm:$0xff] }
 0x305   : > { %v8567_v52 = vpop.f32.mrf.mxu0  ;;  %v12114_v63 = vadd.f32 %v4993_v31, %v4878_v60  ;;  %v4883_v37 = vadd.f32 %v8532_v48, %v11914_v15 }
 0x306   : > { %v4778_v35 = vpop.f32.mrf.mxu1 }
 0x307   : > { %v5009_v38 = vpop.f32.mrf.mxu0  ;;  %v12119_v47 = vadd.f32 %v8566_v55, %v4883_v37  ;;  %v4881_v57 = vadd.f32 %v4778_v35, %v11921_v45  ;;  %v13664_v35 = vld [vmem:[#allocation38_spill] sm:$0xff] }
 0x308   : > { %v8533_v24 = vpop.f32.mrf.mxu1 }
 0x309   : > { %v8570_v54 = vpop.f32.mrf.mxu0  ;;  %8773 = vmatmul.mubr.msk.bf16.gmra.mxu0 %vm670_vm3, %v13659_v11  ;;  %v12126_v53 = vadd.f32 %v5006_v59, %v4881_v57  ;;  %v4884_v15 = vadd.f32 %v8533_v24, %v11924_v49  ;;  %v13665_v11 = vld [vmem:[#allocation44_spill] sm:$0xff] }
 0x30a   : > { %8776 = vmatprep.mubr.msk.bf16.mxu0 %vm670_vm3, %v13660_v36  ;;  %v4781_v25 = vpop.f32.mrf.mxu1 }
 0x30b   : > { %v5022_v61 = vpop.f32.mrf.mxu0  ;;  %v12129_v31 = vadd.f32 %v8567_v52, %v4884_v15  ;;  %v4882_v5 = vadd.f32 %v4781_v25, %v11929_v40  ;;  %8739 = vmatmul.mubr.msk.bf16.gmra.mxu1 %vm670_vm3, %v13661_v43  ;;  %v13663_v40 = vld [vmem:[#allocation71_spill] sm:$0xff]  ;;  %v13667_v25 = vshrl.u32 %v11982_v28, 16 }
 0x30c   : > { %v8536_v45 = vpop.f32.mrf.mxu1  ;;  %8742 = vmatprep.mubr.msk.bf16.mxu1 %vm670_vm3, %v13662_v33 }
 0x30d   : > { %v8571_v44 = vpop.f32.mrf.mxu0  ;;  %v12134_v55 = vadd.f32 %v5009_v38, %v4882_v5  ;;  %v4887_v8 = vadd.f32 %v8536_v45, %v11934_v12  ;;  %v13668_v5 = vshll.u32 %v11982_v28, 16  ;;  %v6212_v45 = vrot.slane %v11985_v51, 5 }
 0x30e   : > { %v4794_v49 = vpop.f32.mrf.mxu1 }
 0x30f   : > { %v5025_v4 = vpop.f32.mrf.mxu0  ;;  %v12139_v42 = vadd.f32 %v8570_v54, %v4887_v8  ;;  %v4885_v59 = vadd.f32 %v4794_v49, %v11941_v18  ;;  %v13670_v49 = vshrl.u32 %v11985_v51, 16 }
 0x310   : > { %v8537_v60 = vpop.f32.mrf.mxu1 }
 0x311   : > { %v8574_v0 = vpop.f32.mrf.mxu0  ;;  %8777 = vmatmul.mubr.msk.bf16.gmra.mxu0 %vm670_vm3, %v13663_v40  ;;  %v12146_v52 = vadd.f32 %v5022_v61, %v4885_v59  ;;  %v4888_v12 = vadd.f32 %v8537_v60, %v11944_v22  ;;  %v5997_v59 = vrot.slane %v13670_v49, 4  ;;  %v13671_v40 = vld [vmem:[#allocation74_spill] sm:$0xff]  ;;  %v13677_v49 = vld [vmem:[#allocation85_spill] sm:$0xff] }
 0x312   : > { %8780 = vmatprep.mubr.msk.bf16.mxu0 %vm670_vm3, %v13608_v21  ;;  %v4797_v20 = vpop.f32.mrf.mxu1 }
 0x313   : > { %v5038_v48 = vpop.f32.mrf.mxu0  ;;  %v12149_v37 = vadd.f32 %v8571_v44, %v4888_v12  ;;  %v4886_v38 = vadd.f32 %v4797_v20, %v11949_v56  ;;  %8743 = vmatmul.mubr.msk.bf16.gmra.mxu1 %vm670_vm3, %v13664_v35  ;;  %v13666_v56 = vld [vmem:[#allocation73_spill] sm:$0xff]  ;;  %v5987_v44 = vrot.slane %v13668_v5, 5  ;;  %v6215_v35 = vrot.slane %v11988_v34, 5 }
 0x314   : > { %v8540_v18 = vpop.f32.mrf.mxu1  ;;  %8746 = vmatprep.mubr.msk.bf16.mxu1 %vm670_vm3, %v13665_v11  ;;  %v13673_v11 = vld [vmem:[#allocation23_spill] sm:$0xff]  ;;  %v13675_v5 = vld [vmem:[#allocation21_spill] sm:$0xff] }
 0x315   : > { %v8575_v29 = vpop.f32.mrf.mxu0  ;;  %v12154_v57 = vadd.f32 %v5025_v4, %v4886_v38  ;;  %v4891_v54 = vadd.f32 %v8540_v18, %v11954_v6  ;;  %v5984_v6 = vrot.slane %v13667_v25, 4  ;;  %v13669_v4 = vshll.u32 %v11985_v51, 16  ;;  %v13672_v38 = vld [vmem:[#allocation47_spill] sm:$0xff] }
 0x316   : > { %v4810_v22 = vpop.f32.mrf.mxu1  ;;  %v6214_v18 = vrot.slane %v6212_v45, 4 }
 0x317   : > { %v5041_v21 = vpop.f32.mrf.mxu0  ;;  %v12159_v24 = vadd.f32 %v8574_v0, %v4891_v54  ;;  %v4889_v36 = vadd.f32 %v4810_v22, %v11961_v27  ;;  %v5993_v33 = vrot.slane %v13669_v4, 5 }
 0x318   : > { %v8541_v61 = vpop.f32.mrf.mxu1 }
 0x319   : > { %v8578_v15 = vpop.f32.mrf.mxu0  ;;  %8781 = vmatmul.mubr.msk.bf16.gmra.mxu0 %vm670_vm3, %v13666_v56  ;;  %v12171_v43 = vadd.f32 %v5038_v48, %v4889_v36  ;;  %v4892_v27 = vadd.f32 %v8541_v61, %v11964_v41  ;;  %v5988_v48 = vor.u32 %v5987_v44, %v5984_v6  ;;  %v7525_v41 = vrot.slane %v11982_v28, 9  ;;  %v13676_v44 = vld [vmem:[#allocation15_spill] sm:$0xff] }
 0x31a   : > { %8784 = vmatprep.mubr.msk.bf16.mxu0 %vm670_vm3, %v13610_v7  ;;  %v4813_v7 = vpop.f32.mrf.mxu1  ;;  %v5998_v56 = vor.u32 %v5997_v59, %v5993_v33  ;;  %v6216_v59 = vsel %vm9530_vm7, %v6214_v18, %v6215_v35 }
 0x31b   : > { %v5054_v8 = vpop.f32.mrf.mxu0  ;;  %v12178_v0 = vadd.f32 %v8575_v29, %v4892_v27  ;;  %v4890_v60 = vadd.f32 %v4813_v7, %v13671_v40  ;;  %8747 = vmatmul.mubr.msk.bf16.gmra.mxu1 %vm670_vm3, %v13672_v38  ;;  %v13674_v29 = vld [vmem:[#allocation50_spill] sm:$0xff]  ;;  %v6213_v40 = vsel %vm9530_vm7, %v7525_v41, %v6212_v45  ;;  %v13681_v41 = vld [vmem:[#allocation81_spill] sm:$0xff] }
 0x31c   : > { %v8544_v20 = vpop.f32.mrf.mxu1  ;;  %8750 = vmatprep.mubr.msk.bf16.mxu1 %vm670_vm3, %v13674_v29 }
 0x31d   : > { %v8579_v12 = vpop.f32.mrf.mxu0  ;;  %v12185_v54 = vadd.f32 %v5041_v21, %v4890_v60  ;;  %v4895_v22 = vadd.f32 %v8544_v20, %v13673_v11  ;;  %v5989_v21 = vrot.slane %v5988_v48, 4  ;;  %v5999_v11 = vrot.slane %v5998_v56, 4  ;;  %v13682_v56 = vld [vmem:[#allocation83_spill] sm:$0xff] }
 0x31e   : > { %v4826_v61 = vpop.f32.mrf.mxu1 }
 0x31f   : > { %v5057_v36 = vpop.f32.mrf.mxu0  ;;  %v12190_v25 = vadd.f32 %v8578_v15, %v4895_v22  ;;  %v4893_v27 = vadd.f32 %v4826_v61, %v13675_v5  ;;  %v13679_v15 = vld [vmem:[#allocation54_spill] sm:$0xff]  ;;  %v13680_v22 = vshll.u32 %v11988_v34, 16 }
 0x320   : > { %v8545_v4 = vpop.f32.mrf.mxu1 }
 0x321   : > { %v8582_v6 = vpop.f32.mrf.mxu0  ;;  %8785 = vmatmul.mubr.msk.bf16.gmra.mxu0 %vm670_vm3, %v13676_v44  ;;  %v12201_v60 = vadd.f32 %v5054_v8, %v4893_v27  ;;  %v4896_v20 = vadd.f32 %v8545_v4, %v13679_v15  ;;  %v6003_v29 = vrot.slane %v13680_v22, 5  ;;  %v13684_v15 = vld [vmem:[#allocation33_spill] sm:$0xff] }
 0x322   : > { %8788 = vmatprep.mubr.msk.bf16.mxu0 %vm670_vm3, %v13677_v49  ;;  %v4829_v61 = vpop.f32.mrf.mxu1  ;;  %v7527_v49 = vcombine.low %v6213_v40, %v6216_v59 }
 0x323   : > { %v5070_v38 = vpop.f32.mrf.mxu0  ;;  %v12206_v5 = vadd.f32 %v8579_v12, %v4896_v20  ;;  %v4894_v48 = vadd.f32 %v4829_v61, %v12021_v32  ;;  %8751 = vmatmul.mubr.msk.bf16.gmra.mxu1 %vm670_vm3, %v13681_v41  ;;  %v5994_v12 = vsel %vm9051_vm4, %v5989_v21, %v5993_v33  ;;  %v6004_v32 = vsel %vm9051_vm4, %v5999_v11, %v6003_v29 }
 0x324   : > { %v8548_v45 = vpop.f32.mrf.mxu1  ;;  %8754 = vmatprep.mubr.msk.bf16.mxu1 %vm670_vm3, %v13682_v56  ;;  %v13687_v56 = vld [vmem:[#allocation2_spill] sm:$0xff] }
 0x325   : > { %v8583_v44 = vpop.f32.mrf.mxu0  ;;  %v12211_v8 = vadd.f32 %v5057_v36, %v4894_v48  ;;  %v4899_v18 = vadd.f32 %v8548_v45, %v12028_v50  ;;  %v7508_v50 = vcombine.low %v5994_v12, %v6004_v32  ;;  %v13685_v45 = vld [vmem:[#allocation32_spill] sm:$0xff] }
 0x326   : > { %v4842_v4 = vpop.f32.mrf.mxu1 }
 0x327   : > { %v5073_v35 = vpop.f32.mrf.mxu0  ;;  %v12220_v7 = vadd.f32 %v8582_v6, %v4899_v18  ;;  %v4897_v40 = vadd.f32 %v4842_v4, %v12036_v14  ;;  %v13686_v18 = vld [vmem:[#allocation75_spill] sm:$0xff] }
 0x328   : > { %v8549_v36 = vpop.f32.mrf.mxu1 }
 0x329   : > { %v8586_v59 = vpop.f32.mrf.mxu0  ;;  %8789 = vmatmul.mubr.msk.bf16.gmra.mxu0 %vm670_vm3, %v7527_v49  ;;  %v12226_v20 = vadd.f32 %v5070_v38, %v4897_v40  ;;  %v4900_v33 = vadd.f32 %v8549_v36, %v12043_v3 }
 0x32a   : > { %8828 = vmatprep.mubr.msk.bf16.mxu0 %vm670_vm3, %v13684_v15  ;;  %v4845_v22 = vpop.f32.mrf.mxu1 }
 0x32b   : > { %v5086_v21 = vpop.f32.mrf.mxu0  ;;  %v12229_v11 = vadd.f32 %v8583_v44, %v4900_v33  ;;  %v4898_v6 = vadd.f32 %v4845_v22, %v12050_v16  ;;  %8755 = vmatmul.mubr.msk.bf16.gmra.mxu1 %vm670_vm3, %v7508_v50  ;;  %v13689_v33 = vld [vmem:[#allocation76_spill] sm:$0xff] }
 0x32c   : > { %v8552_v14 = vpop.f32.mrf.mxu1  ;;  %8794 = vmatprep.mubr.msk.bf16.mxu1 %vm670_vm3, %v13685_v45 }
 0x32d   : > { %v8587_v29 = vpop.f32.mrf.mxu0  ;;  %v12233_v61 = vadd.f32 %v5073_v35, %v4898_v6  ;;  %v4903_v48 = vadd.f32 %v8552_v14, %v12057_v62  ;;  %v13691_v14 = vld [vmem:[#allocation8_spill] sm:$0xff] }
 0x32e   : > { %v4858_v38 = vpop.f32.mrf.mxu1 }
 0x32f   : > { %v5089_v49 = vpop.f32.mrf.mxu0  ;;  %v12238_v3 = vadd.f32 %v8586_v59, %v4903_v48  ;;  %v4901_v44 = vadd.f32 %v4858_v38, %v12064_v9  ;;  %v13688_v59 = vld [vmem:[#allocation39_spill] sm:$0xff] }
 0x330   : > { %v8553_v16 = vpop.f32.mrf.mxu1 }
 0x331   : > { %v8626_v41 = vpop.f32.mrf.mxu0  ;;  %8829 = vmatmul.mubr.msk.bf16.vlgmr.msra.gmra.mxu0 %vm670_vm3, %v13686_v18  ;;  %v12245_v35 = vadd.f32 %v5086_v21, %v4901_v44  ;;  %v4904_v62 = vadd.f32 %v8553_v16, %v12069_v13  ;;  %v13692_v18 = vld [vmem:[#allocation6_spill] sm:$0xff] }
 0x332   : > { %8832 = vmatprep.mubr.msk.bf16.mxu0 %vm670_vm3, %v13687_v56  ;;  %v4861_v12 = vpop.f32.mrf.mxu1 }
 0x333   : > { %v5405_v27 = vpop.f32.mrf.mxu0  ;;  %v12248_v32 = vadd.f32 %v8587_v29, %v4904_v62  ;;  %v4902_v4 = vadd.f32 %v4861_v12, %v12074_v46  ;;  %8795 = vmatmul.mubr.msk.bf16.vlgmr.msra.gmra.mxu1 %vm670_vm3, %v13688_v59  ;;  %v13690_v46 = vld [vmem:[#allocation4_spill] sm:$0xff]  ;;  %v13695_v59 = vld [vmem:[#allocation14_spill] sm:$0xff] }
 0x334   : > { %v8592_v9 = vpop.f32.mrf.mxu1  ;;  %8798 = vmatprep.mubr.msk.bf16.mxu1 %vm670_vm3, %v13689_v33 }
 0x335   : > { %v8627_v40 = vpop.f32.mrf.mxu0  ;;  %v12253_v36 = vadd.f32 %v5089_v49, %v4902_v4  ;;  %v5315_v50 = vadd.f32 %v8592_v9, %v12079_v30 }
 0x336   : > { %v5186_v13 = vpop.f32.mrf.mxu1 }
 0x337   : > { %v5408_v15 = vpop.f32.mrf.mxu0  ;;  %v12258_v21 = vadd.f32 %v8626_v41, %v5315_v50  ;;  %v5313_v22 = vadd.f32 %v5186_v13, %v12086_v26 }
 0x338   : > { %v8593_v29 = vpop.f32.mrf.mxu1 }
 0x339   : > { %v8630_v6 = vpop.f32.mrf.mxu0  ;;  %8833 = vmatmul.mubr.msk.bf16.gmra.mxu0 %vm670_vm3, %v13690_v46  ;;  %v12265_v48 = vadd.f32 %v5405_v27, %v5313_v22  ;;  %v5316_v30 = vadd.f32 %v8593_v29, %v12089_v23  ;;  %v13693_v27 = vld [vmem:[#allocation10_spill] sm:$0xff]  ;;  %v13696_v46 = vld [vmem:[#allocation7_spill] sm:$0xff] }
 0x33a   : > { %8836 = vmatprep.mubr.msk.bf16.mxu0 %vm670_vm3, %v13691_v14  ;;  %v5189_v45 = vpop.f32.mrf.mxu1 }
 0x33b   : > { %v5421_v49 = vpop.f32.mrf.mxu0  ;;  %v12268_v38 = vadd.f32 %v8627_v40, %v5316_v30  ;;  %v5314_v44 = vadd.f32 %v5189_v45, %v12094_v17  ;;  %8799 = vmatmul.mubr.msk.bf16.gmra.mxu1 %vm670_vm3, %v13692_v18  ;;  %v13694_v17 = vld [vmem:[#allocation13_spill] sm:$0xff]  ;;  %v13699_v18 = vld [vmem:[#allocation20_spill] sm:$0xff] }
 0x33c   : > { %v8596_v26 = vpop.f32.mrf.mxu1  ;;  %8802 = vmatprep.mubr.msk.bf16.mxu1 %vm670_vm3, %v13693_v27 }
 0x33d   : > { %v8631_v41 = vpop.f32.mrf.mxu0  ;;  %v12273_v16 = vadd.f32 %v5408_v15, %v5314_v44  ;;  %v5319_v56 = vadd.f32 %v8596_v26, %v12099_v10 }
 0x33e   : > { %v5202_v23 = vpop.f32.mrf.mxu1 }
 0x33f   : > { %v5424_v62 = vpop.f32.mrf.mxu0  ;;  %v12278_v12 = vadd.f32 %v8630_v6, %v5319_v56  ;;  %v5317_v4 = vadd.f32 %v5202_v23, %v12106_v39 }
 0x340   : > { %v8597_v9 = vpop.f32.mrf.mxu1 }
 0x341   : > { %v8634_v40 = vpop.f32.mrf.mxu0  ;;  %8837 = vmatmul.mubr.msk.bf16.gmra.mxu0 %vm670_vm3, %v13694_v17  ;;  %v12285_v50 = vadd.f32 %v5421_v49, %v5317_v4  ;;  %v5320_v10 = vadd.f32 %v8597_v9, %v12109_v19  ;;  %v13697_v49 = vld [vmem:[#allocation11_spill] sm:$0xff] }
 0x342   : > { %8840 = vmatprep.mubr.msk.bf16.mxu0 %vm670_vm3, %v13695_v59  ;;  %v5205_v33 = vpop.f32.mrf.mxu1  ;;  %v13700_v17 = vld [vmem:[#allocation19_spill] sm:$0xff] }
 0x343   : > { %v5437_v15 = vpop.f32.mrf.mxu0  ;;  %v12288_v13 = vadd.f32 %v8631_v41, %v5320_v10  ;;  %v5318_v22 = vadd.f32 %v5205_v33, %v12114_v63  ;;  %8803 = vmatmul.mubr.msk.bf16.gmra.mxu1 %vm670_vm3, %v13696_v46  ;;  %v13698_v63 = vld [vmem:[#allocation16_spill] sm:$0xff]  ;;  %v13703_v46 = vld [vmem:[#allocation37_spill] sm:$0xff] }
 0x344   : > { %v8600_v39 = vpop.f32.mrf.mxu1  ;;  %8806 = vmatprep.mubr.msk.bf16.mxu1 %vm670_vm3, %v13697_v49 }
 0x345   : > { %v8635_v6 = vpop.f32.mrf.mxu0  ;;  %v12293_v29 = vadd.f32 %v5424_v62, %v5318_v22  ;;  %v5323_v14 = vadd.f32 %v8600_v39, %v12119_v47 }
 0x346   : > { %v5218_v19 = vpop.f32.mrf.mxu1 }
 0x347   : > { %v5440_v30 = vpop.f32.mrf.mxu0  ;;  %v12298_v45 = vadd.f32 %v8634_v40, %v5323_v14  ;;  %v5321_v44 = vadd.f32 %v5218_v19, %v12126_v53 }
 0x348   : > { %v8601_v26 = vpop.f32.mrf.mxu1 }
 0x349   : > { %v8638_v41 = vpop.f32.mrf.mxu0  ;;  %8841 = vmatmul.mubr.msk.bf16.gmra.mxu0 %vm670_vm3, %v13698_v63  ;;  %v12305_v56 = vadd.f32 %v5437_v15, %v5321_v44  ;;  %v5324_v47 = vadd.f32 %v8601_v26, %v12129_v31  ;;  %v13701_v15 = vld [vmem:[#allocation22_spill] sm:$0xff]  ;;  %v13704_v63 = vld [vmem:[#allocation43_spill] sm:$0xff] }
 0x34a   : > { %8844 = vmatprep.mubr.msk.bf16.mxu0 %vm670_vm3, %v13699_v18  ;;  %v5221_v27 = vpop.f32.mrf.mxu1 }
 0x34b   : > { %v5453_v62 = vpop.f32.mrf.mxu0  ;;  %v12308_v23 = vadd.f32 %v8635_v6, %v5324_v47  ;;  %v5322_v4 = vadd.f32 %v5221_v27, %v12134_v55  ;;  %8807 = vmatmul.mubr.msk.bf16.gmra.mxu1 %vm670_vm3, %v13700_v17  ;;  %v13702_v55 = vld [vmem:[#allocation29_spill] sm:$0xff]  ;;  %v13707_v17 = vld [vmem:[#allocation86_spill] sm:$0xff] }
 0x34c   : > { %v8604_v53 = vpop.f32.mrf.mxu1  ;;  %8810 = vmatprep.mubr.msk.bf16.mxu1 %vm670_vm3, %v13701_v15 }
 0x34d   : > { %v8639_v40 = vpop.f32.mrf.mxu0  ;;  %v12313_v9 = vadd.f32 %v5440_v30, %v5322_v4  ;;  %v5327_v59 = vadd.f32 %v8604_v53, %v12139_v42 }
 0x34e   : > { %v5234_v31 = vpop.f32.mrf.mxu1 }
 0x34f   : > { %v5456_v10 = vpop.f32.mrf.mxu0  ;;  %v12318_v33 = vadd.f32 %v8638_v41, %v5327_v59  ;;  %v5325_v22 = vadd.f32 %v5234_v31, %v12146_v52  ;;  %v6642_v59 = vrot.slane %v11985_v51, 6  ;;  %v6645_v51 = vrot.slane %v11988_v34, 6 }
 0x350   : > { %v8605_v39 = vpop.f32.mrf.mxu1 }
 0x351   : > { %v8642_v6 = vpop.f32.mrf.mxu0  ;;  %8845 = vmatmul.mubr.msk.bf16.gmra.mxu0 %vm670_vm3, %v13702_v55  ;;  %v12325_v14 = vadd.f32 %v5453_v62, %v5325_v22  ;;  %v5328_v42 = vadd.f32 %v8605_v39, %v12149_v37  ;;  %v13705_v62 = vld [vmem:[#allocation77_spill] sm:$0xff]  ;;  %v13708_v39 = vld [vmem:[#allocation79_spill] sm:$0xff] }
 0x352   : > { %8848 = vmatprep.mubr.msk.bf16.mxu0 %vm670_vm3, %v13703_v46  ;;  %v5237_v49 = vpop.f32.mrf.mxu1  ;;  %v7562_v46 = vrot.slane %v11982_v28, 10 }
 0x353   : > { %v5469_v30 = vpop.f32.mrf.mxu0  ;;  %v12328_v19 = vadd.f32 %v8639_v40, %v5328_v42  ;;  %v5326_v44 = vadd.f32 %v5237_v49, %v12154_v57  ;;  %8811 = vmatmul.mubr.msk.bf16.gmra.mxu1 %vm670_vm3, %v13704_v63  ;;  %v13706_v57 = vld [vmem:[#allocation78_spill] sm:$0xff]  ;;  %v6644_v42 = vrot.slane %v6642_v59, 4 }
 0x354   : > { %v8608_v52 = vpop.f32.mrf.mxu1  ;;  %8814 = vmatprep.mubr.msk.bf16.mxu1 %vm670_vm3, %v13705_v62 }
 0x355   : > { %v8643_v41 = vpop.f32.mrf.mxu0  ;;  %v12333_v26 = vadd.f32 %v5456_v10, %v5326_v44  ;;  %v5331_v18 = vadd.f32 %v8608_v52, %v12159_v24  ;;  %v13709_v44 = vld [vmem:[#allocation9_spill] sm:$0xff] }
 0x356   : > { %v5250_v37 = vpop.f32.mrf.mxu1 }
 0x357   : > { %v5472_v47 = vpop.f32.mrf.mxu0  ;;  %v12338_v27 = vadd.f32 %v8642_v6, %v5331_v18  ;;  %v5329_v4 = vadd.f32 %v5250_v37, %v12171_v43  ;;  %v6646_v18 = vsel %vm9851_vm13, %v6644_v42, %v6645_v51 }
 0x358   : > { %v8609_v53 = vpop.f32.mrf.mxu1 }
 0x359   : > { %v8646_v40 = vpop.f32.mrf.mxu0  ;;  %8849 = vmatmul.mubr.msk.bf16.gmra.mxu0 %vm670_vm3, %v13706_v57  ;;  %v12346_v24 = vadd.f32 %v5469_v30, %v5329_v4  ;;  %v5332_v10 = vadd.f32 %v8609_v53, %v12178_v0 }
 0x35a   : > { %8852 = vmatprep.mubr.msk.bf16.mxu0 %vm670_vm3, %v13707_v17  ;;  %v5253_v31 = vpop.f32.mrf.mxu1 }
 0x35b   : > { %v5485_v15 = vpop.f32.mrf.mxu0  ;;  %v12349_v22 = vadd.f32 %v8643_v41, %v5332_v10  ;;  %v5330_v43 = vadd.f32 %v5253_v31, %v12185_v54  ;;  %8815 = vmatmul.mubr.msk.bf16.gmra.mxu1 %vm670_vm3, %v13708_v39 }
 0x35c   : > { %v8612_v55 = vpop.f32.mrf.mxu1  ;;  %8818 = vmatprep.mubr.msk.bf16.mxu1 %vm670_vm3, %v13709_v44 }
 0x35d   : > { %v8647_v6 = vpop.f32.mrf.mxu0  ;;  %v12356_v30 = vadd.f32 %v5472_v47, %v5330_v43  ;;  %v5335_v0 = vadd.f32 %v8612_v55, %v12190_v25  ;;  %v6643_v25 = vsel %vm9851_vm13, %v7562_v46, %v6642_v59 }
 0x35e   : > { %v5266_v41 = vpop.f32.mrf.mxu1  ;;  %v7564_v57 = vcombine.low %v6643_v25, %v6646_v18 }
 0x35f   : > { %v5488_v49 = vpop.f32.mrf.mxu0  ;;  %v12361_v54 = vadd.f32 %v8646_v40, %v5335_v0  ;;  %v5333_v52 = vadd.f32 %v5266_v41, %v12201_v60 }
 0x360   : > { %v8613_v28 = vpop.f32.mrf.mxu1 }
 0x361   : > { %v8650_v63 = vpop.f32.mrf.mxu0  ;;  %8853 = vmatmul.mubr.msk.bf16.gmra.mxu0 %vm670_vm3, %v13645_v58  ;;  %v12372_v47 = vadd.f32 %v5485_v15, %v5333_v52  ;;  %v5336_v62 = vadd.f32 %v8613_v28, %v12206_v5  ;;  %v13712_v15 = vld [vmem:[#allocation80_spill] sm:$0xff] }
 0x362   : > { %8856 = vmatprep.mubr.msk.bf16.mxu0 %vm670_vm3, %v12032_v2  ;;  %v5269_v60 = vpop.f32.mrf.mxu1  ;;  %v13711_v2 = vld [vmem:[#allocation49_spill] sm:$0xff] }
 0x363   : > { %v5501_v37 = vpop.f32.mrf.mxu0  ;;  %v12375_v4 = vadd.f32 %v8647_v6, %v5336_v62  ;;  %v5334_v58 = vadd.f32 %v5269_v60, %v12211_v8  ;;  %8819 = vmatmul.mubr.msk.bf16.gmra.mxu1 %vm670_vm3, %v13711_v2 }
 0x364   : > { %v8616_v53 = vpop.f32.mrf.mxu1  ;;  %8822 = vmatprep.mubr.msk.bf16.mxu1 %vm670_vm3, %v13712_v15 }
 0x365   : > { %v8651_v40 = vpop.f32.mrf.mxu0  ;;  %v12380_v17 = vadd.f32 %v5488_v49, %v5334_v58  ;;  %v5339_v59 = vadd.f32 %v8616_v53, %v12220_v7 }
 0x366   : > { %v5282_v5 = vpop.f32.mrf.mxu1 }
 0x367   : > { %v5504_v10 = vpop.f32.mrf.mxu0  ;;  %v12385_v31 = vadd.f32 %v8650_v63, %v5339_v59  ;;  %v5337_v43 = vadd.f32 %v5282_v5, %v12226_v20 }
 0x368   : > { %v8617_v6 = vpop.f32.mrf.mxu1 }
 0x369   : > { %v8654_v8 = vpop.f32.mrf.mxu0  ;;  %8857 = vmatmul.mubr.msk.bf16.gmra.mxu0 %vm670_vm3, %v7564_v57  ;;  %v12389_v55 = vadd.f32 %v5501_v37, %v5337_v43  ;;  %v5340_v39 = vadd.f32 %v8617_v6, %v12229_v11 }
 0x36a   : > { %v5285_v42 = vpop.f32.mrf.mxu1 }
 0x36b   : > { %v5517_v46 = vpop.f32.mrf.mxu0  ;;  %v12392_v7 = vadd.f32 %v8651_v40, %v5340_v39  ;;  %v5338_v51 = vadd.f32 %v5285_v42, %v12233_v61  ;;  %8823 = vmatmul.mubr.msk.bf16.gmra.mxu1 %vm670_vm3, %v12046_v1 }
 0x36c   : > { %v8620_v49 = vpop.f32.mrf.mxu1 }
 0x36d   : > { %v8655_v0 = vpop.f32.mrf.mxu0  ;;  %v12397_v20 = vadd.f32 %v5504_v10, %v5338_v51  ;;  %v5343_v44 = vadd.f32 %v8620_v49, %v12238_v3 }
 0x36e   : > { %v5298_v52 = vpop.f32.mrf.mxu1 }
 0x36f   : > { %v5520_v41 = vpop.f32.mrf.mxu0  ;;  %v12400_v63 = vadd.f32 %v8654_v8, %v5343_v44  ;;  %v5341_v11 = vadd.f32 %v5298_v52, %v12245_v35 }
 0x370   : > { %v8621_v34 = vpop.f32.mrf.mxu1 }
 0x371   : > { %v8694_v28 = vpop.f32.mrf.mxu0  ;;  %v12403_v25 = vadd.f32 %v5517_v46, %v5341_v11  ;;  %v5344_v61 = vadd.f32 %v8621_v34, %v12248_v32 }
 0x372   : > { %v5301_v62 = vpop.f32.mrf.mxu1 }
 0x373   : > { %v5822_v18 = vpop.f32.mrf.mxu0  ;;  %v12406_v37 = vadd.f32 %v8655_v0, %v5344_v61  ;;  %v5342_v1 = vadd.f32 %v5301_v62, %v12253_v36 }
 0x374   : > { %v8660_v3 = vpop.f32.mrf.mxu1 }
 0x375   : > { %v8695_v60 = vpop.f32.mrf.mxu0  ;;  %v12409_v58 = vadd.f32 %v5520_v41, %v5342_v1  ;;  %v5745_v40 = vadd.f32 %v8660_v3, %v12258_v21 }
 0x376   : > { %v5616_v35 = vpop.f32.mrf.mxu1 }
 0x377   : > { %v5825_v57 = vpop.f32.mrf.mxu0  ;;  %v12412_v53 = vadd.f32 %v8694_v28, %v5745_v40  ;;  %v5743_v2 = vadd.f32 %v5616_v35, %v12265_v48 }
 0x378   : > { %v8661_v32 = vpop.f32.mrf.mxu1 }
 0x379   : > { %v8698_v59 = vpop.f32.mrf.mxu0  ;;  %v12415_v10 = vadd.f32 %v5822_v18, %v5743_v2  ;;  %v5746_v15 = vadd.f32 %v8661_v32, %v12268_v38 }
 0x37a   : > { %v5619_v36 = vpop.f32.mrf.mxu1 }
 0x37b   : > { %v5838_v5 = vpop.f32.mrf.mxu0  ;;  %v12418_v43 = vadd.f32 %v8695_v60, %v5746_v15  ;;  %v5744_v8 = vadd.f32 %v5619_v36, %v12273_v16 }
 0x37c   : > { %v8664_v21 = vpop.f32.mrf.mxu1 }
 0x37d   : > { %v8699_v6 = vpop.f32.mrf.mxu0  ;;  %v12421_v39 = vadd.f32 %v5825_v57, %v5744_v8  ;;  %v5749_v46 = vadd.f32 %v8664_v21, %v12278_v12 }
 0x37e   : > { %v5632_v48 = vpop.f32.mrf.mxu1 }
 0x37f   : > { %v5841_v42 = vpop.f32.mrf.mxu0  ;;  %v12424_v51 = vadd.f32 %v8698_v59, %v5749_v46  ;;  %v5747_v0 = vadd.f32 %v5632_v48, %v12285_v50 }
 0x380   : > { %v8665_v38 = vpop.f32.mrf.mxu1 }
 0x381   : > { %v8702_v49 = vpop.f32.mrf.mxu0  ;;  %v12427_v44 = vadd.f32 %v5838_v5, %v5747_v0  ;;  %v5750_v41 = vadd.f32 %v8665_v38, %v12288_v13 }
 0x382   : > { %v5635_v16 = vpop.f32.mrf.mxu1 }
 0x383   : > { %v5854_v52 = vpop.f32.mrf.mxu0  ;;  %v12430_v11 = vadd.f32 %v8699_v6, %v5750_v41  ;;  %v5748_v28 = vadd.f32 %v5635_v16, %v12293_v29 }
 0x384   : > { %v8668_v12 = vpop.f32.mrf.mxu1 }
 0x385   : > { %v8703_v34 = vpop.f32.mrf.mxu0  ;;  %v12433_v61 = vadd.f32 %v5841_v42, %v5748_v28  ;;  %v5753_v18 = vadd.f32 %v8668_v12, %v12298_v45 }
 0x386   : > { %v5648_v50 = vpop.f32.mrf.mxu1 }
 0x387   : > { %v5857_v62 = vpop.f32.mrf.mxu0  ;;  %v12436_v1 = vadd.f32 %v8702_v49, %v5753_v18  ;;  %v5751_v60 = vadd.f32 %v5648_v50, %v12305_v56 }
 0x388   : > { %v8669_v13 = vpop.f32.mrf.mxu1 }
 0x389   : > { %v8706_v3 = vpop.f32.mrf.mxu0  ;;  %v12439_v40 = vadd.f32 %v5854_v52, %v5751_v60  ;;  %v5754_v57 = vadd.f32 %v8669_v13, %v12308_v23 }
 0x38a   : > { %v5651_v29 = vpop.f32.mrf.mxu1 }
 0x38b   : > { %v5870_v35 = vpop.f32.mrf.mxu0  ;;  %v12442_v2 = vadd.f32 %v8703_v34, %v5754_v57  ;;  %v5752_v59 = vadd.f32 %v5651_v29, %v12313_v9 }
 0x38c   : > { %v8672_v45 = vpop.f32.mrf.mxu1 }
 0x38d   : > { %v8707_v32 = vpop.f32.mrf.mxu0  ;;  %v12445_v15 = vadd.f32 %v5857_v62, %v5752_v59  ;;  %v5757_v5 = vadd.f32 %v8672_v45, %v12318_v33 }
 0x38e   : > { %v5664_v56 = vpop.f32.mrf.mxu1 }
 0x38f   : > { %v5873_v36 = vpop.f32.mrf.mxu0  ;;  %v12448_v8 = vadd.f32 %v8706_v3, %v5757_v5  ;;  %v5755_v6 = vadd.f32 %v5664_v56, %v12325_v14 }
 0x390   : > { %v8673_v23 = vpop.f32.mrf.mxu1 }
 0x391   : > { %v8710_v21 = vpop.f32.mrf.mxu0  ;;  %v12451_v46 = vadd.f32 %v5870_v35, %v5755_v6  ;;  %v5758_v42 = vadd.f32 %v8673_v23, %v12328_v19 }
 0x392   : > { %v5667_v9 = vpop.f32.mrf.mxu1 }
 0x393   : > { %v5886_v48 = vpop.f32.mrf.mxu0  ;;  %v12454_v0 = vadd.f32 %v8707_v32, %v5758_v42  ;;  %v5756_v49 = vadd.f32 %v5667_v9, %v12333_v26 }
 0x394   : > { %v8676_v33 = vpop.f32.mrf.mxu1 }
 0x395   : > { %v8711_v38 = vpop.f32.mrf.mxu0  ;;  %v12457_v41 = vadd.f32 %v5873_v36, %v5756_v49  ;;  %v5761_v52 = vadd.f32 %v8676_v33, %v12338_v27 }
 0x396   : > { %v5680_v14 = vpop.f32.mrf.mxu1 }
 0x397   : > { %v5889_v16 = vpop.f32.mrf.mxu0  ;;  %v12460_v28 = vadd.f32 %v8710_v21, %v5761_v52  ;;  %v5759_v34 = vadd.f32 %v5680_v14, %v12346_v24 }
 0x398   : > { %v8677_v19 = vpop.f32.mrf.mxu1 }
 0x399   : > { %v8714_v12 = vpop.f32.mrf.mxu0  ;;  %v12463_v18 = vadd.f32 %v5886_v48, %v5759_v34  ;;  %v5762_v62 = vadd.f32 %v8677_v19, %v12349_v22 }
 0x39a   : > { %v5683_v26 = vpop.f32.mrf.mxu1 }
 0x39b   : > { %v5902_v50 = vpop.f32.mrf.mxu0  ;;  %v12466_v60 = vadd.f32 %v8711_v38, %v5762_v62  ;;  %v5760_v3 = vadd.f32 %v5683_v26, %v12356_v30 }
 0x39c   : > { %v8680_v27 = vpop.f32.mrf.mxu1 }
 0x39d   : > { %13713 = vst [vmem:[#allocation40_spill] sm:$0xff] %v12466_v60  ;;  %v8715_v13 = vpop.f32.mrf.mxu0  ;;  %v12469_v57 = vadd.f32 %v5889_v16, %v5760_v3  ;;  %v5765_v35 = vadd.f32 %v8680_v27, %v12361_v54 }
 0x39e   : > { %v5696_v24 = vpop.f32.mrf.mxu1 }
 0x39f   : > { %13714 = vst [vmem:[#allocation70_spill] sm:$0xff] %v12469_v57  ;;  %v5905_v29 = vpop.f32.mrf.mxu0  ;;  %v12472_v59 = vadd.f32 %v8714_v12, %v5765_v35  ;;  %v5763_v32 = vadd.f32 %v5696_v24, %v12372_v47 }
 0x3a0   : > { %v8681_v22 = vpop.f32.mrf.mxu1 }
 0x3a1   : > { %13715 = vst [vmem:[#allocation48_spill] sm:$0xff] %v12472_v59  ;;  %v8718_v45 = vpop.f32.mrf.mxu0  ;;  %v12475_v5 = vadd.f32 %v5902_v50, %v5763_v32  ;;  %v5766_v36 = vadd.f32 %v8681_v22, %v12375_v4 }
 0x3a2   : > { %v5699_v30 = vpop.f32.mrf.mxu1 }
 0x3a3   : > { %13716 = vst [vmem:[#allocation51_spill] sm:$0xff] %v12475_v5  ;;  %v5918_v56 = vpop.f32.mrf.mxu0  ;;  %v12478_v6 = vadd.f32 %v8715_v13, %v5766_v36  ;;  %v5764_v21 = vadd.f32 %v5699_v30, %v12380_v17 }
 0x3a4   : > { %v8684_v54 = vpop.f32.mrf.mxu1 }
 0x3a5   : > { %13717 = vst [vmem:[#allocation84_spill] sm:$0xff] %v12478_v6  ;;  %v8719_v23 = vpop.f32.mrf.mxu0  ;;  %v12481_v42 = vadd.f32 %v5905_v29, %v5764_v21  ;;  %v5769_v48 = vadd.f32 %v8684_v54, %v12385_v31 }
 0x3a6   : > { %v5712_v47 = vpop.f32.mrf.mxu1 }
 0x3a7   : > { %13718 = vst [vmem:[#allocation25_spill] sm:$0xff] %v12481_v42  ;;  %v5921_v9 = vpop.f32.mrf.mxu0  ;;  %v12484_v49 = vadd.f32 %v8718_v45, %v5769_v48  ;;  %v5767_v38 = vadd.f32 %v5712_v47, %v12389_v55 }
 0x3a8   : > { %v8685_v4 = vpop.f32.mrf.mxu1 }
 0x3a9   : > { %13719 = vst [vmem:[#allocation52_spill] sm:$0xff] %v12484_v49  ;;  %v8722_v33 = vpop.f32.mrf.mxu0  ;;  %v12487_v52 = vadd.f32 %v5918_v56, %v5767_v38  ;;  %v5770_v16 = vadd.f32 %v8685_v4, %v12392_v7 }
 0x3aa   : > { %v5715_v17 = vpop.f32.mrf.mxu1 }
 0x3ab   : > { %13720 = vst [vmem:[#allocation53_spill] sm:$0xff] %v12487_v52  ;;  %v5934_v14 = vpop.f32.mrf.mxu0  ;;  %v12490_v34 = vadd.f32 %v8719_v23, %v5770_v16  ;;  %v5768_v12 = vadd.f32 %v5715_v17, %v12397_v20 }
 0x3ac   : > { %v8688_v31 = vpop.f32.mrf.mxu1 }
 0x3ad   : > { %13721 = vst [vmem:[#allocation57_spill] sm:$0xff] %v12490_v34  ;;  %v8723_v19 = vpop.f32.mrf.mxu0  ;;  %v12493_v62 = vadd.f32 %v5921_v9, %v5768_v12  ;;  %v5773_v50 = vadd.f32 %v8688_v31, %v12400_v63 }
 0x3ae   : > { %v5728_v55 = vpop.f32.mrf.mxu1 }
 0x3af   : > { %13722 = vst [vmem:[#allocation59_spill] sm:$0xff] %v12493_v62  ;;  %v5937_v26 = vpop.f32.mrf.mxu0  ;;  %v12496_v3 = vadd.f32 %v8722_v33, %v5773_v50  ;;  %v5771_v13 = vadd.f32 %v5728_v55, %v12403_v25 }
 0x3b0   : > { %v8689_v7 = vpop.f32.mrf.mxu1 }
 0x3b1   : > { %13723 = vst [vmem:[#allocation72_spill] sm:$0xff] %v12496_v3  ;;  %v12499_v27 = vpop.f32.mrf.mxu0  ;;  %v12501_v35 = vadd.f32 %v5934_v14, %v5771_v13  ;;  %v5774_v29 = vadd.f32 %v8689_v7, %v12406_v37 }
 0x3b2   : > { %v5731_v24 = vpop.f32.mrf.mxu1 }
 0x3b3   : > { %13724 = vst [vmem:[#allocation82_spill] sm:$0xff] %v12501_v35  ;;  %v12504_v20 = vpop.f32.mrf.mxu0  ;;  %v12506_v32 = vadd.f32 %v8723_v19, %v5774_v29  ;;  %v5772_v63 = vadd.f32 %v5731_v24, %v12409_v58 }
 0x3b4   : > { %v8728_v22 = vpop.f32.mrf.mxu1 }
 0x3b5   : > { %13725 = vst [vmem:[#allocation55_spill] sm:$0xff] %v12506_v32  ;;  %v12509_v45 = vpop.f32.mrf.mxu0  ;;  %v12511_v36 = vadd.f32 %v5937_v26, %v5772_v63 }
 0x3b6   : > { %v6050_v56 = vpop.f32.mrf.mxu1 }
 0x3b7   : > { %13726 = vst [vmem:[#allocation30_spill] sm:$0xff] %v12511_v36  ;;  %v12513_v25 = vpop.f32.mrf.mxu0 }
 0x3b8   : > { %v8729_v21 = vpop.f32.mrf.mxu1 }
 0x3b9   : > { %v12515_v30 = vpop.f32.mrf.mxu0 }
 0x3ba   : > { %v12519_v37 = vpop.f32.mrf.mxu1 }
 0x3bb   : > { %v12517_v23 = vpop.f32.mrf.mxu0 }
 0x3bc   : > { %v12523_v48 = vpop.f32.mrf.mxu1 }
 0x3bd   : > { %v12521_v54 = vpop.f32.mrf.mxu0 }
 0x3be   : > { %v12527_v9 = vpop.f32.mrf.mxu1 }
 0x3bf   : > { %v12525_v58 = vpop.f32.mrf.mxu0 }
 0x3c0   : > { %v12531_v38 = vpop.f32.mrf.mxu1 }
 0x3c1   : > { %v12529_v47 = vpop.f32.mrf.mxu0 }
 0x3c2   : > { %v12535_v4 = vpop.f32.mrf.mxu1 }
 0x3c3   : > { %v12533_v33 = vpop.f32.mrf.mxu0 }
 0x3c4   : > { %v12539_v14 = vpop.f32.mrf.mxu1 }
 0x3c5   : > { %v12537_v16 = vpop.f32.mrf.mxu0 }
 0x3c6   : > { %v12543_v12 = vpop.f32.mrf.mxu1 }
 0x3c7   : > { %v12541_v17 = vpop.f32.mrf.mxu0 }
 0x3c8   : > { %v12547_v31 = vpop.f32.mrf.mxu1 }
 0x3c9   : > { %v12545_v19 = vpop.f32.mrf.mxu0 }
 0x3ca   : > { %v12551_v26 = vpop.f32.mrf.mxu1 }
 0x3cb   : > { %v12549_v50 = vpop.f32.mrf.mxu0 }
 0x3cc   : > { %v12555_v13 = vpop.f32.mrf.mxu1 }
 0x3cd   : > { %v12553_v55 = vpop.f32.mrf.mxu0 }
 0x3ce   : > { %v12559_v29 = vpop.f32.mrf.mxu1 }
 0x3cf   : > { %v12557_v7 = vpop.f32.mrf.mxu0 }
 0x3d0   : > { %v12563_v63 = vpop.f32.mrf.mxu1 }
 0x3d1   : > { %v12561_v24 = vpop.f32.mrf.mxu0 }
 0x3d2   : > { %13727 = vst [vmem:[#allocation56_spill] sm:$0xff] %v12561_v24  ;;  %v12567_v32 = vpop.f32.mrf.mxu1 }
 0x3d3   : > { %v12565_v36 = vpop.f32.mrf.mxu0 }
 0x3d4   : > { %13728 = vst [vmem:[#allocation58_spill] sm:$0xff] %v12565_v36  ;;  %v12571_v3 = vpop.f32.mrf.mxu1 }
 0x3d5   : > { %v12569_v35 = vpop.f32.mrf.mxu0 }
 0x3d6   : > { %13729 = vst [vmem:[#allocation60_spill] sm:$0xff] %v12569_v35  ;;  %v12575_v34 = vpop.f32.mrf.mxu1 }
 0x3d7   : > { %v12573_v62 = vpop.f32.mrf.mxu0 }
 0x3d8   : > { %13730 = vst [vmem:[#allocation61_spill] sm:$0xff] %v12573_v62  ;;  %v12579_v49 = vpop.f32.mrf.mxu1 }
 0x3d9   : > { %v12577_v52 = vpop.f32.mrf.mxu0  ;;  %13732 = vst [vmem:[#allocation64_spill] sm:$0xff] %v12579_v49 }
 0x3da   : > { %13731 = vst [vmem:[#allocation62_spill] sm:$0xff] %v12577_v52  ;;  %v12583_v6 = vpop.f32.mrf.mxu1 }
 0x3db   : > { %v12581_v42 = vpop.f32.mrf.mxu0  ;;  %13734 = vst [vmem:[#allocation67_spill] sm:$0xff] %v12583_v6 }
 0x3dc   : > { %13733 = vst [vmem:[#allocation66_spill] sm:$0xff] %v12581_v42  ;;  %v12587_v59 = vpop.f32.mrf.mxu1 }
 0x3dd   : > { %v12585_v5 = vpop.f32.mrf.mxu0  ;;  %13736 = vst [vmem:[#allocation18_spill] sm:$0xff] %v12587_v59 }
 0x3de   : > { %13735 = vst [vmem:[#allocation34_spill] sm:$0xff] %v12585_v5  ;;  %v12591_v35 = vpop.f32.mrf.mxu1 }
 0x3df   : > { %v12589_v57 = vpop.f32.mrf.mxu0  ;;  %13738 = vst [vmem:[#allocation28_spill] sm:$0xff] %v12591_v35 }
 0x3e0   : > { %13737 = vst [vmem:[#allocation27_spill] sm:$0xff] %v12589_v57  ;;  %v12595_v62 = vpop.f32.mrf.mxu1 }
 0x3e1   : > { %v12593_v36 = vpop.f32.mrf.mxu0  ;;  %13740 = vst [vmem:[#allocation42_spill] sm:$0xff] %v12595_v62 }
 0x3e2   : > { %13739 = vst [vmem:[#allocation36_spill] sm:$0xff] %v12593_v36  ;;  %v12599_v52 = vpop.f32.mrf.mxu1 }
 0x3e3   : > { %v12597_v60 = vpop.f32.mrf.mxu0  ;;  %13742 = vst [vmem:[#allocation65_spill] sm:$0xff] %v12599_v52 }
 0x3e4   : > { %13741 = vst [vmem:[#allocation63_spill] sm:$0xff] %v12597_v60  ;;  %v12603_v42 = vpop.f32.mrf.mxu1 }
 0x3e5   : > { %v12601_v49 = vpop.f32.mrf.mxu0  ;;  %13744 = vst [vmem:[#allocation5_spill] sm:$0xff] %v12603_v42 }
 0x3e6   : > { %13743 = vst [vmem:[#allocation46_spill] sm:$0xff] %v12601_v49  ;;  %v12607_v5 = vpop.f32.mrf.mxu1 }
 0x3e7   : > { %v12605_v6 = vpop.f32.mrf.mxu0  ;;  %13746 = vst [vmem:[#allocation68_spill] sm:$0xff] %v12607_v5 }
 0x3e8   : > { %13745 = vst [vmem:[#allocation26_spill] sm:$0xff] %v12605_v6  ;;  %v12611_v57 = vpop.f32.mrf.mxu1  ;;  %v6179_v6 = vadd.f32 %v8728_v22, %v12412_v53  ;;  %v6178_v53 = vadd.f32 %v12519_v37, %v12421_v39  ;;  %v6181_v39 = vadd.f32 %v12527_v9, %v12427_v44 }
 0x3e9   : > { %v12609_v59 = vpop.f32.mrf.mxu0  ;;  %13748 = vst [vmem:[#allocation17_spill] sm:$0xff] %v12611_v57 }
 0x3ea   : > { %13747 = vst [vmem:[#allocation12_spill] sm:$0xff] %v12609_v59  ;;  %v12615_v36 = vpop.f32.mrf.mxu1  ;;  %v6177_v59 = vadd.f32 %v6050_v56, %v12415_v10  ;;  %v12641_v10 = vld [vmem:[%s12802_s2] ss:$0 sm:$0xff]  ;;  %v6393_v9 = vadd.f32 %v12517_v23, %v6181_v39 }
 0x3eb   : > { %v12613_v35 = vpop.f32.mrf.mxu0  ;;  %13750 = vst [vmem:[#allocation69_spill] sm:$0xff] %v12615_v36  ;;  %v6391_v36 = vadd.f32 %v12499_v27, %v6179_v6 }
 0x3ec   : > { %13749 = vst [vmem:[#allocation41_spill] sm:$0xff] %v12613_v35  ;;  %v12619_v60 = vpop.f32.mrf.mxu1 }
 0x3ed   : > { %v12617_v62 = vpop.f32.mrf.mxu0  ;;  %13752 = vst [vmem:[#allocation31_spill] sm:$0xff] %v12619_v60 }
 0x3ee   : > { %13751 = vst [vmem:[#allocation24_spill] sm:$0xff] %v12617_v62  ;;  %v12623_v49 = vpop.f32.mrf.mxu1  ;;  %v6180_v62 = vadd.f32 %v8729_v21, %v12418_v43 }
 0x3ef   : > { %v12621_v52 = vpop.f32.mrf.mxu0  ;;  %13754 = vst [vmem:[#allocation38_spill] sm:$0xff] %v12623_v49 }
 0x3f0   : > { %13753 = vst [vmem:[#allocation71_spill] sm:$0xff] %v12621_v52  ;;  %v12626_v5 = vpop.f32.mrf.mxu1  ;;  %v6389_v52 = vadd.f32 %v12504_v20, %v6177_v59  ;;  %v6392_v43 = vadd.f32 %v12509_v45, %v6180_v62  ;;  %v6184_v62 = vadd.f32 %v12531_v38, %v12430_v11 }
 0x3f1   : > { %v8830_v42 = vpop.f32.mrf.mxu0  ;;  %13755 = vst [vmem:[#allocation44_spill] sm:$0xff] %v12626_v5  ;;  %v6183_v5 = vadd.f32 %v12523_v48, %v12424_v51 }
 0x3f2   : > { %v12629_v35 = vpop.f32.mrf.mxu1 }
 0x3f3   : > { %v6692_v57 = vpop.f32.mrf.mxu0 }
 0x3f4   : > { %v8796_v24 = vpop.f32.mrf.mxu1 }
 0x3f5   : > { %v8831_v60 = vpop.f32.mrf.mxu0  ;;  %v6610_v22 = vadd.f32 %v8796_v24, %v6391_v36  ;;  %v6390_v36 = vadd.f32 %v12513_v25, %v6178_v53  ;;  %v6395_v24 = vadd.f32 %v12515_v30, %v6183_v5  ;;  %v6182_v5 = vadd.f32 %v12535_v4, %v12433_v61 }
 0x3f6   : > { %v6481_v6 = vpop.f32.mrf.mxu1 }
 0x3f7   : > { %v6695_v49 = vpop.f32.mrf.mxu0  ;;  %v6821_v27 = vadd.f32 %v8830_v42, %v6610_v22  ;;  %v6608_v56 = vadd.f32 %v6481_v6, %v6389_v52 }
 0x3f8   : > { %v8797_v20 = vpop.f32.mrf.mxu1 }
 0x3f9   : > { %v8834_v59 = vpop.f32.mrf.mxu0  ;;  %v6860_v51 = vadd.f32 %v12641_v10, %v6821_v27  ;;  %v6819_v21 = vadd.f32 %v6692_v57, %v6608_v56  ;;  %v6611_v37 = vadd.f32 %v8797_v20, %v6392_v43  ;;  %v6396_v43 = vadd.f32 %v12521_v54, %v6184_v62 }
 0x3fa   : > { %v6484_v44 = vpop.f32.mrf.mxu1  ;;  %v6394_v20 = vadd.f32 %v12525_v58, %v6182_v5 }
 0x3fb   : > { %v6708_v48 = vpop.f32.mrf.mxu0  ;;  %v6892_v42 = vmax.f32 %v6860_v51, 0.0  ;;  %v6858_v52 = vadd.f32 %v12641_v10, %v6819_v21  ;;  %v6822_v45 = vadd.f32 %v8831_v60, %v6611_v37  ;;  %v6609_v57 = vadd.f32 %v6484_v44, %v6390_v36 }
 0x3fc   : > { %v8800_v11 = vpop.f32.mrf.mxu1  ;;  %v6187_v60 = vadd.f32 %v12539_v14, %v12436_v1 }
 0x3fd   : > { %v8835_v25 = vpop.f32.mrf.mxu0  ;;  %6924 = vst [vmem:[%s12655_s22 + $0x10] sm:$0xff] %v6892_v42  ;;  %v6890_v30 = vmax.f32 %v6858_v52, 0.0  ;;  %v6861_v38 = vadd.f32 %v12641_v10, %v6822_v45  ;;  %v6820_v53 = vadd.f32 %v6695_v49, %v6609_v57  ;;  %v6614_v22 = vadd.f32 %v8800_v11, %v6395_v24 }
 0x3fe   : > { %v6497_v27 = vpop.f32.mrf.mxu1  ;;  %v6185_v49 = vadd.f32 %v12543_v12, %v12439_v40  ;;  %v6399_v37 = vadd.f32 %v12529_v47, %v6187_v60 }
 0x3ff   : > { %v6711_v6 = vpop.f32.mrf.mxu0  ;;  %6922 = vst [vmem:[%s12655_s22] sm:$0xff] %v6890_v30  ;;  %v6893_v23 = vmax.f32 %v6861_v38, 0.0  ;;  %v6859_v56 = vadd.f32 %v12641_v10, %v6820_v53  ;;  %v6825_v61 = vadd.f32 %v8834_v59, %v6614_v22  ;;  %v6612_v4 = vadd.f32 %v6497_v27, %v6393_v9 }
 0x400   : > { %v8801_v36 = vpop.f32.mrf.mxu1  ;;  %v6188_v59 = vadd.f32 %v12547_v31, %v12442_v2  ;;  %v6397_v42 = vadd.f32 %v12533_v33, %v6185_v49  ;;  %v6189_v53 = vadd.f32 %v12559_v29, %v12451_v46  ;;  %v6192_v27 = vadd.f32 %v12563_v63, %v12454_v0 }
 0x401   : > { %v8838_v39 = vpop.f32.mrf.mxu0  ;;  %6925 = vst [vmem:[%s12655_s22 + $0x18] sm:$0xff] %v6893_v23  ;;  %v6891_v54 = vmax.f32 %v6859_v56, 0.0  ;;  %v6864_v51 = vadd.f32 %v12641_v10, %v6825_v61  ;;  %v6823_v1 = vadd.f32 %v6708_v48, %v6612_v4  ;;  %v6615_v14 = vadd.f32 %v8801_v36, %v6396_v43 }
 0x402   : > { %v6500_v24 = vpop.f32.mrf.mxu1  ;;  %v6186_v48 = vadd.f32 %v12551_v26, %v12445_v15  ;;  %v6400_v9 = vadd.f32 %v12537_v16, %v6188_v59  ;;  %v6401_v4 = vadd.f32 %v12549_v50, %v6189_v53  ;;  %v6193_v59 = vadd.f32 %v12575_v34, %v12463_v18 }
 0x403   : > { %v6724_v21 = vpop.f32.mrf.mxu0  ;;  %6923 = vst [vmem:[%s12655_s22 + $0x8] sm:$0xff] %v6891_v54  ;;  %v6896_v58 = vmax.f32 %v6864_v51, 0.0  ;;  %v6862_v62 = vadd.f32 %v12641_v10, %v6823_v1  ;;  %v6826_v40 = vadd.f32 %v8835_v25, %v6615_v14  ;;  %v6613_v12 = vadd.f32 %v6500_v24, %v6394_v20 }
 0x404   : > { %v8804_v52 = vpop.f32.mrf.mxu1  ;;  %v6191_v25 = vadd.f32 %v12555_v13, %v12448_v8  ;;  %v6398_v38 = vadd.f32 %v12541_v17, %v6186_v48  ;;  %v6404_v54 = vadd.f32 %v12553_v55, %v6192_v27  ;;  %v6195_v51 = vadd.f32 %v12571_v3, %v12460_v28 }
 0x405   : > { %v8839_v44 = vpop.f32.mrf.mxu0  ;;  %6928 = vst [vmem:[%s12655_s22 + $0x30] sm:$0xff] %v6896_v58  ;;  %v6894_v47 = vmax.f32 %v6862_v62, 0.0  ;;  %v6865_v45 = vadd.f32 %v12641_v10, %v6826_v40  ;;  %v6824_v2 = vadd.f32 %v6711_v6, %v6613_v12  ;;  %v6618_v31 = vadd.f32 %v8804_v52, %v6399_v37  ;;  %v13756_v40 = vld [vmem:[#allocation56_spill] sm:$0xff] }
 0x406   : > { %v6513_v5 = vpop.f32.mrf.mxu1  ;;  %v6403_v60 = vadd.f32 %v12545_v19, %v6191_v25  ;;  %v6407_v12 = vadd.f32 %v13756_v40, %v6195_v51  ;;  %v13770_v51 = vld [vmem:[#allocation42_spill] sm:$0xff] }
 0x407   : > { %v6727_v57 = vpop.f32.mrf.mxu0  ;;  %6926 = vst [vmem:[%s12655_s22 + $0x20] sm:$0xff] %v6894_v47  ;;  %v6897_v33 = vmax.f32 %v6865_v45, 0.0  ;;  %v6863_v11 = vadd.f32 %v12641_v10, %v6824_v2  ;;  %v6829_v15 = vadd.f32 %v8838_v39, %v6618_v31  ;;  %v6616_v26 = vadd.f32 %v6513_v5, %v6397_v42  ;;  %v13758_v42 = vld [vmem:[#allocation64_spill] sm:$0xff]  ;;  %v13759_v2 = vld [vmem:[#allocation58_spill] sm:$0xff] }
 0x408   : > { %v8805_v22 = vpop.f32.mrf.mxu1  ;;  %v6190_v39 = vadd.f32 %v12567_v32, %v12457_v41  ;;  %v6405_v31 = vadd.f32 %v13759_v2, %v6193_v59  ;;  %v13771_v59 = vld [vmem:[#allocation66_spill] sm:$0xff] }
 0x409   : > { %v8842_v30 = vpop.f32.mrf.mxu0  ;;  %6929 = vst [vmem:[%s12655_s22 + $0x38] sm:$0xff] %v6897_v33  ;;  %v6895_v16 = vmax.f32 %v6863_v11, 0.0  ;;  %v6868_v6 = vadd.f32 %v12641_v10, %v6829_v15  ;;  %v6827_v8 = vadd.f32 %v6724_v21, %v6616_v26  ;;  %v6619_v13 = vadd.f32 %v8805_v22, %v6400_v9  ;;  %v13761_v9 = vld [vmem:[#allocation67_spill] sm:$0xff]  ;;  %v13763_v22 = vld [vmem:[#allocation48_spill] sm:$0xff] }
 0x40a   : > { %v6516_v23 = vpop.f32.mrf.mxu1  ;;  %v6402_v37 = vadd.f32 %v12557_v7, %v6190_v39 }
 0x40b   : > { %v6740_v43 = vpop.f32.mrf.mxu0  ;;  %6927 = vst [vmem:[%s12655_s22 + $0x28] sm:$0xff] %v6895_v16  ;;  %v6900_v17 = vmax.f32 %v6868_v6, 0.0  ;;  %v6866_v56 = vadd.f32 %v12641_v10, %v6827_v8  ;;  %v6830_v46 = vadd.f32 %v8839_v44, %v6619_v13  ;;  %v6617_v29 = vadd.f32 %v6516_v23, %v6398_v38  ;;  %v13757_v44 = vld [vmem:[#allocation40_spill] sm:$0xff]  ;;  %v13764_v16 = vld [vmem:[#allocation18_spill] sm:$0xff] }
 0x40c   : > { %v8808_v20 = vpop.f32.mrf.mxu1  ;;  %v6196_v48 = vadd.f32 %v13758_v42, %v13757_v44  ;;  %v13762_v38 = vld [vmem:[#allocation60_spill] sm:$0xff]  ;;  %v6199_v6 = vadd.f32 %v13764_v16, %v13763_v22 }
 0x40d   : > { %v8843_v61 = vpop.f32.mrf.mxu0  ;;  %6932 = vst [vmem:[%s12655_s22 + $0x50] sm:$0xff] %v6900_v17  ;;  %v6898_v19 = vmax.f32 %v6866_v56, 0.0  ;;  %v6869_v49 = vadd.f32 %v12641_v10, %v6830_v46  ;;  %v6828_v0 = vadd.f32 %v6727_v57, %v6617_v29  ;;  %v6622_v63 = vadd.f32 %v8808_v20, %v6403_v60  ;;  %v13760_v57 = vld [vmem:[#allocation70_spill] sm:$0xff]  ;;  %v13765_v17 = vld [vmem:[#allocation61_spill] sm:$0xff]  ;;  %v13766_v46 = vld [vmem:[#allocation51_spill] sm:$0xff] }
 0x40e   : > { %v6529_v1 = vpop.f32.mrf.mxu1  ;;  %v6194_v25 = vadd.f32 %v13761_v9, %v13760_v57  ;;  %v6408_v53 = vadd.f32 %v13762_v38, %v6196_v48  ;;  %v13767_v29 = vld [vmem:[#allocation28_spill] sm:$0xff]  ;;  %v13774_v48 = vld [vmem:[#allocation34_spill] sm:$0xff] }
 0x40f   : > { %v6743_v36 = vpop.f32.mrf.mxu0  ;;  %6930 = vst [vmem:[%s12655_s22 + $0x40] sm:$0xff] %v6898_v19  ;;  %v6901_v50 = vmax.f32 %v6869_v49, 0.0  ;;  %v6867_v14 = vadd.f32 %v12641_v10, %v6828_v0  ;;  %v6833_v41 = vadd.f32 %v8842_v30, %v6622_v63  ;;  %v6620_v32 = vadd.f32 %v6529_v1, %v6401_v4  ;;  %v13768_v63 = vld [vmem:[#allocation62_spill] sm:$0xff] }
 0x410   : > { %v8809_v24 = vpop.f32.mrf.mxu1  ;;  %v6406_v56 = vadd.f32 %v13765_v17, %v6194_v25  ;;  %v13777_v25 = vld [vmem:[#allocation27_spill] sm:$0xff] }
 0x411   : > { %v8846_v21 = vpop.f32.mrf.mxu0  ;;  %6933 = vst [vmem:[%s12655_s22 + $0x58] sm:$0xff] %v6901_v50  ;;  %v6899_v55 = vmax.f32 %v6867_v14, 0.0  ;;  %v6872_v58 = vadd.f32 %v12641_v10, %v6833_v41  ;;  %v6831_v28 = vadd.f32 %v6740_v43, %v6620_v32  ;;  %v6623_v3 = vadd.f32 %v8809_v24, %v6404_v54  ;;  %v13769_v54 = vld [vmem:[#allocation84_spill] sm:$0xff] }
 0x412   : > { %v6532_v52 = vpop.f32.mrf.mxu1  ;;  %v6200_v1 = vadd.f32 %v13770_v51, %v13769_v54 }
 0x413   : > { %v6756_v62 = vpop.f32.mrf.mxu0  ;;  %6931 = vst [vmem:[%s12655_s22 + $0x48] sm:$0xff] %v6899_v55  ;;  %v6904_v7 = vmax.f32 %v6872_v58, 0.0  ;;  %v6870_v47 = vadd.f32 %v12641_v10, %v6831_v28  ;;  %v6834_v18 = vadd.f32 %v8843_v61, %v6623_v3  ;;  %v6621_v34 = vadd.f32 %v6532_v52, %v6402_v37  ;;  %v13772_v55 = vld [vmem:[#allocation25_spill] sm:$0xff] }
 0x414   : > { %v8812_v5 = vpop.f32.mrf.mxu1  ;;  %v6197_v61 = vadd.f32 %v13767_v29, %v13766_v46  ;;  %v13773_v58 = vld [vmem:[#allocation65_spill] sm:$0xff]  ;;  %v6412_v52 = vadd.f32 %v13774_v48, %v6200_v1  ;;  %v13786_v1 = vld [vmem:[#allocation46_spill] sm:$0xff] }
 0x415   : > { %v8847_v45 = vpop.f32.mrf.mxu0  ;;  %6936 = vst [vmem:[%s12655_s22 + $0x70] sm:$0xff] %v6904_v7  ;;  %v6902_v33 = vmax.f32 %v6870_v47, 0.0  ;;  %v6873_v11 = vadd.f32 %v12641_v10, %v6834_v18  ;;  %v6832_v15 = vadd.f32 %v6743_v36, %v6621_v34  ;;  %v6626_v26 = vadd.f32 %v8812_v5, %v6407_v12  ;;  %v13775_v7 = vld [vmem:[#allocation52_spill] sm:$0xff]  ;;  %v13776_v47 = vld [vmem:[#allocation5_spill] sm:$0xff] }
 0x416   : > { %v6545_v8 = vpop.f32.mrf.mxu1  ;;  %v6411_v36 = vadd.f32 %v13768_v63, %v6199_v6  ;;  %v6409_v24 = vadd.f32 %v13771_v59, %v6197_v61  ;;  %v6198_v28 = vadd.f32 %v13773_v58, %v13772_v55  ;;  %v6203_v18 = vadd.f32 %v13776_v47, %v13775_v7  ;;  %v13780_v6 = vld [vmem:[#allocation36_spill] sm:$0xff]  ;;  %v13783_v61 = vld [vmem:[#allocation63_spill] sm:$0xff]  ;;  %v13789_v58 = vld [vmem:[#allocation26_spill] sm:$0xff] }
 0x417   : > { %v6759_v30 = vpop.f32.mrf.mxu0  ;;  %6934 = vst [vmem:[%s12655_s22 + $0x60] sm:$0xff] %v6902_v33  ;;  %v6905_v13 = vmax.f32 %v6873_v11, 0.0  ;;  %v6871_v43 = vadd.f32 %v12641_v10, %v6832_v15  ;;  %v6837_v60 = vadd.f32 %v8846_v21, %v6626_v26  ;;  %v6624_v27 = vadd.f32 %v6545_v8, %v6405_v31  ;;  %v13778_v33 = vld [vmem:[#allocation53_spill] sm:$0xff]  ;;  %v13779_v11 = vld [vmem:[#allocation68_spill] sm:$0xff] }
 0x418   : > { %v8813_v4 = vpop.f32.mrf.mxu1  ;;  %v6410_v5 = vadd.f32 %v13777_v25, %v6198_v28  ;;  %v6201_v15 = vadd.f32 %v13779_v11, %v13778_v33  ;;  %v6415_v8 = vadd.f32 %v13780_v6, %v6203_v18  ;;  %v13792_v47 = vld [vmem:[#allocation12_spill] sm:$0xff]  ;;  %v13795_v33 = vld [vmem:[#allocation41_spill] sm:$0xff] }
 0x419   : > { %v8850_v23 = vpop.f32.mrf.mxu0  ;;  %6937 = vst [vmem:[%s12655_s22 + $0x78] sm:$0xff] %v6905_v13  ;;  %v6903_v39 = vmax.f32 %v6871_v43, 0.0  ;;  %v6876_v20 = vadd.f32 %v12641_v10, %v6837_v60  ;;  %v6835_v19 = vadd.f32 %v6756_v62, %v6624_v27  ;;  %v6627_v49 = vadd.f32 %v8813_v4, %v6408_v53  ;;  %v13781_v13 = vld [vmem:[#allocation57_spill] sm:$0xff] }
 0x41a   : > { %v6548_v50 = vpop.f32.mrf.mxu1  ;;  %v13782_v43 = vld [vmem:[#allocation17_spill] sm:$0xff]  ;;  %v6413_v4 = vadd.f32 %v13783_v61, %v6201_v15  ;;  %v13796_v15 = vld [vmem:[#allocation30_spill] sm:$0xff] }
 0x41b   : > { %v6772_v0 = vpop.f32.mrf.mxu0  ;;  %6935 = vst [vmem:[%s12655_s22 + $0x68] sm:$0xff] %v6903_v39  ;;  %v6908_v14 = vmax.f32 %v6876_v20, 0.0  ;;  %v6874_v41 = vadd.f32 %v12641_v10, %v6835_v19  ;;  %v6838_v32 = vadd.f32 %v8847_v45, %v6627_v49  ;;  %v6625_v21 = vadd.f32 %v6548_v50, %v6406_v56  ;;  %v13784_v39 = vld [vmem:[#allocation59_spill] sm:$0xff]  ;;  %v13785_v20 = vld [vmem:[#allocation69_spill] sm:$0xff] }
 0x41c   : > { %v8816_v3 = vpop.f32.mrf.mxu1  ;;  %v6204_v60 = vadd.f32 %v13782_v43, %v13781_v13  ;;  %v6202_v19 = vadd.f32 %v13785_v20, %v13784_v39 }
 0x41d   : > { %v8851_v37 = vpop.f32.mrf.mxu0  ;;  %6940 = vst [vmem:[%s12655_s22 + $0x90] sm:$0xff] %v6908_v14  ;;  %v6906_v62 = vmax.f32 %v6874_v41, 0.0  ;;  %v6877_v40 = vadd.f32 %v12641_v10, %v6838_v32  ;;  %v6836_v12 = vadd.f32 %v6759_v30, %v6625_v21  ;;  %v6630_v44 = vadd.f32 %v8816_v3, %v6411_v36  ;;  %v13787_v14 = vld [vmem:[#allocation72_spill] sm:$0xff]  ;;  %v13788_v41 = vld [vmem:[#allocation31_spill] sm:$0xff]  ;;  %v13790_v3 = vld [vmem:[#allocation82_spill] sm:$0xff] }
 0x41e   : > { %v6561_v34 = vpop.f32.mrf.mxu1  ;;  %v6416_v50 = vadd.f32 %v13786_v1, %v6204_v60  ;;  %v6207_v32 = vadd.f32 %v13788_v41, %v13787_v14  ;;  %v6414_v28 = vadd.f32 %v13789_v58, %v6202_v19 }
 0x41f   : > { %v6775_v42 = vpop.f32.mrf.mxu0  ;;  %6938 = vst [vmem:[%s12655_s22 + $0x80] sm:$0xff] %v6906_v62  ;;  %v6909_v45 = vmax.f32 %v6877_v40, 0.0  ;;  %v6875_v2 = vadd.f32 %v12641_v10, %v6836_v12  ;;  %v6841_v31 = vadd.f32 %v8850_v23, %v6630_v44  ;;  %v6628_v57 = vadd.f32 %v6561_v34, %v6409_v24  ;;  %v13791_v62 = vld [vmem:[#allocation38_spill] sm:$0xff]  ;;  %v13793_v34 = vld [vmem:[#allocation55_spill] sm:$0xff] }
 0x420   : > { %v8817_v26 = vpop.f32.mrf.mxu1  ;;  %v6205_v40 = vadd.f32 %v13791_v62, %v13790_v3  ;;  %v6419_v18 = vadd.f32 %v13792_v47, %v6207_v32 }
 0x421   : > { %v8854_v9 = vpop.f32.mrf.mxu0  ;;  %6941 = vst [vmem:[%s12655_s22 + $0x98] sm:$0xff] %v6909_v45  ;;  %v6907_v30 = vmax.f32 %v6875_v2, 0.0  ;;  %v6880_v38 = vadd.f32 %v12641_v10, %v6841_v31  ;;  %v6839_v53 = vadd.f32 %v6772_v0, %v6628_v57  ;;  %v6631_v22 = vadd.f32 %v8817_v26, %v6412_v52  ;;  %v13794_v45 = vld [vmem:[#allocation44_spill] sm:$0xff] }
 0x422   : > { %v6564_v27 = vpop.f32.mrf.mxu1  ;;  %v6208_v2 = vadd.f32 %v13794_v45, %v13793_v34  ;;  %v6417_v11 = vadd.f32 %v13795_v33, %v6205_v40  ;;  %v6206_v26 = vadd.f32 %v12629_v35, %v13796_v15  ;;  %v13798_v35 = vld [vmem:[#allocation71_spill] sm:$0xff] }
 0x423   : > { %v6788_v16 = vpop.f32.mrf.mxu0  ;;  %6939 = vst [vmem:[%s12655_s22 + $0x88] sm:$0xff] %v6907_v30  ;;  %v6912_v23 = vmax.f32 %v6880_v38, 0.0  ;;  %v6878_v17 = vadd.f32 %v12641_v10, %v6839_v53  ;;  %v6842_v56 = vadd.f32 %v8851_v37, %v6631_v22  ;;  %v6629_v46 = vadd.f32 %v6564_v27, %v6410_v5 }
 0x424   : > { %v8820_v49 = vpop.f32.mrf.mxu1 }
 0x425   : > { %v8855_v29 = vpop.f32.mrf.mxu0  ;;  %6944 = vst [vmem:[%s12655_s22 + $0xb0] sm:$0xff] %v6912_v23  ;;  %v6910_v0 = vmax.f32 %v6878_v17, 0.0  ;;  %v6881_v63 = vadd.f32 %v12641_v10, %v6842_v56  ;;  %v6840_v36 = vadd.f32 %v6775_v42, %v6629_v46  ;;  %v6634_v54 = vadd.f32 %v8820_v49, %v6415_v8  ;;  %v13797_v8 = vld [vmem:[#allocation24_spill] sm:$0xff] }
 0x426   : > { %v6577_v21 = vpop.f32.mrf.mxu1  ;;  %v6420_v13 = vadd.f32 %v13797_v8, %v6208_v2  ;;  %v6418_v56 = vadd.f32 %v13798_v35, %v6206_v26 }
 0x427   : > { %v6791_v51 = vpop.f32.mrf.mxu0  ;;  %6942 = vst [vmem:[%s12655_s22 + $0xa0] sm:$0xff] %v6910_v0  ;;  %v6913_v37 = vmax.f32 %v6881_v63, 0.0  ;;  %v6879_v59 = vadd.f32 %v12641_v10, %v6840_v36  ;;  %v6845_v24 = vadd.f32 %v8854_v9, %v6634_v54  ;;  %v6632_v55 = vadd.f32 %v6577_v21, %v6413_v4 }
 0x428   : > { %v8821_v12 = vpop.f32.mrf.mxu1 }
 0x429   : > { %v8858_v44 = vpop.f32.mrf.mxu0  ;;  %6945 = vst [vmem:[%s12655_s22 + $0xb8] sm:$0xff] %v6913_v37  ;;  %v6911_v42 = vmax.f32 %v6879_v59, 0.0  ;;  %v6884_v48 = vadd.f32 %v12641_v10, %v6845_v24  ;;  %v6843_v52 = vadd.f32 %v6788_v16, %v6632_v55  ;;  %v6635_v7 = vadd.f32 %v8821_v12, %v6416_v50 }
 0x42a   : > { %v6580_v31 = vpop.f32.mrf.mxu1 }
 0x42b   : > { %6943 = vst [vmem:[%s12655_s22 + $0xa8] sm:$0xff] %v6911_v42  ;;  %v6916_v57 = vmax.f32 %v6884_v48, 0.0  ;;  %v6882_v9 = vadd.f32 %v12641_v10, %v6843_v52  ;;  %v6846_v25 = vadd.f32 %v8855_v29, %v6635_v7  ;;  %v6633_v5 = vadd.f32 %v6580_v31, %v6414_v28  ;;  %v6804_v38 = vpop.f32.mrf.mxu0 }
 0x42c   : > { %v8824_v30 = vpop.f32.mrf.mxu1 }
 0x42d   : > { %6948 = vst [vmem:[%s12655_s22 + $0xd0] sm:$0xff] %v6916_v57  ;;  %v6914_v53 = vmax.f32 %v6882_v9, 0.0  ;;  %v6885_v22 = vadd.f32 %v12641_v10, %v6846_v25  ;;  %v6844_v16 = vadd.f32 %v6791_v51, %v6633_v5  ;;  %v6638_v6 = vadd.f32 %v8824_v30, %v6419_v18  ;;  %v8859_v29 = vpop.f32.mrf.mxu0 }
 0x42e   : > { %v6593_v43 = vpop.f32.mrf.mxu1 }
 0x42f   : > { %6946 = vst [vmem:[%s12655_s22 + $0xc0] sm:$0xff] %v6914_v53  ;;  %v6917_v60 = vmax.f32 %v6885_v22, 0.0  ;;  %v6883_v27 = vadd.f32 %v12641_v10, %v6844_v16  ;;  %v6849_v23 = vadd.f32 %v8858_v44, %v6638_v6  ;;  %v6636_v17 = vadd.f32 %v6593_v43, %v6417_v11  ;;  %v6807_v54 = vpop.f32.mrf.mxu0 }
 0x430   : > { %v8825_v46 = vpop.f32.mrf.mxu1 }
 0x431   : > { %6949 = vst [vmem:[%s12655_s22 + $0xd8] sm:$0xff] %v6917_v60  ;;  %v6915_v61 = vmax.f32 %v6883_v27, 0.0  ;;  %v6888_v4 = vadd.f32 %v12641_v10, %v6849_v23  ;;  %v6847_v39 = vadd.f32 %v6804_v38, %v6636_v17  ;;  %v6639_v20 = vadd.f32 %v8825_v46, %v6420_v13 }
 0x432   : > { %v6596_v19 = vpop.f32.mrf.mxu1 }
 0x433   : > { %6947 = vst [vmem:[%s12655_s22 + $0xc8] sm:$0xff] %v6915_v61  ;;  %v6920_v49 = vmax.f32 %v6888_v4, 0.0  ;;  %v6886_v0 = vadd.f32 %v12641_v10, %v6847_v39  ;;  %v6850_v63 = vadd.f32 %v8859_v29, %v6639_v20  ;;  %v6637_v36 = vadd.f32 %v6596_v19, %v6418_v56 }
 0x435   : > { %6952 = vst [vmem:[%s12655_s22 + $0xf0] sm:$0xff] %v6920_v49  ;;  %v6918_v51 = vmax.f32 %v6886_v0, 0.0  ;;  %v6889_v1 = vadd.f32 %v12641_v10, %v6850_v63  ;;  %v6848_v50 = vadd.f32 %v6807_v54, %v6637_v36 }
 0x437   : > { %6950 = vst [vmem:[%s12655_s22 + $0xe0] sm:$0xff] %v6918_v51  ;;  %v6921_v14 = vmax.f32 %v6889_v1, 0.0  ;;  %v6887_v41 = vadd.f32 %v12641_v10, %v6848_v50 }
 0x439   : > { %6953 = vst [vmem:[%s12655_s22 + $0xf8] sm:$0xff] %v6921_v14  ;;  %v6919_v32 = vmax.f32 %v6887_v41, 0.0 }
 0x43b   : > { %6951 = vst [vmem:[%s12655_s22 + $0xe8] sm:$0xff] %v6919_v32 }
 0x43c PF: > { %s13_s12 = sadd.s32 1, %s8955_s12  }
 0x43d   : > { %p10_p4 = scmp.ge.s32.totalorder %s13_s12, 4  }
 0x43f   :  { %12 = sbr.rel (!%p10_p4) target bundleno = 1 (0x1), region = 86 }

</bundles_post_ra>
